<compile_context>
chip_gen: v7x
topology: tpu7x:2x2x1
jax: 0.10.0
libtpu: 0.0.40
codegen_flags: <defaults>
</compile_context>

<pallas_src>
import functools

import jax
import jax.numpy as jnp
from jax.experimental import pallas as pl
from jax.experimental.pallas import tpu as pltpu


# ----------------------------------------------------------------------------
# Pallas kernel 1: conv-as-matmul, full K/N resident, grid over M only.
#   o = leaky_relu(x @ w + b)   (bf16 in, f32 accumulate, bf16 out)
# ----------------------------------------------------------------------------
def _conv_mm_kernel(x_ref, w_ref, b_ref, o_ref, *, negslope):
    acc = jnp.dot(x_ref[...], w_ref[...], preferred_element_type=jnp.float32)
    y = acc + b_ref[...]
    o_ref[...] = jnp.where(y > 0, y, negslope * y).astype(o_ref.dtype)


def conv_matmul_lrelu(x, w, b, *, negslope=0.2, tm_max=2048):
    """leaky_relu(x @ w + b); x:(M,K) bf16, w:(K,N) bf16, b:(1,N) f32 -> (M,N) bf16."""
    M, K = x.shape
    K2, N = w.shape
    assert K == K2
    # Full-M block when it fits (block == array dim, no 8-divisibility needed);
    # otherwise 2048-row tiles with a ragged (masked) final block. No pad/slice.
    tm = M if M <= tm_max else tm_max
    return pl.pallas_call(
        functools.partial(_conv_mm_kernel, negslope=negslope),
        out_shape=jax.ShapeDtypeStruct((M, N), jnp.bfloat16),
        grid_spec=pltpu.PrefetchScalarGridSpec(
            num_scalar_prefetch=0,
            grid=(pl.cdiv(M, tm),),
            in_specs=[
                pl.BlockSpec((tm, K), lambda i: (i, 0)),   # patch tile
                pl.BlockSpec((K, N), lambda i: (0, 0)),    # whole weight resident
                pl.BlockSpec((1, N), lambda i: (0, 0)),    # bias
            ],
            out_specs=pl.BlockSpec((tm, N), lambda i: (i, 0)),
        ),
        compiler_params=pltpu.CompilerParams(
            dimension_semantics=("parallel",),
        ),
    )(x, w, b)


# ----------------------------------------------------------------------------
# Pallas kernel 2: FC head, N split into `n_split` parallel column halves.
# Each grid step computes:
#   h_half = leaky_relu(x @ W1[:, half] + b1[half])
#   partial = sum(h_half * w2[half], axis=-1)        (fc2 GEMV contribution)
# The (tm,1) partial is broadcast to a lane-dense (tm,128) output block (tiny
# traffic, keeps the out BlockSpec 128-lane aligned). Partials of both halves
# are summed + biased + sigmoided in a negligible epilogue.
# ----------------------------------------------------------------------------
def _fc_partial_kernel(x_ref, w1_ref, b1_ref, w2_ref, o_ref, *, negslope):
    h = jnp.dot(x_ref[...], w1_ref[...], preferred_element_type=jnp.float32)
    h = h + b1_ref[...]
    h = jnp.where(h > 0, h, negslope * h)
    part = jnp.sum(h * w2_ref[...], axis=-1, keepdims=True)        # (tm, 1)
    o_ref[...] = jnp.broadcast_to(part, o_ref.shape)


def fc_head(x, w1, b1, w2_row, b2, *, negslope=0.2, tm_max=256, n_split=2):
    """sigmoid(leaky_relu(x@w1+b1) @ w2_row.T + b2); x:(M,K) bf16, w1:(K,N) bf16."""
    M, K = x.shape
    K2, N = w1.shape
    assert K == K2 and N % n_split == 0 and w2_row.shape == (1, N)
    nh = N // n_split
    LANES = 128
    tm = M if M <= tm_max else tm_max    # tm_max multiple of 16 (bf16 packing)

    partials = pl.pallas_call(
        functools.partial(_fc_partial_kernel, negslope=negslope),
        out_shape=jax.ShapeDtypeStruct((M, n_split * LANES), jnp.float32),
        grid_spec=pltpu.PrefetchScalarGridSpec(
            num_scalar_prefetch=0,
            grid=(pl.cdiv(M, tm), n_split),
            in_specs=[
                pl.BlockSpec((tm, K), lambda i, n: (i, 0)),   # activation tile
                pl.BlockSpec((K, nh), lambda i, n: (0, n)),   # fc1 weight half
                pl.BlockSpec((1, nh), lambda i, n: (0, n)),   # fc1 bias half
                pl.BlockSpec((1, nh), lambda i, n: (0, n)),   # fc2 weight half
            ],
            out_specs=pl.BlockSpec((tm, LANES), lambda i, n: (i, n)),
        ),
        compiler_params=pltpu.CompilerParams(
            dimension_semantics=("parallel", "parallel"),
        ),
    )(x, w1, b1, w2_row)

    logits = partials.reshape(M, n_split, LANES)[:, :, 0].sum(axis=1) + b2
    return jax.nn.sigmoid(logits)


# ----------------------------------------------------------------------------
# Glue: NHWC im2col (matches PyTorch Conv2d (cin,kh,kw) flattening) and NHWC
# 2x2 avg-pool. All in bf16; no NCHW<->NHWC relayouts between conv stages.
# ----------------------------------------------------------------------------
def im2col_nhwc(x, k=5, pad=2):
    """x: (B, H, W, C) -> (B*H*W, C*k*k), stride 1, 'same' padding."""
    B, H, W, C = x.shape
    xp = jnp.pad(x, ((0, 0), (pad, pad), (pad, pad), (0, 0)))
    cols = []
    for di in range(k):
        for dj in range(k):
            cols.append(xp[:, di:di + H, dj:dj + W, :])
    p = jnp.stack(cols, axis=-1)                  # (B, H, W, C, k*k)
    return p.reshape(B * H * W, C * k * k)        # flatten order = (cin, kh, kw)


def avgpool2x2_nhwc(x):
    """x: (B, H, W, C) -> (B, H//2, W//2, C), AvgPool2d(2, stride=2)."""
    B, H, W, C = x.shape
    return x.reshape(B, H // 2, 2, W // 2, 2, C).mean(axis=(2, 4))


# ----------------------------------------------------------------------------
# One-time parameter prep: all transposes / casts hoisted out of the forward.
# ----------------------------------------------------------------------------
def prepare_params(params):
    # fc1: PyTorch (1024, 3136) with K flattened as (c,h,w). Permute K to the
    # NHWC (h,w,c) order so activations flatten directly after the last pool.
    fc1 = params["fc1_w"].reshape(1024, 64, 7, 7)
    fc1 = jnp.transpose(fc1, (2, 3, 1, 0)).reshape(64 * 7 * 7, 1024)
    return {
        "conv1_w": params["conv1_w"].reshape(32, -1).T.astype(jnp.bfloat16),   # (25, 32)
        "conv1_b": params["conv1_b"].reshape(1, -1).astype(jnp.float32),
        "conv2_w": params["conv2_w"].reshape(64, -1).T.astype(jnp.bfloat16),   # (800, 64)
        "conv2_b": params["conv2_b"].reshape(1, -1).astype(jnp.float32),
        "fc1_w": fc1.astype(jnp.bfloat16),                                     # (3136, 1024)
        "fc1_b": params["fc1_b"].reshape(1, -1).astype(jnp.float32),
        "fc2_w": params["fc2_w"].astype(jnp.float32),                          # (1, 1024)
        "fc2_b": params["fc2_b"].astype(jnp.float32),                          # (1,)
    }


# ----------------------------------------------------------------------------
# Discriminator forward (Pallas matmuls carry the conv + fc hot paths).
# ----------------------------------------------------------------------------
def discriminator_forward(x, prep):
    B = x.shape[0]
    x = x.reshape(B, 1, 28, 28)
    x = jnp.transpose(x, (0, 2, 3, 1)).astype(jnp.bfloat16)        # NHWC (B,28,28,1)

    # conv1: Conv2d(1, 32, 5, padding=2) + LeakyReLU(0.2) + AvgPool2d(2)
    p = im2col_nhwc(x, 5, 2)                                       # (B*784, 25) bf16
    y = conv_matmul_lrelu(p, prep["conv1_w"], prep["conv1_b"])     # (B*784, 32) bf16
    y = avgpool2x2_nhwc(y.reshape(B, 28, 28, 32))                  # (B, 14, 14, 32)

    # conv2: Conv2d(32, 64, 5, padding=2) + LeakyReLU(0.2) + AvgPool2d(2)
    p = im2col_nhwc(y, 5, 2)                                       # (B*196, 800) bf16
    y = conv_matmul_lrelu(p, prep["conv2_w"], prep["conv2_b"])     # (B*196, 64) bf16
    y = avgpool2x2_nhwc(y.reshape(B, 14, 14, 64))                  # (B, 7, 7, 64)

    # Flatten NHWC directly (fc1 weight K-axis was pre-permuted to match).
    feat = y.reshape(B, 64 * 7 * 7)                                # (B, 3136) bf16

    # fc: Linear(3136,1024)+LeakyReLU(0.2)+Linear(1024,1)+Sigmoid
    out = fc_head(feat, prep["fc1_w"], prep["fc1_b"], prep["fc2_w"], prep["fc2_b"])
    return out                                                     # (B,)  == squeeze(1)


def init_params(key):
    ks = jax.random.split(key, 8)
    s = 0.05  # small deterministic scale to keep sigmoid off saturation
    return {
        "conv1_w": s * jax.random.normal(ks[0], (32, 1, 5, 5), jnp.float32),
        "conv1_b": s * jax.random.normal(ks[1], (32,), jnp.float32),
        "conv2_w": s * jax.random.normal(ks[2], (64, 32, 5, 5), jnp.float32),
        "conv2_b": s * jax.random.normal(ks[3], (64,), jnp.float32),
        "fc1_w": s * jax.random.normal(ks[4], (1024, 64 * 7 * 7), jnp.float32),
        "fc1_b": s * jax.random.normal(ks[5], (1024,), jnp.float32),
        "fc2_w": s * jax.random.normal(ks[6], (1, 1024), jnp.float32),
        "fc2_b": s * jax.random.normal(ks[7], (1,), jnp.float32),
    }


if __name__ == "__main__":
    key = jax.random.PRNGKey(0)
    kx, kp = jax.random.split(key)
    B = 2
    x = jax.random.normal(kx, (B, 1, 28, 28), jnp.float32)
    params = init_params(kp)

    prep = prepare_params(params)          # one-time weight relayout/cast
    fwd = jax.jit(discriminator_forward)
    out = jax.block_until_ready(fwd(x, prep))

    assert out.shape == (B,), out.shape
    assert bool(jnp.all(jnp.isfinite(out)))
    assert bool(jnp.all((out >= 0.0) & (out <= 1.0)))  # sigmoid range
    print("KERNEL_OK")
</pallas_src>

<mosaic_0001>
module attributes {stable_mosaic.version = 11 : i64} {
  func.func @_conv_mm_kernel(%arg0: i32, %arg1: memref<1568x25xbf16, #tpu.memory_space<vmem>>, %arg2: memref<25x32xbf16, #tpu.memory_space<vmem>>, %arg3: memref<1x32xf32, #tpu.memory_space<vmem>>, %arg4: memref<1568x32xbf16, #tpu.memory_space<vmem>>) attributes {dimension_semantics = [#tpu.dimension_semantics<parallel>], iteration_bounds = array<i64: 1>, scalar_prefetch = 0 : i64, scratch_operands = 0 : i64, tpu.core_type = #tpu.core_type<tc>, window_params = [{transform_indices = @transform_0, window_bounds = array<i64: 1568, 25>}, {pipeline_mode = #tpu.pipeline_mode<synchronous>, transform_indices = @transform_1, window_bounds = array<i64: 25, 32>}, {pipeline_mode = #tpu.pipeline_mode<synchronous>, transform_indices = @transform_2, window_bounds = array<i64: 1, 32>}, {transform_indices = @transform_3, window_bounds = array<i64: 1568, 32>}]} {
    %c0 = arith.constant 0 : index
    %c0_0 = arith.constant 0 : index
    %0 = vector.load %arg1[%c0, %c0_0] : memref<1568x25xbf16, #tpu.memory_space<vmem>>, vector<1568x25xbf16>
    %c0_1 = arith.constant 0 : index
    %c0_2 = arith.constant 0 : index
    %1 = vector.load %arg2[%c0_1, %c0_2] : memref<25x32xbf16, #tpu.memory_space<vmem>>, vector<25x32xbf16>
    %cst = arith.constant dense<0.000000e+00> : vector<1568x32xf32>
    %2 = tpu.matmul %0, %1, %cst {dimension_numbers = #tpu.dot_dimension_numbers<[1], [0], [0], [1], [0, 0, 1, 1], [], []>} : vector<1568x25xbf16>, vector<25x32xbf16>, vector<1568x32xf32> -> vector<1568x32xf32>
    %c0_3 = arith.constant 0 : index
    %c0_4 = arith.constant 0 : index
    %3 = vector.load %arg3[%c0_3, %c0_4] : memref<1x32xf32, #tpu.memory_space<vmem>>, vector<1x32xf32>
    %4 = vector.broadcast %3 : vector<1x32xf32> to vector<1568x32xf32>
    %5 = arith.addf %2, %4 : vector<1568x32xf32>
    %cst_5 = arith.constant 0.000000e+00 : f32
    %6 = vector.broadcast %cst_5 : f32 to vector<1568x32xf32>
    %7 = arith.cmpf ogt, %5, %6 : vector<1568x32xf32>
    %cst_6 = arith.constant 2.000000e-01 : f32
    %8 = vector.broadcast %cst_6 : f32 to vector<1568x32xf32>
    %9 = arith.mulf %8, %5 : vector<1568x32xf32>
    %10 = arith.select %7, %5, %9 : vector<1568x32xi1>, vector<1568x32xf32>
    %11 = arith.truncf %10 : vector<1568x32xf32> to vector<1568x32xbf16>
    %c0_7 = arith.constant 0 : index
    %c0_8 = arith.constant 0 : index
    %12 = vector.load %arg4[%c0_7, %c0_8] : memref<1568x32xbf16, #tpu.memory_space<vmem>>, vector<1568x32xbf16>
    tpu.vector_store %arg4[%c0_7, %c0_8], %11 {strides = array<i32>} : memref<1568x32xbf16, #tpu.memory_space<vmem>>, vector<1568x32xbf16>,
    return
  }
  func.func @transform_0(%arg0: i32) -> (i32, i32) {
    %c0_i32 = arith.constant 0 : i32
    %c0_i32_0 = arith.constant 0 : i32
    return %arg0, %c0_i32 : i32, i32
  }
  func.func @transform_1(%arg0: i32) -> (i32, i32) {
    %c0_i32 = arith.constant 0 : i32
    %c0_i32_0 = arith.constant 0 : i32
    %c0_i32_1 = arith.constant 0 : i32
    return %c0_i32, %c0_i32_0 : i32, i32
  }
  func.func @transform_2(%arg0: i32) -> (i32, i32) {
    %c0_i32 = arith.constant 0 : i32
    %c0_i32_0 = arith.constant 0 : i32
    %c0_i32_1 = arith.constant 0 : i32
    return %c0_i32, %c0_i32_0 : i32, i32
  }
  func.func @transform_3(%arg0: i32) -> (i32, i32) {
    %c0_i32 = arith.constant 0 : i32
    %c0_i32_0 = arith.constant 0 : i32
    return %arg0, %c0_i32 : i32, i32
  }
}

module attributes {stable_mosaic.version = 11 : i64} {
  func.func @_conv_mm_kernel(%arg0: i32, %arg1: memref<392x800xbf16, #tpu.memory_space<vmem>>, %arg2: memref<800x64xbf16, #tpu.memory_space<vmem>>, %arg3: memref<1x64xf32, #tpu.memory_space<vmem>>, %arg4: memref<392x64xbf16, #tpu.memory_space<vmem>>) attributes {dimension_semantics = [#tpu.dimension_semantics<parallel>], iteration_bounds = array<i64: 1>, scalar_prefetch = 0 : i64, scratch_operands = 0 : i64, tpu.core_type = #tpu.core_type<tc>, window_params = [{transform_indices = @transform_0, window_bounds = array<i64: 392, 800>}, {pipeline_mode = #tpu.pipeline_mode<synchronous>, transform_indices = @transform_1, window_bounds = array<i64: 800, 64>}, {pipeline_mode = #tpu.pipeline_mode<synchronous>, transform_indices = @transform_2, window_bounds = array<i64: 1, 64>}, {transform_indices = @transform_3, window_bounds = array<i64: 392, 64>}]} {
    %c0 = arith.constant 0 : index
    %c0_0 = arith.constant 0 : index
    %0 = vector.load %arg1[%c0, %c0_0] : memref<392x800xbf16, #tpu.memory_space<vmem>>, vector<392x800xbf16>
    %c0_1 = arith.constant 0 : index
    %c0_2 = arith.constant 0 : index
    %1 = vector.load %arg2[%c0_1, %c0_2] : memref<800x64xbf16, #tpu.memory_space<vmem>>, vector<800x64xbf16>
    %cst = arith.constant dense<0.000000e+00> : vector<392x64xf32>
    %2 = tpu.matmul %0, %1, %cst {dimension_numbers = #tpu.dot_dimension_numbers<[1], [0], [0], [1], [0, 0, 1, 1], [], []>} : vector<392x800xbf16>, vector<800x64xbf16>, vector<392x64xf32> -> vector<392x64xf32>
    %c0_3 = arith.constant 0 : index
    %c0_4 = arith.constant 0 : index
    %3 = vector.load %arg3[%c0_3, %c0_4] : memref<1x64xf32, #tpu.memory_space<vmem>>, vector<1x64xf32>
    %4 = vector.broadcast %3 : vector<1x64xf32> to vector<392x64xf32>
    %5 = arith.addf %2, %4 : vector<392x64xf32>
    %cst_5 = arith.constant 0.000000e+00 : f32
    %6 = vector.broadcast %cst_5 : f32 to vector<392x64xf32>
    %7 = arith.cmpf ogt, %5, %6 : vector<392x64xf32>
    %cst_6 = arith.constant 2.000000e-01 : f32
    %8 = vector.broadcast %cst_6 : f32 to vector<392x64xf32>
    %9 = arith.mulf %8, %5 : vector<392x64xf32>
    %10 = arith.select %7, %5, %9 : vector<392x64xi1>, vector<392x64xf32>
    %11 = arith.truncf %10 : vector<392x64xf32> to vector<392x64xbf16>
    %c0_7 = arith.constant 0 : index
    %c0_8 = arith.constant 0 : index
    %12 = vector.load %arg4[%c0_7, %c0_8] : memref<392x64xbf16, #tpu.memory_space<vmem>>, vector<392x64xbf16>
    tpu.vector_store %arg4[%c0_7, %c0_8], %11 {strides = array<i32>} : memref<392x64xbf16, #tpu.memory_space<vmem>>, vector<392x64xbf16>,
    return
  }
  func.func @transform_0(%arg0: i32) -> (i32, i32) {
    %c0_i32 = arith.constant 0 : i32
    %c0_i32_0 = arith.constant 0 : i32
    return %arg0, %c0_i32 : i32, i32
  }
  func.func @transform_1(%arg0: i32) -> (i32, i32) {
    %c0_i32 = arith.constant 0 : i32
    %c0_i32_0 = arith.constant 0 : i32
    %c0_i32_1 = arith.constant 0 : i32
    return %c0_i32, %c0_i32_0 : i32, i32
  }
  func.func @transform_2(%arg0: i32) -> (i32, i32) {
    %c0_i32 = arith.constant 0 : i32
    %c0_i32_0 = arith.constant 0 : i32
    %c0_i32_1 = arith.constant 0 : i32
    return %c0_i32, %c0_i32_0 : i32, i32
  }
  func.func @transform_3(%arg0: i32) -> (i32, i32) {
    %c0_i32 = arith.constant 0 : i32
    %c0_i32_0 = arith.constant 0 : i32
    return %arg0, %c0_i32 : i32, i32
  }
}

module attributes {stable_mosaic.version = 11 : i64} {
  func.func @_fc_partial_kernel(%arg0: i32, %arg1: i32, %arg2: memref<2x3136xbf16, #tpu.memory_space<vmem>>, %arg3: memref<3136x512xbf16, #tpu.memory_space<vmem>>, %arg4: memref<1x512xf32, #tpu.memory_space<vmem>>, %arg5: memref<1x512xf32, #tpu.memory_space<vmem>>, %arg6: memref<2x128xf32, #tpu.memory_space<vmem>>) attributes {dimension_semantics = [#tpu.dimension_semantics<parallel>, #tpu.dimension_semantics<parallel>], iteration_bounds = array<i64: 1, 2>, scalar_prefetch = 0 : i64, scratch_operands = 0 : i64, tpu.core_type = #tpu.core_type<tc>, window_params = [{transform_indices = @transform_0, window_bounds = array<i64: 2, 3136>}, {transform_indices = @transform_1, window_bounds = array<i64: 3136, 512>}, {transform_indices = @transform_2, window_bounds = array<i64: 1, 512>}, {transform_indices = @transform_3, window_bounds = array<i64: 1, 512>}, {transform_indices = @transform_4, window_bounds = array<i64: 2, 128>}]} {
    %c0 = arith.constant 0 : index
    %c0_0 = arith.constant 0 : index
    %0 = vector.load %arg2[%c0, %c0_0] : memref<2x3136xbf16, #tpu.memory_space<vmem>>, vector<2x3136xbf16>
    %c0_1 = arith.constant 0 : index
    %c0_2 = arith.constant 0 : index
    %1 = vector.load %arg3[%c0_1, %c0_2] : memref<3136x512xbf16, #tpu.memory_space<vmem>>, vector<3136x512xbf16>
    %cst = arith.constant dense<0.000000e+00> : vector<2x512xf32>
    %2 = tpu.matmul %0, %1, %cst {dimension_numbers = #tpu.dot_dimension_numbers<[1], [0], [0], [1], [0, 0, 1, 1], [], []>} : vector<2x3136xbf16>, vector<3136x512xbf16>, vector<2x512xf32> -> vector<2x512xf32>
    %c0_3 = arith.constant 0 : index
    %c0_4 = arith.constant 0 : index
    %3 = vector.load %arg4[%c0_3, %c0_4] : memref<1x512xf32, #tpu.memory_space<vmem>>, vector<1x512xf32>
    %4 = vector.broadcast %3 : vector<1x512xf32> to vector<2x512xf32>
    %5 = arith.addf %2, %4 : vector<2x512xf32>
    %cst_5 = arith.constant 0.000000e+00 : f32
    %6 = vector.broadcast %cst_5 : f32 to vector<2x512xf32>
    %7 = arith.cmpf ogt, %5, %6 : vector<2x512xf32>
    %cst_6 = arith.constant 2.000000e-01 : f32
    %8 = vector.broadcast %cst_6 : f32 to vector<2x512xf32>
    %9 = arith.mulf %8, %5 : vector<2x512xf32>
    %10 = arith.select %7, %5, %9 : vector<2x512xi1>, vector<2x512xf32>
    %c0_7 = arith.constant 0 : index
    %c0_8 = arith.constant 0 : index
    %11 = vector.load %arg5[%c0_7, %c0_8] : memref<1x512xf32, #tpu.memory_space<vmem>>, vector<1x512xf32>
    %12 = vector.broadcast %11 : vector<1x512xf32> to vector<2x512xf32>
    %13 = arith.mulf %10, %12 : vector<2x512xf32>
    %cst_9 = arith.constant dense<0.000000e+00> : vector<2xf32>
    %14 = vector.multi_reduction <add>, %13, %cst_9 [1] : vector<2x512xf32> to vector<2xf32>
    %15 = vector.shape_cast %14 : vector<2xf32> to vector<2x1xf32>
    %16 = vector.shape_cast %15 : vector<2x1xf32> to vector<2x1xf32>
    %17 = vector.broadcast %16 : vector<2x1xf32> to vector<2x128xf32>
    %c0_10 = arith.constant 0 : index
    %c0_11 = arith.constant 0 : index
    %18 = vector.load %arg6[%c0_10, %c0_11] : memref<2x128xf32, #tpu.memory_space<vmem>>, vector<2x128xf32>
    tpu.vector_store %arg6[%c0_10, %c0_11], %17 {strides = array<i32>} : memref<2x128xf32, #tpu.memory_space<vmem>>, vector<2x128xf32>,
    return
  }
  func.func @transform_0(%arg0: i32, %arg1: i32) -> (i32, i32) {
    %c0_i32 = arith.constant 0 : i32
    %c0_i32_0 = arith.constant 0 : i32
    return %arg0, %c0_i32 : i32, i32
  }
  func.func @transform_1(%arg0: i32, %arg1: i32) -> (i32, i32) {
    %c0_i32 = arith.constant 0 : i32
    %c0_i32_0 = arith.constant 0 : i32
    return %c0_i32, %arg1 : i32, i32
  }
  func.func @transform_2(%arg0: i32, %arg1: i32) -> (i32, i32) {
    %c0_i32 = arith.constant 0 : i32
    %c0_i32_0 = arith.constant 0 : i32
    return %c0_i32, %arg1 : i32, i32
  }
  func.func @transform_3(%arg0: i32, %arg1: i32) -> (i32, i32) {
    %c0_i32 = arith.constant 0 : i32
    %c0_i32_0 = arith.constant 0 : i32
    return %c0_i32, %arg1 : i32, i32
  }
  func.func @transform_4(%arg0: i32, %arg1: i32) -> (i32, i32) {
    %c0_i32 = arith.constant 0 : i32
    return %arg0, %arg1 : i32, i32
  }
}

</mosaic_0001>

<bundles_post_ra>
// kernel: discriminator_forward.3
= control target key start
LH: loop header
LB: loop body
LE: loop exit
PB: predicated region body
PF: predicated region fallthrough
CT: control target
= control target key end

     0   :  { %8 = vsyncpa [#allocation3], 0  ;;  %s6396_s0 = inlined_call_operand.vmem [shape: bf16[1568,25], index: 0, kind: input, shape index: {}]   ;;  %s6397_s1 = inlined_call_operand.hbm [shape: bf16[25,32], index: 1, kind: input, shape index: {}]   ;;  %s6398_s2 = inlined_call_operand.hbm [shape: f32[1,32], index: 2, kind: input, shape index: {}]   ;;  %s6399_s3 = inlined_call_operand.vmem [shape: bf16[1568,32], index: 3, kind: output, shape index: {}]  }
   0x1   :  { %9 = vsyncpa [#allocation5], 0  ;;  %s4493_s12 = smov [#allocation2]   ;;  %s4445_s16 = scalar_lea.hbm %s6397_s1, 256 }
   0x2   :  { %s17_s13 = sshll.u32 %s4493_s12, 4  ;;  %p4446_p0 = scmp.ne.s32.totalorder %s6397_s1, %s4445_s16  ;;  %s18_s13 = int_to_ptr.vmem [resolvable:$true] %s17_s13 }
   0x3   :  { %p4449_p1 = scmp.lt.u32.totalorder %s4445_s16, %s6397_s1 }
   0x5   :  { %p4451_p2 = pnand %p4449_p1, %p4446_p0 }
   0x7   :  { %4454 = shalt.err (!%p4451_p2)
}
   0x8   :  { %s4455_s21 = scalar_lea.vmem %s18_s13, 256  ;;  %p4460_p4 = scmp.lt.s32.totalorder %s18_s13, %s18_s13 }
   0x9   :  { %p4456_p3 = scmp.ne.s32.totalorder %s18_s13, %s4455_s21  ;;  %p4461_p5 = scmp.lt.s32.totalorder %s4455_s21, %s4455_s21 }
   0xb   :  { %p4462_p6 = por %p4461_p5, %p4460_p4 }
   0xd   :  { %p4463_p7 = pnand %p4462_p6, %p4456_p3 }
   0xf   :  { %4466 = shalt.err (!%p4463_p7)
}
  0x10   :  { %s4494_s22 = smov 64   ;;  %s4495_s23 = smov 4  }
  0x11   :  { %23 = dma.hbm_to_vmem [thread:$0]  %s6397_s1, 256, %s18_s13, [#allocation3], %s4494_s22, %s4494_s22, %s4495_s23  }
  0x12   :  { %s4496_s26 = smov [#allocation4]   ;;  %s4467_s30 = scalar_lea.hbm %s6398_s2, 16 }
  0x13   :  { %s30_s27 = sshll.u32 %s4496_s26, 4  ;;  %p4468_p8 = scmp.ne.s32.totalorder %s6398_s2, %s4467_s30  ;;  %s31_s27 = int_to_ptr.vmem [resolvable:$true] %s30_s27 }
  0x14   :  { %p4471_p9 = scmp.lt.u32.totalorder %s4467_s30, %s6398_s2 }
  0x16   :  { %p4473_p10 = pnand %p4471_p9, %p4468_p8 }
  0x18   :  { %4476 = shalt.err (!%p4473_p10)
}
  0x19   :  { %s4477_s8 = scalar_lea.vmem %s31_s27, 16  ;;  %s4481_s1 = scalar_lea.vmem %s31_s27, 32 }
  0x1a   :  { %p4478_p11 = scmp.ne.s32.totalorder %s31_s27, %s4477_s8  ;;  %p4482_p12 = scmp.lt.s32.totalorder %s31_s27, %s31_s27 }
  0x1b   :  { %p4483_p13 = scmp.lt.s32.totalorder %s4481_s1, %s4477_s8 }
  0x1d   :  { %p4484_p0 = por %p4483_p13, %p4482_p12 }
  0x1f   :  { %p4485_p1 = pnand %p4484_p0, %p4478_p11 }
  0x21   :  { %4488 = shalt.err (!%p4485_p1)
}
  0x22   :  { %33 = dma.hbm_to_vmem [thread:$0]  %s6398_s2, 16, %s31_s27, [#allocation5]  }
  0x23   :  { %4489 = dma.done.wait [#allocation3], 256  }
  0x24   :  { %4490 = vsyncadd [#allocation3], 4294967040 }
  0x25   :  { %4491 = dma.done.wait [#allocation5], 16  }
  0x26   :  { %4492 = vsyncadd [#allocation5], 4294967280  ;;  %vm1044_vm0 = vcmask 1043456   ;;  %vm1045_vm1 = vcmask 1044480   ;;  %v4497_v0 = vmov 65535   ;;  %vm749_vm2 = vcmask 203776  }
  0x27   :  { %v1046_v1 = vsel %vm1044_vm0, 4294967295, %v4497_v0  ;;  %v4343_v2 = vld [vmem:[#allocation2] sm:$0xff]   ;;  %v4344_v4 = vld [vmem:[#allocation2 + $0x8] sm:$0x1f]   ;;  %v4347_v7 = vld [vmem:[%s6396_s0 + $0x190] sm:$0xff]   ;;  %vm3240_vm3 = vcmask 257024  }
  0x28   :  { %v1047_v3 = vsel %vm1045_vm1, %v1046_v1, 0  ;;  %4134 = vmatprep.subr.bf16.mxu0 %v4343_v2  ;;  %4334 = vmatprep.subr.bf16.mxu1 %v4343_v2  ;;  %v4345_v5 = vld [vmem:[%s6396_s0] sm:$0xff]   ;;  %v4346_v8 = vld [vmem:[%s6396_s0 + $0x8] sm:$0xff]   ;;  %v4348_v9 = vld [vmem:[%s6396_s0 + $0x198] sm:$0xff]  }
  0x29   :  { %4135 = vmatpush3.bf16.msra.mxu0 %v4343_v2  ;;  %4336 = vmatpush3.bf16.msra.mxu1 %v4343_v2  ;;  %v1049_v6 = vand.u32 %v4344_v4, %v1047_v3  ;;  %v4349_v10 = vld [vmem:[%s6396_s0 + $0x10] sm:$0xff]   ;;  %v4351_v11 = vld [vmem:[%s6396_s0 + $0x1a0] sm:$0xff]   ;;  %v4350_v12 = vld [vmem:[%s6396_s0 + $0x18] sm:$0xff]  }
  0x2a   :  { %4138 = vmatprep.mubr.msk.bf16.mxu0 %vm749_vm2, %v4345_v5  ;;  %4238 = vmatprep.mubr.msk.bf16.mxu1 %vm749_vm2, %v4347_v7  ;;  %v4352_v13 = vld [vmem:[%s6396_s0 + $0x1a8] sm:$0xff]   ;;  %v4353_v14 = vld [vmem:[%s6396_s0 + $0x20] sm:$0xff]   ;;  %v4355_v15 = vld [vmem:[%s6396_s0 + $0x1b0] sm:$0xff]  }
  0x2b   :  { %4136 = vmatprep.subr.bf16.mxu0 %v1049_v6  ;;  %4335 = vmatprep.subr.bf16.mxu1 %v1049_v6  ;;  %v4354_v16 = vld [vmem:[%s6396_s0 + $0x28] sm:$0xff]   ;;  %v4356_v17 = vld [vmem:[%s6396_s0 + $0x1b8] sm:$0xff]   ;;  %v4357_v18 = vld [vmem:[%s6396_s0 + $0x30] sm:$0xff]  }
  0x2c   :  { %v4359_v19 = vld [vmem:[%s6396_s0 + $0x1c0] sm:$0xff]   ;;  %v4358_v20 = vld [vmem:[%s6396_s0 + $0x38] sm:$0xff]   ;;  %v4360_v21 = vld [vmem:[%s6396_s0 + $0x1c8] sm:$0xff]  }
  0x2d   :  { %4137 = vmatpush3.bf16.msra.mxu0 %v1049_v6  ;;  %4337 = vmatpush3.bf16.msra.mxu1 %v1049_v6  ;;  %v4361_v22 = vld [vmem:[%s6396_s0 + $0x40] sm:$0xff]   ;;  %v4363_v23 = vld [vmem:[%s6396_s0 + $0x1d0] sm:$0xff]   ;;  %v4362_v24 = vld [vmem:[%s6396_s0 + $0x48] sm:$0xff]  }
  0x2e   :  { %v4364_v25 = vld [vmem:[%s6396_s0 + $0x1d8] sm:$0xff]   ;;  %v4365_v26 = vld [vmem:[%s6396_s0 + $0x50] sm:$0xff]   ;;  %v4367_v27 = vld [vmem:[%s6396_s0 + $0x1e0] sm:$0xff]  }
  0x2f   :  { %v4366_v28 = vld [vmem:[%s6396_s0 + $0x58] sm:$0xff]   ;;  %v4368_v29 = vld [vmem:[%s6396_s0 + $0x1e8] sm:$0xff]   ;;  %v4369_v30 = vld [vmem:[%s6396_s0 + $0x60] sm:$0xff]  }
  0x30   :  { %4139 = vmatmul.mubr.msk.bf16.vlgmr.msra.gmra.mrb[0].mxu0 %vm749_vm2, %v4346_v8  ;;  %4239 = vmatmul.mubr.msk.bf16.vlgmr.msra.gmra.mrb[0].mxu1 %vm749_vm2, %v4348_v9  ;;  %v4371_v31 = vld [vmem:[%s6396_s0 + $0x1f0] sm:$0xff]   ;;  %v4370_v32 = vld [vmem:[%s6396_s0 + $0x68] sm:$0xff]   ;;  %v4372_v33 = vld [vmem:[%s6396_s0 + $0x1f8] sm:$0xff]  }
  0x31   :  { %4142 = vmatprep.mubr.msk.bf16.mxu0 %vm749_vm2, %v4349_v10  ;;  %4242 = vmatprep.mubr.msk.bf16.mxu1 %vm749_vm2, %v4351_v11  ;;  %v4373_v34 = vld [vmem:[%s6396_s0 + $0x70] sm:$0xff]   ;;  %v4375_v35 = vld [vmem:[%s6396_s0 + $0x200] sm:$0xff]   ;;  %v4374_v36 = vld [vmem:[%s6396_s0 + $0x78] sm:$0xff]  }
  0x32   :  { %v4376_v37 = vld [vmem:[%s6396_s0 + $0x208] sm:$0xff]   ;;  %v4377_v38 = vld [vmem:[%s6396_s0 + $0x80] sm:$0xff]   ;;  %v4379_v39 = vld [vmem:[%s6396_s0 + $0x210] sm:$0xff]  }
  0x33   :  { %v4378_v40 = vld [vmem:[%s6396_s0 + $0x88] sm:$0xff]   ;;  %v4380_v41 = vld [vmem:[%s6396_s0 + $0x218] sm:$0xff]   ;;  %v4381_v42 = vld [vmem:[%s6396_s0 + $0x90] sm:$0xff]  }
  0x34   :  { %v4383_v43 = vld [vmem:[%s6396_s0 + $0x220] sm:$0xff]   ;;  %v4382_v44 = vld [vmem:[%s6396_s0 + $0x98] sm:$0xff]   ;;  %v4384_v45 = vld [vmem:[%s6396_s0 + $0x228] sm:$0xff]  }
  0x35   :  { %v4385_v46 = vld [vmem:[%s6396_s0 + $0xa0] sm:$0xff]   ;;  %v4387_v47 = vld [vmem:[%s6396_s0 + $0x230] sm:$0xff]   ;;  %v4386_v48 = vld [vmem:[%s6396_s0 + $0xa8] sm:$0xff]  }
  0x36   :  { %v4388_v49 = vld [vmem:[%s6396_s0 + $0x238] sm:$0xff]   ;;  %v4389_v50 = vld [vmem:[%s6396_s0 + $0xb0] sm:$0xff]   ;;  %v4391_v51 = vld [vmem:[%s6396_s0 + $0x240] sm:$0xff]  }
  0x37   :  { %v4390_v52 = vld [vmem:[%s6396_s0 + $0xb8] sm:$0xff]   ;;  %v4392_v53 = vld [vmem:[%s6396_s0 + $0x248] sm:$0xff]   ;;  %v4393_v54 = vld [vmem:[%s6396_s0 + $0xc0] sm:$0xff]  }
  0x38   :  { %4143 = vmatmul.mubr.msk.bf16.gmra.mrb[4].mxu0 %vm749_vm2, %v4350_v12  ;;  %4243 = vmatmul.mubr.msk.bf16.gmra.mrb[4].mxu1 %vm749_vm2, %v4352_v13  ;;  %v4395_v55 = vld [vmem:[%s6396_s0 + $0x250] sm:$0xff]   ;;  %v4394_v56 = vld [vmem:[%s6396_s0 + $0xc8] sm:$0xff]   ;;  %v4396_v57 = vld [vmem:[%s6396_s0 + $0x258] sm:$0xff]  }
  0x39   :  { %4146 = vmatprep.mubr.msk.bf16.mxu0 %vm749_vm2, %v4353_v14  ;;  %4246 = vmatprep.mubr.msk.bf16.mxu1 %vm749_vm2, %v4355_v15  ;;  %v4397_v58 = vld [vmem:[%s6396_s0 + $0xd0] sm:$0xff]   ;;  %v4399_v59 = vld [vmem:[%s6396_s0 + $0x260] sm:$0xff]   ;;  %v4398_v60 = vld [vmem:[%s6396_s0 + $0xd8] sm:$0xff]  }
  0x3a   :  { %v4400_v61 = vld [vmem:[%s6396_s0 + $0x268] sm:$0xff]   ;;  %v4401_v62 = vld [vmem:[%s6396_s0 + $0xe0] sm:$0xff]   ;;  %v4403_v63 = vld [vmem:[%s6396_s0 + $0x270] sm:$0xff]  }
  0x3b   :  { %v4402_v0 = vld [vmem:[%s6396_s0 + $0xe8] sm:$0xff]   ;;  %v4404_v1 = vld [vmem:[%s6396_s0 + $0x278] sm:$0xff]   ;;  %v4405_v2 = vld [vmem:[%s6396_s0 + $0xf0] sm:$0xff]  }
  0x3c   :  { %v4407_v3 = vld [vmem:[%s6396_s0 + $0x280] sm:$0xff]   ;;  %v4406_v4 = vld [vmem:[%s6396_s0 + $0xf8] sm:$0xff]   ;;  %v4408_v5 = vld [vmem:[%s6396_s0 + $0x288] sm:$0xff]  }
  0x3d   :  { %v4409_v6 = vld [vmem:[%s6396_s0 + $0x100] sm:$0xff]   ;;  %v4411_v7 = vld [vmem:[%s6396_s0 + $0x290] sm:$0xff]   ;;  %v4410_v8 = vld [vmem:[%s6396_s0 + $0x108] sm:$0xff]  }
  0x3e   :  { %v4412_v9 = vld [vmem:[%s6396_s0 + $0x298] sm:$0xff]   ;;  %v4413_v10 = vld [vmem:[%s6396_s0 + $0x110] sm:$0xff]   ;;  %v4415_v11 = vld [vmem:[%s6396_s0 + $0x2a0] sm:$0xff]  }
  0x3f   :  { %v4414_v12 = vld [vmem:[%s6396_s0 + $0x118] sm:$0xff]   ;;  %v4416_v13 = vld [vmem:[%s6396_s0 + $0x2a8] sm:$0xff]   ;;  %v4417_v14 = vld [vmem:[%s6396_s0 + $0x120] sm:$0xff]  }
  0x40   :  { %4147 = vmatmul.mubr.msk.bf16.gmra.mrb[8].mxu0 %vm749_vm2, %v4354_v16  ;;  %4247 = vmatmul.mubr.msk.bf16.gmra.mrb[8].mxu1 %vm749_vm2, %v4356_v17  ;;  %v4419_v15 = vld [vmem:[%s6396_s0 + $0x2b0] sm:$0xff]   ;;  %v4418_v16 = vld [vmem:[%s6396_s0 + $0x128] sm:$0xff]   ;;  %v4420_v17 = vld [vmem:[%s6396_s0 + $0x2b8] sm:$0xff]  }
  0x41   :  { %4150 = vmatprep.mubr.msk.bf16.mxu0 %vm749_vm2, %v4357_v18  ;;  %4250 = vmatprep.mubr.msk.bf16.mxu1 %vm749_vm2, %v4359_v19  ;;  %v4421_v18 = vld [vmem:[%s6396_s0 + $0x130] sm:$0xff]   ;;  %v4423_v19 = vld [vmem:[%s6396_s0 + $0x2c0] sm:$0xff]  }
  0x48   :  { %4151 = vmatmul.mubr.msk.bf16.gmra.mrb[12].mxu0 %vm749_vm2, %v4358_v20  ;;  %4251 = vmatmul.mubr.msk.bf16.gmra.mrb[12].mxu1 %vm749_vm2, %v4360_v21  ;;  %v4422_v20 = vld [vmem:[%s6396_s0 + $0x138] sm:$0xff]   ;;  %v4424_v21 = vld [vmem:[%s6396_s0 + $0x2c8] sm:$0xff]  }
  0x49   :  { %4154 = vmatprep.mubr.msk.bf16.mxu0 %vm749_vm2, %v4361_v22  ;;  %4254 = vmatprep.mubr.msk.bf16.mxu1 %vm749_vm2, %v4363_v23  ;;  %v4425_v22 = vld [vmem:[%s6396_s0 + $0x140] sm:$0xff]   ;;  %v4427_v23 = vld [vmem:[%s6396_s0 + $0x2d0] sm:$0xff]  }
  0x50   :  { %4155 = vmatmul.mubr.msk.bf16.gmra.mrb[16].mxu0 %vm749_vm2, %v4362_v24  ;;  %4255 = vmatmul.mubr.msk.bf16.gmra.mrb[16].mxu1 %vm749_vm2, %v4364_v25  ;;  %v4426_v24 = vld [vmem:[%s6396_s0 + $0x148] sm:$0xff]   ;;  %v4428_v25 = vld [vmem:[%s6396_s0 + $0x2d8] sm:$0xff]  }
  0x51   :  { %4158 = vmatprep.mubr.msk.bf16.mxu0 %vm749_vm2, %v4365_v26  ;;  %4258 = vmatprep.mubr.msk.bf16.mxu1 %vm749_vm2, %v4367_v27  ;;  %v4429_v26 = vld [vmem:[%s6396_s0 + $0x150] sm:$0xff]   ;;  %v4431_v27 = vld [vmem:[%s6396_s0 + $0x2e0] sm:$0xff]  }
  0x58   :  { %4159 = vmatmul.mubr.msk.bf16.gmra.mrb[20].mxu0 %vm749_vm2, %v4366_v28  ;;  %4259 = vmatmul.mubr.msk.bf16.gmra.mrb[20].mxu1 %vm749_vm2, %v4368_v29  ;;  %v4430_v28 = vld [vmem:[%s6396_s0 + $0x158] sm:$0xff]   ;;  %v4432_v29 = vld [vmem:[%s6396_s0 + $0x2e8] sm:$0xff]  }
  0x59   :  { %4162 = vmatprep.mubr.msk.bf16.mxu0 %vm749_vm2, %v4369_v30  ;;  %4262 = vmatprep.mubr.msk.bf16.mxu1 %vm749_vm2, %v4371_v31  ;;  %v4433_v30 = vld [vmem:[%s6396_s0 + $0x160] sm:$0xff]   ;;  %v4435_v31 = vld [vmem:[%s6396_s0 + $0x2f0] sm:$0xff]  }
  0x60   :  { %4163 = vmatmul.mubr.msk.bf16.gmra.mrb[24].mxu0 %vm749_vm2, %v4370_v32  ;;  %4263 = vmatmul.mubr.msk.bf16.gmra.mrb[24].mxu1 %vm749_vm2, %v4372_v33  ;;  %v4434_v32 = vld [vmem:[%s6396_s0 + $0x168] sm:$0xff]   ;;  %v4436_v33 = vld [vmem:[%s6396_s0 + $0x2f8] sm:$0xff]  }
  0x61   :  { %4166 = vmatprep.mubr.msk.bf16.mxu0 %vm749_vm2, %v4373_v34  ;;  %4266 = vmatprep.mubr.msk.bf16.mxu1 %vm749_vm2, %v4375_v35  ;;  %v4437_v34 = vld [vmem:[%s6396_s0 + $0x170] sm:$0xff]   ;;  %v4439_v35 = vld [vmem:[%s6396_s0 + $0x300] sm:$0xff]  }
  0x68   :  { %4167 = vmatmul.mubr.msk.bf16.gmra.mrb[28].mxu0 %vm749_vm2, %v4374_v36  ;;  %4267 = vmatmul.mubr.msk.bf16.gmra.mrb[28].mxu1 %vm749_vm2, %v4376_v37  ;;  %v4438_v36 = vld [vmem:[%s6396_s0 + $0x178] sm:$0xff]   ;;  %v4440_v37 = vld [vmem:[%s6396_s0 + $0x308] sm:$0xff]  }
  0x69   :  { %4170 = vmatprep.mubr.msk.bf16.mxu0 %vm749_vm2, %v4377_v38  ;;  %4270 = vmatprep.mubr.msk.bf16.mxu1 %vm749_vm2, %v4379_v39  ;;  %v4441_v38 = vld [vmem:[%s6396_s0 + $0x180] sm:$0xff]   ;;  %v4442_v39 = vld [vmem:[%s6396_s0 + $0x188] sm:$0xff]  }
  0x70   :  { %4171 = vmatmul.mubr.msk.bf16.gmra.mrb[32].mxu0 %vm749_vm2, %v4378_v40  ;;  %4271 = vmatmul.mubr.msk.bf16.gmra.mrb[32].mxu1 %vm749_vm2, %v4380_v41  ;;  %v4934_v40 = vld [vmem:[#allocation4] ss:$0 sm:$0xff] }
  0x71   :  { %4174 = vmatprep.mubr.msk.bf16.mxu0 %vm749_vm2, %v4381_v42  ;;  %4274 = vmatprep.mubr.msk.bf16.mxu1 %vm749_vm2, %v4383_v43 }
  0x78   :  { %4175 = vmatmul.mubr.msk.bf16.gmra.mrb[36].mxu0 %vm749_vm2, %v4382_v44  ;;  %4275 = vmatmul.mubr.msk.bf16.gmra.mrb[36].mxu1 %vm749_vm2, %v4384_v45 }
  0x79   :  { %4178 = vmatprep.mubr.msk.bf16.mxu0 %vm749_vm2, %v4385_v46  ;;  %4278 = vmatprep.mubr.msk.bf16.mxu1 %vm749_vm2, %v4387_v47 }
  0x80   :  { %4179 = vmatmul.mubr.msk.bf16.gmra.mrb[40].mxu0 %vm749_vm2, %v4386_v48  ;;  %4279 = vmatmul.mubr.msk.bf16.gmra.mrb[40].mxu1 %vm749_vm2, %v4388_v49 }
  0x81   :  { %4182 = vmatprep.mubr.msk.bf16.mxu0 %vm749_vm2, %v4389_v50  ;;  %4282 = vmatprep.mubr.msk.bf16.mxu1 %vm749_vm2, %v4391_v51 }
  0x88   :  { %4183 = vmatmul.mubr.msk.bf16.gmra.mrb[44].mxu0 %vm749_vm2, %v4390_v52  ;;  %4283 = vmatmul.mubr.msk.bf16.gmra.mrb[44].mxu1 %vm749_vm2, %v4392_v53 }
  0x89   :  { %4186 = vmatprep.mubr.msk.bf16.mxu0 %vm749_vm2, %v4393_v54  ;;  %4286 = vmatprep.mubr.msk.bf16.mxu1 %vm749_vm2, %v4395_v55 }
  0x90   :  { %4187 = vmatmul.mubr.msk.bf16.gmra.mrb[48].mxu0 %vm749_vm2, %v4394_v56  ;;  %4287 = vmatmul.mubr.msk.bf16.gmra.mrb[48].mxu1 %vm749_vm2, %v4396_v57 }
  0x91   :  { %4190 = vmatprep.mubr.msk.bf16.mxu0 %vm749_vm2, %v4397_v58  ;;  %4290 = vmatprep.mubr.msk.bf16.mxu1 %vm749_vm2, %v4399_v59 }
  0x98   :  { %4191 = vmatmul.mubr.msk.bf16.gmra.mrb[52].mxu0 %vm749_vm2, %v4398_v60  ;;  %4291 = vmatmul.mubr.msk.bf16.gmra.mrb[52].mxu1 %vm749_vm2, %v4400_v61 }
  0x99   :  { %4194 = vmatprep.mubr.msk.bf16.mxu0 %vm749_vm2, %v4401_v62  ;;  %4294 = vmatprep.mubr.msk.bf16.mxu1 %vm749_vm2, %v4403_v63 }
  0xa0   :  { %4195 = vmatmul.mubr.msk.bf16.gmra.mrb[56].mxu0 %vm749_vm2, %v4402_v0  ;;  %4295 = vmatmul.mubr.msk.bf16.gmra.mrb[56].mxu1 %vm749_vm2, %v4404_v1 }
  0xa1   :  { %4198 = vmatprep.mubr.msk.bf16.mxu0 %vm749_vm2, %v4405_v2  ;;  %4298 = vmatprep.mubr.msk.bf16.mxu1 %vm749_vm2, %v4407_v3 }
  0xa8   :  { %4199 = vmatmul.mubr.msk.bf16.gmra.mrb[60].mxu0 %vm749_vm2, %v4406_v4  ;;  %4299 = vmatmul.mubr.msk.bf16.gmra.mrb[60].mxu1 %vm749_vm2, %v4408_v5 }
  0xa9   :  { %4202 = vmatprep.mubr.msk.bf16.mxu0 %vm749_vm2, %v4409_v6  ;;  %4302 = vmatprep.mubr.msk.bf16.mxu1 %vm749_vm2, %v4411_v7 }
  0xb0   :  { %4203 = vmatmul.mubr.msk.bf16.gmra.mrb[64].mxu0 %vm749_vm2, %v4410_v8  ;;  %4303 = vmatmul.mubr.msk.bf16.gmra.mrb[64].mxu1 %vm749_vm2, %v4412_v9 }
  0xb1   :  { %4206 = vmatprep.mubr.msk.bf16.mxu0 %vm749_vm2, %v4413_v10  ;;  %4306 = vmatprep.mubr.msk.bf16.mxu1 %vm749_vm2, %v4415_v11 }
  0xb8   :  { %4207 = vmatmul.mubr.msk.bf16.gmra.mrb[68].mxu0 %vm749_vm2, %v4414_v12  ;;  %4307 = vmatmul.mubr.msk.bf16.gmra.mrb[68].mxu1 %vm749_vm2, %v4416_v13 }
  0xb9   :  { %4210 = vmatprep.mubr.msk.bf16.mxu0 %vm749_vm2, %v4417_v14  ;;  %4310 = vmatprep.mubr.msk.bf16.mxu1 %vm749_vm2, %v4419_v15 }
  0xc0   :  { %4211 = vmatmul.mubr.msk.bf16.gmra.mrb[72].mxu0 %vm749_vm2, %v4418_v16  ;;  %4311 = vmatmul.mubr.msk.bf16.gmra.mrb[72].mxu1 %vm749_vm2, %v4420_v17 }
  0xc1   :  { %4214 = vmatprep.mubr.msk.bf16.mxu0 %vm749_vm2, %v4421_v18  ;;  %4314 = vmatprep.mubr.msk.bf16.mxu1 %vm749_vm2, %v4423_v19 }
  0xc8   :  { %4215 = vmatmul.mubr.msk.bf16.gmra.mrb[76].mxu0 %vm749_vm2, %v4422_v20  ;;  %4315 = vmatmul.mubr.msk.bf16.gmra.mrb[76].mxu1 %vm749_vm2, %v4424_v21 }
  0xc9   :  { %4218 = vmatprep.mubr.msk.bf16.mxu0 %vm749_vm2, %v4425_v22  ;;  %4318 = vmatprep.mubr.msk.bf16.mxu1 %vm749_vm2, %v4427_v23 }
  0xd0   :  { %4219 = vmatmul.mubr.msk.bf16.gmra.mrb[80].mxu0 %vm749_vm2, %v4426_v24  ;;  %4319 = vmatmul.mubr.msk.bf16.gmra.mrb[80].mxu1 %vm749_vm2, %v4428_v25 }
  0xd1   :  { %4222 = vmatprep.mubr.msk.bf16.mxu0 %vm749_vm2, %v4429_v26  ;;  %4322 = vmatprep.mubr.msk.bf16.mxu1 %vm749_vm2, %v4431_v27 }
  0xd8   :  { %4223 = vmatmul.mubr.msk.bf16.gmra.mrb[84].mxu0 %vm749_vm2, %v4430_v28  ;;  %4323 = vmatmul.mubr.msk.bf16.gmra.mrb[84].mxu1 %vm749_vm2, %v4432_v29 }
  0xd9   :  { %4226 = vmatprep.mubr.msk.bf16.mxu0 %vm749_vm2, %v4433_v30  ;;  %4326 = vmatprep.mubr.msk.bf16.mxu1 %vm749_vm2, %v4435_v31 }
  0xe0   :  { %4227 = vmatmul.mubr.msk.bf16.gmra.mrb[88].mxu0 %vm749_vm2, %v4434_v32  ;;  %4327 = vmatmul.mubr.msk.bf16.gmra.mrb[88].mxu1 %vm749_vm2, %v4436_v33 }
  0xe1   :  { %4230 = vmatprep.mubr.msk.bf16.mxu0 %vm749_vm2, %v4437_v34  ;;  %4330 = vmatprep.mubr.msk.bf16.mxu1 %vm749_vm2, %v4439_v35 }
  0xe8   :  { %4231 = vmatmul.mubr.msk.bf16.gmra.mrb[92].mxu0 %vm749_vm2, %v4438_v36  ;;  %4331 = vmatmul.mubr.msk.bf16.gmra.mrb[92].mxu1 %vm749_vm2, %v4440_v37 }
  0xe9   :  { %4234 = vmatprep.mubr.msk.bf16.mxu0 %vm749_vm2, %v4441_v38 }
  0xf0   :  { %4235 = vmatmul.mubr.msk.bf16.gmra.mrb[96].mxu0 %vm749_vm2, %v4442_v39 }
 0x103   :  { %v4140_v41 = vpop.f32.mrb[0].mxu0  ;;  %v4240_v42 = vpop.f32.mrb[0].mxu1 }
 0x104   :  { %v1094_v43 = vadd.f32 %v4140_v41, %v4934_v40  ;;  %v1085_v44 = vpop.f32.mrb[1].mxu0  ;;  %v1494_v45 = vadd.f32 %v4240_v42, %v4934_v40  ;;  %v1485_v46 = vpop.f32.mrb[1].mxu1 }
 0x105   :  { %v1086_v47 = vadd.f32 %v4934_v40, %v1085_v44  ;;  %v4141_v48 = vpop.f32.mrb[2].mxu0  ;;  %v1486_v49 = vadd.f32 %v4934_v40, %v1485_v46  ;;  %v4241_v50 = vpop.f32.mrb[2].mxu1 }
 0x106   :  { %vm1870_vm4 = vcmp.gt.f32.partialorder %v1094_v43, 0.0  ;;  %v2066_v51 = vmul.f32 0.2, %v1094_v43  ;;  %v1097_v52 = vadd.f32 %v4141_v48, %v4934_v40  ;;  %v1088_v53 = vpop.f32.mrb[3].mxu0  ;;  %vm1970_vm5 = vcmp.gt.f32.partialorder %v1494_v45, 0.0  ;;  %v1488_v54 = vpop.f32.mrb[3].mxu1 }
 0x107   :  { %vm1868_vm6 = vcmp.gt.f32.partialorder %v1086_v47, 0.0  ;;  %v2064_v55 = vmul.f32 0.2, %v1086_v47  ;;  %v1089_v56 = vadd.f32 %v4934_v40, %v1088_v53  ;;  %v2166_v57 = vmul.f32 0.2, %v1494_v45 }
 0x108   :  { %v2262_v58 = vsel %vm1870_vm4, %v1094_v43, %v2066_v51  ;;  %vm1871_vm7 = vcmp.gt.f32.partialorder %v1097_v52, 0.0  ;;  %v2067_v59 = vmul.f32 0.2, %v1097_v52  ;;  %vm1968_vm8 = vcmp.gt.f32.partialorder %v1486_v49, 0.0 }
 0x109   :  { %v3840_v60 = vpack.c.bf16 %v2262_v58, %v2262_v58  ;;  %v2260_v61 = vsel %vm1868_vm6, %v1086_v47, %v2064_v55  ;;  %vm1869_vm9 = vcmp.gt.f32.partialorder %v1089_v56, 0.0  ;;  %v2065_v62 = vmul.f32 0.2, %v1089_v56 }
 0x10a   :  { %v3838_v63 = vpack.c.bf16 %v2260_v61, %v2260_v61  ;;  %v2263_v0 = vsel %vm1871_vm7, %v1097_v52, %v2067_v59  ;;  %v2362_v1 = vsel %vm1970_vm5, %v1494_v45, %v2166_v57  ;;  %v2164_v2 = vmul.f32 0.2, %v1486_v49 }
 0x10b   :  { %3243 = vst.msk [vmem:[%s6399_s3 + $0x8] sm:$0xf] %vm3240_vm3, %v3840_v60  ;;  %v3841_v3 = vpack.c.bf16 %v2263_v0, %v2263_v0  ;;  %v2261_v4 = vsel %vm1869_vm9, %v1089_v56, %v2065_v62  ;;  %v3940_v5 = vpack.c.bf16 %v2362_v1, %v2362_v1  ;;  %v1497_v6 = vadd.f32 %v4241_v50, %v4934_v40  ;;  %v4144_v7 = vpop.f32.mrb[4].mxu0  ;;  %v4244_v8 = vpop.f32.mrb[4].mxu1 }
 0x10c   :  { %3241 = vst.msk [vmem:[%s6399_s3] sm:$0xf] %vm3240_vm3, %v3838_v63  ;;  %v3839_v9 = vpack.c.bf16 %v2261_v4, %v2261_v4  ;;  %v2360_v10 = vsel %vm1968_vm8, %v1486_v49, %v2164_v2  ;;  %v1489_v11 = vadd.f32 %v4934_v40, %v1488_v54  ;;  %v1110_v12 = vadd.f32 %v4144_v7, %v4934_v40  ;;  %v1101_v13 = vpop.f32.mrb[5].mxu0  ;;  %v1501_v14 = vpop.f32.mrb[5].mxu1 }
 0x10d   :  { %3244 = vst.msk [vmem:[%s6399_s3 + $0xc] sm:$0xf] %vm3240_vm3, %v3841_v3  ;;  %3343 = vst.msk [vmem:[%s6399_s3 + $0x198] sm:$0xf] %vm3240_vm3, %v3940_v5  ;;  %v3938_v15 = vpack.c.bf16 %v2360_v10, %v2360_v10  ;;  %vm1971_vm10 = vcmp.gt.f32.partialorder %v1497_v6, 0.0  ;;  %v1102_v17 = vadd.f32 %v4934_v40, %v1101_v13  ;;  %v4145_v18 = vpop.f32.mrb[6].mxu0  ;;  %v1510_v37 = vadd.f32 %v4244_v8, %v4934_v40 }
 0x10e   :  { %v2167_v16 = vmul.f32 0.2, %v1497_v6  ;;  %v4245_v19 = vpop.f32.mrb[6].mxu1  ;;  %3242 = vst.msk [vmem:[%s6399_s3 + $0x4] sm:$0xf] %vm3240_vm3, %v3839_v9  ;;  %vm1969_vm11 = vcmp.gt.f32.partialorder %v1489_v11, 0.0  ;;  %v1113_v24 = vadd.f32 %v4145_v18, %v4934_v40  ;;  %v1502_v38 = vadd.f32 %v4934_v40, %v1501_v14 }
 0x10f   :  { %v2165_v20 = vmul.f32 0.2, %v1489_v11  ;;  %vm1874_vm12 = vcmp.gt.f32.partialorder %v1110_v12, 0.0  ;;  %v2070_v21 = vmul.f32 0.2, %v1110_v12  ;;  %vm1872_vm13 = vcmp.gt.f32.partialorder %v1102_v17, 0.0 }
 0x110   :  { %3341 = vst.msk [vmem:[%s6399_s3 + $0x190] sm:$0xf] %vm3240_vm3, %v3938_v15  ;;  %v2363_v22 = vsel %vm1971_vm10, %v1497_v6, %v2167_v16  ;;  %v2068_v23 = vmul.f32 0.2, %v1102_v17  ;;  %v1104_v25 = vpop.f32.mrb[7].mxu0  ;;  %v1504_v26 = vpop.f32.mrb[7].mxu1  ;;  %v1513_v39 = vadd.f32 %v4245_v19, %v4934_v40 }
 0x111   :  { %v3941_v27 = vpack.c.bf16 %v2363_v22, %v2363_v22  ;;  %v2361_v28 = vsel %vm1969_vm11, %v1489_v11, %v2165_v20  ;;  %v2266_v29 = vsel %vm1874_vm12, %v1110_v12, %v2070_v21  ;;  %v1105_v30 = vadd.f32 %v4934_v40, %v1104_v25 }
 0x112   :  { %v3939_v31 = vpack.c.bf16 %v2361_v28, %v2361_v28  ;;  %v3844_v32 = vpack.c.bf16 %v2266_v29, %v2266_v29  ;;  %v2264_v33 = vsel %vm1872_vm13, %v1102_v17, %v2068_v23  ;;  %vm1875_vm14 = vcmp.gt.f32.partialorder %v1113_v24, 0.0 }
 0x113   :  { %3344 = vst.msk [vmem:[%s6399_s3 + $0x19c] sm:$0xf] %vm3240_vm3, %v3941_v27  ;;  %v3842_v34 = vpack.c.bf16 %v2264_v33, %v2264_v33  ;;  %v2071_v35 = vmul.f32 0.2, %v1113_v24  ;;  %vm1873_vm15 = vcmp.gt.f32.partialorder %v1105_v30, 0.0  ;;  %v1505_v41 = vadd.f32 %v4934_v40, %v1504_v26  ;;  %v4148_v42 = vpop.f32.mrb[8].mxu0 }
 0x114   :  { %v2069_v36 = vmul.f32 0.2, %v1105_v30  ;;  %3342 = vst.msk [vmem:[%s6399_s3 + $0x194] sm:$0xf] %vm3240_vm3, %v3939_v31  ;;  %3247 = vst.msk [vmem:[%s6399_s3 + $0x18] sm:$0xf] %vm3240_vm3, %v3844_v32  ;;  %v1126_v46 = vadd.f32 %v4148_v42, %v4934_v40 }
 0x115   :  { %v4248_v43 = vpop.f32.mrb[8].mxu1  ;;  %3245 = vst.msk [vmem:[%s6399_s3 + $0x10] sm:$0xf] %vm3240_vm3, %v3842_v34  ;;  %v2267_v44 = vsel %vm1875_vm14, %v1113_v24, %v2071_v35  ;;  %v1117_v47 = vpop.f32.mrb[9].mxu0  ;;  %vm1974_vm0 = vcmp.gt.f32.partialorder %v1510_v37, 0.0  ;;  %vm1972_vm1 = vcmp.gt.f32.partialorder %v1502_v38, 0.0 }
 0x116   :  { %v2265_v45 = vsel %vm1873_vm15, %v1105_v30, %v2069_v36  ;;  %v1526_v48 = vadd.f32 %v4248_v43, %v4934_v40  ;;  %v1517_v49 = vpop.f32.mrb[9].mxu1  ;;  %v3845_v50 = vpack.c.bf16 %v2267_v44, %v2267_v44  ;;  %v2170_v52 = vmul.f32 0.2, %v1510_v37  ;;  %v4149_v53 = vpop.f32.mrb[10].mxu0 }
 0x117   :  { %v3843_v51 = vpack.c.bf16 %v2265_v45, %v2265_v45  ;;  %v4249_v54 = vpop.f32.mrb[10].mxu1  ;;  %v2168_v55 = vmul.f32 0.2, %v1502_v38  ;;  %vm1975_vm2 = vcmp.gt.f32.partialorder %v1513_v39, 0.0  ;;  %v2171_v56 = vmul.f32 0.2, %v1513_v39 }
 0x118   :  { %3248 = vst.msk [vmem:[%s6399_s3 + $0x1c] sm:$0xf] %vm3240_vm3, %v3845_v50  ;;  %v2366_v57 = vsel %vm1974_vm0, %v1510_v37, %v2170_v52  ;;  %vm1973_vm4 = vcmp.gt.f32.partialorder %v1505_v41, 0.0  ;;  %v2169_v58 = vmul.f32 0.2, %v1505_v41  ;;  %vm1878_vm5 = vcmp.gt.f32.partialorder %v1126_v46, 0.0 }
 0x119   :  { %3246 = vst.msk [vmem:[%s6399_s3 + $0x14] sm:$0xf] %vm3240_vm3, %v3843_v51  ;;  %v1120_v59 = vpop.f32.mrb[11].mxu0  ;;  %v1520_v60 = vpop.f32.mrb[11].mxu1  ;;  %v3944_v61 = vpack.c.bf16 %v2366_v57, %v2366_v57  ;;  %v2364_v62 = vsel %vm1972_vm1, %v1502_v38, %v2168_v55  ;;  %v2367_v63 = vsel %vm1975_vm2, %v1513_v39, %v2171_v56  ;;  %v2074_v0 = vmul.f32 0.2, %v1126_v46 }
 0x11a   :  { %v3942_v1 = vpack.c.bf16 %v2364_v62, %v2364_v62  ;;  %v3945_v2 = vpack.c.bf16 %v2367_v63, %v2367_v63  ;;  %v2365_v3 = vsel %vm1973_vm4, %v1505_v41, %v2169_v58  ;;  %v1118_v4 = vadd.f32 %v4934_v40, %v1117_v47 }
 0x11b   :  { %3347 = vst.msk [vmem:[%s6399_s3 + $0x1a8] sm:$0xf] %vm3240_vm3, %v3944_v61  ;;  %v3943_v5 = vpack.c.bf16 %v2365_v3, %v2365_v3  ;;  %v2270_v6 = vsel %vm1878_vm5, %v1126_v46, %v2074_v0  ;;  %v1129_v7 = vadd.f32 %v4149_v53, %v4934_v40  ;;  %v1121_v8 = vadd.f32 %v4934_v40, %v1120_v59  ;;  %v4152_v11 = vpop.f32.mrb[12].mxu0  ;;  %v4252_v12 = vpop.f32.mrb[12].mxu1 }
 0x11c   :  { %3345 = vst.msk [vmem:[%s6399_s3 + $0x1a0] sm:$0xf] %vm3240_vm3, %v3942_v1  ;;  %3348 = vst.msk [vmem:[%s6399_s3 + $0x1ac] sm:$0xf] %vm3240_vm3, %v3945_v2  ;;  %v3848_v9 = vpack.c.bf16 %v2270_v6, %v2270_v6  ;;  %vm1876_vm6 = vcmp.gt.f32.partialorder %v1118_v4, 0.0  ;;  %vm1978_vm7 = vcmp.gt.f32.partialorder %v1526_v48, 0.0  ;;  %v1518_v17 = vadd.f32 %v4934_v40, %v1517_v49 }
 0x11d   :  { %v2072_v10 = vmul.f32 0.2, %v1118_v4  ;;  %3346 = vst.msk [vmem:[%s6399_s3 + $0x1a4] sm:$0xf] %vm3240_vm3, %v3943_v5  ;;  %vm1879_vm8 = vcmp.gt.f32.partialorder %v1129_v7, 0.0  ;;  %vm1877_vm9 = vcmp.gt.f32.partialorder %v1121_v8, 0.0  ;;  %v1529_v18 = vadd.f32 %v4249_v54, %v4934_v40 }
 0x11e   :  { %v2075_v13 = vmul.f32 0.2, %v1129_v7  ;;  %v2073_v14 = vmul.f32 0.2, %v1121_v8  ;;  %3251 = vst.msk [vmem:[%s6399_s3 + $0x28] sm:$0xf] %vm3240_vm3, %v3848_v9  ;;  %v1521_v24 = vadd.f32 %v4934_v40, %v1520_v60  ;;  %v1142_v36 = vadd.f32 %v4152_v11, %v4934_v40 }
 0x11f   :  { %v2268_v15 = vsel %vm1876_vm6, %v1118_v4, %v2072_v10  ;;  %v2174_v16 = vmul.f32 0.2, %v1526_v48  ;;  %v1133_v19 = vpop.f32.mrb[13].mxu0  ;;  %v1533_v20 = vpop.f32.mrb[13].mxu1  ;;  %vm1976_vm10 = vcmp.gt.f32.partialorder %v1518_v17, 0.0  ;;  %vm1979_vm11 = vcmp.gt.f32.partialorder %v1529_v18, 0.0 }
 0x120   :  { %v3846_v21 = vpack.c.bf16 %v2268_v15, %v2268_v15  ;;  %v2271_v22 = vsel %vm1879_vm8, %v1129_v7, %v2075_v13  ;;  %v2269_v23 = vsel %vm1877_vm9, %v1121_v8, %v2073_v14  ;;  %v4153_v25 = vpop.f32.mrb[14].mxu0  ;;  %v4253_v26 = vpop.f32.mrb[14].mxu1  ;;  %v2172_v33 = vmul.f32 0.2, %v1518_v17 }
 0x121   :  { %v3849_v27 = vpack.c.bf16 %v2271_v22, %v2271_v22  ;;  %v3847_v28 = vpack.c.bf16 %v2269_v23, %v2269_v23  ;;  %v2370_v29 = vsel %vm1978_vm7, %v1526_v48, %v2174_v16  ;;  %v1136_v30 = vpop.f32.mrb[15].mxu0  ;;  %v1536_v31 = vpop.f32.mrb[15].mxu1  ;;  %v2175_v34 = vmul.f32 0.2, %v1529_v18 }
 0x122   :  { %3249 = vst.msk [vmem:[%s6399_s3 + $0x20] sm:$0xf] %vm3240_vm3, %v3846_v21  ;;  %v3948_v32 = vpack.c.bf16 %v2370_v29, %v2370_v29  ;;  %vm1977_vm12 = vcmp.gt.f32.partialorder %v1521_v24, 0.0  ;;  %v2173_v35 = vmul.f32 0.2, %v1521_v24  ;;  %v1134_v37 = vadd.f32 %v4934_v40, %v1133_v19 }
 0x123   :  { %3252 = vst.msk [vmem:[%s6399_s3 + $0x2c] sm:$0xf] %vm3240_vm3, %v3849_v27  ;;  %3250 = vst.msk [vmem:[%s6399_s3 + $0x24] sm:$0xf] %vm3240_vm3, %v3847_v28  ;;  %v2368_v38 = vsel %vm1976_vm10, %v1518_v17, %v2172_v33  ;;  %v2371_v39 = vsel %vm1979_vm11, %v1529_v18, %v2175_v34  ;;  %v1145_v41 = vadd.f32 %v4153_v25, %v4934_v40  ;;  %vm1882_vm13 = vcmp.gt.f32.partialorder %v1142_v36, 0.0  ;;  %v4156_v46 = vpop.f32.mrb[16].mxu0 }
 0x124   :  { %3351 = vst.msk [vmem:[%s6399_s3 + $0x1b8] sm:$0xf] %vm3240_vm3, %v3948_v32  ;;  %v1137_v42 = vadd.f32 %v4934_v40, %v1136_v30  ;;  %v3946_v43 = vpack.c.bf16 %v2368_v38, %v2368_v38  ;;  %v3949_v44 = vpack.c.bf16 %v2371_v39, %v2371_v39  ;;  %v2369_v45 = vsel %vm1977_vm12, %v1521_v24, %v2173_v35  ;;  %v5051_v47 = vpop.f32.mrb[16].mxu1  ;;  %v1149_v51 = vpop.f32.mrb[17].mxu0 }
 0x125   :  { %v3947_v48 = vpack.c.bf16 %v2369_v45, %v2369_v45  ;;  %v2078_v49 = vmul.f32 0.2, %v1142_v36  ;;  %vm1880_vm14 = vcmp.gt.f32.partialorder %v1134_v37, 0.0  ;;  %v2076_v50 = vmul.f32 0.2, %v1134_v37  ;;  %v4157_v58 = vpop.f32.mrb[18].mxu0 }
 0x126   :  { %3349 = vst.msk [vmem:[%s6399_s3 + $0x1b0] sm:$0xf] %vm3240_vm3, %v3946_v43  ;;  %3352 = vst.msk [vmem:[%s6399_s3 + $0x1bc] sm:$0xf] %vm3240_vm3, %v3949_v44  ;;  %vm1883_vm15 = vcmp.gt.f32.partialorder %v1145_v41, 0.0  ;;  %vm1881_vm0 = vcmp.gt.f32.partialorder %v1137_v42, 0.0  ;;  %v1542_v56 = vadd.f32 %v4252_v12, %v4934_v40  ;;  %v1534_v57 = vadd.f32 %v4934_v40, %v1533_v20 }
 0x127   :  { %v2079_v52 = vmul.f32 0.2, %v1145_v41  ;;  %v2077_v53 = vmul.f32 0.2, %v1137_v42  ;;  %3350 = vst.msk [vmem:[%s6399_s3 + $0x1b4] sm:$0xf] %vm3240_vm3, %v3947_v48  ;;  %v2274_v54 = vsel %vm1882_vm13, %v1142_v36, %v2078_v49  ;;  %v2272_v55 = vsel %vm1880_vm14, %v1134_v37, %v2076_v50 }
 0x128   :  { %v5067_v59 = vpop.f32.mrb[17].mxu1  ;;  %v3852_v60 = vpack.c.bf16 %v2274_v54, %v2274_v54  ;;  %v3850_v61 = vpack.c.bf16 %v2272_v55, %v2272_v55  ;;  %v1152_v0 = vpop.f32.mrb[19].mxu0  ;;  %vm1982_vm1 = vcmp.gt.f32.partialorder %v1542_v56, 0.0  ;;  %v2178_v4 = vmul.f32 0.2, %v1542_v56 }
 0x129   :  { %v2275_v62 = vsel %vm1883_vm15, %v1145_v41, %v2079_v52  ;;  %v2273_v63 = vsel %vm1881_vm0, %v1137_v42, %v2077_v53  ;;  %v4257_v1 = vpop.f32.mrb[18].mxu1  ;;  %vm1980_vm2 = vcmp.gt.f32.partialorder %v1534_v57, 0.0  ;;  %v2176_v6 = vmul.f32 0.2, %v1534_v57 }
 0x12a   :  { %v3853_v2 = vpack.c.bf16 %v2275_v62, %v2275_v62  ;;  %v3851_v3 = vpack.c.bf16 %v2273_v63, %v2273_v63  ;;  %v1552_v5 = vpop.f32.mrb[19].mxu1  ;;  %3255 = vst.msk [vmem:[%s6399_s3 + $0x38] sm:$0xf] %vm3240_vm3, %v3852_v60  ;;  %3253 = vst.msk [vmem:[%s6399_s3 + $0x30] sm:$0xf] %vm3240_vm3, %v3850_v61  ;;  %v1545_v7 = vadd.f32 %v4253_v26, %v4934_v40 }
 0x12b   :  { %v1537_v8 = vadd.f32 %v4934_v40, %v1536_v31  ;;  %v2374_v9 = vsel %vm1982_vm1, %v1542_v56, %v2178_v4  ;;  %v1158_v10 = vadd.f32 %v4156_v46, %v4934_v40  ;;  %v1150_v11 = vadd.f32 %v4934_v40, %v1149_v51  ;;  %v4160_v16 = vpop.f32.mrb[20].mxu0  ;;  %v5090_v17 = vpop.f32.mrb[20].mxu1 }
 0x12c   :  { %3256 = vst.msk [vmem:[%s6399_s3 + $0x3c] sm:$0xf] %vm3240_vm3, %v3853_v2  ;;  %3254 = vst.msk [vmem:[%s6399_s3 + $0x34] sm:$0xf] %vm3240_vm3, %v3851_v3  ;;  %v1161_v12 = vadd.f32 %v4157_v58, %v4934_v40  ;;  %v3952_v13 = vpack.c.bf16 %v2374_v9, %v2374_v9  ;;  %v2372_v14 = vsel %vm1980_vm2, %v1534_v57, %v2176_v6  ;;  %vm1983_vm4 = vcmp.gt.f32.partialorder %v1545_v7, 0.0  ;;  %v5092_v20 = vpop.f32.mrb[21].mxu0 }
 0x12d   :  { %v2179_v15 = vmul.f32 0.2, %v1545_v7  ;;  %v3950_v18 = vpack.c.bf16 %v2372_v14, %v2372_v14  ;;  %vm1981_vm5 = vcmp.gt.f32.partialorder %v1537_v8, 0.0  ;;  %v2177_v19 = vmul.f32 0.2, %v1537_v8  ;;  %v5094_v21 = vpop.f32.mrb[21].mxu1 }
 0x12e   :  { %vm1886_vm6 = vcmp.gt.f32.partialorder %v1158_v10, 0.0  ;;  %3355 = vst.msk [vmem:[%s6399_s3 + $0x1c8] sm:$0xf] %vm3240_vm3, %v3952_v13  ;;  %v2082_v23 = vmul.f32 0.2, %v1158_v10  ;;  %vm1884_vm7 = vcmp.gt.f32.partialorder %v1150_v11, 0.0  ;;  %v1153_v34 = vadd.f32 %v4934_v40, %v1152_v0 }
 0x12f   :  { %v2375_v22 = vsel %vm1983_vm4, %v1545_v7, %v2179_v15  ;;  %v2080_v24 = vmul.f32 0.2, %v1150_v11  ;;  %v4161_v25 = vpop.f32.mrb[22].mxu0  ;;  %3353 = vst.msk [vmem:[%s6399_s3 + $0x1c0] sm:$0xf] %vm3240_vm3, %v3950_v18  ;;  %v2373_v27 = vsel %vm1981_vm5, %v1537_v8, %v2177_v19  ;;  %vm1887_vm8 = vcmp.gt.f32.partialorder %v1161_v12, 0.0 }
 0x130   :  { %v3953_v26 = vpack.c.bf16 %v2375_v22, %v2375_v22  ;;  %v2083_v28 = vmul.f32 0.2, %v1161_v12  ;;  %v1168_v29 = vpop.f32.mrb[23].mxu0  ;;  %v5104_v30 = vpop.f32.mrb[22].mxu1  ;;  %v3951_v31 = vpack.c.bf16 %v2373_v27, %v2373_v27  ;;  %v2278_v32 = vsel %vm1886_vm6, %v1158_v10, %v2082_v23 }
 0x131   :  { %v2276_v33 = vsel %vm1884_vm7, %v1150_v11, %v2080_v24  ;;  %v5108_v35 = vpop.f32.mrb[23].mxu1  ;;  %v3856_v36 = vpack.c.bf16 %v2278_v32, %v2278_v32  ;;  %v1558_v39 = vadd.f32 %v5051_v47, %v4934_v40  ;;  %vm1885_vm9 = vcmp.gt.f32.partialorder %v1153_v34, 0.0 }
 0x132   :  { %3356 = vst.msk [vmem:[%s6399_s3 + $0x1cc] sm:$0xf] %vm3240_vm3, %v3953_v26  ;;  %v3854_v37 = vpack.c.bf16 %v2276_v33, %v2276_v33  ;;  %v2279_v38 = vsel %vm1887_vm8, %v1161_v12, %v2083_v28  ;;  %3354 = vst.msk [vmem:[%s6399_s3 + $0x1c4] sm:$0xf] %vm3240_vm3, %v3951_v31  ;;  %v2081_v42 = vmul.f32 0.2, %v1153_v34  ;;  %v1550_v43 = vadd.f32 %v4934_v40, %v5067_v59 }
 0x133   :  { %v3857_v41 = vpack.c.bf16 %v2279_v38, %v2279_v38  ;;  %3259 = vst.msk [vmem:[%s6399_s3 + $0x48] sm:$0xf] %vm3240_vm3, %v3856_v36  ;;  %vm1986_vm10 = vcmp.gt.f32.partialorder %v1558_v39, 0.0  ;;  %v2182_v44 = vmul.f32 0.2, %v1558_v39  ;;  %v1561_v45 = vadd.f32 %v4257_v1, %v4934_v40  ;;  %v5137_v50 = vpop.f32.mrb[24].mxu0 }
 0x134   :  { %3257 = vst.msk [vmem:[%s6399_s3 + $0x40] sm:$0xf] %vm3240_vm3, %v3854_v37  ;;  %v1553_v46 = vadd.f32 %v4934_v40, %v1552_v5  ;;  %v2277_v47 = vsel %vm1885_vm9, %v1153_v34, %v2081_v42  ;;  %vm1984_vm11 = vcmp.gt.f32.partialorder %v1550_v43, 0.0  ;;  %v2180_v48 = vmul.f32 0.2, %v1550_v43  ;;  %v5139_v51 = vpop.f32.mrb[24].mxu1 }
 0x135   :  { %3260 = vst.msk [vmem:[%s6399_s3 + $0x4c] sm:$0xf] %vm3240_vm3, %v3857_v41  ;;  %v1174_v49 = vadd.f32 %v4160_v16, %v4934_v40  ;;  %v3855_v52 = vpack.c.bf16 %v2277_v47, %v2277_v47  ;;  %v2378_v53 = vsel %vm1986_vm10, %v1558_v39, %v2182_v44  ;;  %vm1987_vm12 = vcmp.gt.f32.partialorder %v1561_v45, 0.0  ;;  %v5141_v55 = vpop.f32.mrb[25].mxu0  ;;  %v5143_v56 = vpop.f32.mrb[25].mxu1 }
 0x136   :  { %v2183_v54 = vmul.f32 0.2, %v1561_v45  ;;  %v3956_v57 = vpack.c.bf16 %v2378_v53, %v2378_v53  ;;  %v2376_v58 = vsel %vm1984_vm11, %v1550_v43, %v2180_v48  ;;  %vm1985_vm13 = vcmp.gt.f32.partialorder %v1553_v46, 0.0  ;;  %v5145_v60 = vpop.f32.mrb[26].mxu0  ;;  %v5147_v61 = vpop.f32.mrb[26].mxu1 }
 0x137   :  { %v2181_v59 = vmul.f32 0.2, %v1553_v46  ;;  %3258 = vst.msk [vmem:[%s6399_s3 + $0x44] sm:$0xf] %vm3240_vm3, %v3855_v52  ;;  %v3954_v62 = vpack.c.bf16 %v2376_v58, %v2376_v58  ;;  %vm1890_vm14 = vcmp.gt.f32.partialorder %v1174_v49, 0.0  ;;  %v1184_v1 = vpop.f32.mrb[27].mxu0  ;;  %v1166_v5 = vadd.f32 %v4934_v40, %v5092_v20 }
 0x138   :  { %v2379_v63 = vsel %vm1987_vm12, %v1561_v45, %v2183_v54  ;;  %v2086_v0 = vmul.f32 0.2, %v1174_v49  ;;  %v5153_v2 = vpop.f32.mrb[27].mxu1  ;;  %3359 = vst.msk [vmem:[%s6399_s3 + $0x1d8] sm:$0xf] %vm3240_vm3, %v3956_v57  ;;  %v1177_v6 = vadd.f32 %v4161_v25, %v4934_v40  ;;  %v1169_v9 = vadd.f32 %v4934_v40, %v1168_v29 }
 0x139   :  { %v3957_v3 = vpack.c.bf16 %v2379_v63, %v2379_v63  ;;  %v2377_v4 = vsel %vm1985_vm13, %v1553_v46, %v2181_v59  ;;  %3357 = vst.msk [vmem:[%s6399_s3 + $0x1d0] sm:$0xf] %vm3240_vm3, %v3954_v62  ;;  %v1574_v10 = vadd.f32 %v5090_v17, %v4934_v40  ;;  %vm1888_vm15 = vcmp.gt.f32.partialorder %v1166_v5, 0.0 }
 0x13a   :  { %v3955_v7 = vpack.c.bf16 %v2377_v4, %v2377_v4  ;;  %v2282_v8 = vsel %vm1890_vm14, %v1174_v49, %v2086_v0  ;;  %v2084_v12 = vmul.f32 0.2, %v1166_v5  ;;  %vm1891_vm0 = vcmp.gt.f32.partialorder %v1177_v6, 0.0 }
 0x13b   :  { %3360 = vst.msk [vmem:[%s6399_s3 + $0x1dc] sm:$0xf] %vm3240_vm3, %v3957_v3  ;;  %v3860_v11 = vpack.c.bf16 %v2282_v8, %v2282_v8  ;;  %v2087_v13 = vmul.f32 0.2, %v1177_v6  ;;  %vm1889_vm1 = vcmp.gt.f32.partialorder %v1169_v9, 0.0  ;;  %vm1990_vm2 = vcmp.gt.f32.partialorder %v1574_v10, 0.0 }
 0x13c   :  { %3358 = vst.msk [vmem:[%s6399_s3 + $0x1d4] sm:$0xf] %vm3240_vm3, %v3955_v7  ;;  %v2085_v14 = vmul.f32 0.2, %v1169_v9  ;;  %v2280_v15 = vsel %vm1888_vm15, %v1166_v5, %v2084_v12  ;;  %v2186_v16 = vmul.f32 0.2, %v1574_v10  ;;  %v1566_v17 = vadd.f32 %v4934_v40, %v5094_v21 }
 0x13d   :  { %3263 = vst.msk [vmem:[%s6399_s3 + $0x58] sm:$0xf] %vm3240_vm3, %v3860_v11  ;;  %v1577_v18 = vadd.f32 %v5104_v30, %v4934_v40  ;;  %v5185_v19 = vpop.f32.mrb[28].mxu0  ;;  %v5187_v20 = vpop.f32.mrb[28].mxu1  ;;  %v3858_v22 = vpack.c.bf16 %v2280_v15, %v2280_v15  ;;  %v2283_v23 = vsel %vm1891_vm0, %v1177_v6, %v2087_v13  ;;  %v1569_v25 = vadd.f32 %v4934_v40, %v5108_v35 }
 0x13e   :  { %v2281_v24 = vsel %vm1889_vm1, %v1169_v9, %v2085_v14  ;;  %v5191_v26 = vpop.f32.mrb[29].mxu0  ;;  %v5193_v27 = vpop.f32.mrb[29].mxu1  ;;  %v3861_v28 = vpack.c.bf16 %v2283_v23, %v2283_v23  ;;  %v2382_v21 = vsel %vm1990_vm2, %v1574_v10, %v2186_v16  ;;  %vm1988_vm4 = vcmp.gt.f32.partialorder %v1566_v17, 0.0 }
 0x13f   :  { %v3859_v29 = vpack.c.bf16 %v2281_v24, %v2281_v24  ;;  %v5196_v30 = vpop.f32.mrb[30].mxu0  ;;  %v5198_v31 = vpop.f32.mrb[30].mxu1  ;;  %3261 = vst.msk [vmem:[%s6399_s3 + $0x50] sm:$0xf] %vm3240_vm3, %v3858_v22  ;;  %v3960_v32 = vpack.c.bf16 %v2382_v21, %v2382_v21  ;;  %v2184_v33 = vmul.f32 0.2, %v1566_v17  ;;  %v1190_v37 = vadd.f32 %v5137_v50, %v4934_v40 }
 0x140   :  { %vm1991_vm5 = vcmp.gt.f32.partialorder %v1577_v18, 0.0  ;;  %v2187_v34 = vmul.f32 0.2, %v1577_v18  ;;  %v5204_v35 = vpop.f32.mrb[31].mxu0  ;;  %3264 = vst.msk [vmem:[%s6399_s3 + $0x5c] sm:$0xf] %vm3240_vm3, %v3861_v28  ;;  %v1182_v38 = vadd.f32 %v4934_v40, %v5141_v55  ;;  %v1193_v43 = vadd.f32 %v5145_v60, %v4934_v40 }
 0x141   :  { %3262 = vst.msk [vmem:[%s6399_s3 + $0x54] sm:$0xf] %vm3240_vm3, %v3859_v29  ;;  %vm1989_vm6 = vcmp.gt.f32.partialorder %v1569_v25, 0.0  ;;  %v2185_v36 = vmul.f32 0.2, %v1569_v25  ;;  %v5218_v39 = vpop.f32.mrb[31].mxu1  ;;  %v2380_v41 = vsel %vm1988_vm4, %v1566_v17, %v2184_v33  ;;  %v1185_v44 = vadd.f32 %v4934_v40, %v1184_v1 }
 0x142   :  { %3363 = vst.msk [vmem:[%s6399_s3 + $0x1e8] sm:$0xf] %vm3240_vm3, %v3960_v32  ;;  %v2383_v42 = vsel %vm1991_vm5, %v1577_v18, %v2187_v34  ;;  %v3958_v45 = vpack.c.bf16 %v2380_v41, %v2380_v41  ;;  %vm1894_vm7 = vcmp.gt.f32.partialorder %v1190_v37, 0.0  ;;  %v2090_v49 = vmul.f32 0.2, %v1190_v37 }
 0x143   :  { %v3961_v46 = vpack.c.bf16 %v2383_v42, %v2383_v42  ;;  %v2381_v47 = vsel %vm1989_vm6, %v1569_v25, %v2185_v36  ;;  %vm1892_vm8 = vcmp.gt.f32.partialorder %v1182_v38, 0.0  ;;  %v2088_v50 = vmul.f32 0.2, %v1182_v38  ;;  %v5244_v59 = vpop.f32.mrb[32].mxu0  ;;  %v5246_v60 = vpop.f32.mrb[32].mxu1 }
 0x144   :  { %v3959_v48 = vpack.c.bf16 %v2381_v47, %v2381_v47  ;;  %3361 = vst.msk [vmem:[%s6399_s3 + $0x1e0] sm:$0xf] %vm3240_vm3, %v3958_v45  ;;  %vm1895_vm9 = vcmp.gt.f32.partialorder %v1193_v43, 0.0  ;;  %v2091_v52 = vmul.f32 0.2, %v1193_v43  ;;  %vm1893_vm10 = vcmp.gt.f32.partialorder %v1185_v44, 0.0 }
 0x145   :  { %3364 = vst.msk [vmem:[%s6399_s3 + $0x1ec] sm:$0xf] %vm3240_vm3, %v3961_v46  ;;  %v2089_v53 = vmul.f32 0.2, %v1185_v44  ;;  %v2286_v54 = vsel %vm1894_vm7, %v1190_v37, %v2090_v49  ;;  %v2284_v55 = vsel %vm1892_vm8, %v1182_v38, %v2088_v50  ;;  %v1590_v57 = vadd.f32 %v5139_v51, %v4934_v40  ;;  %v5248_v3 = vpop.f32.mrb[33].mxu0  ;;  %v5250_v4 = vpop.f32.mrb[33].mxu1 }
 0x146   :  { %3362 = vst.msk [vmem:[%s6399_s3 + $0x1e4] sm:$0xf] %vm3240_vm3, %v3959_v48  ;;  %v1582_v58 = vadd.f32 %v4934_v40, %v5143_v56  ;;  %v3864_v62 = vpack.c.bf16 %v2286_v54, %v2286_v54  ;;  %v3862_v63 = vpack.c.bf16 %v2284_v55, %v2284_v55  ;;  %v2287_v0 = vsel %vm1895_vm9, %v1193_v43, %v2091_v52  ;;  %v5252_v51 = vpop.f32.mrb[34].mxu0  ;;  %v5254_v8 = vpop.f32.mrb[34].mxu1 }
 0x147   :  { %v2285_v1 = vsel %vm1893_vm10, %v1185_v44, %v2089_v53  ;;  %v3865_v5 = vpack.c.bf16 %v2287_v0, %v2287_v0  ;;  %vm1994_vm11 = vcmp.gt.f32.partialorder %v1590_v57, 0.0  ;;  %v2190_v7 = vmul.f32 0.2, %v1590_v57  ;;  %v5268_v11 = vpop.f32.mrb[35].mxu0  ;;  %v5270_v12 = vpop.f32.mrb[35].mxu1 }
 0x148   :  { %v3863_v6 = vpack.c.bf16 %v2285_v1, %v2285_v1  ;;  %3267 = vst.msk [vmem:[%s6399_s3 + $0x68] sm:$0xf] %vm3240_vm3, %v3864_v62  ;;  %3265 = vst.msk [vmem:[%s6399_s3 + $0x60] sm:$0xf] %vm3240_vm3, %v3862_v63  ;;  %vm1992_vm12 = vcmp.gt.f32.partialorder %v1582_v58, 0.0  ;;  %v1593_v9 = vadd.f32 %v5147_v61, %v4934_v40  ;;  %v1585_v10 = vadd.f32 %v4934_v40, %v5153_v2 }
 0x149   :  { %v2188_v56 = vmul.f32 0.2, %v1582_v58  ;;  %3268 = vst.msk [vmem:[%s6399_s3 + $0x6c] sm:$0xf] %vm3240_vm3, %v3865_v5  ;;  %v2386_v13 = vsel %vm1994_vm11, %v1590_v57, %v2190_v7  ;;  %v1206_v61 = vadd.f32 %v5185_v19, %v4934_v40  ;;  %v1198_v2 = vadd.f32 %v4934_v40, %v5191_v26 }
 0x14a   :  { %3266 = vst.msk [vmem:[%s6399_s3 + $0x64] sm:$0xf] %vm3240_vm3, %v3863_v6  ;;  %v1209_v14 = vadd.f32 %v5196_v30, %v4934_v40  ;;  %v3964_v15 = vpack.c.bf16 %v2386_v13, %v2386_v13  ;;  %vm1995_vm13 = vcmp.gt.f32.partialorder %v1593_v9, 0.0  ;;  %v2191_v17 = vmul.f32 0.2, %v1593_v9 }
 0x14b   :  { %v2384_v16 = vsel %vm1992_vm12, %v1582_v58, %v2188_v56  ;;  %vm1993_vm14 = vcmp.gt.f32.partialorder %v1585_v10, 0.0  ;;  %v2189_v22 = vmul.f32 0.2, %v1585_v10  ;;  %vm1898_vm15 = vcmp.gt.f32.partialorder %v1206_v61, 0.0  ;;  %v5290_v25 = vpop.f32.mrb[36].mxu0  ;;  %v5298_v30 = vpop.f32.mrb[36].mxu1 }
 0x14c   :  { %v3962_v18 = vpack.c.bf16 %v2384_v16, %v2384_v16  ;;  %3367 = vst.msk [vmem:[%s6399_s3 + $0x1f8] sm:$0xf] %vm3240_vm3, %v3964_v15  ;;  %v2387_v19 = vsel %vm1995_vm13, %v1593_v9, %v2191_v17  ;;  %v2094_v23 = vmul.f32 0.2, %v1206_v61  ;;  %vm1896_vm0 = vcmp.gt.f32.partialorder %v1198_v2, 0.0  ;;  %v5296_v21 = vpop.f32.mrb[37].mxu0 }
 0x14d   :  { %v2092_v24 = vmul.f32 0.2, %v1198_v2  ;;  %v3965_v26 = vpack.c.bf16 %v2387_v19, %v2387_v19  ;;  %v2385_v28 = vsel %vm1993_vm14, %v1585_v10, %v2189_v22  ;;  %vm1899_vm1 = vcmp.gt.f32.partialorder %v1209_v14, 0.0  ;;  %v5302_v37 = vpop.f32.mrb[38].mxu0  ;;  %v5304_v38 = vpop.f32.mrb[37].mxu1 }
 0x14e   :  { %3365 = vst.msk [vmem:[%s6399_s3 + $0x1f0] sm:$0xf] %vm3240_vm3, %v3962_v18  ;;  %v2095_v29 = vmul.f32 0.2, %v1209_v14  ;;  %v3963_v32 = vpack.c.bf16 %v2385_v28, %v2385_v28  ;;  %v2290_v33 = vsel %vm1898_vm15, %v1206_v61, %v2094_v23  ;;  %v1201_v36 = vadd.f32 %v4934_v40, %v5204_v35  ;;  %v5312_v45 = vpop.f32.mrb[39].mxu0  ;;  %v5314_v46 = vpop.f32.mrb[38].mxu1 }
 0x14f   :  { %v2288_v34 = vsel %vm1896_vm0, %v1198_v2, %v2092_v24  ;;  %3368 = vst.msk [vmem:[%s6399_s3 + $0x1fc] sm:$0xf] %vm3240_vm3, %v3965_v26  ;;  %v3868_v41 = vpack.c.bf16 %v2290_v33, %v2290_v33  ;;  %v1606_v44 = vadd.f32 %v5187_v20, %v4934_v40  ;;  %v1598_v48 = vadd.f32 %v4934_v40, %v5193_v27  ;;  %v5322_v49 = vpop.f32.mrb[39].mxu1 }
 0x150   :  { %v3866_v42 = vpack.c.bf16 %v2288_v34, %v2288_v34  ;;  %v2291_v43 = vsel %vm1899_vm1, %v1209_v14, %v2095_v29  ;;  %3366 = vst.msk [vmem:[%s6399_s3 + $0x1f4] sm:$0xf] %vm3240_vm3, %v3963_v32  ;;  %vm1897_vm2 = vcmp.gt.f32.partialorder %v1201_v36, 0.0  ;;  %v2093_v47 = vmul.f32 0.2, %v1201_v36 }
 0x151   :  { %v3869_v35 = vpack.c.bf16 %v2291_v43, %v2291_v43  ;;  %3271 = vst.msk [vmem:[%s6399_s3 + $0x78] sm:$0xf] %vm3240_vm3, %v3868_v41  ;;  %vm1998_vm4 = vcmp.gt.f32.partialorder %v1606_v44, 0.0  ;;  %v2194_v20 = vmul.f32 0.2, %v1606_v44  ;;  %v1609_v50 = vadd.f32 %v5198_v31, %v4934_v40 }
 0x152   :  { %3269 = vst.msk [vmem:[%s6399_s3 + $0x70] sm:$0xf] %vm3240_vm3, %v3866_v42  ;;  %v1601_v27 = vadd.f32 %v4934_v40, %v5218_v39  ;;  %v2289_v52 = vsel %vm1897_vm2, %v1201_v36, %v2093_v47  ;;  %vm1996_vm5 = vcmp.gt.f32.partialorder %v1598_v48, 0.0  ;;  %v2192_v53 = vmul.f32 0.2, %v1598_v48 }
 0x153   :  { %3272 = vst.msk [vmem:[%s6399_s3 + $0x7c] sm:$0xf] %vm3240_vm3, %v3869_v35  ;;  %v1222_v54 = vadd.f32 %v5244_v59, %v4934_v40  ;;  %v3867_v55 = vpack.c.bf16 %v2289_v52, %v2289_v52  ;;  %v2390_v57 = vsel %vm1998_vm4, %v1606_v44, %v2194_v20  ;;  %vm1999_vm6 = vcmp.gt.f32.partialorder %v1609_v50, 0.0  ;;  %v5342_v39 = vpop.f32.mrb[40].mxu0  ;;  %v5344_v0 = vpop.f32.mrb[40].mxu1 }
 0x154   :  { %v2195_v58 = vmul.f32 0.2, %v1609_v50  ;;  %v3968_v62 = vpack.c.bf16 %v2390_v57, %v2390_v57  ;;  %v2388_v31 = vsel %vm1996_vm5, %v1598_v48, %v2192_v53  ;;  %vm1997_vm7 = vcmp.gt.f32.partialorder %v1601_v27, 0.0  ;;  %v5350_v6 = vpop.f32.mrb[41].mxu0  ;;  %v5352_v7 = vpop.f32.mrb[41].mxu1 }
 0x155   :  { %v2193_v63 = vmul.f32 0.2, %v1601_v27  ;;  %3270 = vst.msk [vmem:[%s6399_s3 + $0x74] sm:$0xf] %vm3240_vm3, %v3867_v55  ;;  %v3966_v1 = vpack.c.bf16 %v2388_v31, %v2388_v31  ;;  %vm1902_vm8 = vcmp.gt.f32.partialorder %v1222_v54, 0.0  ;;  %v1214_v10 = vadd.f32 %v4934_v40, %v5248_v3  ;;  %v5362_v61 = vpop.f32.mrb[42].mxu0 }
 0x156   :  { %v2391_v5 = vsel %vm1999_vm6, %v1609_v50, %v2195_v58  ;;  %v2098_v59 = vmul.f32 0.2, %v1222_v54  ;;  %3371 = vst.msk [vmem:[%s6399_s3 + $0x208] sm:$0xf] %vm3240_vm3, %v3968_v62  ;;  %v1225_v13 = vadd.f32 %v5252_v51, %v4934_v40  ;;  %v5364_v2 = vpop.f32.mrb[42].mxu1  ;;  %v1217_v16 = vadd.f32 %v4934_v40, %v5268_v11  ;;  %v5374_v17 = vpop.f32.mrb[43].mxu0 }
 0x157   :  { %v3969_v56 = vpack.c.bf16 %v2391_v5, %v2391_v5  ;;  %v2389_v9 = vsel %vm1997_vm7, %v1601_v27, %v2193_v63  ;;  %3369 = vst.msk [vmem:[%s6399_s3 + $0x200] sm:$0xf] %vm3240_vm3, %v3966_v1  ;;  %v1622_v3 = vadd.f32 %v5246_v60, %v4934_v40  ;;  %v5376_v51 = vpop.f32.mrb[43].mxu1  ;;  %vm1900_vm9 = vcmp.gt.f32.partialorder %v1214_v10, 0.0 }
 0x158   :  { %v3967_v14 = vpack.c.bf16 %v2389_v9, %v2389_v9  ;;  %v2294_v15 = vsel %vm1902_vm8, %v1222_v54, %v2098_v59  ;;  %v2096_v22 = vmul.f32 0.2, %v1214_v10  ;;  %vm1903_vm10 = vcmp.gt.f32.partialorder %v1225_v13, 0.0 }
 0x159   :  { %3372 = vst.msk [vmem:[%s6399_s3 + $0x20c] sm:$0xf] %vm3240_vm3, %v3969_v56  ;;  %v3872_v18 = vpack.c.bf16 %v2294_v15, %v2294_v15  ;;  %v2099_v11 = vmul.f32 0.2, %v1225_v13  ;;  %vm1901_vm11 = vcmp.gt.f32.partialorder %v1217_v16, 0.0  ;;  %vm2002_vm12 = vcmp.gt.f32.partialorder %v1622_v3, 0.0 }
 0x15a   :  { %3370 = vst.msk [vmem:[%s6399_s3 + $0x204] sm:$0xf] %vm3240_vm3, %v3967_v14  ;;  %v2097_v60 = vmul.f32 0.2, %v1217_v16  ;;  %v2292_v19 = vsel %vm1900_vm9, %v1214_v10, %v2096_v22  ;;  %v2198_v23 = vmul.f32 0.2, %v1622_v3  ;;  %v1614_v24 = vadd.f32 %v4934_v40, %v5250_v4 }
 0x15b   :  { %3275 = vst.msk [vmem:[%s6399_s3 + $0x88] sm:$0xf] %vm3240_vm3, %v3872_v18  ;;  %v1625_v26 = vadd.f32 %v5254_v8, %v4934_v40  ;;  %v3870_v28 = vpack.c.bf16 %v2292_v19, %v2292_v19  ;;  %v2295_v29 = vsel %vm1903_vm10, %v1225_v13, %v2099_v11  ;;  %v1617_v33 = vadd.f32 %v4934_v40, %v5270_v12  ;;  %v5396_v42 = vpop.f32.mrb[44].mxu0  ;;  %v5398_v43 = vpop.f32.mrb[44].mxu1  ;;  %v5414_v12 = vld [vmem:[#allocation4] ss:$0 sm:$0xff] }
 0x15c   :  { %v2293_v32 = vsel %vm1901_vm11, %v1217_v16, %v2097_v60  ;;  %v3873_v34 = vpack.c.bf16 %v2295_v29, %v2295_v29  ;;  %v2394_v41 = vsel %vm2002_vm12, %v1622_v3, %v2198_v23  ;;  %vm2000_vm13 = vcmp.gt.f32.partialorder %v1614_v24, 0.0  ;;  %v5404_v35 = vpop.f32.mrb[45].mxu0  ;;  %v5422_v50 = vpop.f32.mrb[45].mxu1 }
 0x15d   :  { %v3871_v36 = vpack.c.bf16 %v2293_v32, %v2293_v32  ;;  %3273 = vst.msk [vmem:[%s6399_s3 + $0x80] sm:$0xf] %vm3240_vm3, %v3870_v28  ;;  %v3972_v4 = vpack.c.bf16 %v2394_v41, %v2394_v41  ;;  %v2196_v8 = vmul.f32 0.2, %v1614_v24  ;;  %vm2003_vm14 = vcmp.gt.f32.partialorder %v1625_v26, 0.0  ;;  %v5420_v20 = vpop.f32.mrb[46].mxu0 }
 0x15e   :  { %v2199_v44 = vmul.f32 0.2, %v1625_v26  ;;  %3276 = vst.msk [vmem:[%s6399_s3 + $0x8c] sm:$0xf] %vm3240_vm3, %v3873_v34  ;;  %vm2001_vm15 = vcmp.gt.f32.partialorder %v1617_v33, 0.0  ;;  %v1238_v47 = vadd.f32 %v5414_v12, %v5290_v25  ;;  %v1230_v48 = vadd.f32 %v5414_v12, %v5296_v21  ;;  %v5433_v54 = vpop.f32.mrb[47].mxu0 }
 0x15f   :  { %3274 = vst.msk [vmem:[%s6399_s3 + $0x84] sm:$0xf] %vm3240_vm3, %v3871_v36  ;;  %v2197_v40 = vmul.f32 0.2, %v1617_v33  ;;  %3375 = vst.msk [vmem:[%s6399_s3 + $0x218] sm:$0xf] %vm3240_vm3, %v3972_v4  ;;  %v2392_v27 = vsel %vm2000_vm13, %v1614_v24, %v2196_v8  ;;  %v1241_v53 = vadd.f32 %v5414_v12, %v5302_v37  ;;  %v1233_v25 = vadd.f32 %v5414_v12, %v5312_v45 }
 0x160   :  { %v2395_v52 = vsel %vm2003_vm14, %v1625_v26, %v2199_v44  ;;  %v5435_v21 = vpop.f32.mrb[46].mxu1  ;;  %v3970_v55 = vpack.c.bf16 %v2392_v27, %v2392_v27  ;;  %vm1906_vm0 = vcmp.gt.f32.partialorder %v1238_v47, 0.0  ;;  %v2102_v63 = vmul.f32 0.2, %v1238_v47 }
 0x161   :  { %v3973_v57 = vpack.c.bf16 %v2395_v52, %v2395_v52  ;;  %v2393_v58 = vsel %vm2001_vm15, %v1617_v33, %v2197_v40  ;;  %v5438_v62 = vpop.f32.mrb[47].mxu1  ;;  %vm1904_vm1 = vcmp.gt.f32.partialorder %v1230_v48, 0.0  ;;  %v2100_v1 = vmul.f32 0.2, %v1230_v48 }
 0x162   :  { %v3971_v31 = vpack.c.bf16 %v2393_v58, %v2393_v58  ;;  %3373 = vst.msk [vmem:[%s6399_s3 + $0x210] sm:$0xf] %vm3240_vm3, %v3970_v55  ;;  %vm1907_vm2 = vcmp.gt.f32.partialorder %v1241_v53, 0.0  ;;  %v2103_v37 = vmul.f32 0.2, %v1241_v53  ;;  %vm1905_vm4 = vcmp.gt.f32.partialorder %v1233_v25, 0.0 }
 0x163   :  { %3376 = vst.msk [vmem:[%s6399_s3 + $0x21c] sm:$0xf] %vm3240_vm3, %v3973_v57  ;;  %v2101_v45 = vmul.f32 0.2, %v1233_v25  ;;  %v2298_v5 = vsel %vm1906_vm0, %v1238_v47, %v2102_v63  ;;  %v2296_v59 = vsel %vm1904_vm1, %v1230_v48, %v2100_v1  ;;  %v1638_v56 = vadd.f32 %v5414_v12, %v5298_v30  ;;  %v5456_v16 = vpop.f32.mrb[48].mxu0  ;;  %v5458_v3 = vpop.f32.mrb[48].mxu1 }
 0x164   :  { %3374 = vst.msk [vmem:[%s6399_s3 + $0x214] sm:$0xf] %vm3240_vm3, %v3971_v31  ;;  %v1630_v9 = vadd.f32 %v5414_v12, %v5304_v38  ;;  %v3876_v10 = vpack.c.bf16 %v2298_v5, %v2298_v5  ;;  %v3874_v13 = vpack.c.bf16 %v2296_v59, %v2296_v59  ;;  %v2299_v14 = vsel %vm1907_vm2, %v1241_v53, %v2103_v37  ;;  %v5460_v60 = vpop.f32.mrb[49].mxu0  ;;  %v5462_v19 = vpop.f32.mrb[49].mxu1 }
 0x165   :  { %v2297_v15 = vsel %vm1905_vm4, %v1233_v25, %v2101_v45  ;;  %v3877_v18 = vpack.c.bf16 %v2299_v14, %v2299_v14  ;;  %vm2006_vm5 = vcmp.gt.f32.partialorder %v1638_v56, 0.0  ;;  %v2202_v11 = vmul.f32 0.2, %v1638_v56  ;;  %v5476_v24 = vpop.f32.mrb[50].mxu0  ;;  %v5478_v26 = vpop.f32.mrb[50].mxu1 }
 0x166   :  { %v3875_v22 = vpack.c.bf16 %v2297_v15, %v2297_v15  ;;  %3279 = vst.msk [vmem:[%s6399_s3 + $0x98] sm:$0xf] %vm3240_vm3, %v3876_v10  ;;  %3277 = vst.msk [vmem:[%s6399_s3 + $0x90] sm:$0xf] %vm3240_vm3, %v3874_v13  ;;  %vm2004_vm6 = vcmp.gt.f32.partialorder %v1630_v9, 0.0  ;;  %v1641_v38 = vadd.f32 %v5414_v12, %v5314_v46  ;;  %v1633_v23 = vadd.f32 %v5414_v12, %v5322_v49  ;;  %v5494_v32 = vpop.f32.mrb[51].mxu0 }
 0x167   :  { %v2200_v30 = vmul.f32 0.2, %v1630_v9  ;;  %3280 = vst.msk [vmem:[%s6399_s3 + $0x9c] sm:$0xf] %vm3240_vm3, %v3877_v18  ;;  %v2398_v28 = vsel %vm2006_vm5, %v1638_v56, %v2202_v11  ;;  %v1254_v46 = vadd.f32 %v5414_v12, %v5342_v39  ;;  %v1246_v49 = vadd.f32 %v5414_v12, %v5350_v6  ;;  %v5496_v33 = vpop.f32.mrb[51].mxu1 }
 0x168   :  { %3278 = vst.msk [vmem:[%s6399_s3 + $0x94] sm:$0xf] %vm3240_vm3, %v3875_v22  ;;  %v1257_v29 = vadd.f32 %v5414_v12, %v5362_v61  ;;  %v3976_v34 = vpack.c.bf16 %v2398_v28, %v2398_v28  ;;  %vm2007_vm7 = vcmp.gt.f32.partialorder %v1641_v38, 0.0  ;;  %v2203_v41 = vmul.f32 0.2, %v1641_v38 }
 0x169   :  { %v2396_v36 = vsel %vm2004_vm6, %v1630_v9, %v2200_v30  ;;  %vm2005_vm8 = vcmp.gt.f32.partialorder %v1633_v23, 0.0  ;;  %v2201_v8 = vmul.f32 0.2, %v1633_v23  ;;  %vm1910_vm9 = vcmp.gt.f32.partialorder %v1254_v46, 0.0 }
 0x16a   :  { %v3974_v4 = vpack.c.bf16 %v2396_v36, %v2396_v36  ;;  %3379 = vst.msk [vmem:[%s6399_s3 + $0x228] sm:$0xf] %vm3240_vm3, %v3976_v34  ;;  %v2399_v39 = vsel %vm2007_vm7, %v1641_v38, %v2203_v41  ;;  %v2106_v6 = vmul.f32 0.2, %v1254_v46  ;;  %vm1908_vm10 = vcmp.gt.f32.partialorder %v1246_v49, 0.0 }
 0x16b   :  { %v2104_v61 = vmul.f32 0.2, %v1246_v49  ;;  %v3977_v44 = vpack.c.bf16 %v2399_v39, %v2399_v39  ;;  %v2397_v40 = vsel %vm2005_vm8, %v1633_v23, %v2201_v8  ;;  %vm1911_vm11 = vcmp.gt.f32.partialorder %v1257_v29, 0.0  ;;  %v5508_v25 = vpop.f32.mrb[52].mxu0  ;;  %v5510_v55 = vpop.f32.mrb[52].mxu1 }
 0x16c   :  { %3377 = vst.msk [vmem:[%s6399_s3 + $0x220] sm:$0xf] %vm3240_vm3, %v3974_v4  ;;  %v2107_v47 = vmul.f32 0.2, %v1257_v29  ;;  %v3975_v48 = vpack.c.bf16 %v2397_v40, %v2397_v40  ;;  %v2302_v27 = vsel %vm1910_vm9, %v1254_v46, %v2106_v6  ;;  %v1249_v53 = vadd.f32 %v5414_v12, %v5374_v17  ;;  %v5518_v1 = vpop.f32.mrb[53].mxu0  ;;  %v5520_v37 = vpop.f32.mrb[53].mxu1 }
 0x16d   :  { %v2300_v52 = vsel %vm1908_vm10, %v1246_v49, %v2104_v61  ;;  %3380 = vst.msk [vmem:[%s6399_s3 + $0x22c] sm:$0xf] %vm3240_vm3, %v3977_v44  ;;  %v3880_v57 = vpack.c.bf16 %v2302_v27, %v2302_v27  ;;  %v1654_v63 = vadd.f32 %v5414_v12, %v5344_v0  ;;  %v1646_v5 = vadd.f32 %v5414_v12, %v5352_v7  ;;  %v5528_v59 = vpop.f32.mrb[54].mxu0  ;;  %v5530_v56 = vpop.f32.mrb[54].mxu1 }
 0x16e   :  { %v3878_v58 = vpack.c.bf16 %v2300_v52, %v2300_v52  ;;  %v2303_v31 = vsel %vm1911_vm11, %v1257_v29, %v2107_v47  ;;  %3378 = vst.msk [vmem:[%s6399_s3 + $0x224] sm:$0xf] %vm3240_vm3, %v3975_v48  ;;  %vm1909_vm12 = vcmp.gt.f32.partialorder %v1249_v53, 0.0  ;;  %v2105_v45 = vmul.f32 0.2, %v1249_v53  ;;  %v5544_v10 = vpop.f32.mrb[55].mxu0 }
 0x16f   :  { %v3881_v17 = vpack.c.bf16 %v2303_v31, %v2303_v31  ;;  %3283 = vst.msk [vmem:[%s6399_s3 + $0xa8] sm:$0xf] %vm3240_vm3, %v3880_v57  ;;  %vm2010_vm13 = vcmp.gt.f32.partialorder %v1654_v63, 0.0  ;;  %v2206_v0 = vmul.f32 0.2, %v1654_v63  ;;  %v1657_v9 = vadd.f32 %v5414_v12, %v5364_v2  ;;  %v5546_v13 = vpop.f32.mrb[55].mxu1 }
 0x170   :  { %3281 = vst.msk [vmem:[%s6399_s3 + $0xa0] sm:$0xf] %vm3240_vm3, %v3878_v58  ;;  %v1649_v7 = vadd.f32 %v5414_v12, %v5376_v51  ;;  %v2301_v14 = vsel %vm1909_vm12, %v1249_v53, %v2105_v45  ;;  %vm2008_vm14 = vcmp.gt.f32.partialorder %v1646_v5, 0.0  ;;  %v2204_v15 = vmul.f32 0.2, %v1646_v5 }
 0x171   :  { %3284 = vst.msk [vmem:[%s6399_s3 + $0xac] sm:$0xf] %vm3240_vm3, %v3881_v17  ;;  %v1270_v18 = vadd.f32 %v5414_v12, %v5396_v42  ;;  %v3879_v22 = vpack.c.bf16 %v2301_v14, %v2301_v14  ;;  %v2402_v2 = vsel %vm2010_vm13, %v1654_v63, %v2206_v0  ;;  %vm2011_vm15 = vcmp.gt.f32.partialorder %v1657_v9, 0.0 }
 0x172   :  { %v2207_v11 = vmul.f32 0.2, %v1657_v9  ;;  %v3980_v51 = vpack.c.bf16 %v2402_v2, %v2402_v2  ;;  %v2400_v30 = vsel %vm2008_vm14, %v1646_v5, %v2204_v15  ;;  %vm2009_vm0 = vcmp.gt.f32.partialorder %v1649_v7, 0.0 }
 0x173   :  { %v2205_v38 = vmul.f32 0.2, %v1649_v7  ;;  %3282 = vst.msk [vmem:[%s6399_s3 + $0xa4] sm:$0xf] %vm3240_vm3, %v3879_v22  ;;  %v3978_v23 = vpack.c.bf16 %v2400_v30, %v2400_v30  ;;  %vm1914_vm1 = vcmp.gt.f32.partialorder %v1270_v18, 0.0  ;;  %v1262_v29 = vadd.f32 %v5414_v12, %v5404_v35  ;;  %v5566_v36 = vpop.f32.mrb[56].mxu0 }
 0x174   :  { %v2403_v28 = vsel %vm2011_vm15, %v1657_v9, %v2207_v11  ;;  %v2110_v46 = vmul.f32 0.2, %v1270_v18  ;;  %3383 = vst.msk [vmem:[%s6399_s3 + $0x238] sm:$0xf] %vm3240_vm3, %v3980_v51  ;;  %v1273_v34 = vadd.f32 %v5414_v12, %v5420_v20  ;;  %v5568_v41 = vpop.f32.mrb[56].mxu1  ;;  %v1265_v39 = vadd.f32 %v5414_v12, %v5433_v54  ;;  %v5578_v6 = vpop.f32.mrb[57].mxu0 }
 0x175   :  { %v3981_v42 = vpack.c.bf16 %v2403_v28, %v2403_v28  ;;  %v2401_v49 = vsel %vm2009_vm0, %v1649_v7, %v2205_v38  ;;  %3381 = vst.msk [vmem:[%s6399_s3 + $0x230] sm:$0xf] %vm3240_vm3, %v3978_v23  ;;  %v1670_v35 = vadd.f32 %v5414_v12, %v5398_v43  ;;  %v5580_v20 = vpop.f32.mrb[57].mxu1  ;;  %vm1912_vm2 = vcmp.gt.f32.partialorder %v1262_v29, 0.0  ;;  %v5586_v40 = vpop.f32.mrb[58].mxu0 }
 0x176   :  { %v3979_v4 = vpack.c.bf16 %v2401_v49, %v2401_v49  ;;  %v2306_v8 = vsel %vm1914_vm1, %v1270_v18, %v2110_v46  ;;  %v2108_v44 = vmul.f32 0.2, %v1262_v29  ;;  %vm1915_vm4 = vcmp.gt.f32.partialorder %v1273_v34, 0.0  ;;  %v5588_v47 = vpop.f32.mrb[58].mxu1  ;;  %v5602_v57 = vpop.f32.mrb[59].mxu0 }
 0x177   :  { %3384 = vst.msk [vmem:[%s6399_s3 + $0x23c] sm:$0xf] %vm3240_vm3, %v3981_v42  ;;  %v3884_v61 = vpack.c.bf16 %v2306_v8, %v2306_v8  ;;  %v2111_v43 = vmul.f32 0.2, %v1273_v34  ;;  %vm1913_vm5 = vcmp.gt.f32.partialorder %v1265_v39, 0.0  ;;  %vm2014_vm6 = vcmp.gt.f32.partialorder %v1670_v35, 0.0 }
 0x178   :  { %3382 = vst.msk [vmem:[%s6399_s3 + $0x234] sm:$0xf] %vm3240_vm3, %v3979_v4  ;;  %v2109_v54 = vmul.f32 0.2, %v1265_v39  ;;  %v2304_v48 = vsel %vm1912_vm2, %v1262_v29, %v2108_v44  ;;  %v2210_v27 = vmul.f32 0.2, %v1670_v35  ;;  %v1662_v52 = vadd.f32 %v5414_v12, %v5422_v50 }
 0x179   :  { %3287 = vst.msk [vmem:[%s6399_s3 + $0xb8] sm:$0xf] %vm3240_vm3, %v3884_v61  ;;  %v1673_v53 = vadd.f32 %v5414_v12, %v5435_v21  ;;  %v5604_v58 = vpop.f32.mrb[59].mxu1  ;;  %v3882_v31 = vpack.c.bf16 %v2304_v48, %v2304_v48  ;;  %v2307_v63 = vsel %vm1915_vm4, %v1273_v34, %v2111_v43  ;;  %v1665_v45 = vadd.f32 %v5414_v12, %v5438_v62 }
 0x17a   :  { %v2305_v17 = vsel %vm1913_vm5, %v1265_v39, %v2109_v54  ;;  %v3885_v5 = vpack.c.bf16 %v2307_v63, %v2307_v63  ;;  %v2406_v9 = vsel %vm2014_vm6, %v1670_v35, %v2210_v27  ;;  %vm2012_vm7 = vcmp.gt.f32.partialorder %v1662_v52, 0.0 }
 0x17b   :  { %v3883_v0 = vpack.c.bf16 %v2305_v17, %v2305_v17  ;;  %3285 = vst.msk [vmem:[%s6399_s3 + $0xb0] sm:$0xf] %vm3240_vm3, %v3882_v31  ;;  %v3984_v50 = vpack.c.bf16 %v2406_v9, %v2406_v9  ;;  %v2208_v21 = vmul.f32 0.2, %v1662_v52  ;;  %vm2015_vm8 = vcmp.gt.f32.partialorder %v1673_v53, 0.0  ;;  %v5625_v18 = vpop.f32.mrb[60].mxu0 }
 0x17c   :  { %v2211_v7 = vmul.f32 0.2, %v1673_v53  ;;  %3288 = vst.msk [vmem:[%s6399_s3 + $0xbc] sm:$0xf] %vm3240_vm3, %v3885_v5  ;;  %vm2013_vm9 = vcmp.gt.f32.partialorder %v1665_v45, 0.0  ;;  %v1286_v14 = vadd.f32 %v5414_v12, %v5456_v16  ;;  %v1278_v15 = vadd.f32 %v5414_v12, %v5460_v60  ;;  %v5627_v22 = vpop.f32.mrb[60].mxu1 }
 0x17d   :  { %3286 = vst.msk [vmem:[%s6399_s3 + $0xb4] sm:$0xf] %vm3240_vm3, %v3883_v0  ;;  %v2209_v62 = vmul.f32 0.2, %v1665_v45  ;;  %3387 = vst.msk [vmem:[%s6399_s3 + $0x248] sm:$0xf] %vm3240_vm3, %v3984_v50  ;;  %v2404_v2 = vsel %vm2012_vm7, %v1662_v52, %v2208_v21  ;;  %v1289_v51 = vadd.f32 %v5414_v12, %v5476_v24  ;;  %v1281_v16 = vadd.f32 %v5414_v12, %v5494_v32 }
 0x17e   :  { %v2407_v11 = vsel %vm2015_vm8, %v1673_v53, %v2211_v7  ;;  %v5637_v30 = vpop.f32.mrb[61].mxu0  ;;  %v5639_v60 = vpop.f32.mrb[61].mxu1  ;;  %v3982_v38 = vpack.c.bf16 %v2404_v2, %v2404_v2  ;;  %vm1918_vm10 = vcmp.gt.f32.partialorder %v1286_v14, 0.0  ;;  %v2114_v29 = vmul.f32 0.2, %v1286_v14 }
 0x17f   :  { %v3985_v23 = vpack.c.bf16 %v2407_v11, %v2407_v11  ;;  %v2405_v28 = vsel %vm2013_vm9, %v1665_v45, %v2209_v62  ;;  %v5641_v46 = vpop.f32.mrb[62].mxu0  ;;  %v5643_v42 = vpop.f32.mrb[62].mxu1  ;;  %vm1916_vm11 = vcmp.gt.f32.partialorder %v1278_v15, 0.0  ;;  %v2112_v34 = vmul.f32 0.2, %v1278_v15 }
 0x180   :  { %v3983_v49 = vpack.c.bf16 %v2405_v28, %v2405_v28  ;;  %v5645_v24 = vpop.f32.mrb[63].mxu0  ;;  %3385 = vst.msk [vmem:[%s6399_s3 + $0x240] sm:$0xf] %vm3240_vm3, %v3982_v38  ;;  %vm1919_vm12 = vcmp.gt.f32.partialorder %v1289_v51, 0.0  ;;  %v2115_v32 = vmul.f32 0.2, %v1289_v51  ;;  %v2310_v8 = vsel %vm1918_vm10, %v1286_v14, %v2114_v29 }
 0x181   :  { %3388 = vst.msk [vmem:[%s6399_s3 + $0x24c] sm:$0xf] %vm3240_vm3, %v3985_v23  ;;  %vm1917_vm13 = vcmp.gt.f32.partialorder %v1281_v16, 0.0  ;;  %v2113_v4 = vmul.f32 0.2, %v1281_v16  ;;  %v2308_v39 = vsel %vm1916_vm11, %v1278_v15, %v2112_v34  ;;  %v1686_v35 = vadd.f32 %v5414_v12, %v5458_v3  ;;  %v5663_v44 = vpop.f32.mrb[63].mxu1 }
 0x182   :  { %3386 = vst.msk [vmem:[%s6399_s3 + $0x244] sm:$0xf] %vm3240_vm3, %v3983_v49  ;;  %v1678_v61 = vadd.f32 %v5414_v12, %v5462_v19  ;;  %v3888_v43 = vpack.c.bf16 %v2310_v8, %v2310_v8  ;;  %v3886_v54 = vpack.c.bf16 %v2308_v39, %v2308_v39  ;;  %v2311_v48 = vsel %vm1919_vm12, %v1289_v51, %v2115_v32 }
 0x183   :  { %v2309_v27 = vsel %vm1917_vm13, %v1281_v16, %v2113_v4  ;;  %v3889_v52 = vpack.c.bf16 %v2311_v48, %v2311_v48  ;;  %vm2018_vm14 = vcmp.gt.f32.partialorder %v1686_v35, 0.0  ;;  %v2214_v31 = vmul.f32 0.2, %v1686_v35  ;;  %v5677_v17 = vpop.f32.mrb[64].mxu0  ;;  %v5679_v45 = vpop.f32.mrb[64].mxu1 }
 0x184   :  { %v3887_v53 = vpack.c.bf16 %v2309_v27, %v2309_v27  ;;  %3291 = vst.msk [vmem:[%s6399_s3 + $0xc8] sm:$0xf] %vm3240_vm3, %v3888_v43  ;;  %3289 = vst.msk [vmem:[%s6399_s3 + $0xc0] sm:$0xf] %vm3240_vm3, %v3886_v54  ;;  %vm2016_vm15 = vcmp.gt.f32.partialorder %v1678_v61, 0.0  ;;  %v1689_v19 = vadd.f32 %v5414_v12, %v5478_v26  ;;  %v1681_v63 = vadd.f32 %v5414_v12, %v5496_v33  ;;  %v5695_v9 = vpop.f32.mrb[65].mxu0 }
 0x185   :  { %v2212_v3 = vmul.f32 0.2, %v1678_v61  ;;  %3292 = vst.msk [vmem:[%s6399_s3 + $0xcc] sm:$0xf] %vm3240_vm3, %v3889_v52  ;;  %v2410_v5 = vsel %vm2018_vm14, %v1686_v35, %v2214_v31  ;;  %v1302_v26 = vadd.f32 %v5414_v12, %v5508_v25  ;;  %v1294_v33 = vadd.f32 %v5414_v12, %v5518_v1  ;;  %v5697_v50 = vpop.f32.mrb[65].mxu1  ;;  %v5699_v14 = vpop.f32.mrb[66].mxu0 }
 0x186   :  { %3290 = vst.msk [vmem:[%s6399_s3 + $0xc4] sm:$0xf] %vm3240_vm3, %v3887_v53  ;;  %v1305_v0 = vadd.f32 %v5414_v12, %v5528_v59  ;;  %v3988_v21 = vpack.c.bf16 %v2410_v5, %v2410_v5  ;;  %vm2019_vm0 = vcmp.gt.f32.partialorder %v1689_v19, 0.0  ;;  %v2215_v62 = vmul.f32 0.2, %v1689_v19  ;;  %v5701_v15 = vpop.f32.mrb[66].mxu1 }
 0x187   :  { %v2408_v7 = vsel %vm2016_vm15, %v1678_v61, %v2212_v3  ;;  %vm2017_vm1 = vcmp.gt.f32.partialorder %v1681_v63, 0.0  ;;  %v2213_v25 = vmul.f32 0.2, %v1681_v63  ;;  %vm1922_vm2 = vcmp.gt.f32.partialorder %v1302_v26, 0.0  ;;  %v5703_v1 = vpop.f32.mrb[67].mxu0  ;;  %v5705_v11 = vpop.f32.mrb[67].mxu1 }
 0x188   :  { %v3986_v2 = vpack.c.bf16 %v2408_v7, %v2408_v7  ;;  %3391 = vst.msk [vmem:[%s6399_s3 + $0x258] sm:$0xf] %vm3240_vm3, %v3988_v21  ;;  %v2411_v59 = vsel %vm2019_vm0, %v1689_v19, %v2215_v62  ;;  %v2118_v51 = vmul.f32 0.2, %v1302_v26  ;;  %vm1920_vm4 = vcmp.gt.f32.partialorder %v1294_v33, 0.0 }
 0x189   :  { %v2116_v16 = vmul.f32 0.2, %v1294_v33  ;;  %v3989_v38 = vpack.c.bf16 %v2411_v59, %v2411_v59  ;;  %v2409_v23 = vsel %vm2017_vm1, %v1681_v63, %v2213_v25  ;;  %vm1923_vm5 = vcmp.gt.f32.partialorder %v1305_v0, 0.0 }
 0x18a   :  { %3389 = vst.msk [vmem:[%s6399_s3 + $0x250] sm:$0xf] %vm3240_vm3, %v3986_v2  ;;  %v2119_v28 = vmul.f32 0.2, %v1305_v0  ;;  %v3987_v49 = vpack.c.bf16 %v2409_v23, %v2409_v23  ;;  %v2314_v29 = vsel %vm1922_vm2, %v1302_v26, %v2118_v51  ;;  %v1297_v32 = vadd.f32 %v5414_v12, %v5544_v10 }
 0x18b   :  { %v2312_v34 = vsel %vm1920_vm4, %v1294_v33, %v2116_v16  ;;  %3392 = vst.msk [vmem:[%s6399_s3 + $0x25c] sm:$0xf] %vm3240_vm3, %v3989_v38  ;;  %v3892_v4 = vpack.c.bf16 %v2314_v29, %v2314_v29  ;;  %v1702_v35 = vadd.f32 %v5414_v12, %v5510_v55  ;;  %v1694_v10 = vadd.f32 %v5414_v12, %v5520_v37  ;;  %v5729_v54 = vpop.f32.mrb[68].mxu0  ;;  %v5731_v48 = vpop.f32.mrb[68].mxu1 }
 0x18c   :  { %v3890_v8 = vpack.c.bf16 %v2312_v34, %v2312_v34  ;;  %v2315_v39 = vsel %vm1923_vm5, %v1305_v0, %v2119_v28  ;;  %3390 = vst.msk [vmem:[%s6399_s3 + $0x254] sm:$0xf] %vm3240_vm3, %v3987_v49  ;;  %vm1921_vm6 = vcmp.gt.f32.partialorder %v1297_v32, 0.0  ;;  %v2117_v43 = vmul.f32 0.2, %v1297_v32  ;;  %v5745_v52 = vpop.f32.mrb[69].mxu0 }
 0x18d   :  { %v3893_v61 = vpack.c.bf16 %v2315_v39, %v2315_v39  ;;  %3295 = vst.msk [vmem:[%s6399_s3 + $0xd8] sm:$0xf] %vm3240_vm3, %v3892_v4  ;;  %vm2022_vm7 = vcmp.gt.f32.partialorder %v1702_v35, 0.0  ;;  %v2218_v55 = vmul.f32 0.2, %v1702_v35  ;;  %v1705_v27 = vadd.f32 %v5414_v12, %v5530_v56  ;;  %v5747_v53 = vpop.f32.mrb[69].mxu1 }
 0x18e   :  { %3293 = vst.msk [vmem:[%s6399_s3 + $0xd0] sm:$0xf] %vm3240_vm3, %v3890_v8  ;;  %v1697_v37 = vadd.f32 %v5414_v12, %v5546_v13  ;;  %v2313_v31 = vsel %vm1921_vm6, %v1297_v32, %v2117_v43  ;;  %vm2020_vm8 = vcmp.gt.f32.partialorder %v1694_v10, 0.0  ;;  %v2216_v3 = vmul.f32 0.2, %v1694_v10  ;;  %v5755_v63 = vpop.f32.mrb[70].mxu0 }
 0x18f   :  { %3296 = vst.msk [vmem:[%s6399_s3 + $0xdc] sm:$0xf] %vm3240_vm3, %v3893_v61  ;;  %v1318_v19 = vadd.f32 %v5414_v12, %v5566_v36  ;;  %v5757_v56 = vpop.f32.mrb[70].mxu1  ;;  %v3891_v13 = vpack.c.bf16 %v2313_v31, %v2313_v31  ;;  %v2414_v5 = vsel %vm2022_vm7, %v1702_v35, %v2218_v55  ;;  %vm2023_vm9 = vcmp.gt.f32.partialorder %v1705_v27, 0.0  ;;  %v5759_v33 = vpop.f32.mrb[71].mxu0 }
 0x190   :  { %v2219_v26 = vmul.f32 0.2, %v1705_v27  ;;  %v5761_v0 = vpop.f32.mrb[71].mxu1  ;;  %v3992_v21 = vpack.c.bf16 %v2414_v5, %v2414_v5  ;;  %v2412_v7 = vsel %vm2020_vm8, %v1694_v10, %v2216_v3  ;;  %vm2021_vm10 = vcmp.gt.f32.partialorder %v1697_v37, 0.0 }
 0x191   :  { %v2217_v62 = vmul.f32 0.2, %v1697_v37  ;;  %3294 = vst.msk [vmem:[%s6399_s3 + $0xd4] sm:$0xf] %vm3240_vm3, %v3891_v13  ;;  %v3990_v36 = vpack.c.bf16 %v2412_v7, %v2412_v7  ;;  %vm1926_vm11 = vcmp.gt.f32.partialorder %v1318_v19, 0.0  ;;  %v1310_v16 = vadd.f32 %v5414_v12, %v5578_v6 }
 0x192   :  { %v2415_v2 = vsel %vm2023_vm9, %v1705_v27, %v2219_v26  ;;  %v2122_v25 = vmul.f32 0.2, %v1318_v19  ;;  %3395 = vst.msk [vmem:[%s6399_s3 + $0x268] sm:$0xf] %vm3240_vm3, %v3992_v21  ;;  %v1321_v38 = vadd.f32 %v5414_v12, %v5586_v40  ;;  %v1313_v49 = vadd.f32 %v5414_v12, %v5602_v57 }
 0x193   :  { %v3993_v59 = vpack.c.bf16 %v2415_v2, %v2415_v2  ;;  %v2413_v51 = vsel %vm2021_vm10, %v1697_v37, %v2217_v62  ;;  %3393 = vst.msk [vmem:[%s6399_s3 + $0x260] sm:$0xf] %vm3240_vm3, %v3990_v36  ;;  %v1718_v29 = vadd.f32 %v5414_v12, %v5568_v41  ;;  %vm1924_vm12 = vcmp.gt.f32.partialorder %v1310_v16, 0.0  ;;  %v5787_v34 = vpop.f32.mrb[72].mxu0  ;;  %v5789_v32 = vpop.f32.mrb[72].mxu1 }
 0x194   :  { %v3991_v23 = vpack.c.bf16 %v2413_v51, %v2413_v51  ;;  %v2318_v28 = vsel %vm1926_vm11, %v1318_v19, %v2122_v25  ;;  %v2120_v40 = vmul.f32 0.2, %v1310_v16  ;;  %vm1927_vm13 = vcmp.gt.f32.partialorder %v1321_v38, 0.0  ;;  %v5803_v61 = vpop.f32.mrb[73].mxu0  ;;  %v5805_v43 = vpop.f32.mrb[73].mxu1 }
 0x195   :  { %3396 = vst.msk [vmem:[%s6399_s3 + $0x26c] sm:$0xf] %vm3240_vm3, %v3993_v59  ;;  %v3896_v6 = vpack.c.bf16 %v2318_v28, %v2318_v28  ;;  %v2123_v57 = vmul.f32 0.2, %v1321_v38  ;;  %vm1925_vm14 = vcmp.gt.f32.partialorder %v1313_v49, 0.0  ;;  %vm2026_vm15 = vcmp.gt.f32.partialorder %v1718_v29, 0.0 }
 0x196   :  { %3394 = vst.msk [vmem:[%s6399_s3 + $0x264] sm:$0xf] %vm3240_vm3, %v3991_v23  ;;  %v2121_v41 = vmul.f32 0.2, %v1313_v49  ;;  %v2316_v4 = vsel %vm1924_vm12, %v1310_v16, %v2120_v40  ;;  %v2222_v8 = vmul.f32 0.2, %v1718_v29  ;;  %v1710_v39 = vadd.f32 %v5414_v12, %v5580_v20 }
 0x197   :  { %3299 = vst.msk [vmem:[%s6399_s3 + $0xe8] sm:$0xf] %vm3240_vm3, %v3896_v6  ;;  %v1721_v35 = vadd.f32 %v5414_v12, %v5588_v47  ;;  %v3894_v10 = vpack.c.bf16 %v2316_v4, %v2316_v4  ;;  %v2319_v55 = vsel %vm1927_vm13, %v1321_v38, %v2123_v57  ;;  %v1713_v37 = vadd.f32 %v5414_v12, %v5604_v58  ;;  %v5810_v31 = vpop.f32.mrb[74].mxu0  ;;  %v5812_v3 = vpop.f32.mrb[74].mxu1 }
 0x198   :  { %v2317_v27 = vsel %vm1925_vm14, %v1313_v49, %v2121_v41  ;;  %v3897_v19 = vpack.c.bf16 %v2319_v55, %v2319_v55  ;;  %v2418_v13 = vsel %vm2026_vm15, %v1718_v29, %v2222_v8  ;;  %vm2024_vm0 = vcmp.gt.f32.partialorder %v1710_v39, 0.0  ;;  %v5815_v47 = vpop.f32.mrb[75].mxu0  ;;  %v5817_v5 = vpop.f32.mrb[75].mxu1 }
 0x199   :  { %v3895_v20 = vpack.c.bf16 %v2317_v27, %v2317_v27  ;;  %3297 = vst.msk [vmem:[%s6399_s3 + $0xe0] sm:$0xf] %vm3240_vm3, %v3894_v10  ;;  %v3996_v26 = vpack.c.bf16 %v2418_v13, %v2418_v13  ;;  %v2220_v58 = vmul.f32 0.2, %v1710_v39  ;;  %vm2027_vm1 = vcmp.gt.f32.partialorder %v1721_v35, 0.0 }
 0x19a   :  { %v2223_v21 = vmul.f32 0.2, %v1721_v35  ;;  %3300 = vst.msk [vmem:[%s6399_s3 + $0xec] sm:$0xf] %vm3240_vm3, %v3897_v19  ;;  %vm2025_vm2 = vcmp.gt.f32.partialorder %v1713_v37, 0.0  ;;  %v1334_v62 = vadd.f32 %v5414_v12, %v5625_v18  ;;  %v1326_v36 = vadd.f32 %v5414_v12, %v5637_v30 }
 0x19b   :  { %3298 = vst.msk [vmem:[%s6399_s3 + $0xe4] sm:$0xf] %vm3240_vm3, %v3895_v20  ;;  %v2221_v7 = vmul.f32 0.2, %v1713_v37  ;;  %3399 = vst.msk [vmem:[%s6399_s3 + $0x278] sm:$0xf] %vm3240_vm3, %v3996_v26  ;;  %v2416_v2 = vsel %vm2024_vm0, %v1710_v39, %v2220_v58  ;;  %v1337_v59 = vadd.f32 %v5414_v12, %v5641_v46  ;;  %v1329_v51 = vadd.f32 %v5414_v12, %v5645_v24 }
 0x19c   :  { %v2419_v25 = vsel %vm2027_vm1, %v1721_v35, %v2223_v21  ;;  %v3994_v16 = vpack.c.bf16 %v2416_v2, %v2416_v2  ;;  %vm1930_vm4 = vcmp.gt.f32.partialorder %v1334_v62, 0.0  ;;  %v5843_v18 = vpop.f32.mrb[76].mxu0  ;;  %v5845_v30 = vpop.f32.mrb[76].mxu1  ;;  %v2126_v49 = vmul.f32 0.2, %v1334_v62 }
 0x19d   :  { %v3997_v38 = vpack.c.bf16 %v2419_v25, %v2419_v25  ;;  %v2417_v23 = vsel %vm2025_vm2, %v1713_v37, %v2221_v7  ;;  %vm1928_vm5 = vcmp.gt.f32.partialorder %v1326_v36, 0.0  ;;  %v2124_v29 = vmul.f32 0.2, %v1326_v36  ;;  %v5847_v6 = vpop.f32.mrb[77].mxu0  ;;  %v5867_v39 = vpop.f32.mrb[77].mxu1 }
 0x19e   :  { %v3995_v28 = vpack.c.bf16 %v2417_v23, %v2417_v23  ;;  %3397 = vst.msk [vmem:[%s6399_s3 + $0x270] sm:$0xf] %vm3240_vm3, %v3994_v16  ;;  %vm1931_vm6 = vcmp.gt.f32.partialorder %v1337_v59, 0.0  ;;  %v2127_v46 = vmul.f32 0.2, %v1337_v59  ;;  %vm1929_vm7 = vcmp.gt.f32.partialorder %v1329_v51, 0.0 }
 0x19f   :  { %3400 = vst.msk [vmem:[%s6399_s3 + $0x27c] sm:$0xf] %vm3240_vm3, %v3997_v38  ;;  %v2125_v24 = vmul.f32 0.2, %v1329_v51  ;;  %v2322_v40 = vsel %vm1930_vm4, %v1334_v62, %v2126_v49  ;;  %v2320_v57 = vsel %vm1928_vm5, %v1326_v36, %v2124_v29  ;;  %v1734_v41 = vadd.f32 %v5414_v12, %v5627_v22  ;;  %v5865_v8 = vpop.f32.mrb[78].mxu0  ;;  %v5871_v19 = vpop.f32.mrb[78].mxu1 }
 0x1a0   :  { %3398 = vst.msk [vmem:[%s6399_s3 + $0x274] sm:$0xf] %vm3240_vm3, %v3995_v28  ;;  %v1726_v4 = vadd.f32 %v5414_v12, %v5639_v60  ;;  %v3900_v35 = vpack.c.bf16 %v2322_v40, %v2322_v40  ;;  %v3898_v10 = vpack.c.bf16 %v2320_v57, %v2320_v57  ;;  %v2323_v55 = vsel %vm1931_vm6, %v1337_v59, %v2127_v46  ;;  %v5869_v37 = vpop.f32.mrb[79].mxu0  ;;  %v5873_v22 = vpop.f32.mrb[79].mxu1 }
 0x1a1   :  { %v2321_v27 = vsel %vm1929_vm7, %v1329_v51, %v2125_v24  ;;  %v3901_v20 = vpack.c.bf16 %v2323_v55, %v2323_v55  ;;  %vm2030_vm8 = vcmp.gt.f32.partialorder %v1734_v41, 0.0  ;;  %v2226_v26 = vmul.f32 0.2, %v1734_v41 }
 0x1a2   :  { %v3899_v13 = vpack.c.bf16 %v2321_v27, %v2321_v27  ;;  %3303 = vst.msk [vmem:[%s6399_s3 + $0xf8] sm:$0xf] %vm3240_vm3, %v3900_v35  ;;  %3301 = vst.msk [vmem:[%s6399_s3 + $0xf0] sm:$0xf] %vm3240_vm3, %v3898_v10  ;;  %vm2028_vm9 = vcmp.gt.f32.partialorder %v1726_v4, 0.0  ;;  %v1737_v58 = vadd.f32 %v5414_v12, %v5643_v42  ;;  %v1729_v21 = vadd.f32 %v5414_v12, %v5663_v44 }
 0x1a3   :  { %v2224_v60 = vmul.f32 0.2, %v1726_v4  ;;  %3304 = vst.msk [vmem:[%s6399_s3 + $0xfc] sm:$0xf] %vm3240_vm3, %v3901_v20  ;;  %v2422_v7 = vsel %vm2030_vm8, %v1734_v41, %v2226_v26  ;;  %v1350_v62 = vadd.f32 %v5414_v12, %v5677_v17  ;;  %v1342_v42 = vadd.f32 %v5414_v12, %v5695_v9  ;;  %v5901_v59 = vpop.f32.mrb[80].mxu0  ;;  %v5903_v51 = vpop.f32.mrb[80].mxu1 }
 0x1a4   :  { %3302 = vst.msk [vmem:[%s6399_s3 + $0xf4] sm:$0xf] %vm3240_vm3, %v3899_v13  ;;  %v1353_v44 = vadd.f32 %v5414_v12, %v5699_v14  ;;  %v4000_v36 = vpack.c.bf16 %v2422_v7, %v2422_v7  ;;  %vm2031_vm10 = vcmp.gt.f32.partialorder %v1737_v58, 0.0  ;;  %v2227_v25 = vmul.f32 0.2, %v1737_v58  ;;  %v5905_v23 = vpop.f32.mrb[81].mxu0 }
 0x1a5   :  { %v2420_v2 = vsel %vm2028_vm9, %v1726_v4, %v2224_v60  ;;  %vm2029_vm11 = vcmp.gt.f32.partialorder %v1729_v21, 0.0  ;;  %v2225_v38 = vmul.f32 0.2, %v1729_v21  ;;  %vm1934_vm12 = vcmp.gt.f32.partialorder %v1350_v62, 0.0  ;;  %v5907_v17 = vpop.f32.mrb[81].mxu1  ;;  %v5913_v49 = vpop.f32.mrb[82].mxu0 }
 0x1a6   :  { %v3998_v16 = vpack.c.bf16 %v2420_v2, %v2420_v2  ;;  %3403 = vst.msk [vmem:[%s6399_s3 + $0x288] sm:$0xf] %vm3240_vm3, %v4000_v36  ;;  %v2423_v9 = vsel %vm2031_vm10, %v1737_v58, %v2227_v25  ;;  %v2130_v14 = vmul.f32 0.2, %v1350_v62  ;;  %vm1932_vm13 = vcmp.gt.f32.partialorder %v1342_v42, 0.0  ;;  %v5919_v40 = vpop.f32.mrb[83].mxu0 }
 0x1a7   :  { %v2128_v28 = vmul.f32 0.2, %v1342_v42  ;;  %v4001_v29 = vpack.c.bf16 %v2423_v9, %v2423_v9  ;;  %v2421_v46 = vsel %vm2029_vm11, %v1729_v21, %v2225_v38  ;;  %vm1935_vm14 = vcmp.gt.f32.partialorder %v1353_v44, 0.0  ;;  %v5921_v57 = vpop.f32.mrb[82].mxu1 }
 0x1a8   :  { %3401 = vst.msk [vmem:[%s6399_s3 + $0x280] sm:$0xf] %vm3240_vm3, %v3998_v16  ;;  %v2131_v24 = vmul.f32 0.2, %v1353_v44  ;;  %v3999_v41 = vpack.c.bf16 %v2421_v46, %v2421_v46  ;;  %v2326_v4 = vsel %vm1934_vm12, %v1350_v62, %v2130_v14  ;;  %v1345_v10 = vadd.f32 %v5414_v12, %v5703_v1  ;;  %v5926_v55 = vpop.f32.mrb[83].mxu1 }
 0x1a9   :  { %v2324_v35 = vsel %vm1932_vm13, %v1342_v42, %v2128_v28  ;;  %3404 = vst.msk [vmem:[%s6399_s3 + $0x28c] sm:$0xf] %vm3240_vm3, %v4001_v29  ;;  %v3904_v27 = vpack.c.bf16 %v2326_v4, %v2326_v4  ;;  %v1750_v26 = vadd.f32 %v5414_v12, %v5679_v45  ;;  %v1742_v58 = vadd.f32 %v5414_v12, %v5697_v50 }
 0x1aa   :  { %v3902_v20 = vpack.c.bf16 %v2324_v35, %v2324_v35  ;;  %v2327_v13 = vsel %vm1935_vm14, %v1353_v44, %v2131_v24  ;;  %3402 = vst.msk [vmem:[%s6399_s3 + $0x284] sm:$0xf] %vm3240_vm3, %v3999_v41  ;;  %vm1933_vm15 = vcmp.gt.f32.partialorder %v1345_v10, 0.0  ;;  %v2129_v1 = vmul.f32 0.2, %v1345_v10 }
 0x1ab   :  { %v3905_v60 = vpack.c.bf16 %v2327_v13, %v2327_v13  ;;  %3307 = vst.msk [vmem:[%s6399_s3 + $0x108] sm:$0xf] %vm3240_vm3, %v3904_v27  ;;  %vm2034_vm0 = vcmp.gt.f32.partialorder %v1750_v26, 0.0  ;;  %v2230_v45 = vmul.f32 0.2, %v1750_v26  ;;  %v1753_v21 = vadd.f32 %v5414_v12, %v5701_v15  ;;  %v5958_v44 = vpop.f32.mrb[84].mxu0 }
 0x1ac   :  { %3305 = vst.msk [vmem:[%s6399_s3 + $0x100] sm:$0xf] %vm3240_vm3, %v3902_v20  ;;  %v1745_v7 = vadd.f32 %v5414_v12, %v5705_v11  ;;  %v2325_v50 = vsel %vm1933_vm15, %v1345_v10, %v2129_v1  ;;  %vm2032_vm1 = vcmp.gt.f32.partialorder %v1742_v58, 0.0  ;;  %v2228_v62 = vmul.f32 0.2, %v1742_v58  ;;  %v5960_v36 = vpop.f32.mrb[84].mxu1 }
 0x1ad   :  { %3308 = vst.msk [vmem:[%s6399_s3 + $0x10c] sm:$0xf] %vm3240_vm3, %v3905_v60  ;;  %v1366_v42 = vadd.f32 %v5414_v12, %v5729_v54  ;;  %v3903_v2 = vpack.c.bf16 %v2325_v50, %v2325_v50  ;;  %v2426_v15 = vsel %vm2034_vm0, %v1750_v26, %v2230_v45  ;;  %vm2035_vm2 = vcmp.gt.f32.partialorder %v1753_v21, 0.0  ;;  %v5962_v11 = vpop.f32.mrb[85].mxu0  ;;  %v5964_v16 = vpop.f32.mrb[85].mxu1 }
 0x1ae   :  { %v2231_v25 = vmul.f32 0.2, %v1753_v21  ;;  %v4004_v38 = vpack.c.bf16 %v2426_v15, %v2426_v15  ;;  %v2424_v9 = vsel %vm2032_vm1, %v1742_v58, %v2228_v62  ;;  %vm2033_vm4 = vcmp.gt.f32.partialorder %v1745_v7, 0.0  ;;  %v5966_v28 = vpop.f32.mrb[86].mxu0  ;;  %v5968_v29 = vpop.f32.mrb[86].mxu1 }
 0x1af   :  { %v2229_v14 = vmul.f32 0.2, %v1745_v7  ;;  %3306 = vst.msk [vmem:[%s6399_s3 + $0x104] sm:$0xf] %vm3240_vm3, %v3903_v2  ;;  %v4002_v54 = vpack.c.bf16 %v2424_v9, %v2424_v9  ;;  %vm1938_vm5 = vcmp.gt.f32.partialorder %v1366_v42, 0.0  ;;  %v5974_v41 = vpop.f32.mrb[87].mxu0  ;;  %v1358_v27 = vadd.f32 %v5414_v12, %v5745_v52 }
 0x1b0   :  { %v2427_v46 = vsel %vm2035_vm2, %v1753_v21, %v2231_v25  ;;  %v2134_v24 = vmul.f32 0.2, %v1366_v42  ;;  %v5976_v4 = vpop.f32.mrb[87].mxu1  ;;  %3407 = vst.msk [vmem:[%s6399_s3 + $0x298] sm:$0xf] %vm3240_vm3, %v4004_v38  ;;  %v1369_v20 = vadd.f32 %v5414_v12, %v5755_v63  ;;  %v1361_v60 = vadd.f32 %v5414_v12, %v5759_v33 }
 0x1b1   :  { %v4005_v35 = vpack.c.bf16 %v2427_v46, %v2427_v46  ;;  %v2425_v10 = vsel %vm2033_vm4, %v1745_v7, %v2229_v14  ;;  %3405 = vst.msk [vmem:[%s6399_s3 + $0x290] sm:$0xf] %vm3240_vm3, %v4002_v54  ;;  %v1766_v1 = vadd.f32 %v5414_v12, %v5731_v48  ;;  %vm1936_vm6 = vcmp.gt.f32.partialorder %v1358_v27, 0.0 }
 0x1b2   :  { %v4003_v13 = vpack.c.bf16 %v2425_v10, %v2425_v10  ;;  %v2330_v26 = vsel %vm1938_vm5, %v1366_v42, %v2134_v24  ;;  %v2132_v63 = vmul.f32 0.2, %v1358_v27  ;;  %vm1939_vm7 = vcmp.gt.f32.partialorder %v1369_v20, 0.0 }
 0x1b3   :  { %3408 = vst.msk [vmem:[%s6399_s3 + $0x29c] sm:$0xf] %vm3240_vm3, %v4005_v35  ;;  %v3908_v52 = vpack.c.bf16 %v2330_v26, %v2330_v26  ;;  %v2135_v58 = vmul.f32 0.2, %v1369_v20  ;;  %vm1937_vm8 = vcmp.gt.f32.partialorder %v1361_v60, 0.0  ;;  %vm2038_vm9 = vcmp.gt.f32.partialorder %v1766_v1, 0.0 }
 0x1b4   :  { %3406 = vst.msk [vmem:[%s6399_s3 + $0x294] sm:$0xf] %vm3240_vm3, %v4003_v13  ;;  %v2133_v33 = vmul.f32 0.2, %v1361_v60  ;;  %v2328_v48 = vsel %vm1936_vm6, %v1358_v27, %v2132_v63  ;;  %v2234_v45 = vmul.f32 0.2, %v1766_v1  ;;  %v1758_v21 = vadd.f32 %v5414_v12, %v5747_v53 }
 0x1b5   :  { %3311 = vst.msk [vmem:[%s6399_s3 + $0x118] sm:$0xf] %vm3240_vm3, %v3908_v52  ;;  %v1769_v7 = vadd.f32 %v5414_v12, %v5757_v56  ;;  %v6010_v50 = vpop.f32.mrb[88].mxu0  ;;  %v6012_v62 = vpop.f32.mrb[88].mxu1  ;;  %v3906_v42 = vpack.c.bf16 %v2328_v48, %v2328_v48  ;;  %v2331_v2 = vsel %vm1939_vm7, %v1369_v20, %v2135_v58  ;;  %v1761_v25 = vadd.f32 %v5414_v12, %v5761_v0  ;;  %v6039_v27 = vld [vmem:[#allocation4] ss:$0 sm:$0xff] }
 0x1b6   :  { %v2329_v15 = vsel %vm1937_vm8, %v1361_v60, %v2133_v33  ;;  %v6016_v38 = vpop.f32.mrb[89].mxu0  ;;  %v6018_v9 = vpop.f32.mrb[89].mxu1  ;;  %v3909_v14 = vpack.c.bf16 %v2331_v2, %v2331_v2  ;;  %v2430_v53 = vsel %vm2038_vm9, %v1766_v1, %v2234_v45  ;;  %vm2036_vm10 = vcmp.gt.f32.partialorder %v1758_v21, 0.0 }
 0x1b7   :  { %v3907_v54 = vpack.c.bf16 %v2329_v15, %v2329_v15  ;;  %v6021_v56 = vpop.f32.mrb[90].mxu0  ;;  %v6023_v46 = vpop.f32.mrb[90].mxu1  ;;  %3309 = vst.msk [vmem:[%s6399_s3 + $0x110] sm:$0xf] %vm3240_vm3, %v3906_v42  ;;  %v4008_v24 = vpack.c.bf16 %v2430_v53, %v2430_v53  ;;  %v2232_v12 = vmul.f32 0.2, %v1758_v21  ;;  %v1382_v20 = vadd.f32 %v6039_v27, %v5787_v34 }
 0x1b8   :  { %vm2039_vm11 = vcmp.gt.f32.partialorder %v1769_v7, 0.0  ;;  %v2235_v0 = vmul.f32 0.2, %v1769_v7  ;;  %v6029_v35 = vpop.f32.mrb[91].mxu0  ;;  %3312 = vst.msk [vmem:[%s6399_s3 + $0x11c] sm:$0xf] %vm3240_vm3, %v3909_v14  ;;  %v1374_v13 = vadd.f32 %v6039_v27, %v5803_v61  ;;  %v1385_v52 = vadd.f32 %v6039_v27, %v5810_v31 }
 0x1b9   :  { %3310 = vst.msk [vmem:[%s6399_s3 + $0x114] sm:$0xf] %vm3240_vm3, %v3907_v54  ;;  %vm2037_vm12 = vcmp.gt.f32.partialorder %v1761_v25, 0.0  ;;  %v2233_v10 = vmul.f32 0.2, %v1761_v25  ;;  %v6045_v26 = vpop.f32.mrb[91].mxu1  ;;  %v2428_v60 = vsel %vm2036_vm10, %v1758_v21, %v2232_v12  ;;  %v1377_v63 = vadd.f32 %v6039_v27, %v5815_v47 }
 0x1ba   :  { %3411 = vst.msk [vmem:[%s6399_s3 + $0x2a8] sm:$0xf] %vm3240_vm3, %v4008_v24  ;;  %v2431_v1 = vsel %vm2039_vm11, %v1769_v7, %v2235_v0  ;;  %v4006_v34 = vpack.c.bf16 %v2428_v60, %v2428_v60  ;;  %vm1942_vm13 = vcmp.gt.f32.partialorder %v1382_v20, 0.0  ;;  %v2138_v48 = vmul.f32 0.2, %v1382_v20 }
 0x1bb   :  { %v4009_v58 = vpack.c.bf16 %v2431_v1, %v2431_v1  ;;  %v2429_v33 = vsel %vm2037_vm12, %v1761_v25, %v2233_v10  ;;  %vm1940_vm14 = vcmp.gt.f32.partialorder %v1374_v13, 0.0  ;;  %v2136_v45 = vmul.f32 0.2, %v1374_v13  ;;  %v6072_v15 = vpop.f32.mrb[92].mxu0  ;;  %v6074_v25 = vpop.f32.mrb[92].mxu1 }
 0x1bc   :  { %v4007_v61 = vpack.c.bf16 %v2429_v33, %v2429_v33  ;;  %3409 = vst.msk [vmem:[%s6399_s3 + $0x2a0] sm:$0xf] %vm3240_vm3, %v4006_v34  ;;  %vm1943_vm15 = vcmp.gt.f32.partialorder %v1385_v52, 0.0  ;;  %v2139_v31 = vmul.f32 0.2, %v1385_v52  ;;  %vm1941_vm0 = vcmp.gt.f32.partialorder %v1377_v63, 0.0 }
 0x1bd   :  { %3412 = vst.msk [vmem:[%s6399_s3 + $0x2ac] sm:$0xf] %vm3240_vm3, %v4009_v58  ;;  %v2137_v47 = vmul.f32 0.2, %v1377_v63  ;;  %v2334_v21 = vsel %vm1942_vm13, %v1382_v20, %v2138_v48  ;;  %v2332_v7 = vsel %vm1940_vm14, %v1374_v13, %v2136_v45  ;;  %v1782_v42 = vadd.f32 %v6039_v27, %v5789_v32  ;;  %v6076_v12 = vpop.f32.mrb[93].mxu0  ;;  %v6078_v0 = vpop.f32.mrb[93].mxu1 }
 0x1be   :  { %3410 = vst.msk [vmem:[%s6399_s3 + $0x2a4] sm:$0xf] %vm3240_vm3, %v4007_v61  ;;  %v1774_v2 = vadd.f32 %v6039_v27, %v5805_v43  ;;  %v3912_v14 = vpack.c.bf16 %v2334_v21, %v2334_v21  ;;  %v3910_v54 = vpack.c.bf16 %v2332_v7, %v2332_v7  ;;  %v2335_v53 = vsel %vm1943_vm15, %v1385_v52, %v2139_v31  ;;  %v6080_v32 = vpop.f32.mrb[94].mxu0  ;;  %v6082_v60 = vpop.f32.mrb[94].mxu1 }
 0x1bf   :  { %v2333_v24 = vsel %vm1941_vm0, %v1377_v63, %v2137_v47  ;;  %v3913_v10 = vpack.c.bf16 %v2335_v53, %v2335_v53  ;;  %vm2042_vm1 = vcmp.gt.f32.partialorder %v1782_v42, 0.0  ;;  %v2238_v13 = vmul.f32 0.2, %v1782_v42  ;;  %v6096_v63 = vpop.f32.mrb[95].mxu0  ;;  %v6098_v34 = vpop.f32.mrb[95].mxu1 }
 0x1c0   :  { %v3911_v20 = vpack.c.bf16 %v2333_v24, %v2333_v24  ;;  %3315 = vst.msk [vmem:[%s6399_s3 + $0x128] sm:$0xf] %vm3240_vm3, %v3912_v14  ;;  %3313 = vst.msk [vmem:[%s6399_s3 + $0x120] sm:$0xf] %vm3240_vm3, %v3910_v54  ;;  %vm2040_vm2 = vcmp.gt.f32.partialorder %v1774_v2, 0.0  ;;  %v1785_v1 = vadd.f32 %v6039_v27, %v5812_v3  ;;  %v1777_v52 = vadd.f32 %v6039_v27, %v5817_v5 }
 0x1c1   :  { %v2236_v43 = vmul.f32 0.2, %v1774_v2  ;;  %3316 = vst.msk [vmem:[%s6399_s3 + $0x12c] sm:$0xf] %vm3240_vm3, %v3913_v10  ;;  %v2434_v58 = vsel %vm2042_vm1, %v1782_v42, %v2238_v13  ;;  %v1398_v3 = vadd.f32 %v6039_v27, %v5843_v18  ;;  %v1390_v5 = vadd.f32 %v6039_v27, %v5847_v6 }
 0x1c2   :  { %3314 = vst.msk [vmem:[%s6399_s3 + $0x124] sm:$0xf] %vm3240_vm3, %v3911_v20  ;;  %v1401_v33 = vadd.f32 %v6039_v27, %v5865_v8  ;;  %v4012_v61 = vpack.c.bf16 %v2434_v58, %v2434_v58  ;;  %vm2043_vm4 = vcmp.gt.f32.partialorder %v1785_v1, 0.0  ;;  %v2239_v45 = vmul.f32 0.2, %v1785_v1 }
 0x1c3   :  { %v2432_v48 = vsel %vm2040_vm2, %v1774_v2, %v2236_v43  ;;  %vm2041_vm5 = vcmp.gt.f32.partialorder %v1777_v52, 0.0  ;;  %v2237_v47 = vmul.f32 0.2, %v1777_v52  ;;  %vm1946_vm6 = vcmp.gt.f32.partialorder %v1398_v3, 0.0  ;;  %v6118_v7 = vpop.f32.mrb[96].mxu0 }
 0x1c4   :  { %v4010_v31 = vpack.c.bf16 %v2432_v48, %v2432_v48  ;;  %3415 = vst.msk [vmem:[%s6399_s3 + $0x2b8] sm:$0xf] %vm3240_vm3, %v4012_v61  ;;  %v2435_v18 = vsel %vm2043_vm4, %v1785_v1, %v2239_v45  ;;  %v2142_v21 = vmul.f32 0.2, %v1398_v3  ;;  %vm1944_vm7 = vcmp.gt.f32.partialorder %v1390_v5, 0.0  ;;  %v6124_v14 = vpop.f32.mrb[97].mxu0 }
 0x1c5   :  { %v2140_v6 = vmul.f32 0.2, %v1390_v5  ;;  %v4013_v8 = vpack.c.bf16 %v2435_v18, %v2435_v18  ;;  %v2433_v42 = vsel %vm2041_vm5, %v1777_v52, %v2237_v47  ;;  %vm1947_vm8 = vcmp.gt.f32.partialorder %v1401_v33, 0.0  ;;  %v6128_v20 = vpop.f32.mrb[98].mxu0 }
 0x1c6   :  { %3413 = vst.msk [vmem:[%s6399_s3 + $0x2b0] sm:$0xf] %vm3240_vm3, %v4010_v31  ;;  %v2143_v2 = vmul.f32 0.2, %v1401_v33  ;;  %v4011_v54 = vpack.c.bf16 %v2433_v42, %v2433_v42  ;;  %v2338_v53 = vsel %vm1946_vm6, %v1398_v3, %v2142_v21  ;;  %v1393_v10 = vadd.f32 %v6039_v27, %v5869_v37  ;;  %v6136_v58 = vpop.f32.mrb[99].mxu0 }
 0x1c7   :  { %v2336_v24 = vsel %vm1944_vm7, %v1390_v5, %v2140_v6  ;;  %3416 = vst.msk [vmem:[%s6399_s3 + $0x2bc] sm:$0xf] %vm3240_vm3, %v4013_v8  ;;  %v3916_v13 = vpack.c.bf16 %v2338_v53, %v2338_v53  ;;  %v1798_v52 = vadd.f32 %v6039_v27, %v5845_v30  ;;  %v1790_v5 = vadd.f32 %v6039_v27, %v5867_v39 }
 0x1c8   :  { %v3914_v43 = vpack.c.bf16 %v2336_v24, %v2336_v24  ;;  %v2339_v1 = vsel %vm1947_vm8, %v1401_v33, %v2143_v2  ;;  %3414 = vst.msk [vmem:[%s6399_s3 + $0x2b4] sm:$0xf] %vm3240_vm3, %v4011_v54  ;;  %vm1945_vm9 = vcmp.gt.f32.partialorder %v1393_v10, 0.0  ;;  %v2141_v3 = vmul.f32 0.2, %v1393_v10 }
 0x1c9   :  { %v3917_v37 = vpack.c.bf16 %v2339_v1, %v2339_v1  ;;  %3319 = vst.msk [vmem:[%s6399_s3 + $0x138] sm:$0xf] %vm3240_vm3, %v3916_v13  ;;  %vm2046_vm10 = vcmp.gt.f32.partialorder %v1798_v52, 0.0  ;;  %v2242_v30 = vmul.f32 0.2, %v1798_v52  ;;  %v1801_v33 = vadd.f32 %v6039_v27, %v5871_v19 }
 0x1ca   :  { %3317 = vst.msk [vmem:[%s6399_s3 + $0x130] sm:$0xf] %vm3240_vm3, %v3914_v43  ;;  %v1793_v61 = vadd.f32 %v6039_v27, %v5873_v22  ;;  %v2337_v39 = vsel %vm1945_vm9, %v1393_v10, %v2141_v3  ;;  %vm2044_vm11 = vcmp.gt.f32.partialorder %v1790_v5, 0.0  ;;  %v2240_v48 = vmul.f32 0.2, %v1790_v5 }
 0x1cb   :  { %3320 = vst.msk [vmem:[%s6399_s3 + $0x13c] sm:$0xf] %vm3240_vm3, %v3917_v37  ;;  %v1414_v45 = vadd.f32 %v6039_v27, %v5901_v59  ;;  %v3915_v31 = vpack.c.bf16 %v2337_v39, %v2337_v39  ;;  %v2438_v47 = vsel %vm2046_vm10, %v1798_v52, %v2242_v30  ;;  %vm2047_vm12 = vcmp.gt.f32.partialorder %v1801_v33, 0.0 }
 0x1cc   :  { %v2243_v18 = vmul.f32 0.2, %v1801_v33  ;;  %v4016_v21 = vpack.c.bf16 %v2438_v47, %v2438_v47  ;;  %v2436_v19 = vsel %vm2044_vm11, %v1790_v5, %v2240_v48  ;;  %vm2045_vm13 = vcmp.gt.f32.partialorder %v1793_v61, 0.0 }
 0x1cd   :  { %v2241_v6 = vmul.f32 0.2, %v1793_v61  ;;  %3318 = vst.msk [vmem:[%s6399_s3 + $0x134] sm:$0xf] %vm3240_vm3, %v3915_v31  ;;  %v4014_v22 = vpack.c.bf16 %v2436_v19, %v2436_v19  ;;  %vm1950_vm14 = vcmp.gt.f32.partialorder %v1414_v45, 0.0  ;;  %v1406_v54 = vadd.f32 %v6039_v27, %v5905_v23 }
 0x1ce   :  { %v2439_v8 = vsel %vm2047_vm12, %v1801_v33, %v2243_v18  ;;  %v2146_v42 = vmul.f32 0.2, %v1414_v45  ;;  %3419 = vst.msk [vmem:[%s6399_s3 + $0x2c8] sm:$0xf] %vm3240_vm3, %v4016_v21  ;;  %v1417_v53 = vadd.f32 %v6039_v27, %v5913_v49  ;;  %v1409_v13 = vadd.f32 %v6039_v27, %v5919_v40 }
 0x1cf   :  { %v4017_v59 = vpack.c.bf16 %v2439_v8, %v2439_v8  ;;  %v2437_v2 = vsel %vm2045_vm13, %v1793_v61, %v2241_v6  ;;  %3417 = vst.msk [vmem:[%s6399_s3 + $0x2c0] sm:$0xf] %vm3240_vm3, %v4014_v22  ;;  %v1814_v43 = vadd.f32 %v6039_v27, %v5903_v51  ;;  %vm1948_vm15 = vcmp.gt.f32.partialorder %v1406_v54, 0.0 }
 0x1d0   :  { %v4015_v24 = vpack.c.bf16 %v2437_v2, %v2437_v2  ;;  %v2342_v10 = vsel %vm1950_vm14, %v1414_v45, %v2146_v42  ;;  %v2144_v49 = vmul.f32 0.2, %v1406_v54  ;;  %vm1951_vm0 = vcmp.gt.f32.partialorder %v1417_v53, 0.0 }
 0x1d1   :  { %3420 = vst.msk [vmem:[%s6399_s3 + $0x2cc] sm:$0xf] %vm3240_vm3, %v4017_v59  ;;  %v3920_v23 = vpack.c.bf16 %v2342_v10, %v2342_v10  ;;  %v2147_v1 = vmul.f32 0.2, %v1417_v53  ;;  %vm1949_vm1 = vcmp.gt.f32.partialorder %v1409_v13, 0.0  ;;  %vm2050_vm2 = vcmp.gt.f32.partialorder %v1814_v43, 0.0 }
 0x1d2   :  { %3418 = vst.msk [vmem:[%s6399_s3 + $0x2c4] sm:$0xf] %vm3240_vm3, %v4015_v24  ;;  %v2145_v40 = vmul.f32 0.2, %v1409_v13  ;;  %v2340_v51 = vsel %vm1948_vm15, %v1406_v54, %v2144_v49  ;;  %v2246_v52 = vmul.f32 0.2, %v1814_v43  ;;  %v1806_v37 = vadd.f32 %v6039_v27, %v5907_v17 }
 0x1d3   :  { %3323 = vst.msk [vmem:[%s6399_s3 + $0x148] sm:$0xf] %vm3240_vm3, %v3920_v23  ;;  %v1817_v3 = vadd.f32 %v6039_v27, %v5921_v57  ;;  %v3918_v5 = vpack.c.bf16 %v2340_v51, %v2340_v51  ;;  %v2343_v30 = vsel %vm1951_vm0, %v1417_v53, %v2147_v1  ;;  %v1809_v61 = vadd.f32 %v6039_v27, %v5926_v55 }
 0x1d4   :  { %v2341_v33 = vsel %vm1949_vm1, %v1409_v13, %v2145_v40  ;;  %v3921_v39 = vpack.c.bf16 %v2343_v30, %v2343_v30  ;;  %v2442_v45 = vsel %vm2050_vm2, %v1814_v43, %v2246_v52  ;;  %vm2048_vm4 = vcmp.gt.f32.partialorder %v1806_v37, 0.0 }
 0x1d5   :  { %v3919_v48 = vpack.c.bf16 %v2341_v33, %v2341_v33  ;;  %3321 = vst.msk [vmem:[%s6399_s3 + $0x140] sm:$0xf] %vm3240_vm3, %v3918_v5  ;;  %v4020_v31 = vpack.c.bf16 %v2442_v45, %v2442_v45  ;;  %v2244_v17 = vmul.f32 0.2, %v1806_v37  ;;  %vm2051_vm5 = vcmp.gt.f32.partialorder %v1817_v3, 0.0 }
 0x1d6   :  { %v2247_v47 = vmul.f32 0.2, %v1817_v3  ;;  %3324 = vst.msk [vmem:[%s6399_s3 + $0x14c] sm:$0xf] %vm3240_vm3, %v3921_v39  ;;  %vm2049_vm6 = vcmp.gt.f32.partialorder %v1809_v61, 0.0  ;;  %v1430_v55 = vadd.f32 %v6039_v27, %v5958_v44  ;;  %v1422_v18 = vadd.f32 %v6039_v27, %v5962_v11 }
 0x1d7   :  { %3322 = vst.msk [vmem:[%s6399_s3 + $0x144] sm:$0xf] %vm3240_vm3, %v3919_v48  ;;  %v2245_v57 = vmul.f32 0.2, %v1809_v61  ;;  %3423 = vst.msk [vmem:[%s6399_s3 + $0x2d8] sm:$0xf] %vm3240_vm3, %v4020_v31  ;;  %v2440_v21 = vsel %vm2048_vm4, %v1806_v37, %v2244_v17  ;;  %v1433_v6 = vadd.f32 %v6039_v27, %v5966_v28  ;;  %v1425_v22 = vadd.f32 %v6039_v27, %v5974_v41 }
 0x1d8   :  { %v2443_v19 = vsel %vm2051_vm5, %v1817_v3, %v2247_v47  ;;  %v4018_v8 = vpack.c.bf16 %v2440_v21, %v2440_v21  ;;  %vm1954_vm7 = vcmp.gt.f32.partialorder %v1430_v55, 0.0  ;;  %v2150_v2 = vmul.f32 0.2, %v1430_v55 }
 0x1d9   :  { %v4021_v42 = vpack.c.bf16 %v2443_v19, %v2443_v19  ;;  %v2441_v59 = vsel %vm2049_vm6, %v1809_v61, %v2245_v57  ;;  %vm1952_vm8 = vcmp.gt.f32.partialorder %v1422_v18, 0.0  ;;  %v2148_v11 = vmul.f32 0.2, %v1422_v18 }
 0x1da   :  { %v4019_v44 = vpack.c.bf16 %v2441_v59, %v2441_v59  ;;  %3421 = vst.msk [vmem:[%s6399_s3 + $0x2d0] sm:$0xf] %vm3240_vm3, %v4018_v8  ;;  %vm1955_vm9 = vcmp.gt.f32.partialorder %v1433_v6, 0.0  ;;  %v2151_v28 = vmul.f32 0.2, %v1433_v6  ;;  %vm1953_vm10 = vcmp.gt.f32.partialorder %v1425_v22, 0.0 }
 0x1db   :  { %3424 = vst.msk [vmem:[%s6399_s3 + $0x2dc] sm:$0xf] %vm3240_vm3, %v4021_v42  ;;  %v2149_v41 = vmul.f32 0.2, %v1425_v22  ;;  %v2346_v54 = vsel %vm1954_vm7, %v1430_v55, %v2150_v2  ;;  %v2344_v53 = vsel %vm1952_vm8, %v1422_v18, %v2148_v11  ;;  %v1830_v24 = vadd.f32 %v6039_v27, %v5960_v36 }
 0x1dc   :  { %3422 = vst.msk [vmem:[%s6399_s3 + $0x2d4] sm:$0xf] %vm3240_vm3, %v4019_v44  ;;  %v1822_v10 = vadd.f32 %v6039_v27, %v5964_v16  ;;  %v3924_v13 = vpack.c.bf16 %v2346_v54, %v2346_v54  ;;  %v3922_v43 = vpack.c.bf16 %v2344_v53, %v2344_v53  ;;  %v2347_v23 = vsel %vm1955_vm9, %v1433_v6, %v2151_v28 }
 0x1dd   :  { %v2345_v49 = vsel %vm1953_vm10, %v1425_v22, %v2149_v41  ;;  %v3925_v1 = vpack.c.bf16 %v2347_v23, %v2347_v23  ;;  %vm2054_vm11 = vcmp.gt.f32.partialorder %v1830_v24, 0.0  ;;  %v2250_v51 = vmul.f32 0.2, %v1830_v24 }
 0x1de   :  { %v3923_v40 = vpack.c.bf16 %v2345_v49, %v2345_v49  ;;  %3327 = vst.msk [vmem:[%s6399_s3 + $0x158] sm:$0xf] %vm3240_vm3, %v3924_v13  ;;  %3325 = vst.msk [vmem:[%s6399_s3 + $0x150] sm:$0xf] %vm3240_vm3, %v3922_v43  ;;  %vm2052_vm12 = vcmp.gt.f32.partialorder %v1822_v10, 0.0  ;;  %v1833_v16 = vadd.f32 %v6039_v27, %v5968_v29  ;;  %v1825_v52 = vadd.f32 %v6039_v27, %v5976_v4 }
 0x1df   :  { %v2248_v36 = vmul.f32 0.2, %v1822_v10  ;;  %3328 = vst.msk [vmem:[%s6399_s3 + $0x15c] sm:$0xf] %vm3240_vm3, %v3925_v1  ;;  %v2446_v37 = vsel %vm2054_vm11, %v1830_v24, %v2250_v51  ;;  %v1446_v3 = vadd.f32 %v6039_v27, %v6010_v50  ;;  %v1438_v29 = vadd.f32 %v6039_v27, %v6016_v38 }
 0x1e0   :  { %3326 = vst.msk [vmem:[%s6399_s3 + $0x154] sm:$0xf] %vm3240_vm3, %v3923_v40  ;;  %v1449_v4 = vadd.f32 %v6039_v27, %v6021_v56  ;;  %v4024_v5 = vpack.c.bf16 %v2446_v37, %v2446_v37  ;;  %vm2055_vm13 = vcmp.gt.f32.partialorder %v1833_v16, 0.0  ;;  %v2251_v33 = vmul.f32 0.2, %v1833_v16 }
 0x1e1   :  { %v2444_v30 = vsel %vm2052_vm12, %v1822_v10, %v2248_v36  ;;  %vm2053_vm14 = vcmp.gt.f32.partialorder %v1825_v52, 0.0  ;;  %v2249_v39 = vmul.f32 0.2, %v1825_v52  ;;  %vm1958_vm15 = vcmp.gt.f32.partialorder %v1446_v3, 0.0 }
 0x1e2   :  { %v4022_v61 = vpack.c.bf16 %v2444_v30, %v2444_v30  ;;  %3427 = vst.msk [vmem:[%s6399_s3 + $0x2e8] sm:$0xf] %vm3240_vm3, %v4024_v5  ;;  %v2447_v50 = vsel %vm2055_vm13, %v1833_v16, %v2251_v33  ;;  %v2154_v48 = vmul.f32 0.2, %v1446_v3  ;;  %vm1956_vm0 = vcmp.gt.f32.partialorder %v1438_v29, 0.0 }
 0x1e3   :  { %v2152_v38 = vmul.f32 0.2, %v1438_v29  ;;  %v4025_v56 = vpack.c.bf16 %v2447_v50, %v2447_v50  ;;  %v2445_v45 = vsel %vm2053_vm14, %v1825_v52, %v2249_v39  ;;  %vm1959_vm1 = vcmp.gt.f32.partialorder %v1449_v4, 0.0 }
 0x1e4   :  { %3425 = vst.msk [vmem:[%s6399_s3 + $0x2e0] sm:$0xf] %vm3240_vm3, %v4022_v61  ;;  %v2155_v31 = vmul.f32 0.2, %v1449_v4  ;;  %v4023_v17 = vpack.c.bf16 %v2445_v45, %v2445_v45  ;;  %v2350_v47 = vsel %vm1958_vm15, %v1446_v3, %v2154_v48  ;;  %v1441_v55 = vadd.f32 %v6039_v27, %v6029_v35 }
 0x1e5   :  { %v2348_v57 = vsel %vm1956_vm0, %v1438_v29, %v2152_v38  ;;  %3428 = vst.msk [vmem:[%s6399_s3 + $0x2ec] sm:$0xf] %vm3240_vm3, %v4025_v56  ;;  %v3928_v18 = vpack.c.bf16 %v2350_v47, %v2350_v47  ;;  %v1846_v6 = vadd.f32 %v6039_v27, %v6012_v62  ;;  %v1838_v35 = vadd.f32 %v6039_v27, %v6018_v9 }
 0x1e6   :  { %v3926_v21 = vpack.c.bf16 %v2348_v57, %v2348_v57  ;;  %v2351_v19 = vsel %vm1959_vm1, %v1449_v4, %v2155_v31  ;;  %3426 = vst.msk [vmem:[%s6399_s3 + $0x2e4] sm:$0xf] %vm3240_vm3, %v4023_v17  ;;  %vm1957_vm2 = vcmp.gt.f32.partialorder %v1441_v55, 0.0  ;;  %v2153_v8 = vmul.f32 0.2, %v1441_v55 }
 0x1e7   :  { %v3929_v22 = vpack.c.bf16 %v2351_v19, %v2351_v19  ;;  %3331 = vst.msk [vmem:[%s6399_s3 + $0x168] sm:$0xf] %vm3240_vm3, %v3928_v18  ;;  %vm2058_vm4 = vcmp.gt.f32.partialorder %v1846_v6, 0.0  ;;  %v2254_v62 = vmul.f32 0.2, %v1846_v6  ;;  %v1849_v42 = vadd.f32 %v6039_v27, %v6023_v46 }
 0x1e8   :  { %3329 = vst.msk [vmem:[%s6399_s3 + $0x160] sm:$0xf] %vm3240_vm3, %v3926_v21  ;;  %v1841_v59 = vadd.f32 %v6039_v27, %v6045_v26  ;;  %v2349_v9 = vsel %vm1957_vm2, %v1441_v55, %v2153_v8  ;;  %vm2056_vm5 = vcmp.gt.f32.partialorder %v1838_v35, 0.0  ;;  %v2252_v44 = vmul.f32 0.2, %v1838_v35 }
 0x1e9   :  { %3332 = vst.msk [vmem:[%s6399_s3 + $0x16c] sm:$0xf] %vm3240_vm3, %v3929_v22  ;;  %v1462_v2 = vadd.f32 %v6039_v27, %v6072_v15  ;;  %v3927_v11 = vpack.c.bf16 %v2349_v9, %v2349_v9  ;;  %v2450_v28 = vsel %vm2058_vm4, %v1846_v6, %v2254_v62  ;;  %vm2059_vm6 = vcmp.gt.f32.partialorder %v1849_v42, 0.0 }
 0x1ea   :  { %v2255_v41 = vmul.f32 0.2, %v1849_v42  ;;  %v4028_v54 = vpack.c.bf16 %v2450_v28, %v2450_v28  ;;  %v2448_v46 = vsel %vm2056_vm5, %v1838_v35, %v2252_v44  ;;  %vm2057_vm7 = vcmp.gt.f32.partialorder %v1841_v59, 0.0 }
 0x1eb   :  { %v2253_v53 = vmul.f32 0.2, %v1841_v59  ;;  %3330 = vst.msk [vmem:[%s6399_s3 + $0x164] sm:$0xf] %vm3240_vm3, %v3927_v11  ;;  %v4026_v26 = vpack.c.bf16 %v2448_v46, %v2448_v46  ;;  %vm1962_vm8 = vcmp.gt.f32.partialorder %v1462_v2, 0.0  ;;  %v1454_v43 = vadd.f32 %v6039_v27, %v6076_v12 }
 0x1ec   :  { %v2451_v24 = vsel %vm2059_vm6, %v1849_v42, %v2255_v41  ;;  %v2158_v10 = vmul.f32 0.2, %v1462_v2  ;;  %3431 = vst.msk [vmem:[%s6399_s3 + $0x2f8] sm:$0xf] %vm3240_vm3, %v4028_v54  ;;  %v1465_v23 = vadd.f32 %v6039_v27, %v6080_v32  ;;  %v1457_v40 = vadd.f32 %v6039_v27, %v6096_v63 }
 0x1ed   :  { %v4029_v15 = vpack.c.bf16 %v2451_v24, %v2451_v24  ;;  %v2449_v13 = vsel %vm2057_vm7, %v1841_v59, %v2253_v53  ;;  %3429 = vst.msk [vmem:[%s6399_s3 + $0x2f0] sm:$0xf] %vm3240_vm3, %v4026_v26  ;;  %v1862_v51 = vadd.f32 %v6039_v27, %v6074_v25  ;;  %vm1960_vm9 = vcmp.gt.f32.partialorder %v1454_v43, 0.0 }
 0x1ee   :  { %v4027_v49 = vpack.c.bf16 %v2449_v13, %v2449_v13  ;;  %v2354_v1 = vsel %vm1962_vm8, %v1462_v2, %v2158_v10  ;;  %v2156_v32 = vmul.f32 0.2, %v1454_v43  ;;  %vm1963_vm10 = vcmp.gt.f32.partialorder %v1465_v23, 0.0 }
 0x1ef   :  { %3432 = vst.msk [vmem:[%s6399_s3 + $0x2fc] sm:$0xf] %vm3240_vm3, %v4029_v15  ;;  %v3932_v12 = vpack.c.bf16 %v2354_v1, %v2354_v1  ;;  %v2159_v36 = vmul.f32 0.2, %v1465_v23  ;;  %vm1961_vm11 = vcmp.gt.f32.partialorder %v1457_v40, 0.0  ;;  %vm2062_vm12 = vcmp.gt.f32.partialorder %v1862_v51, 0.0 }
 0x1f0   :  { %3430 = vst.msk [vmem:[%s6399_s3 + $0x2f4] sm:$0xf] %vm3240_vm3, %v4027_v49  ;;  %v2157_v63 = vmul.f32 0.2, %v1457_v40  ;;  %v2352_v25 = vsel %vm1960_vm9, %v1454_v43, %v2156_v32  ;;  %v2258_v16 = vmul.f32 0.2, %v1862_v51  ;;  %v1854_v52 = vadd.f32 %v6039_v27, %v6078_v0 }
 0x1f1   :  { %3335 = vst.msk [vmem:[%s6399_s3 + $0x178] sm:$0xf] %vm3240_vm3, %v3932_v12  ;;  %v1865_v37 = vadd.f32 %v6039_v27, %v6082_v60  ;;  %v3930_v3 = vpack.c.bf16 %v2352_v25, %v2352_v25  ;;  %v2355_v29 = vsel %vm1963_vm10, %v1465_v23, %v2159_v36  ;;  %v1857_v5 = vadd.f32 %v6039_v27, %v6098_v34 }
 0x1f2   :  { %v2353_v4 = vsel %vm1961_vm11, %v1457_v40, %v2157_v63  ;;  %v3933_v30 = vpack.c.bf16 %v2355_v29, %v2355_v29  ;;  %v2454_v61 = vsel %vm2062_vm12, %v1862_v51, %v2258_v16  ;;  %vm2060_vm13 = vcmp.gt.f32.partialorder %v1854_v52, 0.0 }
 0x1f3   :  { %v3931_v33 = vpack.c.bf16 %v2353_v4, %v2353_v4  ;;  %3333 = vst.msk [vmem:[%s6399_s3 + $0x170] sm:$0xf] %vm3240_vm3, %v3930_v3  ;;  %v4032_v39 = vpack.c.bf16 %v2454_v61, %v2454_v61  ;;  %v2256_v0 = vmul.f32 0.2, %v1854_v52  ;;  %vm2063_vm14 = vcmp.gt.f32.partialorder %v1865_v37, 0.0 }
 0x1f4   :  { %v2259_v50 = vmul.f32 0.2, %v1865_v37  ;;  %3336 = vst.msk [vmem:[%s6399_s3 + $0x17c] sm:$0xf] %vm3240_vm3, %v3933_v30  ;;  %vm2061_vm15 = vcmp.gt.f32.partialorder %v1857_v5, 0.0  ;;  %v1478_v34 = vadd.f32 %v6039_v27, %v6118_v7  ;;  %v1470_v48 = vadd.f32 %v6039_v27, %v6124_v14 }
 0x1f5   :  { %3334 = vst.msk [vmem:[%s6399_s3 + $0x174] sm:$0xf] %vm3240_vm3, %v3931_v33  ;;  %v2257_v60 = vmul.f32 0.2, %v1857_v5  ;;  %3435 = vst.msk [vmem:[%s6399_s3 + $0x308] sm:$0xf] %vm3240_vm3, %v4032_v39  ;;  %v2452_v38 = vsel %vm2060_vm13, %v1854_v52, %v2256_v0  ;;  %v1481_v45 = vadd.f32 %v6039_v27, %v6128_v20  ;;  %v1473_v31 = vadd.f32 %v6039_v27, %v6136_v58 }
 0x1f6   :  { %v2455_v56 = vsel %vm2063_vm14, %v1865_v37, %v2259_v50  ;;  %v4030_v17 = vpack.c.bf16 %v2452_v38, %v2452_v38  ;;  %vm1966_vm0 = vcmp.gt.f32.partialorder %v1478_v34, 0.0  ;;  %v2162_v55 = vmul.f32 0.2, %v1478_v34 }
 0x1f7   :  { %v4033_v47 = vpack.c.bf16 %v2455_v56, %v2455_v56  ;;  %v2453_v57 = vsel %vm2061_vm15, %v1857_v5, %v2257_v60  ;;  %vm1964_vm1 = vcmp.gt.f32.partialorder %v1470_v48, 0.0  ;;  %v2160_v14 = vmul.f32 0.2, %v1470_v48 }
 0x1f8   :  { %v4031_v7 = vpack.c.bf16 %v2453_v57, %v2453_v57  ;;  %3433 = vst.msk [vmem:[%s6399_s3 + $0x300] sm:$0xf] %vm3240_vm3, %v4030_v17  ;;  %vm1967_vm2 = vcmp.gt.f32.partialorder %v1481_v45, 0.0  ;;  %v2163_v27 = vmul.f32 0.2, %v1481_v45  ;;  %vm1965_vm4 = vcmp.gt.f32.partialorder %v1473_v31, 0.0 }
 0x1f9   :  { %3436 = vst.msk [vmem:[%s6399_s3 + $0x30c] sm:$0xf] %vm3240_vm3, %v4033_v47  ;;  %v2161_v20 = vmul.f32 0.2, %v1473_v31  ;;  %v2358_v58 = vsel %vm1966_vm0, %v1478_v34, %v2162_v55  ;;  %v2356_v18 = vsel %vm1964_vm1, %v1470_v48, %v2160_v14 }
 0x1fa   :  { %3434 = vst.msk [vmem:[%s6399_s3 + $0x304] sm:$0xf] %vm3240_vm3, %v4031_v7  ;;  %v3936_v21 = vpack.c.bf16 %v2358_v58, %v2358_v58  ;;  %v3934_v19 = vpack.c.bf16 %v2356_v18, %v2356_v18  ;;  %v2359_v6 = vsel %vm1967_vm2, %v1481_v45, %v2163_v27 }
 0x1fb   :  { %v2357_v22 = vsel %vm1965_vm4, %v1473_v31, %v2161_v20  ;;  %v3937_v8 = vpack.c.bf16 %v2359_v6, %v2359_v6 }
 0x1fc   :  { %v3935_v35 = vpack.c.bf16 %v2357_v22, %v2357_v22  ;;  %3339 = vst.msk [vmem:[%s6399_s3 + $0x188] sm:$0xf] %vm3240_vm3, %v3936_v21  ;;  %3337 = vst.msk [vmem:[%s6399_s3 + $0x180] sm:$0xf] %vm3240_vm3, %v3934_v19 }
 0x1fd   :  { %3340 = vst.msk [vmem:[%s6399_s3 + $0x18c] sm:$0xf] %vm3240_vm3, %v3937_v8 }
 0x1fe   :  { %3338 = vst.msk [vmem:[%s6399_s3 + $0x184] sm:$0xf] %vm3240_vm3, %v3935_v35 }
 0x1ff   :  { %3441 = vsyncpa [#allocation3], 1 }
 0x200   :  { %3442 = vsyncpa [#allocation5], 1 }

// kernel: discriminator_forward.4
= control target key start
LH: loop header
LB: loop body
LE: loop exit
PB: predicated region body
PF: predicated region fallthrough
CT: control target
= control target key end

     0   :  { %v3963_v0 = vmov 0   ;;  %v3964_v40 = vmov 0.0   ;;  %vm3965_vm0 = vmmov 0   ;;  %vm1482_vm1 = vcmask 261120   ;;  %s5028_s1 = inlined_call_operand.vmem [shape: bf16[800,64], index: 1, kind: input, shape index: {}]   ;;  %s5029_s0 = inlined_call_operand.vmem [shape: bf16[392,800], index: 0, kind: input, shape index: {}]   ;;  %s5030_s2 = inlined_call_operand.vmem [shape: f32[1,64], index: 2, kind: input, shape index: {}]   ;;  %s5031_s3 = inlined_call_operand.vmem [shape: bf16[392,64], index: 3, kind: output, shape index: {}]  }
   0x1   :  { %1558 = vmatprep.subr.bf16.mxu1 %v3963_v0  ;;  %2022 = vmatprep.subr.bf16.mxu0 %v3963_v0  ;;  %v3665_v1 = vld [vmem:[%s5028_s1] sm:$0xff]   ;;  %v3667_v3 = vld [vmem:[%s5028_s1 + $0x8] sm:$0xff]   ;;  %v3669_v5 = vld [vmem:[%s5028_s1 + $0x10] sm:$0xff]   ;;  %vm2830_vm3 = vcmask 519168  }
   0x2   :  { %v3666_v2 = vld [vmem:[%s5028_s1 + $0x100] sm:$0xff]   ;;  %1559 = vmatpush1.bf16.msra.mxu1 %v3665_v1  ;;  %v3668_v4 = vld [vmem:[%s5028_s1 + $0x108] sm:$0xff]   ;;  %v3670_v6 = vld [vmem:[%s5028_s1 + $0x110] sm:$0xff]  }
   0x3   :  { %2023 = vmatpush1.bf16.msra.mxu0 %v3666_v2  ;;  %1560 = vmatprep.subr.bf16.mxu1 %v3963_v0  ;;  %v3671_v7 = vld [vmem:[%s5028_s1 + $0x18] sm:$0xff]   ;;  %v3673_v9 = vld [vmem:[%s5028_s1 + $0x20] sm:$0xff]   ;;  %v3675_v11 = vld [vmem:[%s5028_s1 + $0x28] sm:$0xff]  }
   0x4   :  { %2024 = vmatprep.subr.bf16.mxu0 %v3963_v0  ;;  %v3672_v8 = vld [vmem:[%s5028_s1 + $0x118] sm:$0xff]   ;;  %v3674_v10 = vld [vmem:[%s5028_s1 + $0x120] sm:$0xff]   ;;  %v3676_v12 = vld [vmem:[%s5028_s1 + $0x128] sm:$0xff]  }
   0x5   :  { %v3677_v13 = vld [vmem:[%s5028_s1 + $0x30] sm:$0xff]   ;;  %v3679_v15 = vld [vmem:[%s5028_s1 + $0x38] sm:$0xff]   ;;  %v3681_v17 = vld [vmem:[%s5028_s1 + $0x40] sm:$0xff]  }
   0x6   :  { %1561 = vmatpush1.bf16.msra.mxu1 %v3667_v3  ;;  %v3678_v14 = vld [vmem:[%s5028_s1 + $0x130] sm:$0xff]   ;;  %v3680_v16 = vld [vmem:[%s5028_s1 + $0x138] sm:$0xff]   ;;  %v3682_v18 = vld [vmem:[%s5028_s1 + $0x140] sm:$0xff]  }
   0x7   :  { %2025 = vmatpush1.bf16.msra.mxu0 %v3668_v4  ;;  %1562 = vmatprep.subr.bf16.mxu1 %v3963_v0  ;;  %v3699_v19 = vld [vmem:[%s5029_s0 + $0x4] ss:$28 sps:$4 sm:$0xff]   ;;  %v3683_v20 = vld [vmem:[%s5028_s1 + $0x48] sm:$0xff]   ;;  %v3702_v21 = vld [vmem:[%s5029_s0 + $0x14] ss:$28 sps:$4 sm:$0xff]  }
   0x8   :  { %2026 = vmatprep.subr.bf16.mxu0 %v3963_v0  ;;  %v3684_v22 = vld [vmem:[%s5028_s1 + $0x148] sm:$0xff]   ;;  %1590 = vmatprep.mubr.bf16.mxu1 %v3699_v19  ;;  %v3685_v23 = vld [vmem:[%s5028_s1 + $0x50] sm:$0xff]   ;;  %v3687_v25 = vld [vmem:[%s5028_s1 + $0x58] sm:$0xff]  }
   0x9   :  { %2054 = vmatprep.mubr.bf16.mxu0 %v3702_v21  ;;  %v3686_v24 = vld [vmem:[%s5028_s1 + $0x150] sm:$0xff]   ;;  %v3688_v26 = vld [vmem:[%s5028_s1 + $0x158] sm:$0xff]   ;;  %v3689_v27 = vld [vmem:[%s5028_s1 + $0x60] sm:$0xff]  }
   0xa   :  { %1563 = vmatpush1.bf16.msra.mxu1 %v3669_v5  ;;  %v3690_v28 = vld [vmem:[%s5028_s1 + $0x160] sm:$0xff]   ;;  %v3691_v29 = vld [vmem:[%s5028_s1 + $0x68] sm:$0xff]   ;;  %v3693_v31 = vld [vmem:[%s5028_s1 + $0x70] sm:$0xff]  }
   0xb   :  { %2027 = vmatpush1.bf16.msra.mxu0 %v3670_v6  ;;  %1564 = vmatprep.subr.bf16.mxu1 %v3963_v0  ;;  %v3692_v30 = vld [vmem:[%s5028_s1 + $0x168] sm:$0xff]   ;;  %v3694_v32 = vld [vmem:[%s5028_s1 + $0x170] sm:$0xff]   ;;  %v3695_v33 = vld [vmem:[%s5028_s1 + $0x78] sm:$0xff]  }
   0xc   :  { %2028 = vmatprep.subr.bf16.mxu0 %v3963_v0  ;;  %v3696_v34 = vld [vmem:[%s5028_s1 + $0x178] sm:$0xff]   ;;  %v3700_v36 = vld [vmem:[%s5029_s0 + $0x10] ss:$28 sps:$4 sm:$0xff]   ;;  %v3703_v37 = vld [vmem:[%s5028_s1 + $0x80] sm:$0xff]  }
   0xd   :  { %v3697_v35 = vld [vmem:[%s5029_s0] ss:$28 sps:$4 sm:$0xff]   ;;  %v3707_v41 = vld [vmem:[%s5029_s0 + $0x4c] ss:$28 sps:$4 sm:$0xff]   ;;  %v3709_v43 = vld [vmem:[%s5029_s0 + $0x38] ss:$28 sps:$4 sm:$0xff]  }
   0xe   :  { %1565 = vmatpush1.bf16.msra.mxu1 %v3671_v7  ;;  %v3704_v38 = vld [vmem:[%s5028_s1 + $0x180] sm:$0xff]   ;;  %v3705_v39 = vld [vmem:[%s5029_s0 + $0x3c] ss:$28 sps:$4 sm:$0xff]   ;;  %v3711_v42 = vld [vmem:[%s5028_s1 + $0x88] sm:$0xff]  }
   0xf   :  { %2029 = vmatpush1.bf16.msra.mxu0 %v3672_v8  ;;  %1566 = vmatprep.subr.bf16.mxu1 %v3963_v0  ;;  %v3710_v44 = vld [vmem:[%s5029_s0 + $0x48] ss:$28 sps:$4 sm:$0xff]   ;;  %v3712_v45 = vld [vmem:[%s5029_s0 + $0x74] ss:$28 sps:$4 sm:$0xff]   ;;  %v3733_v49 = vld [vmem:[%s5028_s1 + $0x98] sm:$0xff]  }
  0x10   :  { %2030 = vmatprep.subr.bf16.mxu0 %v3963_v0  ;;  %v3714_v46 = vld [vmem:[%s5029_s0 + $0x84] ss:$28 sps:$4 sm:$0xff]   ;;  %v3724_v47 = vld [vmem:[%s5028_s1 + $0x90] sm:$0xff]   ;;  %v3718_v51 = vld [vmem:[%s5029_s0 + $0xac] ss:$28 sps:$4 sm:$0xff]  }
  0x11   :  { %v3716_v48 = vld [vmem:[%s5029_s0 + $0x70] ss:$28 sps:$4 sm:$0xff]   ;;  %v3717_v50 = vld [vmem:[%s5029_s0 + $0x80] ss:$28 sps:$4 sm:$0xff]   ;;  %v3722_v56 = vld [vmem:[%s5029_s0 + $0xa8] ss:$28 sps:$4 sm:$0xff]  }
  0x12   :  { %1567 = vmatpush1.bf16.msra.mxu1 %v3673_v9  ;;  %v3720_v52 = vld [vmem:[%s5029_s0 + $0xbc] ss:$28 sps:$4 sm:$0xff]   ;;  %v3744_v53 = vld [vmem:[%s5028_s1 + $0xa0] sm:$0xff]   ;;  %v3789_v54 = vld [vmem:[%s5028_s1 + $0x188] sm:$0xff]  }
  0x13   :  { %2031 = vmatpush1.bf16.msra.mxu0 %v3674_v10  ;;  %1568 = vmatprep.subr.bf16.mxu1 %v3963_v0  ;;  %v3756_v55 = vld [vmem:[%s5028_s1 + $0xa8] sm:$0xff]   ;;  %v3723_v57 = vld [vmem:[%s5029_s0 + $0xb8] ss:$28 sps:$4 sm:$0xff]   ;;  %v3725_v58 = vld [vmem:[%s5029_s0 + $0xe4] ss:$28 sps:$4 sm:$0xff]  }
  0x14   :  { %2032 = vmatprep.subr.bf16.mxu0 %v3963_v0  ;;  %v3727_v59 = vld [vmem:[%s5029_s0 + $0xf4] ss:$28 sps:$4 sm:$0xff]   ;;  %v3777_v61 = vld [vmem:[%s5028_s1 + $0xb8] sm:$0xff]   ;;  %v3734_v2 = vld [vmem:[%s5029_s0 + $0x12c] ss:$28 sps:$4 sm:$0xff]  }
  0x15   :  { %v3764_v60 = vld [vmem:[%s5028_s1 + $0xb0] sm:$0xff]   ;;  %v3729_v62 = vld [vmem:[%s5029_s0 + $0xe0] ss:$28 sps:$4 sm:$0xff]   ;;  %v3798_v4 = vld [vmem:[%s5028_s1 + $0xc8] sm:$0xff]  }
  0x16   :  { %1569 = vmatpush1.bf16.msra.mxu1 %v3675_v11  ;;  %v3730_v63 = vld [vmem:[%s5029_s0 + $0xf0] ss:$28 sps:$4 sm:$0xff]   ;;  %v3731_v1 = vld [vmem:[%s5029_s0 + $0x11c] ss:$28 sps:$4 sm:$0xff]   ;;  %v3784_v3 = vld [vmem:[%s5028_s1 + $0xc0] sm:$0xff]  }
  0x17   :  { %2033 = vmatpush1.bf16.msra.mxu0 %v3676_v12  ;;  %1570 = vmatprep.subr.bf16.mxu1 %v3963_v0  ;;  %v3736_v5 = vld [vmem:[%s5029_s0 + $0x118] ss:$28 sps:$4 sm:$0xff]   ;;  %v3737_v6 = vld [vmem:[%s5029_s0 + $0x128] ss:$28 sps:$4 sm:$0xff]   ;;  %v3742_v10 = vld [vmem:[%s5029_s0 + $0x150] ss:$28 sps:$4 sm:$0xff]  }
  0x18   :  { %2034 = vmatprep.subr.bf16.mxu0 %v3963_v0  ;;  %v3738_v7 = vld [vmem:[%s5029_s0 + $0x154] ss:$28 sps:$4 sm:$0xff]   ;;  %v3740_v8 = vld [vmem:[%s5029_s0 + $0x164] ss:$28 sps:$4 sm:$0xff]   ;;  %v3818_v11 = vld [vmem:[%s5028_s1 + $0xd8] sm:$0xff]  }
  0x19   :  { %v3805_v9 = vld [vmem:[%s5028_s1 + $0xd0] sm:$0xff]   ;;  %v3743_v12 = vld [vmem:[%s5029_s0 + $0x160] ss:$28 sps:$4 sm:$0xff]  }
  0x1a   :  { %1571 = vmatpush1.bf16.msra.mxu1 %v3677_v13  ;;  %v3745_v13 = vld [vmem:[%s5029_s0 + $0x18c] ss:$28 sps:$4 sm:$0xff]   ;;  %v3751_v19 = vld [vmem:[%s5029_s0 + $0x1c4] ss:$28 sps:$4 sm:$0xff]   ;;  %v3850_v21 = vld [vmem:[%s5028_s1 + $0xf0] sm:$0xff]  }
  0x1b   :  { %2035 = vmatpush1.bf16.msra.mxu0 %v3678_v14  ;;  %1572 = vmatprep.subr.bf16.mxu1 %v3963_v0  ;;  %v3747_v14 = vld [vmem:[%s5029_s0 + $0x19c] ss:$28 sps:$4 sm:$0xff]  }
  0x1c   :  { %2036 = vmatprep.subr.bf16.mxu0 %v3963_v0 }
  0x1e   :  { %1573 = vmatpush1.bf16.msra.mxu1 %v3679_v15  ;;  %v3827_v15 = vld [vmem:[%s5028_s1 + $0xe0] sm:$0xff]  }
  0x1f   :  { %2037 = vmatpush1.bf16.msra.mxu0 %v3680_v16  ;;  %1574 = vmatprep.subr.bf16.mxu1 %v3963_v0  ;;  %v3749_v16 = vld [vmem:[%s5029_s0 + $0x188] ss:$28 sps:$4 sm:$0xff]  }
  0x20   :  { %2038 = vmatprep.subr.bf16.mxu0 %v3963_v0 }
  0x22   :  { %1575 = vmatpush1.bf16.msra.mxu1 %v3681_v17  ;;  %v3838_v17 = vld [vmem:[%s5028_s1 + $0xe8] sm:$0xff]  }
  0x23   :  { %2039 = vmatpush1.bf16.msra.mxu0 %v3682_v18  ;;  %1576 = vmatprep.subr.bf16.mxu1 %v3963_v0  ;;  %v3750_v18 = vld [vmem:[%s5029_s0 + $0x198] ss:$28 sps:$4 sm:$0xff]  }
  0x24   :  { %2040 = vmatprep.subr.bf16.mxu0 %v3963_v0 }
  0x26   :  { %1577 = vmatpush1.bf16.msra.mxu1 %v3683_v20  ;;  %v3753_v20 = vld [vmem:[%s5029_s0 + $0x1d4] ss:$28 sps:$4 sm:$0xff]  }
  0x27   :  { %2041 = vmatpush1.bf16.msra.mxu0 %v3684_v22  ;;  %1578 = vmatprep.subr.bf16.mxu1 %v3963_v0  ;;  %v3858_v22 = vld [vmem:[%s5028_s1 + $0xf8] sm:$0xff]  }
  0x28   :  { %2042 = vmatprep.subr.bf16.mxu0 %v3963_v0 }
  0x2a   :  { %1579 = vmatpush1.bf16.msra.mxu1 %v3685_v23  ;;  %v3755_v23 = vld [vmem:[%s5029_s0 + $0x1c0] ss:$28 sps:$4 sm:$0xff]  }
  0x2b   :  { %2043 = vmatpush1.bf16.msra.mxu0 %v3686_v24  ;;  %1580 = vmatprep.subr.bf16.mxu1 %v3963_v0  ;;  %v3757_v24 = vld [vmem:[%s5029_s0 + $0x1d0] ss:$28 sps:$4 sm:$0xff]  }
  0x2c   :  { %2044 = vmatprep.subr.bf16.mxu0 %v3963_v0 }
  0x2e   :  { %1581 = vmatpush1.bf16.msra.mxu1 %v3687_v25  ;;  %v3758_v25 = vld [vmem:[%s5029_s0 + $0x1fc] ss:$28 sps:$4 sm:$0xff]  }
  0x2f   :  { %2045 = vmatpush1.bf16.msra.mxu0 %v3688_v26  ;;  %1582 = vmatprep.subr.bf16.mxu1 %v3963_v0  ;;  %v3760_v26 = vld [vmem:[%s5029_s0 + $0x20c] ss:$28 sps:$4 sm:$0xff]  }
  0x30   :  { %2046 = vmatprep.subr.bf16.mxu0 %v3963_v0 }
  0x32   :  { %1583 = vmatpush1.bf16.msra.mxu1 %v3689_v27  ;;  %v3762_v27 = vld [vmem:[%s5029_s0 + $0x1f8] ss:$28 sps:$4 sm:$0xff]  }
  0x33   :  { %2047 = vmatpush1.bf16.msra.mxu0 %v3690_v28  ;;  %1584 = vmatprep.subr.bf16.mxu1 %v3963_v0  ;;  %v3763_v28 = vld [vmem:[%s5029_s0 + $0x208] ss:$28 sps:$4 sm:$0xff]  }
  0x34   :  { %2048 = vmatprep.subr.bf16.mxu0 %v3963_v0 }
  0x36   :  { %1585 = vmatpush1.bf16.msra.mxu1 %v3691_v29  ;;  %v3767_v29 = vld [vmem:[%s5029_s0 + $0x244] ss:$28 sps:$4 sm:$0xff]  }
  0x37   :  { %2049 = vmatpush1.bf16.msra.mxu0 %v3692_v30  ;;  %1586 = vmatprep.subr.bf16.mxu1 %v3963_v0  ;;  %v3769_v30 = vld [vmem:[%s5029_s0 + $0x230] ss:$28 sps:$4 sm:$0xff]  }
  0x38   :  { %2050 = vmatprep.subr.bf16.mxu0 %v3963_v0 }
  0x3a   :  { %1587 = vmatpush1.bf16.msra.mxu1 %v3693_v31  ;;  %v3770_v31 = vld [vmem:[%s5029_s0 + $0x240] ss:$28 sps:$4 sm:$0xff]  }
  0x3b   :  { %2051 = vmatpush1.bf16.msra.mxu0 %v3694_v32  ;;  %1588 = vmatprep.subr.bf16.mxu1 %v3963_v0  ;;  %v3771_v32 = vld [vmem:[%s5029_s0 + $0x26c] ss:$28 sps:$4 sm:$0xff]  }
  0x3c   :  { %2052 = vmatprep.subr.bf16.mxu0 %v3963_v0 }
  0x3e   :  { %1589 = vmatpush1.bf16.msra.mxu1 %v3695_v33  ;;  %v3773_v33 = vld [vmem:[%s5029_s0 + $0x27c] ss:$28 sps:$4 sm:$0xff]  }
  0x3f   :  { %2053 = vmatpush1.bf16.msra.mxu0 %v3696_v34  ;;  %1790 = vmatprep.subr.bf16.mxu1 %v3963_v0  ;;  %v3775_v34 = vld [vmem:[%s5029_s0 + $0x268] ss:$28 sps:$4 sm:$0xff]  }
  0x40   :  { %3260 = vmatprep.subr.bf16.mxu0 %v3964_v40 }
  0x41   :  { %1591 = vmatmul.mubr.bf16.vlgmr.msra.gmra.mrb[0].mxu1 %v3697_v35  ;;  %v3776_v35 = vld [vmem:[%s5029_s0 + $0x278] ss:$28 sps:$4 sm:$0xff]  }
  0x42   :  { %2055 = vmatmul.mubr.bf16.vlgmr.msra.gmra.mrb[0].mxu0 %v3700_v36  ;;  %1791 = vmatpush1.bf16.msra.mxu1 %v3703_v37  ;;  %v3778_v36 = vld [vmem:[%s5029_s0 + $0x2a4] ss:$28 sps:$4 sm:$0xff]   ;;  %v3780_v37 = vld [vmem:[%s5029_s0 + $0x2b4] ss:$28 sps:$4 sm:$0xff]  }
  0x43   :  { %3261 = vmatpush3.bf16.msra.mxu0 %v3704_v38  ;;  %1598 = vmatprep.mubr.bf16.mxu1 %v3705_v39  ;;  %v3782_v38 = vld [vmem:[%s5029_s0 + $0x2a0] ss:$28 sps:$4 sm:$0xff]   ;;  %v3783_v39 = vld [vmem:[%s5029_s0 + $0x2b0] ss:$28 sps:$4 sm:$0xff]  }
  0x44   :  { %2062 = vmatprep.mubr.bf16.mxu0 %v3707_v41  ;;  %1792 = vmatprep.subr.bf16.mxu1 %v3963_v0  ;;  %v3785_v41 = vld [vmem:[%s5029_s0 + $0x2dc] ss:$28 sps:$4 sm:$0xff]  }
  0x45   :  { %3262 = vmatprep.subr.bf16.mxu0 %v3964_v40 }
  0x46   :  { %1793 = vmatpush1.bf16.msra.mxu1 %v3711_v42  ;;  %v3787_v42 = vld [vmem:[%s5029_s0 + $0x2ec] ss:$28 sps:$4 sm:$0xff]  }
  0x47   :  { %1794 = vmatprep.subr.bf16.mxu1 %v3963_v0  ;;  %3263 = vmatpush3.bf16.msra.mxu0 %v3789_v54  ;;  %v3808_v54 = vld [vmem:[%s5029_s0 + $0x394] ss:$28 sps:$4 sm:$0xff]  }
  0x49   :  { %1599 = vmatmul.mubr.bf16.gmra.mrb[4].mxu1 %v3709_v43  ;;  %v3790_v43 = vld [vmem:[%s5029_s0 + $0x2d8] ss:$28 sps:$4 sm:$0xff]  }
  0x4a   :  { %2063 = vmatmul.mubr.bf16.gmra.mrb[4].mxu0 %v3710_v44  ;;  %1606 = vmatprep.mubr.bf16.mxu1 %v3712_v45  ;;  %v3791_v44 = vld [vmem:[%s5029_s0 + $0x2e8] ss:$28 sps:$4 sm:$0xff]   ;;  %v3792_v45 = vld [vmem:[%s5029_s0 + $0x314] ss:$28 sps:$4 sm:$0xff]  }
  0x4b   :  { %2070 = vmatprep.mubr.bf16.mxu0 %v3714_v46  ;;  %1795 = vmatpush1.bf16.msra.mxu1 %v3724_v47  ;;  %v3794_v46 = vld [vmem:[%s5029_s0 + $0x324] ss:$28 sps:$4 sm:$0xff]   ;;  %v3796_v47 = vld [vmem:[%s5029_s0 + $0x310] ss:$28 sps:$4 sm:$0xff]  }
  0x4c   :  { %1796 = vmatprep.subr.bf16.mxu1 %v3963_v0 }
  0x4f   :  { %1797 = vmatpush1.bf16.msra.mxu1 %v3733_v49  ;;  %v3799_v49 = vld [vmem:[%s5029_s0 + $0x34c] ss:$28 sps:$4 sm:$0xff]  }
  0x50   :  { %1798 = vmatprep.subr.bf16.mxu1 %v3963_v0 }
  0x51   :  { %1607 = vmatmul.mubr.bf16.gmra.mrb[8].mxu1 %v3716_v48  ;;  %v3797_v48 = vld [vmem:[%s5029_s0 + $0x320] ss:$28 sps:$4 sm:$0xff]  }
  0x52   :  { %2071 = vmatmul.mubr.bf16.gmra.mrb[8].mxu0 %v3717_v50  ;;  %1614 = vmatprep.mubr.bf16.mxu1 %v3718_v51  ;;  %v3801_v50 = vld [vmem:[%s5029_s0 + $0x35c] ss:$28 sps:$4 sm:$0xff]   ;;  %v3803_v51 = vld [vmem:[%s5029_s0 + $0x348] ss:$28 sps:$4 sm:$0xff]  }
  0x53   :  { %2078 = vmatprep.mubr.bf16.mxu0 %v3720_v52  ;;  %1799 = vmatpush1.bf16.msra.mxu1 %v3744_v53  ;;  %v3804_v52 = vld [vmem:[%s5029_s0 + $0x358] ss:$28 sps:$4 sm:$0xff]   ;;  %v3806_v53 = vld [vmem:[%s5029_s0 + $0x384] ss:$28 sps:$4 sm:$0xff]  }
  0x54   :  { %1800 = vmatprep.subr.bf16.mxu1 %v3963_v0 }
  0x57   :  { %1801 = vmatpush1.bf16.msra.mxu1 %v3756_v55  ;;  %v3810_v55 = vld [vmem:[%s5029_s0 + $0x380] ss:$28 sps:$4 sm:$0xff]  }
  0x58   :  { %1802 = vmatprep.subr.bf16.mxu1 %v3963_v0 }
  0x59   :  { %1615 = vmatmul.mubr.bf16.gmra.mrb[12].mxu1 %v3722_v56  ;;  %v3811_v56 = vld [vmem:[%s5029_s0 + $0x390] ss:$28 sps:$4 sm:$0xff]  }
  0x5a   :  { %2079 = vmatmul.mubr.bf16.gmra.mrb[12].mxu0 %v3723_v57  ;;  %1622 = vmatprep.mubr.bf16.mxu1 %v3725_v58  ;;  %v3812_v57 = vld [vmem:[%s5029_s0 + $0x3bc] ss:$28 sps:$4 sm:$0xff]   ;;  %v3814_v58 = vld [vmem:[%s5029_s0 + $0x3cc] ss:$28 sps:$4 sm:$0xff]  }
  0x5b   :  { %2086 = vmatprep.mubr.bf16.mxu0 %v3727_v59  ;;  %1803 = vmatpush1.bf16.msra.mxu1 %v3764_v60  ;;  %v3816_v59 = vld [vmem:[%s5029_s0 + $0x3b8] ss:$28 sps:$4 sm:$0xff]   ;;  %v3817_v60 = vld [vmem:[%s5029_s0 + $0x3c8] ss:$28 sps:$4 sm:$0xff]  }
  0x5c   :  { %1804 = vmatprep.subr.bf16.mxu1 %v3963_v0 }
  0x5f   :  { %1805 = vmatpush1.bf16.msra.mxu1 %v3777_v61  ;;  %v3819_v61 = vld [vmem:[%s5029_s0 + $0x3f4] ss:$28 sps:$4 sm:$0xff]  }
  0x60   :  { %1806 = vmatprep.subr.bf16.mxu1 %v3963_v0 }
  0x61   :  { %1623 = vmatmul.mubr.bf16.gmra.mrb[16].mxu1 %v3729_v62  ;;  %v3821_v62 = vld [vmem:[%s5029_s0 + $0x404] ss:$28 sps:$4 sm:$0xff]  }
  0x62   :  { %2087 = vmatmul.mubr.bf16.gmra.mrb[16].mxu0 %v3730_v63  ;;  %1630 = vmatprep.mubr.bf16.mxu1 %v3731_v1  ;;  %v3823_v63 = vld [vmem:[%s5029_s0 + $0x3f0] ss:$28 sps:$4 sm:$0xff]   ;;  %v3824_v1 = vld [vmem:[%s5029_s0 + $0x400] ss:$28 sps:$4 sm:$0xff]  }
  0x63   :  { %2094 = vmatprep.mubr.bf16.mxu0 %v3734_v2  ;;  %1807 = vmatpush1.bf16.msra.mxu1 %v3784_v3  ;;  %v3825_v2 = vld [vmem:[%s5029_s0 + $0x42c] ss:$28 sps:$4 sm:$0xff]   ;;  %v3828_v3 = vld [vmem:[%s5029_s0 + $0x43c] ss:$28 sps:$4 sm:$0xff]  }
  0x64   :  { %1808 = vmatprep.subr.bf16.mxu1 %v3963_v0 }
  0x67   :  { %1809 = vmatpush1.bf16.msra.mxu1 %v3798_v4  ;;  %v3830_v4 = vld [vmem:[%s5029_s0 + $0x428] ss:$28 sps:$4 sm:$0xff]  }
  0x68   :  { %1810 = vmatprep.subr.bf16.mxu1 %v3963_v0 }
  0x69   :  { %1631 = vmatmul.mubr.bf16.gmra.mrb[20].mxu1 %v3736_v5  ;;  %v3831_v5 = vld [vmem:[%s5029_s0 + $0x438] ss:$28 sps:$4 sm:$0xff]  }
  0x6a   :  { %2095 = vmatmul.mubr.bf16.gmra.mrb[20].mxu0 %v3737_v6  ;;  %1638 = vmatprep.mubr.bf16.mxu1 %v3738_v7  ;;  %v3832_v6 = vld [vmem:[%s5029_s0 + $0x464] ss:$28 sps:$4 sm:$0xff]   ;;  %v3834_v7 = vld [vmem:[%s5029_s0 + $0x474] ss:$28 sps:$4 sm:$0xff]  }
  0x6b   :  { %2102 = vmatprep.mubr.bf16.mxu0 %v3740_v8  ;;  %1811 = vmatpush1.bf16.msra.mxu1 %v3805_v9  ;;  %v3836_v8 = vld [vmem:[%s5029_s0 + $0x460] ss:$28 sps:$4 sm:$0xff]   ;;  %v3837_v9 = vld [vmem:[%s5029_s0 + $0x470] ss:$28 sps:$4 sm:$0xff]  }
  0x6c   :  { %1812 = vmatprep.subr.bf16.mxu1 %v3963_v0 }
  0x6f   :  { %1813 = vmatpush1.bf16.msra.mxu1 %v3818_v11  ;;  %v3841_v11 = vld [vmem:[%s5029_s0 + $0x4ac] ss:$28 sps:$4 sm:$0xff]  }
  0x70   :  { %1814 = vmatprep.subr.bf16.mxu1 %v3963_v0 }
  0x71   :  { %1639 = vmatmul.mubr.bf16.gmra.mrb[24].mxu1 %v3742_v10  ;;  %v3839_v10 = vld [vmem:[%s5029_s0 + $0x49c] ss:$28 sps:$4 sm:$0xff]  }
  0x72   :  { %2103 = vmatmul.mubr.bf16.gmra.mrb[24].mxu0 %v3743_v12  ;;  %1646 = vmatprep.mubr.bf16.mxu1 %v3745_v13  ;;  %v3843_v12 = vld [vmem:[%s5029_s0 + $0x498] ss:$28 sps:$4 sm:$0xff]   ;;  %v3844_v13 = vld [vmem:[%s5029_s0 + $0x4a8] ss:$28 sps:$4 sm:$0xff]  }
  0x73   :  { %2110 = vmatprep.mubr.bf16.mxu0 %v3747_v14  ;;  %1815 = vmatpush1.bf16.msra.mxu1 %v3827_v15  ;;  %v3845_v14 = vld [vmem:[%s5029_s0 + $0x4d4] ss:$28 sps:$4 sm:$0xff]   ;;  %v3847_v15 = vld [vmem:[%s5029_s0 + $0x4e4] ss:$28 sps:$4 sm:$0xff]  }
  0x74   :  { %1816 = vmatprep.subr.bf16.mxu1 %v3963_v0 }
  0x77   :  { %1817 = vmatpush1.bf16.msra.mxu1 %v3838_v17  ;;  %v3851_v17 = vld [vmem:[%s5029_s0 + $0x4e0] ss:$28 sps:$4 sm:$0xff]  }
  0x78   :  { %1818 = vmatprep.subr.bf16.mxu1 %v3963_v0 }
  0x79   :  { %1647 = vmatmul.mubr.bf16.gmra.mrb[28].mxu1 %v3749_v16  ;;  %v3849_v16 = vld [vmem:[%s5029_s0 + $0x4d0] ss:$28 sps:$4 sm:$0xff]  }
  0x7a   :  { %2111 = vmatmul.mubr.bf16.gmra.mrb[28].mxu0 %v3750_v18  ;;  %1654 = vmatprep.mubr.bf16.mxu1 %v3751_v19  ;;  %v3852_v18 = vld [vmem:[%s5029_s0 + $0x50c] ss:$28 sps:$4 sm:$0xff]   ;;  %v3854_v19 = vld [vmem:[%s5029_s0 + $0x51c] ss:$28 sps:$4 sm:$0xff]  }
  0x7b   :  { %2118 = vmatprep.mubr.bf16.mxu0 %v3753_v20  ;;  %1819 = vmatpush1.bf16.msra.mxu1 %v3850_v21  ;;  %v207_v20 = vld [vmem:[%s5029_s0 + $0x540] sm:$0xff]  ;;  %v209_v21 = vld [vmem:[%s5029_s0 + $0x550] sm:$0xff] }
  0x7c   :  { %1820 = vmatprep.subr.bf16.mxu1 %v3963_v0  ;;  %v3765_v0 = vld [vmem:[%s5029_s0 + $0x234] ss:$28 sps:$4 sm:$0xff]  }
  0x7f   :  { %1821 = vmatpush1.bf16.msra.mxu1 %v3858_v22  ;;  %v3856_v22 = vld [vmem:[%s5029_s0 + $0x508] ss:$28 sps:$4 sm:$0xff]  }
  0x81   :  { %1655 = vmatmul.mubr.bf16.gmra.mrb[32].mxu1 %v3755_v23  ;;  %v3857_v23 = vld [vmem:[%s5029_s0 + $0x518] ss:$28 sps:$4 sm:$0xff]  }
  0x82   :  { %2119 = vmatmul.mubr.bf16.gmra.mrb[32].mxu0 %v3757_v24  ;;  %1662 = vmatprep.mubr.bf16.mxu1 %v3758_v25  ;;  %v3054_v24 = vcombine.high %v207_v20, %v207_v20  ;;  %v3058_v25 = vcombine.high %v209_v21, %v209_v21 }
  0x83   :  { %2126 = vmatprep.mubr.bf16.mxu0 %v3760_v26  ;;  %v3053_v26 = vcombine.low %v207_v20, %v207_v20  ;;  %v3937_v20 = vld [vmem:[%s5029_s0 + $0x3f8] ss:$28 sps:$4 sm:$0xff]  }
  0x89   :  { %1663 = vmatmul.mubr.bf16.gmra.mrb[36].mxu1 %v3762_v27  ;;  %v3057_v27 = vcombine.low %v209_v21, %v209_v21  ;;  %v3938_v21 = vld [vmem:[%s5029_s0 + $0x408] ss:$28 sps:$4 sm:$0xff]  }
  0x8a   :  { %2127 = vmatmul.mubr.bf16.gmra.mrb[36].mxu0 %v3763_v28  ;;  %1670 = vmatprep.mubr.bf16.mxu1 %v3765_v0  ;;  %v3865_v28 = vld [vmem:[%s5029_s0 + $0xc] ss:$28 sps:$4 sm:$0xff]  }
  0x8b   :  { %2134 = vmatprep.mubr.bf16.mxu0 %v3767_v29  ;;  %v3863_v0 = vld [vmem:[%s5029_s0 + $0x8] ss:$28 sps:$4 sm:$0xff]   ;;  %v3866_v29 = vld [vmem:[%s5029_s0 + $0x18] ss:$28 sps:$4 sm:$0xff]  }
  0x91   :  { %1671 = vmatmul.mubr.bf16.gmra.mrb[40].mxu1 %v3769_v30  ;;  %v3867_v30 = vld [vmem:[%s5029_s0 + $0x44] ss:$28 sps:$4 sm:$0xff]  }
  0x92   :  { %2135 = vmatmul.mubr.bf16.gmra.mrb[40].mxu0 %v3770_v31  ;;  %1678 = vmatprep.mubr.bf16.mxu1 %v3771_v32  ;;  %v3869_v31 = vld [vmem:[%s5029_s0 + $0x40] ss:$28 sps:$4 sm:$0xff]   ;;  %v3870_v32 = vld [vmem:[%s5029_s0 + $0x50] ss:$28 sps:$4 sm:$0xff]  }
  0x93   :  { %2142 = vmatprep.mubr.bf16.mxu0 %v3773_v33  ;;  %v3871_v33 = vld [vmem:[%s5029_s0 + $0x7c] ss:$28 sps:$4 sm:$0xff]  }
  0x99   :  { %1679 = vmatmul.mubr.bf16.gmra.mrb[44].mxu1 %v3775_v34  ;;  %v3873_v34 = vld [vmem:[%s5029_s0 + $0x78] ss:$28 sps:$4 sm:$0xff]  }
  0x9a   :  { %2143 = vmatmul.mubr.bf16.gmra.mrb[44].mxu0 %v3776_v35  ;;  %1686 = vmatprep.mubr.bf16.mxu1 %v3778_v36  ;;  %v3874_v35 = vld [vmem:[%s5029_s0 + $0x88] ss:$28 sps:$4 sm:$0xff]   ;;  %v3875_v36 = vld [vmem:[%s5029_s0 + $0xb4] ss:$28 sps:$4 sm:$0xff]  }
  0x9b   :  { %2150 = vmatprep.mubr.bf16.mxu0 %v3780_v37  ;;  %v3877_v37 = vld [vmem:[%s5029_s0 + $0xb0] ss:$28 sps:$4 sm:$0xff]  }
  0xa1   :  { %1687 = vmatmul.mubr.bf16.gmra.mrb[48].mxu1 %v3782_v38  ;;  %v3878_v38 = vld [vmem:[%s5029_s0 + $0xc0] ss:$28 sps:$4 sm:$0xff]  }
  0xa2   :  { %2151 = vmatmul.mubr.bf16.gmra.mrb[48].mxu0 %v3783_v39  ;;  %1694 = vmatprep.mubr.bf16.mxu1 %v3785_v41  ;;  %v3879_v39 = vld [vmem:[%s5029_s0 + $0xec] ss:$28 sps:$4 sm:$0xff]  }
  0xa3   :  { %2158 = vmatprep.mubr.bf16.mxu0 %v3787_v42  ;;  %v3881_v41 = vld [vmem:[%s5029_s0 + $0xe8] ss:$28 sps:$4 sm:$0xff]   ;;  %v3882_v42 = vld [vmem:[%s5029_s0 + $0xf8] ss:$28 sps:$4 sm:$0xff]  }
  0xa9   :  { %1695 = vmatmul.mubr.bf16.gmra.mrb[52].mxu1 %v3790_v43  ;;  %v3883_v43 = vld [vmem:[%s5029_s0 + $0x124] ss:$28 sps:$4 sm:$0xff]  }
  0xaa   :  { %2159 = vmatmul.mubr.bf16.gmra.mrb[52].mxu0 %v3791_v44  ;;  %1702 = vmatprep.mubr.bf16.mxu1 %v3792_v45  ;;  %v3885_v44 = vld [vmem:[%s5029_s0 + $0x120] ss:$28 sps:$4 sm:$0xff]   ;;  %v3886_v45 = vld [vmem:[%s5029_s0 + $0x130] ss:$28 sps:$4 sm:$0xff]  }
  0xab   :  { %2166 = vmatprep.mubr.bf16.mxu0 %v3794_v46  ;;  %v3887_v46 = vld [vmem:[%s5029_s0 + $0x15c] ss:$28 sps:$4 sm:$0xff]  }
  0xb1   :  { %1703 = vmatmul.mubr.bf16.gmra.mrb[56].mxu1 %v3796_v47  ;;  %v3889_v47 = vld [vmem:[%s5029_s0 + $0x158] ss:$28 sps:$4 sm:$0xff]  }
  0xb2   :  { %2167 = vmatmul.mubr.bf16.gmra.mrb[56].mxu0 %v3797_v48  ;;  %1710 = vmatprep.mubr.bf16.mxu1 %v3799_v49  ;;  %v3890_v48 = vld [vmem:[%s5029_s0 + $0x168] ss:$28 sps:$4 sm:$0xff]   ;;  %v3891_v49 = vld [vmem:[%s5029_s0 + $0x194] ss:$28 sps:$4 sm:$0xff]  }
  0xb3   :  { %2174 = vmatprep.mubr.bf16.mxu0 %v3801_v50  ;;  %v3893_v50 = vld [vmem:[%s5029_s0 + $0x190] ss:$28 sps:$4 sm:$0xff]  }
  0xb9   :  { %1711 = vmatmul.mubr.bf16.gmra.mrb[60].mxu1 %v3803_v51  ;;  %v3894_v51 = vld [vmem:[%s5029_s0 + $0x1a0] ss:$28 sps:$4 sm:$0xff]  }
  0xba   :  { %2175 = vmatmul.mubr.bf16.gmra.mrb[60].mxu0 %v3804_v52  ;;  %1718 = vmatprep.mubr.bf16.mxu1 %v3806_v53  ;;  %v3895_v52 = vld [vmem:[%s5029_s0 + $0x1cc] ss:$28 sps:$4 sm:$0xff]  }
  0xbb   :  { %2182 = vmatprep.mubr.bf16.mxu0 %v3808_v54  ;;  %v3897_v53 = vld [vmem:[%s5029_s0 + $0x1c8] ss:$28 sps:$4 sm:$0xff]   ;;  %v3898_v54 = vld [vmem:[%s5029_s0 + $0x1d8] ss:$28 sps:$4 sm:$0xff]  }
  0xc1   :  { %1719 = vmatmul.mubr.bf16.gmra.mrb[64].mxu1 %v3810_v55  ;;  %v3899_v55 = vld [vmem:[%s5029_s0 + $0x204] ss:$28 sps:$4 sm:$0xff]  }
  0xc2   :  { %2183 = vmatmul.mubr.bf16.gmra.mrb[64].mxu0 %v3811_v56  ;;  %1726 = vmatprep.mubr.bf16.mxu1 %v3812_v57  ;;  %v3901_v56 = vld [vmem:[%s5029_s0 + $0x200] ss:$28 sps:$4 sm:$0xff]   ;;  %v3902_v57 = vld [vmem:[%s5029_s0 + $0x210] ss:$28 sps:$4 sm:$0xff]  }
  0xc3   :  { %2190 = vmatprep.mubr.bf16.mxu0 %v3814_v58  ;;  %v3903_v58 = vld [vmem:[%s5029_s0 + $0x23c] ss:$28 sps:$4 sm:$0xff]  }
  0xc9   :  { %1727 = vmatmul.mubr.bf16.gmra.mrb[68].mxu1 %v3816_v59  ;;  %v3905_v59 = vld [vmem:[%s5029_s0 + $0x238] ss:$28 sps:$4 sm:$0xff]  }
  0xca   :  { %2191 = vmatmul.mubr.bf16.gmra.mrb[68].mxu0 %v3817_v60  ;;  %1734 = vmatprep.mubr.bf16.mxu1 %v3819_v61  ;;  %v3906_v60 = vld [vmem:[%s5029_s0 + $0x248] ss:$28 sps:$4 sm:$0xff]   ;;  %v3907_v61 = vld [vmem:[%s5029_s0 + $0x274] ss:$28 sps:$4 sm:$0xff]  }
  0xcb   :  { %2198 = vmatprep.mubr.bf16.mxu0 %v3821_v62  ;;  %v3909_v62 = vld [vmem:[%s5029_s0 + $0x270] ss:$28 sps:$4 sm:$0xff]  }
  0xd1   :  { %1735 = vmatmul.mubr.bf16.gmra.mrb[72].mxu1 %v3823_v63  ;;  %v3910_v63 = vld [vmem:[%s5029_s0 + $0x280] ss:$28 sps:$4 sm:$0xff]  }
  0xd2   :  { %2199 = vmatmul.mubr.bf16.gmra.mrb[72].mxu0 %v3824_v1  ;;  %1742 = vmatprep.mubr.bf16.mxu1 %v3825_v2  ;;  %v3911_v1 = vld [vmem:[%s5029_s0 + $0x2ac] ss:$28 sps:$4 sm:$0xff]  }
  0xd3   :  { %2206 = vmatprep.mubr.bf16.mxu0 %v3828_v3  ;;  %v3913_v2 = vld [vmem:[%s5029_s0 + $0x2a8] ss:$28 sps:$4 sm:$0xff]   ;;  %v3914_v3 = vld [vmem:[%s5029_s0 + $0x2b8] ss:$28 sps:$4 sm:$0xff]  }
  0xd9   :  { %1743 = vmatmul.mubr.bf16.gmra.mrb[76].mxu1 %v3830_v4  ;;  %v3915_v4 = vld [vmem:[%s5029_s0 + $0x2e4] ss:$28 sps:$4 sm:$0xff]  }
  0xda   :  { %2207 = vmatmul.mubr.bf16.gmra.mrb[76].mxu0 %v3831_v5  ;;  %1750 = vmatprep.mubr.bf16.mxu1 %v3832_v6  ;;  %v3917_v5 = vld [vmem:[%s5029_s0 + $0x2e0] ss:$28 sps:$4 sm:$0xff]   ;;  %v3918_v6 = vld [vmem:[%s5029_s0 + $0x2f0] ss:$28 sps:$4 sm:$0xff]  }
  0xdb   :  { %2214 = vmatprep.mubr.bf16.mxu0 %v3834_v7  ;;  %v3919_v7 = vld [vmem:[%s5029_s0 + $0x31c] ss:$28 sps:$4 sm:$0xff]  }
  0xe1   :  { %1751 = vmatmul.mubr.bf16.gmra.mrb[80].mxu1 %v3836_v8  ;;  %v3921_v8 = vld [vmem:[%s5029_s0 + $0x318] ss:$28 sps:$4 sm:$0xff]  }
  0xe2   :  { %2215 = vmatmul.mubr.bf16.gmra.mrb[80].mxu0 %v3837_v9  ;;  %1758 = vmatprep.mubr.bf16.mxu1 %v3839_v10  ;;  %v3922_v9 = vld [vmem:[%s5029_s0 + $0x328] ss:$28 sps:$4 sm:$0xff]   ;;  %v3923_v10 = vld [vmem:[%s5029_s0 + $0x354] ss:$28 sps:$4 sm:$0xff]  }
  0xe3   :  { %2222 = vmatprep.mubr.bf16.mxu0 %v3841_v11  ;;  %v3925_v11 = vld [vmem:[%s5029_s0 + $0x350] ss:$28 sps:$4 sm:$0xff]  }
  0xe9   :  { %1759 = vmatmul.mubr.bf16.gmra.mrb[84].mxu1 %v3843_v12  ;;  %v3926_v12 = vld [vmem:[%s5029_s0 + $0x360] ss:$28 sps:$4 sm:$0xff]  }
  0xea   :  { %2223 = vmatmul.mubr.bf16.gmra.mrb[84].mxu0 %v3844_v13  ;;  %1766 = vmatprep.mubr.bf16.mxu1 %v3845_v14  ;;  %v3927_v13 = vld [vmem:[%s5029_s0 + $0x38c] ss:$28 sps:$4 sm:$0xff]  }
  0xeb   :  { %2230 = vmatprep.mubr.bf16.mxu0 %v3847_v15  ;;  %v3929_v14 = vld [vmem:[%s5029_s0 + $0x388] ss:$28 sps:$4 sm:$0xff]   ;;  %v3930_v15 = vld [vmem:[%s5029_s0 + $0x398] ss:$28 sps:$4 sm:$0xff]  }
  0xf1   :  { %1767 = vmatmul.mubr.bf16.gmra.mrb[88].mxu1 %v3849_v16  ;;  %v3931_v16 = vld [vmem:[%s5029_s0 + $0x3c4] ss:$28 sps:$4 sm:$0xff]  }
  0xf2   :  { %2231 = vmatmul.mubr.bf16.gmra.mrb[88].mxu0 %v3851_v17  ;;  %1774 = vmatprep.mubr.bf16.mxu1 %v3852_v18  ;;  %v3933_v17 = vld [vmem:[%s5029_s0 + $0x3c0] ss:$28 sps:$4 sm:$0xff]   ;;  %v3934_v18 = vld [vmem:[%s5029_s0 + $0x3d0] ss:$28 sps:$4 sm:$0xff]  }
  0xf3   :  { %2238 = vmatprep.mubr.bf16.mxu0 %v3854_v19  ;;  %v3935_v19 = vld [vmem:[%s5029_s0 + $0x3fc] ss:$28 sps:$4 sm:$0xff]  }
  0xf9   :  { %1775 = vmatmul.mubr.bf16.gmra.mrb[92].mxu1 %v3856_v22  ;;  %v3939_v22 = vld [vmem:[%s5029_s0 + $0x434] ss:$28 sps:$4 sm:$0xff]  }
  0xfa   :  { %2239 = vmatmul.mubr.bf16.gmra.mrb[92].mxu0 %v3857_v23  ;;  %1782 = vmatprep.mubr.bf16.mxu1 %v3054_v24  ;;  %v3941_v23 = vld [vmem:[%s5029_s0 + $0x430] ss:$28 sps:$4 sm:$0xff]   ;;  %v3942_v24 = vld [vmem:[%s5029_s0 + $0x440] ss:$28 sps:$4 sm:$0xff]  }
  0xfb   :  { %2246 = vmatprep.mubr.bf16.mxu0 %v3058_v25  ;;  %v3943_v25 = vld [vmem:[%s5029_s0 + $0x46c] ss:$28 sps:$4 sm:$0xff]  }
 0x101   :  { %1783 = vmatmul.mubr.bf16.gmra.mrb[96].mxu1 %v3053_v26  ;;  %v3945_v26 = vld [vmem:[%s5029_s0 + $0x468] ss:$28 sps:$4 sm:$0xff]  }
 0x102   :  { %2247 = vmatmul.mubr.bf16.gmra.mrb[96].mxu0 %v3057_v27  ;;  %1822 = vmatprep.mubr.bf16.mxu1 %v3865_v28  ;;  %v3946_v27 = vld [vmem:[%s5029_s0 + $0x478] ss:$28 sps:$4 sm:$0xff]   ;;  %v3947_v28 = vld [vmem:[%s5029_s0 + $0x4a4] ss:$28 sps:$4 sm:$0xff]  }
 0x103   :  { %3264 = vmatprep.mubr.msk.bf16.mxu0 %vm3965_vm0, %v3964_v40 }
 0x109   :  { %1823 = vmatmul.mubr.bf16.vlgmr.msra.gmra.mrb[0].mxu1 %v3863_v0  ;;  %v3949_v0 = vld [vmem:[%s5029_s0 + $0x4a0] ss:$28 sps:$4 sm:$0xff]  }
 0x10a   :  { %3265 = vmatmul.mubr.msk.bf16.vlgmr.msra.gmra.mrb[0].mxu0 %vm1482_vm1, %v3866_v29  ;;  %1830 = vmatprep.mubr.bf16.mxu1 %v3867_v30  ;;  %v3950_v29 = vld [vmem:[%s5029_s0 + $0x4b0] ss:$28 sps:$4 sm:$0xff]   ;;  %v3951_v30 = vld [vmem:[%s5029_s0 + $0x4dc] ss:$28 sps:$4 sm:$0xff]  }
 0x10b   :  { %3268 = vmatprep.mubr.msk.bf16.mxu0 %vm3965_vm0, %v3964_v40 }
 0x111   :  { %1831 = vmatmul.mubr.bf16.gmra.mrb[4].mxu1 %v3869_v31  ;;  %v3953_v31 = vld [vmem:[%s5029_s0 + $0x4d8] ss:$28 sps:$4 sm:$0xff]  }
 0x112   :  { %3269 = vmatmul.mubr.msk.bf16.gmra.mrb[4].mxu0 %vm1482_vm1, %v3870_v32  ;;  %1838 = vmatprep.mubr.bf16.mxu1 %v3871_v33  ;;  %v3954_v32 = vld [vmem:[%s5029_s0 + $0x4e8] ss:$28 sps:$4 sm:$0xff]   ;;  %v3955_v33 = vld [vmem:[%s5029_s0 + $0x514] ss:$28 sps:$4 sm:$0xff]  }
 0x113   :  { %3272 = vmatprep.mubr.msk.bf16.mxu0 %vm3965_vm0, %v3964_v40 }
 0x119   :  { %1839 = vmatmul.mubr.bf16.gmra.mrb[8].mxu1 %v3873_v34  ;;  %v208_v34 = vld [vmem:[%s5029_s0 + $0x548] sm:$0xff] }
 0x11a   :  { %3273 = vmatmul.mubr.msk.bf16.gmra.mrb[8].mxu0 %vm1482_vm1, %v3874_v35  ;;  %1846 = vmatprep.mubr.bf16.mxu1 %v3875_v36  ;;  %v3957_v35 = vld [vmem:[%s5029_s0 + $0x510] ss:$28 sps:$4 sm:$0xff]   ;;  %v3958_v36 = vld [vmem:[%s5029_s0 + $0x520] ss:$28 sps:$4 sm:$0xff]  }
 0x11b   :  { %3276 = vmatprep.mubr.msk.bf16.mxu0 %vm3965_vm0, %v3964_v40 }
 0x121   :  { %1847 = vmatmul.mubr.bf16.gmra.mrb[12].mxu1 %v3877_v37  ;;  %v3056_v37 = vcombine.high %v208_v34, %v208_v34 }
 0x122   :  { %3277 = vmatmul.mubr.msk.bf16.gmra.mrb[12].mxu0 %vm1482_vm1, %v3878_v38  ;;  %1854 = vmatprep.mubr.bf16.mxu1 %v3879_v39  ;;  %v3055_v38 = vcombine.low %v208_v34, %v208_v34  ;;  %v3961_v39 = vld [vmem:[%s5029_s0 + $0x558] ss:$0 sps:$4 sm:$0xff]  }
 0x123   :  { %3280 = vmatprep.mubr.msk.bf16.mxu0 %vm3965_vm0, %v3964_v40 }
 0x129   :  { %1855 = vmatmul.mubr.bf16.gmra.mrb[16].mxu1 %v3881_v41  ;;  %v4780_v41 = vld [vmem:[%s5030_s2] ss:$0 sm:$0xff] }
 0x12a   :  { %3281 = vmatmul.mubr.msk.bf16.gmra.mrb[16].mxu0 %vm1482_vm1, %v3882_v42  ;;  %1862 = vmatprep.mubr.bf16.mxu1 %v3883_v43 }
 0x12b   :  { %3284 = vmatprep.mubr.msk.bf16.mxu0 %vm3965_vm0, %v3964_v40 }
 0x131   :  { %1863 = vmatmul.mubr.bf16.gmra.mrb[20].mxu1 %v3885_v44 }
 0x132   :  { %3285 = vmatmul.mubr.msk.bf16.gmra.mrb[20].mxu0 %vm1482_vm1, %v3886_v45  ;;  %1870 = vmatprep.mubr.bf16.mxu1 %v3887_v46 }
 0x133   :  { %3288 = vmatprep.mubr.msk.bf16.mxu0 %vm3965_vm0, %v3964_v40 }
 0x139   :  { %1871 = vmatmul.mubr.bf16.gmra.mrb[24].mxu1 %v3889_v47 }
 0x13a   :  { %3289 = vmatmul.mubr.msk.bf16.gmra.mrb[24].mxu0 %vm1482_vm1, %v3890_v48  ;;  %1878 = vmatprep.mubr.bf16.mxu1 %v3891_v49 }
 0x13b   :  { %3292 = vmatprep.mubr.msk.bf16.mxu0 %vm3965_vm0, %v3964_v40 }
 0x141   :  { %1879 = vmatmul.mubr.bf16.gmra.mrb[28].mxu1 %v3893_v50 }
 0x142   :  { %3293 = vmatmul.mubr.msk.bf16.gmra.mrb[28].mxu0 %vm1482_vm1, %v3894_v51  ;;  %1886 = vmatprep.mubr.bf16.mxu1 %v3895_v52 }
 0x143   :  { %3296 = vmatprep.mubr.msk.bf16.mxu0 %vm3965_vm0, %v3964_v40 }
 0x149   :  { %1887 = vmatmul.mubr.bf16.gmra.mrb[32].mxu1 %v3897_v53 }
 0x14a   :  { %3297 = vmatmul.mubr.msk.bf16.gmra.mrb[32].mxu0 %vm1482_vm1, %v3898_v54  ;;  %1894 = vmatprep.mubr.bf16.mxu1 %v3899_v55 }
 0x14b   :  { %3300 = vmatprep.mubr.msk.bf16.mxu0 %vm3965_vm0, %v3964_v40 }
 0x151   :  { %1895 = vmatmul.mubr.bf16.gmra.mrb[36].mxu1 %v3901_v56 }
 0x152   :  { %3301 = vmatmul.mubr.msk.bf16.gmra.mrb[36].mxu0 %vm1482_vm1, %v3902_v57  ;;  %1902 = vmatprep.mubr.bf16.mxu1 %v3903_v58 }
 0x153   :  { %3304 = vmatprep.mubr.msk.bf16.mxu0 %vm3965_vm0, %v3964_v40 }
 0x159   :  { %1903 = vmatmul.mubr.bf16.gmra.mrb[40].mxu1 %v3905_v59 }
 0x15a   :  { %3305 = vmatmul.mubr.msk.bf16.gmra.mrb[40].mxu0 %vm1482_vm1, %v3906_v60  ;;  %1910 = vmatprep.mubr.bf16.mxu1 %v3907_v61 }
 0x15b   :  { %3308 = vmatprep.mubr.msk.bf16.mxu0 %vm3965_vm0, %v3964_v40 }
 0x161   :  { %1911 = vmatmul.mubr.bf16.gmra.mrb[44].mxu1 %v3909_v62 }
 0x162   :  { %3309 = vmatmul.mubr.msk.bf16.gmra.mrb[44].mxu0 %vm1482_vm1, %v3910_v63  ;;  %1918 = vmatprep.mubr.bf16.mxu1 %v3911_v1 }
 0x163   :  { %3312 = vmatprep.mubr.msk.bf16.mxu0 %vm3965_vm0, %v3964_v40 }
 0x169   :  { %1919 = vmatmul.mubr.bf16.gmra.mrb[48].mxu1 %v3913_v2 }
 0x16a   :  { %3313 = vmatmul.mubr.msk.bf16.gmra.mrb[48].mxu0 %vm1482_vm1, %v3914_v3  ;;  %1926 = vmatprep.mubr.bf16.mxu1 %v3915_v4 }
 0x16b   :  { %3316 = vmatprep.mubr.msk.bf16.mxu0 %vm3965_vm0, %v3964_v40 }
 0x171   :  { %1927 = vmatmul.mubr.bf16.gmra.mrb[52].mxu1 %v3917_v5 }
 0x172   :  { %3317 = vmatmul.mubr.msk.bf16.gmra.mrb[52].mxu0 %vm1482_vm1, %v3918_v6  ;;  %1934 = vmatprep.mubr.bf16.mxu1 %v3919_v7 }
 0x173   :  { %3320 = vmatprep.mubr.msk.bf16.mxu0 %vm3965_vm0, %v3964_v40 }
 0x179   :  { %1935 = vmatmul.mubr.bf16.gmra.mrb[56].mxu1 %v3921_v8 }
 0x17a   :  { %3321 = vmatmul.mubr.msk.bf16.gmra.mrb[56].mxu0 %vm1482_vm1, %v3922_v9  ;;  %1942 = vmatprep.mubr.bf16.mxu1 %v3923_v10 }
 0x17b   :  { %3324 = vmatprep.mubr.msk.bf16.mxu0 %vm3965_vm0, %v3964_v40 }
 0x181   :  { %1943 = vmatmul.mubr.bf16.gmra.mrb[60].mxu1 %v3925_v11 }
 0x182   :  { %3325 = vmatmul.mubr.msk.bf16.gmra.mrb[60].mxu0 %vm1482_vm1, %v3926_v12  ;;  %1950 = vmatprep.mubr.bf16.mxu1 %v3927_v13 }
 0x183   :  { %3328 = vmatprep.mubr.msk.bf16.mxu0 %vm3965_vm0, %v3964_v40 }
 0x189   :  { %1951 = vmatmul.mubr.bf16.gmra.mrb[64].mxu1 %v3929_v14 }
 0x18a   :  { %3329 = vmatmul.mubr.msk.bf16.gmra.mrb[64].mxu0 %vm1482_vm1, %v3930_v15  ;;  %1958 = vmatprep.mubr.bf16.mxu1 %v3931_v16 }
 0x18b   :  { %3332 = vmatprep.mubr.msk.bf16.mxu0 %vm3965_vm0, %v3964_v40 }
 0x191   :  { %1959 = vmatmul.mubr.bf16.gmra.mrb[68].mxu1 %v3933_v17 }
 0x192   :  { %3333 = vmatmul.mubr.msk.bf16.gmra.mrb[68].mxu0 %vm1482_vm1, %v3934_v18  ;;  %1966 = vmatprep.mubr.bf16.mxu1 %v3935_v19 }
 0x193   :  { %3336 = vmatprep.mubr.msk.bf16.mxu0 %vm3965_vm0, %v3964_v40 }
 0x199   :  { %1967 = vmatmul.mubr.bf16.gmra.mrb[72].mxu1 %v3937_v20 }
 0x19a   :  { %3337 = vmatmul.mubr.msk.bf16.gmra.mrb[72].mxu0 %vm1482_vm1, %v3938_v21  ;;  %1974 = vmatprep.mubr.bf16.mxu1 %v3939_v22 }
 0x19b   :  { %3340 = vmatprep.mubr.msk.bf16.mxu0 %vm3965_vm0, %v3964_v40 }
 0x1a1   :  { %1975 = vmatmul.mubr.bf16.gmra.mrb[76].mxu1 %v3941_v23 }
 0x1a2   :  { %3341 = vmatmul.mubr.msk.bf16.gmra.mrb[76].mxu0 %vm1482_vm1, %v3942_v24  ;;  %1982 = vmatprep.mubr.bf16.mxu1 %v3943_v25 }
 0x1a3   :  { %3344 = vmatprep.mubr.msk.bf16.mxu0 %vm3965_vm0, %v3964_v40 }
 0x1a9   :  { %1983 = vmatmul.mubr.bf16.gmra.mrb[80].mxu1 %v3945_v26 }
 0x1aa   :  { %3345 = vmatmul.mubr.msk.bf16.gmra.mrb[80].mxu0 %vm1482_vm1, %v3946_v27  ;;  %1990 = vmatprep.mubr.bf16.mxu1 %v3947_v28 }
 0x1ab   :  { %3348 = vmatprep.mubr.msk.bf16.mxu0 %vm3965_vm0, %v3964_v40 }
 0x1b1   :  { %1991 = vmatmul.mubr.bf16.gmra.mrb[84].mxu1 %v3949_v0 }
 0x1b2   :  { %3349 = vmatmul.mubr.msk.bf16.gmra.mrb[84].mxu0 %vm1482_vm1, %v3950_v29  ;;  %1998 = vmatprep.mubr.bf16.mxu1 %v3951_v30 }
 0x1b3   :  { %3352 = vmatprep.mubr.msk.bf16.mxu0 %vm3965_vm0, %v3964_v40 }
 0x1b9   :  { %1999 = vmatmul.mubr.bf16.gmra.mrb[88].mxu1 %v3953_v31 }
 0x1ba   :  { %3353 = vmatmul.mubr.msk.bf16.gmra.mrb[88].mxu0 %vm1482_vm1, %v3954_v32  ;;  %2006 = vmatprep.mubr.bf16.mxu1 %v3955_v33 }
 0x1bb   :  { %3356 = vmatprep.mubr.msk.bf16.mxu0 %vm3965_vm0, %v3964_v40 }
 0x1c1   :  { %2007 = vmatmul.mubr.bf16.gmra.mrb[92].mxu1 %v3957_v35 }
 0x1c2   :  { %3357 = vmatmul.mubr.msk.bf16.gmra.mrb[92].mxu0 %vm1482_vm1, %v3958_v36  ;;  %2014 = vmatprep.mubr.bf16.mxu1 %v3056_v37 }
 0x1c3   :  { %3360 = vmatprep.mubr.msk.bf16.mxu0 %vm3965_vm0, %v3964_v40 }
 0x1c9   :  { %2015 = vmatmul.mubr.bf16.gmra.mrb[96].mxu1 %v3055_v38 }
 0x1ca   :  { %3361 = vmatmul.mubr.msk.bf16.gmra.mrb[96].mxu0 %vm1482_vm1, %v3961_v39 }
 0x1dc   :  { %v1824_v42 = vpop.f32.mrb[0].mxu1 }
 0x1dd   :  { %v3364_v43 = vadd.f32 %v4780_v41, %v1824_v42  ;;  %v2288_v44 = vpop.f32.mrb[0].mxu0  ;;  %v1826_v45 = vpop.f32.mrb[1].mxu1 }
 0x1de   :  { %v3266_v46 = vpop.f32.mrb[1].mxu0  ;;  %v1827_v40 = vpop.f32.mrb[2].mxu1 }
 0x1df   :  { %v3365_v47 = vadd.f32 %v3364_v43, %v2288_v44  ;;  %v3366_v48 = vadd.f32 %v4780_v41, %v1827_v40  ;;  %v2291_v49 = vpop.f32.mrb[2].mxu0  ;;  %v1829_v50 = vpop.f32.mrb[3].mxu1 }
 0x1e0   :  { %v3267_v51 = vpop.f32.mrb[3].mxu0 }
 0x1e1   :  { %vm2486_vm2 = vcmp.gt.f32.partialorder %v3365_v47, 0.0  ;;  %v2535_v52 = vmul.f32 0.2, %v3365_v47  ;;  %v3367_v53 = vadd.f32 %v3366_v48, %v2291_v49 }
 0x1e3   :  { %v2584_v54 = vsel %vm2486_vm2, %v3365_v47, %v2535_v52  ;;  %vm2487_vm4 = vcmp.gt.f32.partialorder %v3367_v53, 0.0  ;;  %v2536_v55 = vmul.f32 0.2, %v3367_v53 }
 0x1e4   :  { %v3184_v56 = vpack.c.bf16 %v2584_v54, %v2584_v54  ;;  %v1832_v57 = vpop.f32.mrb[4].mxu1 }
 0x1e5   :  { %v2585_v58 = vsel %vm2487_vm4, %v3367_v53, %v2536_v55  ;;  %v3368_v59 = vadd.f32 %v4780_v41, %v1832_v57  ;;  %v2296_v60 = vpop.f32.mrb[4].mxu0  ;;  %v1834_v61 = vpop.f32.mrb[5].mxu1 }
 0x1e6   :  { %2831 = vst.msk [vmem:[%s5031_s3] sm:$0xf] %vm2830_vm3, %v3184_v56  ;;  %v3185_v62 = vpack.c.bf16 %v2585_v58, %v2585_v58  ;;  %v3270_v63 = vpop.f32.mrb[5].mxu0  ;;  %v1835_v1 = vpop.f32.mrb[6].mxu1 }
 0x1e7   :  { %v3369_v2 = vadd.f32 %v3368_v59, %v2296_v60  ;;  %v3370_v3 = vadd.f32 %v4780_v41, %v1835_v1  ;;  %v2299_v4 = vpop.f32.mrb[6].mxu0  ;;  %v1837_v5 = vpop.f32.mrb[7].mxu1 }
 0x1e8   :  { %2832 = vst.msk [vmem:[%s5031_s3 + $0x4] sm:$0xf] %vm2830_vm3, %v3185_v62  ;;  %v3271_v6 = vpop.f32.mrb[7].mxu0 }
 0x1e9   :  { %vm2488_vm5 = vcmp.gt.f32.partialorder %v3369_v2, 0.0  ;;  %v2537_v7 = vmul.f32 0.2, %v3369_v2  ;;  %v3371_v8 = vadd.f32 %v3370_v3, %v2299_v4 }
 0x1eb   :  { %v2586_v9 = vsel %vm2488_vm5, %v3369_v2, %v2537_v7  ;;  %vm2489_vm6 = vcmp.gt.f32.partialorder %v3371_v8, 0.0  ;;  %v2538_v10 = vmul.f32 0.2, %v3371_v8 }
 0x1ec   :  { %v3186_v11 = vpack.c.bf16 %v2586_v9, %v2586_v9  ;;  %v1840_v12 = vpop.f32.mrb[8].mxu1 }
 0x1ed   :  { %v2587_v13 = vsel %vm2489_vm6, %v3371_v8, %v2538_v10  ;;  %v3372_v14 = vadd.f32 %v4780_v41, %v1840_v12  ;;  %v2304_v15 = vpop.f32.mrb[8].mxu0  ;;  %v1842_v16 = vpop.f32.mrb[9].mxu1 }
 0x1ee   :  { %2833 = vst.msk [vmem:[%s5031_s3 + $0x8] sm:$0xf] %vm2830_vm3, %v3186_v11  ;;  %v3187_v17 = vpack.c.bf16 %v2587_v13, %v2587_v13  ;;  %v3274_v18 = vpop.f32.mrb[9].mxu0  ;;  %v1843_v19 = vpop.f32.mrb[10].mxu1 }
 0x1ef   :  { %v3373_v20 = vadd.f32 %v3372_v14, %v2304_v15  ;;  %v3374_v21 = vadd.f32 %v4780_v41, %v1843_v19  ;;  %v2307_v22 = vpop.f32.mrb[10].mxu0  ;;  %v1845_v23 = vpop.f32.mrb[11].mxu1 }
 0x1f0   :  { %2834 = vst.msk [vmem:[%s5031_s3 + $0xc] sm:$0xf] %vm2830_vm3, %v3187_v17  ;;  %v3275_v24 = vpop.f32.mrb[11].mxu0 }
 0x1f1   :  { %vm2490_vm7 = vcmp.gt.f32.partialorder %v3373_v20, 0.0  ;;  %v2539_v25 = vmul.f32 0.2, %v3373_v20  ;;  %v3375_v26 = vadd.f32 %v3374_v21, %v2307_v22 }
 0x1f3   :  { %v2588_v27 = vsel %vm2490_vm7, %v3373_v20, %v2539_v25  ;;  %vm2491_vm8 = vcmp.gt.f32.partialorder %v3375_v26, 0.0  ;;  %v2540_v28 = vmul.f32 0.2, %v3375_v26 }
 0x1f4   :  { %v3188_v0 = vpack.c.bf16 %v2588_v27, %v2588_v27  ;;  %v1848_v29 = vpop.f32.mrb[12].mxu1 }
 0x1f5   :  { %v2589_v30 = vsel %vm2491_vm8, %v3375_v26, %v2540_v28  ;;  %v3376_v31 = vadd.f32 %v4780_v41, %v1848_v29  ;;  %v2312_v32 = vpop.f32.mrb[12].mxu0  ;;  %v1850_v33 = vpop.f32.mrb[13].mxu1 }
 0x1f6   :  { %2835 = vst.msk [vmem:[%s5031_s3 + $0x10] sm:$0xf] %vm2830_vm3, %v3188_v0  ;;  %v3189_v34 = vpack.c.bf16 %v2589_v30, %v2589_v30  ;;  %v3278_v35 = vpop.f32.mrb[13].mxu0  ;;  %v1851_v36 = vpop.f32.mrb[14].mxu1 }
 0x1f7   :  { %v3377_v37 = vadd.f32 %v3376_v31, %v2312_v32  ;;  %v3378_v38 = vadd.f32 %v4780_v41, %v1851_v36  ;;  %v2315_v39 = vpop.f32.mrb[14].mxu0  ;;  %v1853_v42 = vpop.f32.mrb[15].mxu1 }
 0x1f8   :  { %2836 = vst.msk [vmem:[%s5031_s3 + $0x14] sm:$0xf] %vm2830_vm3, %v3189_v34  ;;  %v3279_v43 = vpop.f32.mrb[15].mxu0 }
 0x1f9   :  { %vm2492_vm9 = vcmp.gt.f32.partialorder %v3377_v37, 0.0  ;;  %v2541_v44 = vmul.f32 0.2, %v3377_v37  ;;  %v3379_v45 = vadd.f32 %v3378_v38, %v2315_v39 }
 0x1fb   :  { %v2590_v46 = vsel %vm2492_vm9, %v3377_v37, %v2541_v44  ;;  %vm2493_vm10 = vcmp.gt.f32.partialorder %v3379_v45, 0.0  ;;  %v2542_v40 = vmul.f32 0.2, %v3379_v45 }
 0x1fc   :  { %v3190_v47 = vpack.c.bf16 %v2590_v46, %v2590_v46  ;;  %v1856_v48 = vpop.f32.mrb[16].mxu1 }
 0x1fd   :  { %v2591_v49 = vsel %vm2493_vm10, %v3379_v45, %v2542_v40  ;;  %v3380_v50 = vadd.f32 %v4780_v41, %v1856_v48  ;;  %v2320_v51 = vpop.f32.mrb[16].mxu0  ;;  %v1858_v52 = vpop.f32.mrb[17].mxu1 }
 0x1fe   :  { %2837 = vst.msk [vmem:[%s5031_s3 + $0x18] sm:$0xf] %vm2830_vm3, %v3190_v47  ;;  %v3191_v53 = vpack.c.bf16 %v2591_v49, %v2591_v49  ;;  %v3282_v54 = vpop.f32.mrb[17].mxu0  ;;  %v1859_v55 = vpop.f32.mrb[18].mxu1 }
 0x1ff   :  { %v3381_v56 = vadd.f32 %v3380_v50, %v2320_v51  ;;  %v3382_v57 = vadd.f32 %v4780_v41, %v1859_v55  ;;  %v2323_v58 = vpop.f32.mrb[18].mxu0  ;;  %v1861_v59 = vpop.f32.mrb[19].mxu1 }
 0x200   :  { %2838 = vst.msk [vmem:[%s5031_s3 + $0x1c] sm:$0xf] %vm2830_vm3, %v3191_v53  ;;  %v3283_v60 = vpop.f32.mrb[19].mxu0 }
 0x201   :  { %vm2494_vm11 = vcmp.gt.f32.partialorder %v3381_v56, 0.0  ;;  %v2543_v61 = vmul.f32 0.2, %v3381_v56  ;;  %v3383_v62 = vadd.f32 %v3382_v57, %v2323_v58 }
 0x203   :  { %v2592_v63 = vsel %vm2494_vm11, %v3381_v56, %v2543_v61  ;;  %vm2495_vm12 = vcmp.gt.f32.partialorder %v3383_v62, 0.0  ;;  %v2544_v1 = vmul.f32 0.2, %v3383_v62 }
 0x204   :  { %v3192_v2 = vpack.c.bf16 %v2592_v63, %v2592_v63  ;;  %v1864_v3 = vpop.f32.mrb[20].mxu1 }
 0x205   :  { %v2593_v4 = vsel %vm2495_vm12, %v3383_v62, %v2544_v1  ;;  %v3384_v5 = vadd.f32 %v4780_v41, %v1864_v3  ;;  %v2328_v6 = vpop.f32.mrb[20].mxu0  ;;  %v1866_v7 = vpop.f32.mrb[21].mxu1 }
 0x206   :  { %2839 = vst.msk [vmem:[%s5031_s3 + $0x20] sm:$0xf] %vm2830_vm3, %v3192_v2  ;;  %v3193_v8 = vpack.c.bf16 %v2593_v4, %v2593_v4  ;;  %v3286_v9 = vpop.f32.mrb[21].mxu0  ;;  %v1867_v10 = vpop.f32.mrb[22].mxu1 }
 0x207   :  { %v3385_v11 = vadd.f32 %v3384_v5, %v2328_v6  ;;  %v3386_v12 = vadd.f32 %v4780_v41, %v1867_v10  ;;  %v2331_v13 = vpop.f32.mrb[22].mxu0  ;;  %v1869_v14 = vpop.f32.mrb[23].mxu1 }
 0x208   :  { %2840 = vst.msk [vmem:[%s5031_s3 + $0x24] sm:$0xf] %vm2830_vm3, %v3193_v8  ;;  %v3287_v15 = vpop.f32.mrb[23].mxu0 }
 0x209   :  { %vm2496_vm13 = vcmp.gt.f32.partialorder %v3385_v11, 0.0  ;;  %v2545_v16 = vmul.f32 0.2, %v3385_v11  ;;  %v3387_v17 = vadd.f32 %v3386_v12, %v2331_v13 }
 0x20b   :  { %v2594_v18 = vsel %vm2496_vm13, %v3385_v11, %v2545_v16  ;;  %vm2497_vm14 = vcmp.gt.f32.partialorder %v3387_v17, 0.0  ;;  %v2546_v19 = vmul.f32 0.2, %v3387_v17 }
 0x20c   :  { %v3194_v20 = vpack.c.bf16 %v2594_v18, %v2594_v18  ;;  %v1872_v21 = vpop.f32.mrb[24].mxu1 }
 0x20d   :  { %v2595_v22 = vsel %vm2497_vm14, %v3387_v17, %v2546_v19  ;;  %v3388_v23 = vadd.f32 %v4780_v41, %v1872_v21  ;;  %v2336_v24 = vpop.f32.mrb[24].mxu0  ;;  %v1874_v25 = vpop.f32.mrb[25].mxu1 }
 0x20e   :  { %2841 = vst.msk [vmem:[%s5031_s3 + $0x28] sm:$0xf] %vm2830_vm3, %v3194_v20  ;;  %v3195_v26 = vpack.c.bf16 %v2595_v22, %v2595_v22  ;;  %v3290_v27 = vpop.f32.mrb[25].mxu0  ;;  %v1875_v28 = vpop.f32.mrb[26].mxu1 }
 0x20f   :  { %v3389_v0 = vadd.f32 %v3388_v23, %v2336_v24  ;;  %v3390_v29 = vadd.f32 %v4780_v41, %v1875_v28  ;;  %v2339_v30 = vpop.f32.mrb[26].mxu0  ;;  %v1877_v31 = vpop.f32.mrb[27].mxu1 }
 0x210   :  { %2842 = vst.msk [vmem:[%s5031_s3 + $0x2c] sm:$0xf] %vm2830_vm3, %v3195_v26  ;;  %v3291_v32 = vpop.f32.mrb[27].mxu0 }
 0x211   :  { %vm2498_vm15 = vcmp.gt.f32.partialorder %v3389_v0, 0.0  ;;  %v2547_v33 = vmul.f32 0.2, %v3389_v0  ;;  %v3391_v34 = vadd.f32 %v3390_v29, %v2339_v30 }
 0x213   :  { %v2596_v35 = vsel %vm2498_vm15, %v3389_v0, %v2547_v33  ;;  %vm2499_vm0 = vcmp.gt.f32.partialorder %v3391_v34, 0.0  ;;  %v2548_v36 = vmul.f32 0.2, %v3391_v34 }
 0x214   :  { %v3196_v37 = vpack.c.bf16 %v2596_v35, %v2596_v35  ;;  %v1880_v38 = vpop.f32.mrb[28].mxu1 }
 0x215   :  { %v2597_v39 = vsel %vm2499_vm0, %v3391_v34, %v2548_v36  ;;  %v3392_v42 = vadd.f32 %v4780_v41, %v1880_v38  ;;  %v2344_v43 = vpop.f32.mrb[28].mxu0  ;;  %v1882_v44 = vpop.f32.mrb[29].mxu1 }
 0x216   :  { %2843 = vst.msk [vmem:[%s5031_s3 + $0x30] sm:$0xf] %vm2830_vm3, %v3196_v37  ;;  %v3197_v45 = vpack.c.bf16 %v2597_v39, %v2597_v39  ;;  %v3294_v46 = vpop.f32.mrb[29].mxu0  ;;  %v1883_v40 = vpop.f32.mrb[30].mxu1 }
 0x217   :  { %v3393_v47 = vadd.f32 %v3392_v42, %v2344_v43  ;;  %v3394_v48 = vadd.f32 %v4780_v41, %v1883_v40  ;;  %v2347_v49 = vpop.f32.mrb[30].mxu0  ;;  %v1885_v50 = vpop.f32.mrb[31].mxu1 }
 0x218   :  { %2844 = vst.msk [vmem:[%s5031_s3 + $0x34] sm:$0xf] %vm2830_vm3, %v3197_v45  ;;  %v3295_v51 = vpop.f32.mrb[31].mxu0 }
 0x219   :  { %vm2500_vm1 = vcmp.gt.f32.partialorder %v3393_v47, 0.0  ;;  %v2549_v52 = vmul.f32 0.2, %v3393_v47  ;;  %v3395_v53 = vadd.f32 %v3394_v48, %v2347_v49 }
 0x21b   :  { %v2598_v54 = vsel %vm2500_vm1, %v3393_v47, %v2549_v52  ;;  %vm2501_vm2 = vcmp.gt.f32.partialorder %v3395_v53, 0.0  ;;  %v2550_v55 = vmul.f32 0.2, %v3395_v53 }
 0x21c   :  { %v3198_v56 = vpack.c.bf16 %v2598_v54, %v2598_v54  ;;  %v1888_v57 = vpop.f32.mrb[32].mxu1 }
 0x21d   :  { %v2599_v58 = vsel %vm2501_vm2, %v3395_v53, %v2550_v55  ;;  %v3396_v59 = vadd.f32 %v4780_v41, %v1888_v57  ;;  %v2352_v60 = vpop.f32.mrb[32].mxu0  ;;  %v1890_v61 = vpop.f32.mrb[33].mxu1 }
 0x21e   :  { %2845 = vst.msk [vmem:[%s5031_s3 + $0x38] sm:$0xf] %vm2830_vm3, %v3198_v56  ;;  %v3199_v62 = vpack.c.bf16 %v2599_v58, %v2599_v58  ;;  %v3298_v63 = vpop.f32.mrb[33].mxu0  ;;  %v1891_v1 = vpop.f32.mrb[34].mxu1 }
 0x21f   :  { %v3397_v2 = vadd.f32 %v3396_v59, %v2352_v60  ;;  %v3398_v3 = vadd.f32 %v4780_v41, %v1891_v1  ;;  %v2355_v4 = vpop.f32.mrb[34].mxu0  ;;  %v1893_v5 = vpop.f32.mrb[35].mxu1 }
 0x220   :  { %2846 = vst.msk [vmem:[%s5031_s3 + $0x3c] sm:$0xf] %vm2830_vm3, %v3199_v62  ;;  %v3299_v6 = vpop.f32.mrb[35].mxu0 }
 0x221   :  { %vm2502_vm4 = vcmp.gt.f32.partialorder %v3397_v2, 0.0  ;;  %v2551_v7 = vmul.f32 0.2, %v3397_v2  ;;  %v3399_v8 = vadd.f32 %v3398_v3, %v2355_v4 }
 0x223   :  { %v2600_v9 = vsel %vm2502_vm4, %v3397_v2, %v2551_v7  ;;  %vm2503_vm5 = vcmp.gt.f32.partialorder %v3399_v8, 0.0  ;;  %v2552_v10 = vmul.f32 0.2, %v3399_v8 }
 0x224   :  { %v3200_v11 = vpack.c.bf16 %v2600_v9, %v2600_v9  ;;  %v1896_v12 = vpop.f32.mrb[36].mxu1 }
 0x225   :  { %v2601_v13 = vsel %vm2503_vm5, %v3399_v8, %v2552_v10  ;;  %v3400_v14 = vadd.f32 %v4780_v41, %v1896_v12  ;;  %v2360_v15 = vpop.f32.mrb[36].mxu0  ;;  %v1898_v16 = vpop.f32.mrb[37].mxu1 }
 0x226   :  { %2847 = vst.msk [vmem:[%s5031_s3 + $0x40] sm:$0xf] %vm2830_vm3, %v3200_v11  ;;  %v3201_v17 = vpack.c.bf16 %v2601_v13, %v2601_v13  ;;  %v3302_v18 = vpop.f32.mrb[37].mxu0  ;;  %v1899_v19 = vpop.f32.mrb[38].mxu1 }
 0x227   :  { %v3401_v20 = vadd.f32 %v3400_v14, %v2360_v15  ;;  %v3402_v21 = vadd.f32 %v4780_v41, %v1899_v19  ;;  %v2363_v22 = vpop.f32.mrb[38].mxu0  ;;  %v1901_v23 = vpop.f32.mrb[39].mxu1 }
 0x228   :  { %2848 = vst.msk [vmem:[%s5031_s3 + $0x44] sm:$0xf] %vm2830_vm3, %v3201_v17  ;;  %v3303_v24 = vpop.f32.mrb[39].mxu0 }
 0x229   :  { %vm2504_vm6 = vcmp.gt.f32.partialorder %v3401_v20, 0.0  ;;  %v2553_v25 = vmul.f32 0.2, %v3401_v20  ;;  %v3403_v26 = vadd.f32 %v3402_v21, %v2363_v22 }
 0x22b   :  { %v2602_v27 = vsel %vm2504_vm6, %v3401_v20, %v2553_v25  ;;  %vm2505_vm7 = vcmp.gt.f32.partialorder %v3403_v26, 0.0  ;;  %v2554_v28 = vmul.f32 0.2, %v3403_v26 }
 0x22c   :  { %v3202_v0 = vpack.c.bf16 %v2602_v27, %v2602_v27  ;;  %v1904_v29 = vpop.f32.mrb[40].mxu1 }
 0x22d   :  { %v2603_v30 = vsel %vm2505_vm7, %v3403_v26, %v2554_v28  ;;  %v3404_v31 = vadd.f32 %v4780_v41, %v1904_v29  ;;  %v2368_v32 = vpop.f32.mrb[40].mxu0  ;;  %v1906_v33 = vpop.f32.mrb[41].mxu1 }
 0x22e   :  { %2849 = vst.msk [vmem:[%s5031_s3 + $0x48] sm:$0xf] %vm2830_vm3, %v3202_v0  ;;  %v3203_v34 = vpack.c.bf16 %v2603_v30, %v2603_v30  ;;  %v3306_v35 = vpop.f32.mrb[41].mxu0  ;;  %v1907_v36 = vpop.f32.mrb[42].mxu1 }
 0x22f   :  { %v3405_v37 = vadd.f32 %v3404_v31, %v2368_v32  ;;  %v3406_v38 = vadd.f32 %v4780_v41, %v1907_v36  ;;  %v2371_v39 = vpop.f32.mrb[42].mxu0  ;;  %v1909_v42 = vpop.f32.mrb[43].mxu1 }
 0x230   :  { %2850 = vst.msk [vmem:[%s5031_s3 + $0x4c] sm:$0xf] %vm2830_vm3, %v3203_v34  ;;  %v3307_v43 = vpop.f32.mrb[43].mxu0 }
 0x231   :  { %vm2506_vm8 = vcmp.gt.f32.partialorder %v3405_v37, 0.0  ;;  %v2555_v44 = vmul.f32 0.2, %v3405_v37  ;;  %v3407_v45 = vadd.f32 %v3406_v38, %v2371_v39 }
 0x233   :  { %v2604_v46 = vsel %vm2506_vm8, %v3405_v37, %v2555_v44  ;;  %vm2507_vm9 = vcmp.gt.f32.partialorder %v3407_v45, 0.0  ;;  %v2556_v40 = vmul.f32 0.2, %v3407_v45 }
 0x234   :  { %v3204_v47 = vpack.c.bf16 %v2604_v46, %v2604_v46  ;;  %v1912_v48 = vpop.f32.mrb[44].mxu1 }
 0x235   :  { %v2605_v49 = vsel %vm2507_vm9, %v3407_v45, %v2556_v40  ;;  %v3408_v50 = vadd.f32 %v4780_v41, %v1912_v48  ;;  %v2376_v51 = vpop.f32.mrb[44].mxu0  ;;  %v1914_v52 = vpop.f32.mrb[45].mxu1 }
 0x236   :  { %2851 = vst.msk [vmem:[%s5031_s3 + $0x50] sm:$0xf] %vm2830_vm3, %v3204_v47  ;;  %v3205_v53 = vpack.c.bf16 %v2605_v49, %v2605_v49  ;;  %v3310_v54 = vpop.f32.mrb[45].mxu0  ;;  %v1915_v55 = vpop.f32.mrb[46].mxu1 }
 0x237   :  { %v3409_v56 = vadd.f32 %v3408_v50, %v2376_v51  ;;  %v3410_v57 = vadd.f32 %v4780_v41, %v1915_v55  ;;  %v2379_v58 = vpop.f32.mrb[46].mxu0  ;;  %v1917_v59 = vpop.f32.mrb[47].mxu1 }
 0x238   :  { %2852 = vst.msk [vmem:[%s5031_s3 + $0x54] sm:$0xf] %vm2830_vm3, %v3205_v53  ;;  %v3311_v60 = vpop.f32.mrb[47].mxu0 }
 0x239   :  { %vm2508_vm10 = vcmp.gt.f32.partialorder %v3409_v56, 0.0  ;;  %v2557_v61 = vmul.f32 0.2, %v3409_v56  ;;  %v3411_v62 = vadd.f32 %v3410_v57, %v2379_v58 }
 0x23b   :  { %v2606_v63 = vsel %vm2508_vm10, %v3409_v56, %v2557_v61  ;;  %vm2509_vm11 = vcmp.gt.f32.partialorder %v3411_v62, 0.0  ;;  %v2558_v1 = vmul.f32 0.2, %v3411_v62 }
 0x23c   :  { %v3206_v2 = vpack.c.bf16 %v2606_v63, %v2606_v63  ;;  %v1920_v3 = vpop.f32.mrb[48].mxu1 }
 0x23d   :  { %v2607_v4 = vsel %vm2509_vm11, %v3411_v62, %v2558_v1  ;;  %v3412_v5 = vadd.f32 %v4780_v41, %v1920_v3  ;;  %v2384_v6 = vpop.f32.mrb[48].mxu0  ;;  %v1922_v7 = vpop.f32.mrb[49].mxu1 }
 0x23e   :  { %2853 = vst.msk [vmem:[%s5031_s3 + $0x58] sm:$0xf] %vm2830_vm3, %v3206_v2  ;;  %v3207_v8 = vpack.c.bf16 %v2607_v4, %v2607_v4  ;;  %v3314_v9 = vpop.f32.mrb[49].mxu0  ;;  %v1923_v10 = vpop.f32.mrb[50].mxu1 }
 0x23f   :  { %v3413_v11 = vadd.f32 %v3412_v5, %v2384_v6  ;;  %v3414_v12 = vadd.f32 %v4780_v41, %v1923_v10  ;;  %v2387_v13 = vpop.f32.mrb[50].mxu0  ;;  %v1925_v14 = vpop.f32.mrb[51].mxu1 }
 0x240   :  { %2854 = vst.msk [vmem:[%s5031_s3 + $0x5c] sm:$0xf] %vm2830_vm3, %v3207_v8  ;;  %v3315_v15 = vpop.f32.mrb[51].mxu0 }
 0x241   :  { %vm2510_vm12 = vcmp.gt.f32.partialorder %v3413_v11, 0.0  ;;  %v2559_v16 = vmul.f32 0.2, %v3413_v11  ;;  %v3415_v17 = vadd.f32 %v3414_v12, %v2387_v13 }
 0x243   :  { %v2608_v18 = vsel %vm2510_vm12, %v3413_v11, %v2559_v16  ;;  %vm2511_vm13 = vcmp.gt.f32.partialorder %v3415_v17, 0.0  ;;  %v2560_v19 = vmul.f32 0.2, %v3415_v17 }
 0x244   :  { %v3208_v20 = vpack.c.bf16 %v2608_v18, %v2608_v18  ;;  %v1928_v21 = vpop.f32.mrb[52].mxu1 }
 0x245   :  { %v2609_v22 = vsel %vm2511_vm13, %v3415_v17, %v2560_v19  ;;  %v3416_v23 = vadd.f32 %v4780_v41, %v1928_v21  ;;  %v2392_v24 = vpop.f32.mrb[52].mxu0  ;;  %v1930_v25 = vpop.f32.mrb[53].mxu1 }
 0x246   :  { %2855 = vst.msk [vmem:[%s5031_s3 + $0x60] sm:$0xf] %vm2830_vm3, %v3208_v20  ;;  %v3209_v26 = vpack.c.bf16 %v2609_v22, %v2609_v22  ;;  %v3318_v27 = vpop.f32.mrb[53].mxu0  ;;  %v1931_v28 = vpop.f32.mrb[54].mxu1 }
 0x247   :  { %v3417_v0 = vadd.f32 %v3416_v23, %v2392_v24  ;;  %v3418_v29 = vadd.f32 %v4780_v41, %v1931_v28  ;;  %v2395_v30 = vpop.f32.mrb[54].mxu0  ;;  %v1933_v31 = vpop.f32.mrb[55].mxu1 }
 0x248   :  { %2856 = vst.msk [vmem:[%s5031_s3 + $0x64] sm:$0xf] %vm2830_vm3, %v3209_v26  ;;  %v3319_v32 = vpop.f32.mrb[55].mxu0 }
 0x249   :  { %vm2512_vm14 = vcmp.gt.f32.partialorder %v3417_v0, 0.0  ;;  %v2561_v33 = vmul.f32 0.2, %v3417_v0  ;;  %v3419_v34 = vadd.f32 %v3418_v29, %v2395_v30 }
 0x24b   :  { %v2610_v35 = vsel %vm2512_vm14, %v3417_v0, %v2561_v33  ;;  %vm2513_vm15 = vcmp.gt.f32.partialorder %v3419_v34, 0.0  ;;  %v2562_v36 = vmul.f32 0.2, %v3419_v34 }
 0x24c   :  { %v3210_v37 = vpack.c.bf16 %v2610_v35, %v2610_v35  ;;  %v1936_v38 = vpop.f32.mrb[56].mxu1 }
 0x24d   :  { %v2611_v39 = vsel %vm2513_vm15, %v3419_v34, %v2562_v36  ;;  %v3420_v42 = vadd.f32 %v4780_v41, %v1936_v38  ;;  %v2400_v43 = vpop.f32.mrb[56].mxu0  ;;  %v1938_v44 = vpop.f32.mrb[57].mxu1 }
 0x24e   :  { %2857 = vst.msk [vmem:[%s5031_s3 + $0x68] sm:$0xf] %vm2830_vm3, %v3210_v37  ;;  %v3211_v45 = vpack.c.bf16 %v2611_v39, %v2611_v39  ;;  %v3322_v46 = vpop.f32.mrb[57].mxu0  ;;  %v1939_v40 = vpop.f32.mrb[58].mxu1 }
 0x24f   :  { %v3421_v47 = vadd.f32 %v3420_v42, %v2400_v43  ;;  %v3422_v48 = vadd.f32 %v4780_v41, %v1939_v40  ;;  %v2403_v49 = vpop.f32.mrb[58].mxu0  ;;  %v1941_v50 = vpop.f32.mrb[59].mxu1 }
 0x250   :  { %2858 = vst.msk [vmem:[%s5031_s3 + $0x6c] sm:$0xf] %vm2830_vm3, %v3211_v45  ;;  %v3323_v51 = vpop.f32.mrb[59].mxu0 }
 0x251   :  { %vm2514_vm0 = vcmp.gt.f32.partialorder %v3421_v47, 0.0  ;;  %v2563_v52 = vmul.f32 0.2, %v3421_v47  ;;  %v3423_v53 = vadd.f32 %v3422_v48, %v2403_v49 }
 0x253   :  { %v2612_v54 = vsel %vm2514_vm0, %v3421_v47, %v2563_v52  ;;  %vm2515_vm1 = vcmp.gt.f32.partialorder %v3423_v53, 0.0  ;;  %v2564_v55 = vmul.f32 0.2, %v3423_v53 }
 0x254   :  { %v3212_v56 = vpack.c.bf16 %v2612_v54, %v2612_v54  ;;  %v1944_v57 = vpop.f32.mrb[60].mxu1 }
 0x255   :  { %v2613_v58 = vsel %vm2515_vm1, %v3423_v53, %v2564_v55  ;;  %v3424_v59 = vadd.f32 %v4780_v41, %v1944_v57  ;;  %v2408_v60 = vpop.f32.mrb[60].mxu0  ;;  %v1946_v61 = vpop.f32.mrb[61].mxu1 }
 0x256   :  { %2859 = vst.msk [vmem:[%s5031_s3 + $0x70] sm:$0xf] %vm2830_vm3, %v3212_v56  ;;  %v3213_v62 = vpack.c.bf16 %v2613_v58, %v2613_v58  ;;  %v3326_v63 = vpop.f32.mrb[61].mxu0  ;;  %v1947_v1 = vpop.f32.mrb[62].mxu1 }
 0x257   :  { %v3425_v2 = vadd.f32 %v3424_v59, %v2408_v60  ;;  %v3426_v3 = vadd.f32 %v4780_v41, %v1947_v1  ;;  %v2411_v4 = vpop.f32.mrb[62].mxu0  ;;  %v1949_v5 = vpop.f32.mrb[63].mxu1 }
 0x258   :  { %2860 = vst.msk [vmem:[%s5031_s3 + $0x74] sm:$0xf] %vm2830_vm3, %v3213_v62  ;;  %v3327_v6 = vpop.f32.mrb[63].mxu0 }
 0x259   :  { %vm2516_vm2 = vcmp.gt.f32.partialorder %v3425_v2, 0.0  ;;  %v2565_v7 = vmul.f32 0.2, %v3425_v2  ;;  %v3427_v8 = vadd.f32 %v3426_v3, %v2411_v4 }
 0x25b   :  { %v2614_v9 = vsel %vm2516_vm2, %v3425_v2, %v2565_v7  ;;  %vm2517_vm4 = vcmp.gt.f32.partialorder %v3427_v8, 0.0  ;;  %v2566_v10 = vmul.f32 0.2, %v3427_v8 }
 0x25c   :  { %v3214_v11 = vpack.c.bf16 %v2614_v9, %v2614_v9  ;;  %v1952_v12 = vpop.f32.mrb[64].mxu1 }
 0x25d   :  { %v2615_v13 = vsel %vm2517_vm4, %v3427_v8, %v2566_v10  ;;  %v3428_v14 = vadd.f32 %v4780_v41, %v1952_v12  ;;  %v2416_v15 = vpop.f32.mrb[64].mxu0  ;;  %v1954_v16 = vpop.f32.mrb[65].mxu1 }
 0x25e   :  { %2861 = vst.msk [vmem:[%s5031_s3 + $0x78] sm:$0xf] %vm2830_vm3, %v3214_v11  ;;  %v3215_v17 = vpack.c.bf16 %v2615_v13, %v2615_v13  ;;  %v3330_v18 = vpop.f32.mrb[65].mxu0  ;;  %v1955_v19 = vpop.f32.mrb[66].mxu1 }
 0x25f   :  { %v3429_v20 = vadd.f32 %v3428_v14, %v2416_v15  ;;  %v3430_v21 = vadd.f32 %v4780_v41, %v1955_v19  ;;  %v2419_v22 = vpop.f32.mrb[66].mxu0  ;;  %v1957_v23 = vpop.f32.mrb[67].mxu1 }
 0x260   :  { %2862 = vst.msk [vmem:[%s5031_s3 + $0x7c] sm:$0xf] %vm2830_vm3, %v3215_v17  ;;  %v3331_v24 = vpop.f32.mrb[67].mxu0 }
 0x261   :  { %vm2518_vm5 = vcmp.gt.f32.partialorder %v3429_v20, 0.0  ;;  %v2567_v25 = vmul.f32 0.2, %v3429_v20  ;;  %v3431_v26 = vadd.f32 %v3430_v21, %v2419_v22 }
 0x263   :  { %v2616_v27 = vsel %vm2518_vm5, %v3429_v20, %v2567_v25  ;;  %vm2519_vm6 = vcmp.gt.f32.partialorder %v3431_v26, 0.0  ;;  %v2568_v28 = vmul.f32 0.2, %v3431_v26 }
 0x264   :  { %v3216_v0 = vpack.c.bf16 %v2616_v27, %v2616_v27  ;;  %v1960_v29 = vpop.f32.mrb[68].mxu1 }
 0x265   :  { %v2617_v30 = vsel %vm2519_vm6, %v3431_v26, %v2568_v28  ;;  %v3432_v31 = vadd.f32 %v4780_v41, %v1960_v29  ;;  %v2424_v32 = vpop.f32.mrb[68].mxu0  ;;  %v1962_v33 = vpop.f32.mrb[69].mxu1 }
 0x266   :  { %2863 = vst.msk [vmem:[%s5031_s3 + $0x80] sm:$0xf] %vm2830_vm3, %v3216_v0  ;;  %v3217_v34 = vpack.c.bf16 %v2617_v30, %v2617_v30  ;;  %v3334_v35 = vpop.f32.mrb[69].mxu0  ;;  %v1963_v36 = vpop.f32.mrb[70].mxu1 }
 0x267   :  { %v3433_v37 = vadd.f32 %v3432_v31, %v2424_v32  ;;  %v3434_v38 = vadd.f32 %v4780_v41, %v1963_v36  ;;  %v2427_v39 = vpop.f32.mrb[70].mxu0  ;;  %v1965_v42 = vpop.f32.mrb[71].mxu1 }
 0x268   :  { %2864 = vst.msk [vmem:[%s5031_s3 + $0x84] sm:$0xf] %vm2830_vm3, %v3217_v34  ;;  %v3335_v43 = vpop.f32.mrb[71].mxu0 }
 0x269   :  { %vm2520_vm7 = vcmp.gt.f32.partialorder %v3433_v37, 0.0  ;;  %v2569_v44 = vmul.f32 0.2, %v3433_v37  ;;  %v3435_v45 = vadd.f32 %v3434_v38, %v2427_v39 }
 0x26b   :  { %v2618_v46 = vsel %vm2520_vm7, %v3433_v37, %v2569_v44  ;;  %vm2521_vm8 = vcmp.gt.f32.partialorder %v3435_v45, 0.0  ;;  %v2570_v40 = vmul.f32 0.2, %v3435_v45 }
 0x26c   :  { %v3218_v47 = vpack.c.bf16 %v2618_v46, %v2618_v46  ;;  %v1968_v48 = vpop.f32.mrb[72].mxu1 }
 0x26d   :  { %v2619_v49 = vsel %vm2521_vm8, %v3435_v45, %v2570_v40  ;;  %v3436_v50 = vadd.f32 %v4780_v41, %v1968_v48  ;;  %v2432_v51 = vpop.f32.mrb[72].mxu0  ;;  %v1970_v52 = vpop.f32.mrb[73].mxu1 }
 0x26e   :  { %2865 = vst.msk [vmem:[%s5031_s3 + $0x88] sm:$0xf] %vm2830_vm3, %v3218_v47  ;;  %v3219_v53 = vpack.c.bf16 %v2619_v49, %v2619_v49  ;;  %v3338_v54 = vpop.f32.mrb[73].mxu0  ;;  %v1971_v55 = vpop.f32.mrb[74].mxu1 }
 0x26f   :  { %v3437_v56 = vadd.f32 %v3436_v50, %v2432_v51  ;;  %v3438_v57 = vadd.f32 %v4780_v41, %v1971_v55  ;;  %v2435_v58 = vpop.f32.mrb[74].mxu0  ;;  %v1973_v59 = vpop.f32.mrb[75].mxu1 }
 0x270   :  { %2866 = vst.msk [vmem:[%s5031_s3 + $0x8c] sm:$0xf] %vm2830_vm3, %v3219_v53  ;;  %v3339_v60 = vpop.f32.mrb[75].mxu0 }
 0x271   :  { %vm2522_vm9 = vcmp.gt.f32.partialorder %v3437_v56, 0.0  ;;  %v2571_v61 = vmul.f32 0.2, %v3437_v56  ;;  %v3439_v62 = vadd.f32 %v3438_v57, %v2435_v58 }
 0x273   :  { %v2620_v63 = vsel %vm2522_vm9, %v3437_v56, %v2571_v61  ;;  %vm2523_vm10 = vcmp.gt.f32.partialorder %v3439_v62, 0.0  ;;  %v2572_v1 = vmul.f32 0.2, %v3439_v62 }
 0x274   :  { %v3220_v2 = vpack.c.bf16 %v2620_v63, %v2620_v63  ;;  %v1976_v3 = vpop.f32.mrb[76].mxu1 }
 0x275   :  { %v2621_v4 = vsel %vm2523_vm10, %v3439_v62, %v2572_v1  ;;  %v3440_v5 = vadd.f32 %v4780_v41, %v1976_v3  ;;  %v2440_v6 = vpop.f32.mrb[76].mxu0  ;;  %v1978_v7 = vpop.f32.mrb[77].mxu1 }
 0x276   :  { %2867 = vst.msk [vmem:[%s5031_s3 + $0x90] sm:$0xf] %vm2830_vm3, %v3220_v2  ;;  %v3221_v8 = vpack.c.bf16 %v2621_v4, %v2621_v4  ;;  %v3342_v9 = vpop.f32.mrb[77].mxu0  ;;  %v1979_v10 = vpop.f32.mrb[78].mxu1 }
 0x277   :  { %v3441_v11 = vadd.f32 %v3440_v5, %v2440_v6  ;;  %v3442_v12 = vadd.f32 %v4780_v41, %v1979_v10  ;;  %v2443_v13 = vpop.f32.mrb[78].mxu0  ;;  %v1981_v14 = vpop.f32.mrb[79].mxu1 }
 0x278   :  { %2868 = vst.msk [vmem:[%s5031_s3 + $0x94] sm:$0xf] %vm2830_vm3, %v3221_v8  ;;  %v3343_v15 = vpop.f32.mrb[79].mxu0 }
 0x279   :  { %vm2524_vm11 = vcmp.gt.f32.partialorder %v3441_v11, 0.0  ;;  %v2573_v16 = vmul.f32 0.2, %v3441_v11  ;;  %v3443_v17 = vadd.f32 %v3442_v12, %v2443_v13 }
 0x27b   :  { %v2622_v18 = vsel %vm2524_vm11, %v3441_v11, %v2573_v16  ;;  %vm2525_vm12 = vcmp.gt.f32.partialorder %v3443_v17, 0.0  ;;  %v2574_v19 = vmul.f32 0.2, %v3443_v17 }
 0x27c   :  { %v3222_v20 = vpack.c.bf16 %v2622_v18, %v2622_v18  ;;  %v1984_v21 = vpop.f32.mrb[80].mxu1 }
 0x27d   :  { %v2623_v22 = vsel %vm2525_vm12, %v3443_v17, %v2574_v19  ;;  %v3444_v23 = vadd.f32 %v4780_v41, %v1984_v21  ;;  %v2448_v24 = vpop.f32.mrb[80].mxu0  ;;  %v1986_v25 = vpop.f32.mrb[81].mxu1  ;;  %v3962_v21 = vld [vmem:[%s5030_s2] ss:$0 sm:$0xff] }
 0x27e   :  { %2869 = vst.msk [vmem:[%s5031_s3 + $0x98] sm:$0xf] %vm2830_vm3, %v3222_v20  ;;  %v3223_v26 = vpack.c.bf16 %v2623_v22, %v2623_v22  ;;  %v3346_v27 = vpop.f32.mrb[81].mxu0  ;;  %v1987_v28 = vpop.f32.mrb[82].mxu1 }
 0x27f   :  { %v3445_v0 = vadd.f32 %v3444_v23, %v2448_v24  ;;  %v3446_v29 = vadd.f32 %v4780_v41, %v1987_v28  ;;  %v2451_v30 = vpop.f32.mrb[82].mxu0  ;;  %v1989_v31 = vpop.f32.mrb[83].mxu1 }
 0x280   :  { %2870 = vst.msk [vmem:[%s5031_s3 + $0x9c] sm:$0xf] %vm2830_vm3, %v3223_v26  ;;  %v3347_v32 = vpop.f32.mrb[83].mxu0 }
 0x281   :  { %vm2526_vm13 = vcmp.gt.f32.partialorder %v3445_v0, 0.0  ;;  %v2575_v33 = vmul.f32 0.2, %v3445_v0  ;;  %v3447_v34 = vadd.f32 %v3446_v29, %v2451_v30 }
 0x283   :  { %v2624_v35 = vsel %vm2526_vm13, %v3445_v0, %v2575_v33  ;;  %vm2527_vm14 = vcmp.gt.f32.partialorder %v3447_v34, 0.0  ;;  %v2576_v36 = vmul.f32 0.2, %v3447_v34 }
 0x284   :  { %v3224_v37 = vpack.c.bf16 %v2624_v35, %v2624_v35  ;;  %v1992_v38 = vpop.f32.mrb[84].mxu1 }
 0x285   :  { %v2625_v39 = vsel %vm2527_vm14, %v3447_v34, %v2576_v36  ;;  %v3448_v42 = vadd.f32 %v4780_v41, %v1992_v38  ;;  %v2456_v43 = vpop.f32.mrb[84].mxu0  ;;  %v1994_v44 = vpop.f32.mrb[85].mxu1 }
 0x286   :  { %2871 = vst.msk [vmem:[%s5031_s3 + $0xa0] sm:$0xf] %vm2830_vm3, %v3224_v37  ;;  %v3225_v45 = vpack.c.bf16 %v2625_v39, %v2625_v39  ;;  %v3350_v46 = vpop.f32.mrb[85].mxu0  ;;  %v1995_v40 = vpop.f32.mrb[86].mxu1 }
 0x287   :  { %v3449_v47 = vadd.f32 %v3448_v42, %v2456_v43  ;;  %v3450_v48 = vadd.f32 %v4780_v41, %v1995_v40  ;;  %v2459_v49 = vpop.f32.mrb[86].mxu0  ;;  %v1997_v50 = vpop.f32.mrb[87].mxu1 }
 0x288   :  { %2872 = vst.msk [vmem:[%s5031_s3 + $0xa4] sm:$0xf] %vm2830_vm3, %v3225_v45  ;;  %v3351_v51 = vpop.f32.mrb[87].mxu0 }
 0x289   :  { %vm2528_vm15 = vcmp.gt.f32.partialorder %v3449_v47, 0.0  ;;  %v2577_v52 = vmul.f32 0.2, %v3449_v47  ;;  %v3451_v53 = vadd.f32 %v3450_v48, %v2459_v49 }
 0x28b   :  { %v2626_v54 = vsel %vm2528_vm15, %v3449_v47, %v2577_v52  ;;  %vm2529_vm0 = vcmp.gt.f32.partialorder %v3451_v53, 0.0  ;;  %v2578_v55 = vmul.f32 0.2, %v3451_v53 }
 0x28c   :  { %v3226_v56 = vpack.c.bf16 %v2626_v54, %v2626_v54  ;;  %v2000_v57 = vpop.f32.mrb[88].mxu1 }
 0x28d   :  { %v2627_v58 = vsel %vm2529_vm0, %v3451_v53, %v2578_v55  ;;  %v3452_v59 = vadd.f32 %v4780_v41, %v2000_v57  ;;  %v2464_v60 = vpop.f32.mrb[88].mxu0  ;;  %v2002_v61 = vpop.f32.mrb[89].mxu1 }
 0x28e   :  { %2873 = vst.msk [vmem:[%s5031_s3 + $0xa8] sm:$0xf] %vm2830_vm3, %v3226_v56  ;;  %v3227_v62 = vpack.c.bf16 %v2627_v58, %v2627_v58  ;;  %v3354_v63 = vpop.f32.mrb[89].mxu0  ;;  %v2003_v1 = vpop.f32.mrb[90].mxu1 }
 0x28f   :  { %v3453_v2 = vadd.f32 %v3452_v59, %v2464_v60  ;;  %v3454_v3 = vadd.f32 %v4780_v41, %v2003_v1  ;;  %v2467_v4 = vpop.f32.mrb[90].mxu0  ;;  %v2005_v5 = vpop.f32.mrb[91].mxu1 }
 0x290   :  { %2874 = vst.msk [vmem:[%s5031_s3 + $0xac] sm:$0xf] %vm2830_vm3, %v3227_v62  ;;  %v3355_v6 = vpop.f32.mrb[91].mxu0 }
 0x291   :  { %vm2530_vm1 = vcmp.gt.f32.partialorder %v3453_v2, 0.0  ;;  %v2579_v7 = vmul.f32 0.2, %v3453_v2  ;;  %v3455_v8 = vadd.f32 %v3454_v3, %v2467_v4 }
 0x293   :  { %v2628_v9 = vsel %vm2530_vm1, %v3453_v2, %v2579_v7  ;;  %vm2531_vm2 = vcmp.gt.f32.partialorder %v3455_v8, 0.0  ;;  %v2580_v10 = vmul.f32 0.2, %v3455_v8 }
 0x294   :  { %v3228_v11 = vpack.c.bf16 %v2628_v9, %v2628_v9  ;;  %v2008_v12 = vpop.f32.mrb[92].mxu1 }
 0x295   :  { %v2629_v13 = vsel %vm2531_vm2, %v3455_v8, %v2580_v10  ;;  %v3456_v14 = vadd.f32 %v4780_v41, %v2008_v12  ;;  %v2472_v15 = vpop.f32.mrb[92].mxu0  ;;  %v2010_v16 = vpop.f32.mrb[93].mxu1 }
 0x296   :  { %2875 = vst.msk [vmem:[%s5031_s3 + $0xb0] sm:$0xf] %vm2830_vm3, %v3228_v11  ;;  %v3229_v17 = vpack.c.bf16 %v2629_v13, %v2629_v13  ;;  %v3358_v18 = vpop.f32.mrb[93].mxu0  ;;  %v2011_v19 = vpop.f32.mrb[94].mxu1 }
 0x297   :  { %v3457_v20 = vadd.f32 %v3456_v14, %v2472_v15  ;;  %v3458_v22 = vadd.f32 %v3962_v21, %v2011_v19  ;;  %v2475_v23 = vpop.f32.mrb[94].mxu0  ;;  %v2013_v24 = vpop.f32.mrb[95].mxu1 }
 0x298   :  { %2876 = vst.msk [vmem:[%s5031_s3 + $0xb4] sm:$0xf] %vm2830_vm3, %v3229_v17  ;;  %v3359_v41 = vpop.f32.mrb[95].mxu0 }
 0x299   :  { %vm2532_vm4 = vcmp.gt.f32.partialorder %v3457_v20, 0.0  ;;  %v2581_v25 = vmul.f32 0.2, %v3457_v20  ;;  %v3459_v26 = vadd.f32 %v3458_v22, %v2475_v23 }
 0x29b   :  { %v2630_v27 = vsel %vm2532_vm4, %v3457_v20, %v2581_v25  ;;  %vm2533_vm5 = vcmp.gt.f32.partialorder %v3459_v26, 0.0  ;;  %v2582_v28 = vmul.f32 0.2, %v3459_v26 }
 0x29c   :  { %v3230_v0 = vpack.c.bf16 %v2630_v27, %v2630_v27  ;;  %v2016_v29 = vpop.f32.mrb[96].mxu1 }
 0x29d   :  { %v2631_v30 = vsel %vm2533_vm5, %v3459_v26, %v2582_v28  ;;  %v3460_v31 = vadd.f32 %v3962_v21, %v2016_v29  ;;  %v2480_v32 = vpop.f32.mrb[96].mxu0  ;;  %v2018_v33 = vpop.f32.mrb[97].mxu1 }
 0x29e   :  { %2877 = vst.msk [vmem:[%s5031_s3 + $0xb8] sm:$0xf] %vm2830_vm3, %v3230_v0  ;;  %v3231_v34 = vpack.c.bf16 %v2631_v30, %v2631_v30  ;;  %v3362_v35 = vpop.f32.mrb[97].mxu0  ;;  %v2019_v36 = vpop.f32.mrb[98].mxu1 }
 0x29f   :  { %v3461_v37 = vadd.f32 %v3460_v31, %v2480_v32  ;;  %v2483_v38 = vpop.f32.mrb[98].mxu0  ;;  %v2020_v39 = vpop.f32.mrb[99].mxu1 }
 0x2a0   :  { %2878 = vst.msk [vmem:[%s5031_s3 + $0xbc] sm:$0xf] %vm2830_vm3, %v3231_v34  ;;  %v3363_v42 = vpop.f32.mrb[99].mxu0 }
 0x2a1   :  { %vm2534_vm6 = vcmp.gt.f32.partialorder %v3461_v37, 0.0  ;;  %v2583_v43 = vmul.f32 0.2, %v3461_v37 }
 0x2a3   :  { %v2632_v44 = vsel %vm2534_vm6, %v3461_v37, %v2583_v43 }
 0x2a4   :  { %v3232_v45 = vpack.c.bf16 %v2632_v44, %v2632_v44 }
 0x2a6   :  { %2879 = vst.msk [vmem:[%s5031_s3 + $0xc0] sm:$0xf] %vm2830_vm3, %v3232_v45 }

// kernel: discriminator_forward.5
= control target key start
LH: loop header
LB: loop body
LE: loop exit
PB: predicated region body
PF: predicated region fallthrough
CT: control target
= control target key end

     0   :  { %s10209_s15 = smov 0   ;;  %s10211_s16 = smov 0   ;;  %s12794_s0 = inlined_call_operand.vmem [shape: bf16[2,3136], index: 0, kind: input, shape index: {}]   ;;  %s12795_s1 = inlined_call_operand.vmem [shape: bf16[3136,1024], index: 1, kind: input, shape index: {}]   ;;  %s12796_s2 = inlined_call_operand.vmem [shape: f32[1,1024], index: 2, kind: input, shape index: {}]   ;;  %s12797_s3 = inlined_call_operand.vmem [shape: f32[1,1024], index: 3, kind: input, shape index: {}]   ;;  %s12798_s4 = inlined_call_operand.vmem [shape: f32[2,256], index: 4, kind: output, shape index: {}]  }
   0x1   :  { %s10213_s17 = smov 0   ;;  %s10215_s18 = smov 0  }
   0x2   :  { %s10217_s19 = smov 0  }
   0x3 LB: > { %s23_s20 = sadd.s32 1, %s10176_s18  ;;  %p66_p1 = scmp.ne.s32.totalorder %s10168_s16, %s10164_s15  ;;  %s10180_s19 = sphi %s10217_s19, %s14_s19   ;;  %s10176_s18 = sphi %s10215_s18, %s12802_s18   ;;  %s10172_s17 = sphi %s10213_s17, %s12801_s17   ;;  %s10168_s16 = sphi %s10211_s16, %s12800_s16   ;;  %s10164_s15 = sphi %s10209_s15, %s12799_s15  }
   0x4   : > { %p24_p0 = scmp.ge.s32.totalorder %s23_s20, 2  ;;  %p67_p2 = scmp.eq.s32.totalorder %s10180_s19, 0 }
   0x5   : > { %s59_s22 = sadd.s32 1, %s10168_s16  ;;  %p8020_p5 = scmp.ge.s32.totalorder %s10180_s19, 2 }
   0x6   : > { %s12804_s20 = smov (%p24_p0, %s23_s20), 0  ;;  %p68_p3 = por %p67_p2, %p66_p1 }
   0x7   : > { %s56_s21 = ssub.s32 %s10176_s18, %s12804_s20  ;;  %179 = sbr.rel (%p8020_p5) target bundleno = 410 (0x19a), region = 20 }
   0x8   : > { %p57_p4 = scmp.eq.s32.totalorder %s56_s21, 0 }
   0xa   : > { %s10244_s23 = scalar_select %p57_p4, %s10168_s16, %s59_s22  }
   0xe   : > { %182 = sbr.rel (!%p68_p3) target bundleno = 410 (0x19a), region = 24  ;;  %s184_s24 = sand.u32 (%p68_p3), 1, %s10168_s16  }
   0xf   : > { %s8816_s25 = sshll.u32 (%p68_p3), %s10176_s18, 4  ;;  %s8917_s26 = smul.u32 (%p68_p3), 6272, %s184_s24 }
  0x10   : > { %s10252_s29 = scalar_lea.vmem (%p68_p3), %s12795_s1, %s8816_s25 }
  0x11   : > { %v202_v0 = vld [vmem:[%s10252_s29] sm:$0xff] (%p68_p3)  ;;  %v204_v1 = vld [vmem:[%s10252_s29 + $0x8] sm:$0xff] (%p68_p3)  ;;  %s10260_s30 = scalar_lea.vmem (%p68_p3), [#allocation2], %s8917_s26 }
  0x12   : > { %v206_v2 = vld [vmem:[%s10252_s29 + $0x20] sm:$0xff] (%p68_p3)  ;;  %v208_v3 = vld [vmem:[%s10252_s29 + $0x28] sm:$0xff] (%p68_p3)  ;;  %203 = vst [vmem:[%s10260_s30] sm:$0xff] (%p68_p3), %v202_v0  ;;  %205 = vst [vmem:[%s10260_s30 + $0x8] sm:$0xff] (%p68_p3), %v204_v1 }
  0x13   : > { %v210_v4 = vld [vmem:[%s10252_s29 + $0x40] sm:$0xff] (%p68_p3)  ;;  %v212_v5 = vld [vmem:[%s10252_s29 + $0x48] sm:$0xff] (%p68_p3)  ;;  %207 = vst [vmem:[%s10260_s30 + $0x10] sm:$0xff] (%p68_p3), %v206_v2  ;;  %209 = vst [vmem:[%s10260_s30 + $0x18] sm:$0xff] (%p68_p3), %v208_v3 }
  0x14   : > { %211 = vst [vmem:[%s10260_s30 + $0x20] sm:$0xff] (%p68_p3), %v210_v4  ;;  %213 = vst [vmem:[%s10260_s30 + $0x28] sm:$0xff] (%p68_p3), %v212_v5  ;;  %v214_v6 = vld [vmem:[%s10252_s29 + $0x60] sm:$0xff] (%p68_p3)  ;;  %v216_v7 = vld [vmem:[%s10252_s29 + $0x68] sm:$0xff] (%p68_p3) }
  0x15   : > { %v218_v8 = vld [vmem:[%s10252_s29 + $0x80] sm:$0xff]  ;;  %215 = vst [vmem:[%s10260_s30 + $0x30] sm:$0xff] %v214_v6  ;;  %217 = vst [vmem:[%s10260_s30 + $0x38] sm:$0xff] %v216_v7  ;;  %v220_v9 = vld [vmem:[%s10252_s29 + $0x88] sm:$0xff] }
  0x16   : > { %219 = vst [vmem:[%s10260_s30 + $0x40] sm:$0xff] %v218_v8  ;;  %v222_v10 = vld [vmem:[%s10252_s29 + $0xa0] sm:$0xff]  ;;  %v224_v11 = vld [vmem:[%s10252_s29 + $0xa8] sm:$0xff]  ;;  %221 = vst [vmem:[%s10260_s30 + $0x48] sm:$0xff] %v220_v9 }
  0x17   : > { %223 = vst [vmem:[%s10260_s30 + $0x50] sm:$0xff] %v222_v10  ;;  %225 = vst [vmem:[%s10260_s30 + $0x58] sm:$0xff] %v224_v11  ;;  %v226_v12 = vld [vmem:[%s10252_s29 + $0xc0] sm:$0xff]  ;;  %v228_v13 = vld [vmem:[%s10252_s29 + $0xc8] sm:$0xff] }
  0x18   : > { %v230_v14 = vld [vmem:[%s10252_s29 + $0xe0] sm:$0xff]  ;;  %227 = vst [vmem:[%s10260_s30 + $0x60] sm:$0xff] %v226_v12  ;;  %229 = vst [vmem:[%s10260_s30 + $0x68] sm:$0xff] %v228_v13  ;;  %v232_v15 = vld [vmem:[%s10252_s29 + $0xe8] sm:$0xff] }
  0x19   : > { %231 = vst [vmem:[%s10260_s30 + $0x70] sm:$0xff] %v230_v14  ;;  %v234_v16 = vld [vmem:[%s10252_s29 + $0x100] sm:$0xff]  ;;  %v236_v17 = vld [vmem:[%s10252_s29 + $0x108] sm:$0xff]  ;;  %233 = vst [vmem:[%s10260_s30 + $0x78] sm:$0xff] %v232_v15 }
  0x1a   : > { %235 = vst [vmem:[%s10260_s30 + $0x80] sm:$0xff] %v234_v16  ;;  %237 = vst [vmem:[%s10260_s30 + $0x88] sm:$0xff] %v236_v17  ;;  %v238_v18 = vld [vmem:[%s10252_s29 + $0x120] sm:$0xff]  ;;  %v240_v19 = vld [vmem:[%s10252_s29 + $0x128] sm:$0xff] }
  0x1b   : > { %v242_v20 = vld [vmem:[%s10252_s29 + $0x140] sm:$0xff]  ;;  %239 = vst [vmem:[%s10260_s30 + $0x90] sm:$0xff] %v238_v18  ;;  %241 = vst [vmem:[%s10260_s30 + $0x98] sm:$0xff] %v240_v19  ;;  %v244_v21 = vld [vmem:[%s10252_s29 + $0x148] sm:$0xff] }
  0x1c   : > { %243 = vst [vmem:[%s10260_s30 + $0xa0] sm:$0xff] %v242_v20  ;;  %v246_v22 = vld [vmem:[%s10252_s29 + $0x160] sm:$0xff]  ;;  %v248_v23 = vld [vmem:[%s10252_s29 + $0x168] sm:$0xff]  ;;  %245 = vst [vmem:[%s10260_s30 + $0xa8] sm:$0xff] %v244_v21 }
  0x1d   : > { %247 = vst [vmem:[%s10260_s30 + $0xb0] sm:$0xff] %v246_v22  ;;  %249 = vst [vmem:[%s10260_s30 + $0xb8] sm:$0xff] %v248_v23  ;;  %v250_v24 = vld [vmem:[%s10252_s29 + $0x180] sm:$0xff]  ;;  %v252_v25 = vld [vmem:[%s10252_s29 + $0x188] sm:$0xff] }
  0x1e   : > { %v254_v26 = vld [vmem:[%s10252_s29 + $0x1a0] sm:$0xff]  ;;  %251 = vst [vmem:[%s10260_s30 + $0xc0] sm:$0xff] %v250_v24  ;;  %253 = vst [vmem:[%s10260_s30 + $0xc8] sm:$0xff] %v252_v25  ;;  %v256_v27 = vld [vmem:[%s10252_s29 + $0x1a8] sm:$0xff] }
  0x1f   : > { %255 = vst [vmem:[%s10260_s30 + $0xd0] sm:$0xff] %v254_v26  ;;  %v258_v28 = vld [vmem:[%s10252_s29 + $0x1c0] sm:$0xff]  ;;  %v260_v29 = vld [vmem:[%s10252_s29 + $0x1c8] sm:$0xff]  ;;  %257 = vst [vmem:[%s10260_s30 + $0xd8] sm:$0xff] %v256_v27 }
  0x20   : > { %259 = vst [vmem:[%s10260_s30 + $0xe0] sm:$0xff] %v258_v28  ;;  %261 = vst [vmem:[%s10260_s30 + $0xe8] sm:$0xff] %v260_v29  ;;  %v262_v30 = vld [vmem:[%s10252_s29 + $0x1e0] sm:$0xff]  ;;  %v264_v31 = vld [vmem:[%s10252_s29 + $0x1e8] sm:$0xff] }
  0x21   : > { %v266_v32 = vld [vmem:[%s10252_s29 + $0x200] sm:$0xff]  ;;  %263 = vst [vmem:[%s10260_s30 + $0xf0] sm:$0xff] %v262_v30  ;;  %265 = vst [vmem:[%s10260_s30 + $0xf8] sm:$0xff] %v264_v31  ;;  %v268_v33 = vld [vmem:[%s10252_s29 + $0x208] sm:$0xff] }
  0x22   : > { %267 = vst [vmem:[%s10260_s30 + $0x100] sm:$0xff] %v266_v32  ;;  %v270_v34 = vld [vmem:[%s10252_s29 + $0x220] sm:$0xff]  ;;  %v272_v35 = vld [vmem:[%s10252_s29 + $0x228] sm:$0xff]  ;;  %269 = vst [vmem:[%s10260_s30 + $0x108] sm:$0xff] %v268_v33 }
  0x23   : > { %271 = vst [vmem:[%s10260_s30 + $0x110] sm:$0xff] %v270_v34  ;;  %273 = vst [vmem:[%s10260_s30 + $0x118] sm:$0xff] %v272_v35  ;;  %v274_v36 = vld [vmem:[%s10252_s29 + $0x240] sm:$0xff]  ;;  %v276_v37 = vld [vmem:[%s10252_s29 + $0x248] sm:$0xff] }
  0x24   : > { %v278_v38 = vld [vmem:[%s10252_s29 + $0x260] sm:$0xff]  ;;  %275 = vst [vmem:[%s10260_s30 + $0x120] sm:$0xff] %v274_v36  ;;  %277 = vst [vmem:[%s10260_s30 + $0x128] sm:$0xff] %v276_v37  ;;  %v280_v39 = vld [vmem:[%s10252_s29 + $0x268] sm:$0xff] }
  0x25   : > { %279 = vst [vmem:[%s10260_s30 + $0x130] sm:$0xff] %v278_v38  ;;  %v282_v40 = vld [vmem:[%s10252_s29 + $0x280] sm:$0xff]  ;;  %v284_v41 = vld [vmem:[%s10252_s29 + $0x288] sm:$0xff]  ;;  %281 = vst [vmem:[%s10260_s30 + $0x138] sm:$0xff] %v280_v39 }
  0x26   : > { %283 = vst [vmem:[%s10260_s30 + $0x140] sm:$0xff] %v282_v40  ;;  %285 = vst [vmem:[%s10260_s30 + $0x148] sm:$0xff] %v284_v41  ;;  %v286_v42 = vld [vmem:[%s10252_s29 + $0x2a0] sm:$0xff]  ;;  %v288_v43 = vld [vmem:[%s10252_s29 + $0x2a8] sm:$0xff] }
  0x27   : > { %v290_v44 = vld [vmem:[%s10252_s29 + $0x2c0] sm:$0xff]  ;;  %287 = vst [vmem:[%s10260_s30 + $0x150] sm:$0xff] %v286_v42  ;;  %289 = vst [vmem:[%s10260_s30 + $0x158] sm:$0xff] %v288_v43  ;;  %v292_v45 = vld [vmem:[%s10252_s29 + $0x2c8] sm:$0xff] }
  0x28   : > { %291 = vst [vmem:[%s10260_s30 + $0x160] sm:$0xff] %v290_v44  ;;  %v294_v46 = vld [vmem:[%s10252_s29 + $0x2e0] sm:$0xff]  ;;  %v296_v47 = vld [vmem:[%s10252_s29 + $0x2e8] sm:$0xff]  ;;  %293 = vst [vmem:[%s10260_s30 + $0x168] sm:$0xff] %v292_v45 }
  0x29   : > { %295 = vst [vmem:[%s10260_s30 + $0x170] sm:$0xff] %v294_v46  ;;  %297 = vst [vmem:[%s10260_s30 + $0x178] sm:$0xff] %v296_v47  ;;  %v298_v48 = vld [vmem:[%s10252_s29 + $0x300] sm:$0xff]  ;;  %v300_v49 = vld [vmem:[%s10252_s29 + $0x308] sm:$0xff] }
  0x2a   : > { %v302_v50 = vld [vmem:[%s10252_s29 + $0x320] sm:$0xff]  ;;  %299 = vst [vmem:[%s10260_s30 + $0x180] sm:$0xff] %v298_v48  ;;  %301 = vst [vmem:[%s10260_s30 + $0x188] sm:$0xff] %v300_v49  ;;  %v304_v51 = vld [vmem:[%s10252_s29 + $0x328] sm:$0xff] }
  0x2b   : > { %303 = vst [vmem:[%s10260_s30 + $0x190] sm:$0xff] %v302_v50  ;;  %v306_v52 = vld [vmem:[%s10252_s29 + $0x340] sm:$0xff]  ;;  %v308_v53 = vld [vmem:[%s10252_s29 + $0x348] sm:$0xff]  ;;  %305 = vst [vmem:[%s10260_s30 + $0x198] sm:$0xff] %v304_v51 }
  0x2c   : > { %307 = vst [vmem:[%s10260_s30 + $0x1a0] sm:$0xff] %v306_v52  ;;  %309 = vst [vmem:[%s10260_s30 + $0x1a8] sm:$0xff] %v308_v53  ;;  %v310_v54 = vld [vmem:[%s10252_s29 + $0x360] sm:$0xff]  ;;  %v312_v55 = vld [vmem:[%s10252_s29 + $0x368] sm:$0xff] }
  0x2d   : > { %v314_v56 = vld [vmem:[%s10252_s29 + $0x380] sm:$0xff]  ;;  %311 = vst [vmem:[%s10260_s30 + $0x1b0] sm:$0xff] %v310_v54  ;;  %313 = vst [vmem:[%s10260_s30 + $0x1b8] sm:$0xff] %v312_v55  ;;  %v316_v57 = vld [vmem:[%s10252_s29 + $0x388] sm:$0xff] }
  0x2e   : > { %315 = vst [vmem:[%s10260_s30 + $0x1c0] sm:$0xff] %v314_v56  ;;  %v318_v58 = vld [vmem:[%s10252_s29 + $0x3a0] sm:$0xff]  ;;  %v320_v59 = vld [vmem:[%s10252_s29 + $0x3a8] sm:$0xff]  ;;  %317 = vst [vmem:[%s10260_s30 + $0x1c8] sm:$0xff] %v316_v57 }
  0x2f   : > { %319 = vst [vmem:[%s10260_s30 + $0x1d0] sm:$0xff] %v318_v58  ;;  %321 = vst [vmem:[%s10260_s30 + $0x1d8] sm:$0xff] %v320_v59  ;;  %v322_v60 = vld [vmem:[%s10252_s29 + $0x3c0] sm:$0xff]  ;;  %v324_v61 = vld [vmem:[%s10252_s29 + $0x3c8] sm:$0xff] }
  0x30   : > { %v326_v62 = vld [vmem:[%s10252_s29 + $0x3e0] sm:$0xff]  ;;  %323 = vst [vmem:[%s10260_s30 + $0x1e0] sm:$0xff] %v322_v60  ;;  %325 = vst [vmem:[%s10260_s30 + $0x1e8] sm:$0xff] %v324_v61  ;;  %v328_v63 = vld [vmem:[%s10252_s29 + $0x3e8] sm:$0xff] }
  0x31   : > { %327 = vst [vmem:[%s10260_s30 + $0x1f0] sm:$0xff] %v326_v62  ;;  %v330_v0 = vld [vmem:[%s10252_s29 + $0x400] sm:$0xff]  ;;  %v332_v1 = vld [vmem:[%s10252_s29 + $0x408] sm:$0xff]  ;;  %329 = vst [vmem:[%s10260_s30 + $0x1f8] sm:$0xff] %v328_v63 }
  0x32   : > { %331 = vst [vmem:[%s10260_s30 + $0x200] sm:$0xff] %v330_v0  ;;  %333 = vst [vmem:[%s10260_s30 + $0x208] sm:$0xff] %v332_v1  ;;  %v334_v2 = vld [vmem:[%s10252_s29 + $0x420] sm:$0xff]  ;;  %v336_v3 = vld [vmem:[%s10252_s29 + $0x428] sm:$0xff] }
  0x33   : > { %v338_v4 = vld [vmem:[%s10252_s29 + $0x440] sm:$0xff]  ;;  %335 = vst [vmem:[%s10260_s30 + $0x210] sm:$0xff] %v334_v2  ;;  %337 = vst [vmem:[%s10260_s30 + $0x218] sm:$0xff] %v336_v3  ;;  %v340_v5 = vld [vmem:[%s10252_s29 + $0x448] sm:$0xff] }
  0x34   : > { %339 = vst [vmem:[%s10260_s30 + $0x220] sm:$0xff] %v338_v4  ;;  %v342_v6 = vld [vmem:[%s10252_s29 + $0x460] sm:$0xff]  ;;  %v344_v7 = vld [vmem:[%s10252_s29 + $0x468] sm:$0xff]  ;;  %341 = vst [vmem:[%s10260_s30 + $0x228] sm:$0xff] %v340_v5 }
  0x35   : > { %343 = vst [vmem:[%s10260_s30 + $0x230] sm:$0xff] %v342_v6  ;;  %345 = vst [vmem:[%s10260_s30 + $0x238] sm:$0xff] %v344_v7  ;;  %v346_v8 = vld [vmem:[%s10252_s29 + $0x480] sm:$0xff]  ;;  %v348_v9 = vld [vmem:[%s10252_s29 + $0x488] sm:$0xff] }
  0x36   : > { %v350_v10 = vld [vmem:[%s10252_s29 + $0x4a0] sm:$0xff]  ;;  %347 = vst [vmem:[%s10260_s30 + $0x240] sm:$0xff] %v346_v8  ;;  %349 = vst [vmem:[%s10260_s30 + $0x248] sm:$0xff] %v348_v9  ;;  %v352_v11 = vld [vmem:[%s10252_s29 + $0x4a8] sm:$0xff] }
  0x37   : > { %351 = vst [vmem:[%s10260_s30 + $0x250] sm:$0xff] %v350_v10  ;;  %v354_v12 = vld [vmem:[%s10252_s29 + $0x4c0] sm:$0xff]  ;;  %v356_v13 = vld [vmem:[%s10252_s29 + $0x4c8] sm:$0xff]  ;;  %353 = vst [vmem:[%s10260_s30 + $0x258] sm:$0xff] %v352_v11 }
  0x38   : > { %355 = vst [vmem:[%s10260_s30 + $0x260] sm:$0xff] %v354_v12  ;;  %357 = vst [vmem:[%s10260_s30 + $0x268] sm:$0xff] %v356_v13  ;;  %v358_v14 = vld [vmem:[%s10252_s29 + $0x4e0] sm:$0xff]  ;;  %v360_v15 = vld [vmem:[%s10252_s29 + $0x4e8] sm:$0xff] }
  0x39   : > { %v362_v16 = vld [vmem:[%s10252_s29 + $0x500] sm:$0xff]  ;;  %359 = vst [vmem:[%s10260_s30 + $0x270] sm:$0xff] %v358_v14  ;;  %361 = vst [vmem:[%s10260_s30 + $0x278] sm:$0xff] %v360_v15  ;;  %v364_v17 = vld [vmem:[%s10252_s29 + $0x508] sm:$0xff] }
  0x3a   : > { %363 = vst [vmem:[%s10260_s30 + $0x280] sm:$0xff] %v362_v16  ;;  %v366_v18 = vld [vmem:[%s10252_s29 + $0x520] sm:$0xff]  ;;  %v368_v19 = vld [vmem:[%s10252_s29 + $0x528] sm:$0xff]  ;;  %365 = vst [vmem:[%s10260_s30 + $0x288] sm:$0xff] %v364_v17 }
  0x3b   : > { %367 = vst [vmem:[%s10260_s30 + $0x290] sm:$0xff] %v366_v18  ;;  %369 = vst [vmem:[%s10260_s30 + $0x298] sm:$0xff] %v368_v19  ;;  %v370_v20 = vld [vmem:[%s10252_s29 + $0x540] sm:$0xff]  ;;  %v372_v21 = vld [vmem:[%s10252_s29 + $0x548] sm:$0xff] }
  0x3c   : > { %v374_v22 = vld [vmem:[%s10252_s29 + $0x560] sm:$0xff]  ;;  %371 = vst [vmem:[%s10260_s30 + $0x2a0] sm:$0xff] %v370_v20  ;;  %373 = vst [vmem:[%s10260_s30 + $0x2a8] sm:$0xff] %v372_v21  ;;  %v376_v23 = vld [vmem:[%s10252_s29 + $0x568] sm:$0xff] }
  0x3d   : > { %375 = vst [vmem:[%s10260_s30 + $0x2b0] sm:$0xff] %v374_v22  ;;  %v378_v24 = vld [vmem:[%s10252_s29 + $0x580] sm:$0xff]  ;;  %v380_v25 = vld [vmem:[%s10252_s29 + $0x588] sm:$0xff]  ;;  %377 = vst [vmem:[%s10260_s30 + $0x2b8] sm:$0xff] %v376_v23 }
  0x3e   : > { %379 = vst [vmem:[%s10260_s30 + $0x2c0] sm:$0xff] %v378_v24  ;;  %381 = vst [vmem:[%s10260_s30 + $0x2c8] sm:$0xff] %v380_v25  ;;  %v382_v26 = vld [vmem:[%s10252_s29 + $0x5a0] sm:$0xff]  ;;  %v384_v27 = vld [vmem:[%s10252_s29 + $0x5a8] sm:$0xff] }
  0x3f   : > { %v386_v28 = vld [vmem:[%s10252_s29 + $0x5c0] sm:$0xff]  ;;  %383 = vst [vmem:[%s10260_s30 + $0x2d0] sm:$0xff] %v382_v26  ;;  %385 = vst [vmem:[%s10260_s30 + $0x2d8] sm:$0xff] %v384_v27  ;;  %v388_v29 = vld [vmem:[%s10252_s29 + $0x5c8] sm:$0xff] }
  0x40   : > { %387 = vst [vmem:[%s10260_s30 + $0x2e0] sm:$0xff] %v386_v28  ;;  %v390_v30 = vld [vmem:[%s10252_s29 + $0x5e0] sm:$0xff]  ;;  %v392_v31 = vld [vmem:[%s10252_s29 + $0x5e8] sm:$0xff]  ;;  %389 = vst [vmem:[%s10260_s30 + $0x2e8] sm:$0xff] %v388_v29 }
  0x41   : > { %391 = vst [vmem:[%s10260_s30 + $0x2f0] sm:$0xff] %v390_v30  ;;  %393 = vst [vmem:[%s10260_s30 + $0x2f8] sm:$0xff] %v392_v31  ;;  %v394_v32 = vld [vmem:[%s10252_s29 + $0x600] sm:$0xff]  ;;  %v396_v33 = vld [vmem:[%s10252_s29 + $0x608] sm:$0xff] }
  0x42   : > { %v398_v34 = vld [vmem:[%s10252_s29 + $0x620] sm:$0xff]  ;;  %395 = vst [vmem:[%s10260_s30 + $0x300] sm:$0xff] %v394_v32  ;;  %397 = vst [vmem:[%s10260_s30 + $0x308] sm:$0xff] %v396_v33  ;;  %v400_v35 = vld [vmem:[%s10252_s29 + $0x628] sm:$0xff] }
  0x43   : > { %399 = vst [vmem:[%s10260_s30 + $0x310] sm:$0xff] %v398_v34  ;;  %v402_v36 = vld [vmem:[%s10252_s29 + $0x640] sm:$0xff]  ;;  %v404_v37 = vld [vmem:[%s10252_s29 + $0x648] sm:$0xff]  ;;  %401 = vst [vmem:[%s10260_s30 + $0x318] sm:$0xff] %v400_v35 }
  0x44   : > { %403 = vst [vmem:[%s10260_s30 + $0x320] sm:$0xff] %v402_v36  ;;  %405 = vst [vmem:[%s10260_s30 + $0x328] sm:$0xff] %v404_v37  ;;  %v406_v38 = vld [vmem:[%s10252_s29 + $0x660] sm:$0xff]  ;;  %v408_v39 = vld [vmem:[%s10252_s29 + $0x668] sm:$0xff] }
  0x45   : > { %v410_v40 = vld [vmem:[%s10252_s29 + $0x680] sm:$0xff]  ;;  %407 = vst [vmem:[%s10260_s30 + $0x330] sm:$0xff] %v406_v38  ;;  %409 = vst [vmem:[%s10260_s30 + $0x338] sm:$0xff] %v408_v39  ;;  %v412_v41 = vld [vmem:[%s10252_s29 + $0x688] sm:$0xff] }
  0x46   : > { %411 = vst [vmem:[%s10260_s30 + $0x340] sm:$0xff] %v410_v40  ;;  %v414_v42 = vld [vmem:[%s10252_s29 + $0x6a0] sm:$0xff]  ;;  %v416_v43 = vld [vmem:[%s10252_s29 + $0x6a8] sm:$0xff]  ;;  %413 = vst [vmem:[%s10260_s30 + $0x348] sm:$0xff] %v412_v41 }
  0x47   : > { %415 = vst [vmem:[%s10260_s30 + $0x350] sm:$0xff] %v414_v42  ;;  %417 = vst [vmem:[%s10260_s30 + $0x358] sm:$0xff] %v416_v43  ;;  %v418_v44 = vld [vmem:[%s10252_s29 + $0x6c0] sm:$0xff]  ;;  %v420_v45 = vld [vmem:[%s10252_s29 + $0x6c8] sm:$0xff] }
  0x48   : > { %v422_v46 = vld [vmem:[%s10252_s29 + $0x6e0] sm:$0xff]  ;;  %419 = vst [vmem:[%s10260_s30 + $0x360] sm:$0xff] %v418_v44  ;;  %421 = vst [vmem:[%s10260_s30 + $0x368] sm:$0xff] %v420_v45  ;;  %v424_v47 = vld [vmem:[%s10252_s29 + $0x6e8] sm:$0xff] }
  0x49   : > { %423 = vst [vmem:[%s10260_s30 + $0x370] sm:$0xff] %v422_v46  ;;  %v426_v48 = vld [vmem:[%s10252_s29 + $0x700] sm:$0xff]  ;;  %v428_v49 = vld [vmem:[%s10252_s29 + $0x708] sm:$0xff]  ;;  %425 = vst [vmem:[%s10260_s30 + $0x378] sm:$0xff] %v424_v47 }
  0x4a   : > { %427 = vst [vmem:[%s10260_s30 + $0x380] sm:$0xff] %v426_v48  ;;  %429 = vst [vmem:[%s10260_s30 + $0x388] sm:$0xff] %v428_v49  ;;  %v430_v50 = vld [vmem:[%s10252_s29 + $0x720] sm:$0xff]  ;;  %v432_v51 = vld [vmem:[%s10252_s29 + $0x728] sm:$0xff] }
  0x4b   : > { %v434_v52 = vld [vmem:[%s10252_s29 + $0x740] sm:$0xff]  ;;  %431 = vst [vmem:[%s10260_s30 + $0x390] sm:$0xff] %v430_v50  ;;  %433 = vst [vmem:[%s10260_s30 + $0x398] sm:$0xff] %v432_v51  ;;  %v436_v53 = vld [vmem:[%s10252_s29 + $0x748] sm:$0xff] }
  0x4c   : > { %435 = vst [vmem:[%s10260_s30 + $0x3a0] sm:$0xff] %v434_v52  ;;  %v438_v54 = vld [vmem:[%s10252_s29 + $0x760] sm:$0xff]  ;;  %v440_v55 = vld [vmem:[%s10252_s29 + $0x768] sm:$0xff]  ;;  %437 = vst [vmem:[%s10260_s30 + $0x3a8] sm:$0xff] %v436_v53 }
  0x4d   : > { %439 = vst [vmem:[%s10260_s30 + $0x3b0] sm:$0xff] %v438_v54  ;;  %441 = vst [vmem:[%s10260_s30 + $0x3b8] sm:$0xff] %v440_v55  ;;  %v442_v56 = vld [vmem:[%s10252_s29 + $0x780] sm:$0xff]  ;;  %v444_v57 = vld [vmem:[%s10252_s29 + $0x788] sm:$0xff] }
  0x4e   : > { %v446_v58 = vld [vmem:[%s10252_s29 + $0x7a0] sm:$0xff]  ;;  %443 = vst [vmem:[%s10260_s30 + $0x3c0] sm:$0xff] %v442_v56  ;;  %445 = vst [vmem:[%s10260_s30 + $0x3c8] sm:$0xff] %v444_v57  ;;  %v448_v59 = vld [vmem:[%s10252_s29 + $0x7a8] sm:$0xff] }
  0x4f   : > { %447 = vst [vmem:[%s10260_s30 + $0x3d0] sm:$0xff] %v446_v58  ;;  %v450_v60 = vld [vmem:[%s10252_s29 + $0x7c0] sm:$0xff]  ;;  %v452_v61 = vld [vmem:[%s10252_s29 + $0x7c8] sm:$0xff]  ;;  %449 = vst [vmem:[%s10260_s30 + $0x3d8] sm:$0xff] %v448_v59 }
  0x50   : > { %451 = vst [vmem:[%s10260_s30 + $0x3e0] sm:$0xff] %v450_v60  ;;  %453 = vst [vmem:[%s10260_s30 + $0x3e8] sm:$0xff] %v452_v61  ;;  %v454_v62 = vld [vmem:[%s10252_s29 + $0x7e0] sm:$0xff]  ;;  %v456_v63 = vld [vmem:[%s10252_s29 + $0x7e8] sm:$0xff] }
  0x51   : > { %v458_v0 = vld [vmem:[%s10252_s29 + $0x800] sm:$0xff]  ;;  %455 = vst [vmem:[%s10260_s30 + $0x3f0] sm:$0xff] %v454_v62  ;;  %457 = vst [vmem:[%s10260_s30 + $0x3f8] sm:$0xff] %v456_v63  ;;  %v460_v1 = vld [vmem:[%s10252_s29 + $0x808] sm:$0xff] }
  0x52   : > { %459 = vst [vmem:[%s10260_s30 + $0x400] sm:$0xff] %v458_v0  ;;  %v462_v2 = vld [vmem:[%s10252_s29 + $0x820] sm:$0xff]  ;;  %v464_v3 = vld [vmem:[%s10252_s29 + $0x828] sm:$0xff]  ;;  %461 = vst [vmem:[%s10260_s30 + $0x408] sm:$0xff] %v460_v1 }
  0x53   : > { %463 = vst [vmem:[%s10260_s30 + $0x410] sm:$0xff] %v462_v2  ;;  %465 = vst [vmem:[%s10260_s30 + $0x418] sm:$0xff] %v464_v3  ;;  %v466_v4 = vld [vmem:[%s10252_s29 + $0x840] sm:$0xff]  ;;  %v468_v5 = vld [vmem:[%s10252_s29 + $0x848] sm:$0xff] }
  0x54   : > { %v470_v6 = vld [vmem:[%s10252_s29 + $0x860] sm:$0xff]  ;;  %467 = vst [vmem:[%s10260_s30 + $0x420] sm:$0xff] %v466_v4  ;;  %469 = vst [vmem:[%s10260_s30 + $0x428] sm:$0xff] %v468_v5  ;;  %v472_v7 = vld [vmem:[%s10252_s29 + $0x868] sm:$0xff] }
  0x55   : > { %471 = vst [vmem:[%s10260_s30 + $0x430] sm:$0xff] %v470_v6  ;;  %v474_v8 = vld [vmem:[%s10252_s29 + $0x880] sm:$0xff]  ;;  %v476_v9 = vld [vmem:[%s10252_s29 + $0x888] sm:$0xff]  ;;  %473 = vst [vmem:[%s10260_s30 + $0x438] sm:$0xff] %v472_v7 }
  0x56   : > { %475 = vst [vmem:[%s10260_s30 + $0x440] sm:$0xff] %v474_v8  ;;  %477 = vst [vmem:[%s10260_s30 + $0x448] sm:$0xff] %v476_v9  ;;  %v478_v10 = vld [vmem:[%s10252_s29 + $0x8a0] sm:$0xff]  ;;  %v480_v11 = vld [vmem:[%s10252_s29 + $0x8a8] sm:$0xff] }
  0x57   : > { %v482_v12 = vld [vmem:[%s10252_s29 + $0x8c0] sm:$0xff]  ;;  %479 = vst [vmem:[%s10260_s30 + $0x450] sm:$0xff] %v478_v10  ;;  %481 = vst [vmem:[%s10260_s30 + $0x458] sm:$0xff] %v480_v11  ;;  %v484_v13 = vld [vmem:[%s10252_s29 + $0x8c8] sm:$0xff] }
  0x58   : > { %483 = vst [vmem:[%s10260_s30 + $0x460] sm:$0xff] %v482_v12  ;;  %v486_v14 = vld [vmem:[%s10252_s29 + $0x8e0] sm:$0xff]  ;;  %v488_v15 = vld [vmem:[%s10252_s29 + $0x8e8] sm:$0xff]  ;;  %485 = vst [vmem:[%s10260_s30 + $0x468] sm:$0xff] %v484_v13 }
  0x59   : > { %487 = vst [vmem:[%s10260_s30 + $0x470] sm:$0xff] %v486_v14  ;;  %489 = vst [vmem:[%s10260_s30 + $0x478] sm:$0xff] %v488_v15  ;;  %v490_v16 = vld [vmem:[%s10252_s29 + $0x900] sm:$0xff]  ;;  %v492_v17 = vld [vmem:[%s10252_s29 + $0x908] sm:$0xff] }
  0x5a   : > { %v494_v18 = vld [vmem:[%s10252_s29 + $0x920] sm:$0xff]  ;;  %491 = vst [vmem:[%s10260_s30 + $0x480] sm:$0xff] %v490_v16  ;;  %493 = vst [vmem:[%s10260_s30 + $0x488] sm:$0xff] %v492_v17  ;;  %v496_v19 = vld [vmem:[%s10252_s29 + $0x928] sm:$0xff] }
  0x5b   : > { %495 = vst [vmem:[%s10260_s30 + $0x490] sm:$0xff] %v494_v18  ;;  %v498_v20 = vld [vmem:[%s10252_s29 + $0x940] sm:$0xff]  ;;  %v500_v21 = vld [vmem:[%s10252_s29 + $0x948] sm:$0xff]  ;;  %497 = vst [vmem:[%s10260_s30 + $0x498] sm:$0xff] %v496_v19 }
  0x5c   : > { %499 = vst [vmem:[%s10260_s30 + $0x4a0] sm:$0xff] %v498_v20  ;;  %501 = vst [vmem:[%s10260_s30 + $0x4a8] sm:$0xff] %v500_v21  ;;  %v502_v22 = vld [vmem:[%s10252_s29 + $0x960] sm:$0xff]  ;;  %v504_v23 = vld [vmem:[%s10252_s29 + $0x968] sm:$0xff] }
  0x5d   : > { %v506_v24 = vld [vmem:[%s10252_s29 + $0x980] sm:$0xff]  ;;  %503 = vst [vmem:[%s10260_s30 + $0x4b0] sm:$0xff] %v502_v22  ;;  %505 = vst [vmem:[%s10260_s30 + $0x4b8] sm:$0xff] %v504_v23  ;;  %v508_v25 = vld [vmem:[%s10252_s29 + $0x988] sm:$0xff] }
  0x5e   : > { %507 = vst [vmem:[%s10260_s30 + $0x4c0] sm:$0xff] %v506_v24  ;;  %v510_v26 = vld [vmem:[%s10252_s29 + $0x9a0] sm:$0xff]  ;;  %v512_v27 = vld [vmem:[%s10252_s29 + $0x9a8] sm:$0xff]  ;;  %509 = vst [vmem:[%s10260_s30 + $0x4c8] sm:$0xff] %v508_v25 }
  0x5f   : > { %511 = vst [vmem:[%s10260_s30 + $0x4d0] sm:$0xff] %v510_v26  ;;  %513 = vst [vmem:[%s10260_s30 + $0x4d8] sm:$0xff] %v512_v27  ;;  %v514_v28 = vld [vmem:[%s10252_s29 + $0x9c0] sm:$0xff]  ;;  %v516_v29 = vld [vmem:[%s10252_s29 + $0x9c8] sm:$0xff] }
  0x60   : > { %v518_v30 = vld [vmem:[%s10252_s29 + $0x9e0] sm:$0xff]  ;;  %515 = vst [vmem:[%s10260_s30 + $0x4e0] sm:$0xff] %v514_v28  ;;  %517 = vst [vmem:[%s10260_s30 + $0x4e8] sm:$0xff] %v516_v29  ;;  %v520_v31 = vld [vmem:[%s10252_s29 + $0x9e8] sm:$0xff] }
  0x61   : > { %519 = vst [vmem:[%s10260_s30 + $0x4f0] sm:$0xff] %v518_v30  ;;  %v522_v32 = vld [vmem:[%s10252_s29 + $0xa00] sm:$0xff]  ;;  %v524_v33 = vld [vmem:[%s10252_s29 + $0xa08] sm:$0xff]  ;;  %521 = vst [vmem:[%s10260_s30 + $0x4f8] sm:$0xff] %v520_v31 }
  0x62   : > { %523 = vst [vmem:[%s10260_s30 + $0x500] sm:$0xff] %v522_v32  ;;  %525 = vst [vmem:[%s10260_s30 + $0x508] sm:$0xff] %v524_v33  ;;  %v526_v34 = vld [vmem:[%s10252_s29 + $0xa20] sm:$0xff]  ;;  %v528_v35 = vld [vmem:[%s10252_s29 + $0xa28] sm:$0xff] }
  0x63   : > { %v530_v36 = vld [vmem:[%s10252_s29 + $0xa40] sm:$0xff]  ;;  %527 = vst [vmem:[%s10260_s30 + $0x510] sm:$0xff] %v526_v34  ;;  %529 = vst [vmem:[%s10260_s30 + $0x518] sm:$0xff] %v528_v35  ;;  %v532_v37 = vld [vmem:[%s10252_s29 + $0xa48] sm:$0xff] }
  0x64   : > { %531 = vst [vmem:[%s10260_s30 + $0x520] sm:$0xff] %v530_v36  ;;  %v534_v38 = vld [vmem:[%s10252_s29 + $0xa60] sm:$0xff]  ;;  %v536_v39 = vld [vmem:[%s10252_s29 + $0xa68] sm:$0xff]  ;;  %533 = vst [vmem:[%s10260_s30 + $0x528] sm:$0xff] %v532_v37 }
  0x65   : > { %535 = vst [vmem:[%s10260_s30 + $0x530] sm:$0xff] %v534_v38  ;;  %537 = vst [vmem:[%s10260_s30 + $0x538] sm:$0xff] %v536_v39  ;;  %v538_v40 = vld [vmem:[%s10252_s29 + $0xa80] sm:$0xff]  ;;  %v540_v41 = vld [vmem:[%s10252_s29 + $0xa88] sm:$0xff] }
  0x66   : > { %v542_v42 = vld [vmem:[%s10252_s29 + $0xaa0] sm:$0xff]  ;;  %539 = vst [vmem:[%s10260_s30 + $0x540] sm:$0xff] %v538_v40  ;;  %541 = vst [vmem:[%s10260_s30 + $0x548] sm:$0xff] %v540_v41  ;;  %v544_v43 = vld [vmem:[%s10252_s29 + $0xaa8] sm:$0xff] }
  0x67   : > { %543 = vst [vmem:[%s10260_s30 + $0x550] sm:$0xff] %v542_v42  ;;  %v546_v44 = vld [vmem:[%s10252_s29 + $0xac0] sm:$0xff]  ;;  %v548_v45 = vld [vmem:[%s10252_s29 + $0xac8] sm:$0xff]  ;;  %545 = vst [vmem:[%s10260_s30 + $0x558] sm:$0xff] %v544_v43 }
  0x68   : > { %547 = vst [vmem:[%s10260_s30 + $0x560] sm:$0xff] %v546_v44  ;;  %549 = vst [vmem:[%s10260_s30 + $0x568] sm:$0xff] %v548_v45  ;;  %v550_v46 = vld [vmem:[%s10252_s29 + $0xae0] sm:$0xff]  ;;  %v552_v47 = vld [vmem:[%s10252_s29 + $0xae8] sm:$0xff] }
  0x69   : > { %v554_v48 = vld [vmem:[%s10252_s29 + $0xb00] sm:$0xff]  ;;  %551 = vst [vmem:[%s10260_s30 + $0x570] sm:$0xff] %v550_v46  ;;  %553 = vst [vmem:[%s10260_s30 + $0x578] sm:$0xff] %v552_v47  ;;  %v556_v49 = vld [vmem:[%s10252_s29 + $0xb08] sm:$0xff] }
  0x6a   : > { %555 = vst [vmem:[%s10260_s30 + $0x580] sm:$0xff] %v554_v48  ;;  %v558_v50 = vld [vmem:[%s10252_s29 + $0xb20] sm:$0xff]  ;;  %v560_v51 = vld [vmem:[%s10252_s29 + $0xb28] sm:$0xff]  ;;  %557 = vst [vmem:[%s10260_s30 + $0x588] sm:$0xff] %v556_v49 }
  0x6b   : > { %559 = vst [vmem:[%s10260_s30 + $0x590] sm:$0xff] %v558_v50  ;;  %561 = vst [vmem:[%s10260_s30 + $0x598] sm:$0xff] %v560_v51  ;;  %v562_v52 = vld [vmem:[%s10252_s29 + $0xb40] sm:$0xff]  ;;  %v564_v53 = vld [vmem:[%s10252_s29 + $0xb48] sm:$0xff] }
  0x6c   : > { %v566_v54 = vld [vmem:[%s10252_s29 + $0xb60] sm:$0xff]  ;;  %563 = vst [vmem:[%s10260_s30 + $0x5a0] sm:$0xff] %v562_v52  ;;  %565 = vst [vmem:[%s10260_s30 + $0x5a8] sm:$0xff] %v564_v53  ;;  %v568_v55 = vld [vmem:[%s10252_s29 + $0xb68] sm:$0xff] }
  0x6d   : > { %567 = vst [vmem:[%s10260_s30 + $0x5b0] sm:$0xff] %v566_v54  ;;  %v570_v56 = vld [vmem:[%s10252_s29 + $0xb80] sm:$0xff]  ;;  %v572_v57 = vld [vmem:[%s10252_s29 + $0xb88] sm:$0xff]  ;;  %569 = vst [vmem:[%s10260_s30 + $0x5b8] sm:$0xff] %v568_v55 }
  0x6e   : > { %571 = vst [vmem:[%s10260_s30 + $0x5c0] sm:$0xff] %v570_v56  ;;  %573 = vst [vmem:[%s10260_s30 + $0x5c8] sm:$0xff] %v572_v57  ;;  %v574_v58 = vld [vmem:[%s10252_s29 + $0xba0] sm:$0xff]  ;;  %v576_v59 = vld [vmem:[%s10252_s29 + $0xba8] sm:$0xff] }
  0x6f   : > { %v578_v60 = vld [vmem:[%s10252_s29 + $0xbc0] sm:$0xff]  ;;  %575 = vst [vmem:[%s10260_s30 + $0x5d0] sm:$0xff] %v574_v58  ;;  %577 = vst [vmem:[%s10260_s30 + $0x5d8] sm:$0xff] %v576_v59  ;;  %v580_v61 = vld [vmem:[%s10252_s29 + $0xbc8] sm:$0xff] }
  0x70   : > { %579 = vst [vmem:[%s10260_s30 + $0x5e0] sm:$0xff] %v578_v60  ;;  %v582_v62 = vld [vmem:[%s10252_s29 + $0xbe0] sm:$0xff]  ;;  %v584_v63 = vld [vmem:[%s10252_s29 + $0xbe8] sm:$0xff]  ;;  %581 = vst [vmem:[%s10260_s30 + $0x5e8] sm:$0xff] %v580_v61 }
  0x71   : > { %583 = vst [vmem:[%s10260_s30 + $0x5f0] sm:$0xff] %v582_v62  ;;  %585 = vst [vmem:[%s10260_s30 + $0x5f8] sm:$0xff] %v584_v63  ;;  %v586_v0 = vld [vmem:[%s10252_s29 + $0xc00] sm:$0xff]  ;;  %v588_v1 = vld [vmem:[%s10252_s29 + $0xc08] sm:$0xff] }
  0x72   : > { %v590_v2 = vld [vmem:[%s10252_s29 + $0xc20] sm:$0xff]  ;;  %587 = vst [vmem:[%s10260_s30 + $0x600] sm:$0xff] %v586_v0  ;;  %589 = vst [vmem:[%s10260_s30 + $0x608] sm:$0xff] %v588_v1  ;;  %v592_v3 = vld [vmem:[%s10252_s29 + $0xc28] sm:$0xff] }
  0x73   : > { %591 = vst [vmem:[%s10260_s30 + $0x610] sm:$0xff] %v590_v2  ;;  %v594_v4 = vld [vmem:[%s10252_s29 + $0xc40] sm:$0xff]  ;;  %v596_v5 = vld [vmem:[%s10252_s29 + $0xc48] sm:$0xff]  ;;  %593 = vst [vmem:[%s10260_s30 + $0x618] sm:$0xff] %v592_v3 }
  0x74   : > { %595 = vst [vmem:[%s10260_s30 + $0x620] sm:$0xff] %v594_v4  ;;  %597 = vst [vmem:[%s10260_s30 + $0x628] sm:$0xff] %v596_v5  ;;  %v598_v6 = vld [vmem:[%s10252_s29 + $0xc60] sm:$0xff]  ;;  %v600_v7 = vld [vmem:[%s10252_s29 + $0xc68] sm:$0xff] }
  0x75   : > { %v602_v8 = vld [vmem:[%s10252_s29 + $0xc80] sm:$0xff]  ;;  %599 = vst [vmem:[%s10260_s30 + $0x630] sm:$0xff] %v598_v6  ;;  %601 = vst [vmem:[%s10260_s30 + $0x638] sm:$0xff] %v600_v7  ;;  %v604_v9 = vld [vmem:[%s10252_s29 + $0xc88] sm:$0xff] }
  0x76   : > { %603 = vst [vmem:[%s10260_s30 + $0x640] sm:$0xff] %v602_v8  ;;  %v606_v10 = vld [vmem:[%s10252_s29 + $0xca0] sm:$0xff]  ;;  %v608_v11 = vld [vmem:[%s10252_s29 + $0xca8] sm:$0xff]  ;;  %605 = vst [vmem:[%s10260_s30 + $0x648] sm:$0xff] %v604_v9 }
  0x77   : > { %607 = vst [vmem:[%s10260_s30 + $0x650] sm:$0xff] %v606_v10  ;;  %609 = vst [vmem:[%s10260_s30 + $0x658] sm:$0xff] %v608_v11  ;;  %v610_v12 = vld [vmem:[%s10252_s29 + $0xcc0] sm:$0xff]  ;;  %v612_v13 = vld [vmem:[%s10252_s29 + $0xcc8] sm:$0xff] }
  0x78   : > { %v614_v14 = vld [vmem:[%s10252_s29 + $0xce0] sm:$0xff]  ;;  %611 = vst [vmem:[%s10260_s30 + $0x660] sm:$0xff] %v610_v12  ;;  %613 = vst [vmem:[%s10260_s30 + $0x668] sm:$0xff] %v612_v13  ;;  %v616_v15 = vld [vmem:[%s10252_s29 + $0xce8] sm:$0xff] }
  0x79   : > { %615 = vst [vmem:[%s10260_s30 + $0x670] sm:$0xff] %v614_v14  ;;  %v618_v16 = vld [vmem:[%s10252_s29 + $0xd00] sm:$0xff]  ;;  %v620_v17 = vld [vmem:[%s10252_s29 + $0xd08] sm:$0xff]  ;;  %617 = vst [vmem:[%s10260_s30 + $0x678] sm:$0xff] %v616_v15 }
  0x7a   : > { %619 = vst [vmem:[%s10260_s30 + $0x680] sm:$0xff] %v618_v16  ;;  %621 = vst [vmem:[%s10260_s30 + $0x688] sm:$0xff] %v620_v17  ;;  %v622_v18 = vld [vmem:[%s10252_s29 + $0xd20] sm:$0xff]  ;;  %v624_v19 = vld [vmem:[%s10252_s29 + $0xd28] sm:$0xff] }
  0x7b   : > { %v626_v20 = vld [vmem:[%s10252_s29 + $0xd40] sm:$0xff]  ;;  %623 = vst [vmem:[%s10260_s30 + $0x690] sm:$0xff] %v622_v18  ;;  %625 = vst [vmem:[%s10260_s30 + $0x698] sm:$0xff] %v624_v19  ;;  %v628_v21 = vld [vmem:[%s10252_s29 + $0xd48] sm:$0xff] }
  0x7c   : > { %627 = vst [vmem:[%s10260_s30 + $0x6a0] sm:$0xff] %v626_v20  ;;  %v630_v22 = vld [vmem:[%s10252_s29 + $0xd60] sm:$0xff]  ;;  %v632_v23 = vld [vmem:[%s10252_s29 + $0xd68] sm:$0xff]  ;;  %629 = vst [vmem:[%s10260_s30 + $0x6a8] sm:$0xff] %v628_v21 }
  0x7d   : > { %631 = vst [vmem:[%s10260_s30 + $0x6b0] sm:$0xff] %v630_v22  ;;  %633 = vst [vmem:[%s10260_s30 + $0x6b8] sm:$0xff] %v632_v23  ;;  %v634_v24 = vld [vmem:[%s10252_s29 + $0xd80] sm:$0xff]  ;;  %v636_v25 = vld [vmem:[%s10252_s29 + $0xd88] sm:$0xff] }
  0x7e   : > { %v638_v26 = vld [vmem:[%s10252_s29 + $0xda0] sm:$0xff]  ;;  %635 = vst [vmem:[%s10260_s30 + $0x6c0] sm:$0xff] %v634_v24  ;;  %637 = vst [vmem:[%s10260_s30 + $0x6c8] sm:$0xff] %v636_v25  ;;  %v640_v27 = vld [vmem:[%s10252_s29 + $0xda8] sm:$0xff] }
  0x7f   : > { %639 = vst [vmem:[%s10260_s30 + $0x6d0] sm:$0xff] %v638_v26  ;;  %v642_v28 = vld [vmem:[%s10252_s29 + $0xdc0] sm:$0xff]  ;;  %v644_v29 = vld [vmem:[%s10252_s29 + $0xdc8] sm:$0xff]  ;;  %641 = vst [vmem:[%s10260_s30 + $0x6d8] sm:$0xff] %v640_v27 }
  0x80   : > { %643 = vst [vmem:[%s10260_s30 + $0x6e0] sm:$0xff] %v642_v28  ;;  %645 = vst [vmem:[%s10260_s30 + $0x6e8] sm:$0xff] %v644_v29  ;;  %v646_v30 = vld [vmem:[%s10252_s29 + $0xde0] sm:$0xff]  ;;  %v648_v31 = vld [vmem:[%s10252_s29 + $0xde8] sm:$0xff] }
  0x81   : > { %v650_v32 = vld [vmem:[%s10252_s29 + $0xe00] sm:$0xff]  ;;  %647 = vst [vmem:[%s10260_s30 + $0x6f0] sm:$0xff] %v646_v30  ;;  %649 = vst [vmem:[%s10260_s30 + $0x6f8] sm:$0xff] %v648_v31  ;;  %v652_v33 = vld [vmem:[%s10252_s29 + $0xe08] sm:$0xff] }
  0x82   : > { %651 = vst [vmem:[%s10260_s30 + $0x700] sm:$0xff] %v650_v32  ;;  %v654_v34 = vld [vmem:[%s10252_s29 + $0xe20] sm:$0xff]  ;;  %v656_v35 = vld [vmem:[%s10252_s29 + $0xe28] sm:$0xff]  ;;  %653 = vst [vmem:[%s10260_s30 + $0x708] sm:$0xff] %v652_v33 }
  0x83   : > { %655 = vst [vmem:[%s10260_s30 + $0x710] sm:$0xff] %v654_v34  ;;  %657 = vst [vmem:[%s10260_s30 + $0x718] sm:$0xff] %v656_v35  ;;  %v658_v36 = vld [vmem:[%s10252_s29 + $0xe40] sm:$0xff]  ;;  %v660_v37 = vld [vmem:[%s10252_s29 + $0xe48] sm:$0xff] }
  0x84   : > { %v662_v38 = vld [vmem:[%s10252_s29 + $0xe60] sm:$0xff]  ;;  %659 = vst [vmem:[%s10260_s30 + $0x720] sm:$0xff] %v658_v36  ;;  %661 = vst [vmem:[%s10260_s30 + $0x728] sm:$0xff] %v660_v37  ;;  %v664_v39 = vld [vmem:[%s10252_s29 + $0xe68] sm:$0xff] }
  0x85   : > { %663 = vst [vmem:[%s10260_s30 + $0x730] sm:$0xff] %v662_v38  ;;  %v666_v40 = vld [vmem:[%s10252_s29 + $0xe80] sm:$0xff]  ;;  %v668_v41 = vld [vmem:[%s10252_s29 + $0xe88] sm:$0xff]  ;;  %665 = vst [vmem:[%s10260_s30 + $0x738] sm:$0xff] %v664_v39 }
  0x86   : > { %667 = vst [vmem:[%s10260_s30 + $0x740] sm:$0xff] %v666_v40  ;;  %669 = vst [vmem:[%s10260_s30 + $0x748] sm:$0xff] %v668_v41  ;;  %v670_v42 = vld [vmem:[%s10252_s29 + $0xea0] sm:$0xff]  ;;  %v672_v43 = vld [vmem:[%s10252_s29 + $0xea8] sm:$0xff] }
  0x87   : > { %v674_v44 = vld [vmem:[%s10252_s29 + $0xec0] sm:$0xff]  ;;  %671 = vst [vmem:[%s10260_s30 + $0x750] sm:$0xff] %v670_v42  ;;  %673 = vst [vmem:[%s10260_s30 + $0x758] sm:$0xff] %v672_v43  ;;  %v676_v45 = vld [vmem:[%s10252_s29 + $0xec8] sm:$0xff] }
  0x88   : > { %675 = vst [vmem:[%s10260_s30 + $0x760] sm:$0xff] %v674_v44  ;;  %v678_v46 = vld [vmem:[%s10252_s29 + $0xee0] sm:$0xff]  ;;  %v680_v47 = vld [vmem:[%s10252_s29 + $0xee8] sm:$0xff]  ;;  %677 = vst [vmem:[%s10260_s30 + $0x768] sm:$0xff] %v676_v45 }
  0x89   : > { %679 = vst [vmem:[%s10260_s30 + $0x770] sm:$0xff] %v678_v46  ;;  %681 = vst [vmem:[%s10260_s30 + $0x778] sm:$0xff] %v680_v47  ;;  %v682_v48 = vld [vmem:[%s10252_s29 + $0xf00] sm:$0xff]  ;;  %v684_v49 = vld [vmem:[%s10252_s29 + $0xf08] sm:$0xff] }
  0x8a   : > { %v686_v50 = vld [vmem:[%s10252_s29 + $0xf20] sm:$0xff]  ;;  %683 = vst [vmem:[%s10260_s30 + $0x780] sm:$0xff] %v682_v48  ;;  %685 = vst [vmem:[%s10260_s30 + $0x788] sm:$0xff] %v684_v49  ;;  %v688_v51 = vld [vmem:[%s10252_s29 + $0xf28] sm:$0xff] }
  0x8b   : > { %687 = vst [vmem:[%s10260_s30 + $0x790] sm:$0xff] %v686_v50  ;;  %v690_v52 = vld [vmem:[%s10252_s29 + $0xf40] sm:$0xff]  ;;  %v692_v53 = vld [vmem:[%s10252_s29 + $0xf48] sm:$0xff]  ;;  %689 = vst [vmem:[%s10260_s30 + $0x798] sm:$0xff] %v688_v51 }
  0x8c   : > { %691 = vst [vmem:[%s10260_s30 + $0x7a0] sm:$0xff] %v690_v52  ;;  %693 = vst [vmem:[%s10260_s30 + $0x7a8] sm:$0xff] %v692_v53  ;;  %v694_v54 = vld [vmem:[%s10252_s29 + $0xf60] sm:$0xff]  ;;  %v696_v55 = vld [vmem:[%s10252_s29 + $0xf68] sm:$0xff] }
  0x8d   : > { %v698_v56 = vld [vmem:[%s10252_s29 + $0xf80] sm:$0xff]  ;;  %695 = vst [vmem:[%s10260_s30 + $0x7b0] sm:$0xff] %v694_v54  ;;  %697 = vst [vmem:[%s10260_s30 + $0x7b8] sm:$0xff] %v696_v55  ;;  %v700_v57 = vld [vmem:[%s10252_s29 + $0xf88] sm:$0xff] }
  0x8e   : > { %699 = vst [vmem:[%s10260_s30 + $0x7c0] sm:$0xff] %v698_v56  ;;  %v702_v58 = vld [vmem:[%s10252_s29 + $0xfa0] sm:$0xff]  ;;  %v704_v59 = vld [vmem:[%s10252_s29 + $0xfa8] sm:$0xff]  ;;  %701 = vst [vmem:[%s10260_s30 + $0x7c8] sm:$0xff] %v700_v57 }
  0x8f   : > { %703 = vst [vmem:[%s10260_s30 + $0x7d0] sm:$0xff] %v702_v58  ;;  %705 = vst [vmem:[%s10260_s30 + $0x7d8] sm:$0xff] %v704_v59  ;;  %v706_v60 = vld [vmem:[%s10252_s29 + $0xfc0] sm:$0xff]  ;;  %v708_v61 = vld [vmem:[%s10252_s29 + $0xfc8] sm:$0xff] }
  0x90   : > { %v710_v62 = vld [vmem:[%s10252_s29 + $0xfe0] sm:$0xff]  ;;  %707 = vst [vmem:[%s10260_s30 + $0x7e0] sm:$0xff] %v706_v60  ;;  %709 = vst [vmem:[%s10260_s30 + $0x7e8] sm:$0xff] %v708_v61  ;;  %v712_v63 = vld [vmem:[%s10252_s29 + $0xfe8] sm:$0xff] }
  0x91   : > { %711 = vst [vmem:[%s10260_s30 + $0x7f0] sm:$0xff] %v710_v62  ;;  %v714_v0 = vld [vmem:[%s10252_s29 + $0x1000] sm:$0xff]  ;;  %v716_v1 = vld [vmem:[%s10252_s29 + $0x1008] sm:$0xff]  ;;  %713 = vst [vmem:[%s10260_s30 + $0x7f8] sm:$0xff] %v712_v63 }
  0x92   : > { %715 = vst [vmem:[%s10260_s30 + $0x800] sm:$0xff] %v714_v0  ;;  %717 = vst [vmem:[%s10260_s30 + $0x808] sm:$0xff] %v716_v1  ;;  %v718_v2 = vld [vmem:[%s10252_s29 + $0x1020] sm:$0xff]  ;;  %v720_v3 = vld [vmem:[%s10252_s29 + $0x1028] sm:$0xff] }
  0x93   : > { %v722_v4 = vld [vmem:[%s10252_s29 + $0x1040] sm:$0xff]  ;;  %719 = vst [vmem:[%s10260_s30 + $0x810] sm:$0xff] %v718_v2  ;;  %721 = vst [vmem:[%s10260_s30 + $0x818] sm:$0xff] %v720_v3  ;;  %v724_v5 = vld [vmem:[%s10252_s29 + $0x1048] sm:$0xff] }
  0x94   : > { %723 = vst [vmem:[%s10260_s30 + $0x820] sm:$0xff] %v722_v4  ;;  %v726_v6 = vld [vmem:[%s10252_s29 + $0x1060] sm:$0xff]  ;;  %v728_v7 = vld [vmem:[%s10252_s29 + $0x1068] sm:$0xff]  ;;  %725 = vst [vmem:[%s10260_s30 + $0x828] sm:$0xff] %v724_v5 }
  0x95   : > { %727 = vst [vmem:[%s10260_s30 + $0x830] sm:$0xff] %v726_v6  ;;  %729 = vst [vmem:[%s10260_s30 + $0x838] sm:$0xff] %v728_v7  ;;  %v730_v8 = vld [vmem:[%s10252_s29 + $0x1080] sm:$0xff]  ;;  %v732_v9 = vld [vmem:[%s10252_s29 + $0x1088] sm:$0xff] }
  0x96   : > { %v734_v10 = vld [vmem:[%s10252_s29 + $0x10a0] sm:$0xff]  ;;  %731 = vst [vmem:[%s10260_s30 + $0x840] sm:$0xff] %v730_v8  ;;  %733 = vst [vmem:[%s10260_s30 + $0x848] sm:$0xff] %v732_v9  ;;  %v736_v11 = vld [vmem:[%s10252_s29 + $0x10a8] sm:$0xff] }
  0x97   : > { %735 = vst [vmem:[%s10260_s30 + $0x850] sm:$0xff] %v734_v10  ;;  %v738_v12 = vld [vmem:[%s10252_s29 + $0x10c0] sm:$0xff]  ;;  %v740_v13 = vld [vmem:[%s10252_s29 + $0x10c8] sm:$0xff]  ;;  %737 = vst [vmem:[%s10260_s30 + $0x858] sm:$0xff] %v736_v11 }
  0x98   : > { %739 = vst [vmem:[%s10260_s30 + $0x860] sm:$0xff] %v738_v12  ;;  %741 = vst [vmem:[%s10260_s30 + $0x868] sm:$0xff] %v740_v13  ;;  %v742_v14 = vld [vmem:[%s10252_s29 + $0x10e0] sm:$0xff]  ;;  %v744_v15 = vld [vmem:[%s10252_s29 + $0x10e8] sm:$0xff] }
  0x99   : > { %v746_v16 = vld [vmem:[%s10252_s29 + $0x1100] sm:$0xff]  ;;  %743 = vst [vmem:[%s10260_s30 + $0x870] sm:$0xff] %v742_v14  ;;  %745 = vst [vmem:[%s10260_s30 + $0x878] sm:$0xff] %v744_v15  ;;  %v748_v17 = vld [vmem:[%s10252_s29 + $0x1108] sm:$0xff] }
  0x9a   : > { %747 = vst [vmem:[%s10260_s30 + $0x880] sm:$0xff] %v746_v16  ;;  %v750_v18 = vld [vmem:[%s10252_s29 + $0x1120] sm:$0xff]  ;;  %v752_v19 = vld [vmem:[%s10252_s29 + $0x1128] sm:$0xff]  ;;  %749 = vst [vmem:[%s10260_s30 + $0x888] sm:$0xff] %v748_v17 }
  0x9b   : > { %751 = vst [vmem:[%s10260_s30 + $0x890] sm:$0xff] %v750_v18  ;;  %753 = vst [vmem:[%s10260_s30 + $0x898] sm:$0xff] %v752_v19  ;;  %v754_v20 = vld [vmem:[%s10252_s29 + $0x1140] sm:$0xff]  ;;  %v756_v21 = vld [vmem:[%s10252_s29 + $0x1148] sm:$0xff] }
  0x9c   : > { %v758_v22 = vld [vmem:[%s10252_s29 + $0x1160] sm:$0xff]  ;;  %755 = vst [vmem:[%s10260_s30 + $0x8a0] sm:$0xff] %v754_v20  ;;  %757 = vst [vmem:[%s10260_s30 + $0x8a8] sm:$0xff] %v756_v21  ;;  %v760_v23 = vld [vmem:[%s10252_s29 + $0x1168] sm:$0xff] }
  0x9d   : > { %759 = vst [vmem:[%s10260_s30 + $0x8b0] sm:$0xff] %v758_v22  ;;  %v762_v24 = vld [vmem:[%s10252_s29 + $0x1180] sm:$0xff]  ;;  %v764_v25 = vld [vmem:[%s10252_s29 + $0x1188] sm:$0xff]  ;;  %761 = vst [vmem:[%s10260_s30 + $0x8b8] sm:$0xff] %v760_v23 }
  0x9e   : > { %763 = vst [vmem:[%s10260_s30 + $0x8c0] sm:$0xff] %v762_v24  ;;  %765 = vst [vmem:[%s10260_s30 + $0x8c8] sm:$0xff] %v764_v25  ;;  %v766_v26 = vld [vmem:[%s10252_s29 + $0x11a0] sm:$0xff]  ;;  %v768_v27 = vld [vmem:[%s10252_s29 + $0x11a8] sm:$0xff] }
  0x9f   : > { %v770_v28 = vld [vmem:[%s10252_s29 + $0x11c0] sm:$0xff]  ;;  %767 = vst [vmem:[%s10260_s30 + $0x8d0] sm:$0xff] %v766_v26  ;;  %769 = vst [vmem:[%s10260_s30 + $0x8d8] sm:$0xff] %v768_v27  ;;  %v772_v29 = vld [vmem:[%s10252_s29 + $0x11c8] sm:$0xff] }
  0xa0   : > { %771 = vst [vmem:[%s10260_s30 + $0x8e0] sm:$0xff] %v770_v28  ;;  %v774_v30 = vld [vmem:[%s10252_s29 + $0x11e0] sm:$0xff]  ;;  %v776_v31 = vld [vmem:[%s10252_s29 + $0x11e8] sm:$0xff]  ;;  %773 = vst [vmem:[%s10260_s30 + $0x8e8] sm:$0xff] %v772_v29 }
  0xa1   : > { %775 = vst [vmem:[%s10260_s30 + $0x8f0] sm:$0xff] %v774_v30  ;;  %777 = vst [vmem:[%s10260_s30 + $0x8f8] sm:$0xff] %v776_v31  ;;  %v778_v32 = vld [vmem:[%s10252_s29 + $0x1200] sm:$0xff]  ;;  %v780_v33 = vld [vmem:[%s10252_s29 + $0x1208] sm:$0xff] }
  0xa2   : > { %v782_v34 = vld [vmem:[%s10252_s29 + $0x1220] sm:$0xff]  ;;  %779 = vst [vmem:[%s10260_s30 + $0x900] sm:$0xff] %v778_v32  ;;  %781 = vst [vmem:[%s10260_s30 + $0x908] sm:$0xff] %v780_v33  ;;  %v784_v35 = vld [vmem:[%s10252_s29 + $0x1228] sm:$0xff] }
  0xa3   : > { %783 = vst [vmem:[%s10260_s30 + $0x910] sm:$0xff] %v782_v34  ;;  %v786_v36 = vld [vmem:[%s10252_s29 + $0x1240] sm:$0xff]  ;;  %v788_v37 = vld [vmem:[%s10252_s29 + $0x1248] sm:$0xff]  ;;  %785 = vst [vmem:[%s10260_s30 + $0x918] sm:$0xff] %v784_v35 }
  0xa4   : > { %787 = vst [vmem:[%s10260_s30 + $0x920] sm:$0xff] %v786_v36  ;;  %789 = vst [vmem:[%s10260_s30 + $0x928] sm:$0xff] %v788_v37  ;;  %v790_v38 = vld [vmem:[%s10252_s29 + $0x1260] sm:$0xff]  ;;  %v792_v39 = vld [vmem:[%s10252_s29 + $0x1268] sm:$0xff] }
  0xa5   : > { %v794_v40 = vld [vmem:[%s10252_s29 + $0x1280] sm:$0xff]  ;;  %791 = vst [vmem:[%s10260_s30 + $0x930] sm:$0xff] %v790_v38  ;;  %793 = vst [vmem:[%s10260_s30 + $0x938] sm:$0xff] %v792_v39  ;;  %v796_v41 = vld [vmem:[%s10252_s29 + $0x1288] sm:$0xff] }
  0xa6   : > { %795 = vst [vmem:[%s10260_s30 + $0x940] sm:$0xff] %v794_v40  ;;  %v798_v42 = vld [vmem:[%s10252_s29 + $0x12a0] sm:$0xff]  ;;  %v800_v43 = vld [vmem:[%s10252_s29 + $0x12a8] sm:$0xff]  ;;  %797 = vst [vmem:[%s10260_s30 + $0x948] sm:$0xff] %v796_v41 }
  0xa7   : > { %799 = vst [vmem:[%s10260_s30 + $0x950] sm:$0xff] %v798_v42  ;;  %801 = vst [vmem:[%s10260_s30 + $0x958] sm:$0xff] %v800_v43  ;;  %v802_v44 = vld [vmem:[%s10252_s29 + $0x12c0] sm:$0xff]  ;;  %v804_v45 = vld [vmem:[%s10252_s29 + $0x12c8] sm:$0xff] }
  0xa8   : > { %v806_v46 = vld [vmem:[%s10252_s29 + $0x12e0] sm:$0xff]  ;;  %803 = vst [vmem:[%s10260_s30 + $0x960] sm:$0xff] %v802_v44  ;;  %805 = vst [vmem:[%s10260_s30 + $0x968] sm:$0xff] %v804_v45  ;;  %v808_v47 = vld [vmem:[%s10252_s29 + $0x12e8] sm:$0xff] }
  0xa9   : > { %807 = vst [vmem:[%s10260_s30 + $0x970] sm:$0xff] %v806_v46  ;;  %v810_v48 = vld [vmem:[%s10252_s29 + $0x1300] sm:$0xff]  ;;  %v812_v49 = vld [vmem:[%s10252_s29 + $0x1308] sm:$0xff]  ;;  %809 = vst [vmem:[%s10260_s30 + $0x978] sm:$0xff] %v808_v47 }
  0xaa   : > { %811 = vst [vmem:[%s10260_s30 + $0x980] sm:$0xff] %v810_v48  ;;  %813 = vst [vmem:[%s10260_s30 + $0x988] sm:$0xff] %v812_v49  ;;  %v814_v50 = vld [vmem:[%s10252_s29 + $0x1320] sm:$0xff]  ;;  %v816_v51 = vld [vmem:[%s10252_s29 + $0x1328] sm:$0xff] }
  0xab   : > { %v818_v52 = vld [vmem:[%s10252_s29 + $0x1340] sm:$0xff]  ;;  %815 = vst [vmem:[%s10260_s30 + $0x990] sm:$0xff] %v814_v50  ;;  %817 = vst [vmem:[%s10260_s30 + $0x998] sm:$0xff] %v816_v51  ;;  %v820_v53 = vld [vmem:[%s10252_s29 + $0x1348] sm:$0xff] }
  0xac   : > { %819 = vst [vmem:[%s10260_s30 + $0x9a0] sm:$0xff] %v818_v52  ;;  %v822_v54 = vld [vmem:[%s10252_s29 + $0x1360] sm:$0xff]  ;;  %v824_v55 = vld [vmem:[%s10252_s29 + $0x1368] sm:$0xff]  ;;  %821 = vst [vmem:[%s10260_s30 + $0x9a8] sm:$0xff] %v820_v53 }
  0xad   : > { %823 = vst [vmem:[%s10260_s30 + $0x9b0] sm:$0xff] %v822_v54  ;;  %825 = vst [vmem:[%s10260_s30 + $0x9b8] sm:$0xff] %v824_v55  ;;  %v826_v56 = vld [vmem:[%s10252_s29 + $0x1380] sm:$0xff]  ;;  %v828_v57 = vld [vmem:[%s10252_s29 + $0x1388] sm:$0xff] }
  0xae   : > { %v830_v58 = vld [vmem:[%s10252_s29 + $0x13a0] sm:$0xff]  ;;  %827 = vst [vmem:[%s10260_s30 + $0x9c0] sm:$0xff] %v826_v56  ;;  %829 = vst [vmem:[%s10260_s30 + $0x9c8] sm:$0xff] %v828_v57  ;;  %v832_v59 = vld [vmem:[%s10252_s29 + $0x13a8] sm:$0xff] }
  0xaf   : > { %831 = vst [vmem:[%s10260_s30 + $0x9d0] sm:$0xff] %v830_v58  ;;  %v834_v60 = vld [vmem:[%s10252_s29 + $0x13c0] sm:$0xff]  ;;  %v836_v61 = vld [vmem:[%s10252_s29 + $0x13c8] sm:$0xff]  ;;  %833 = vst [vmem:[%s10260_s30 + $0x9d8] sm:$0xff] %v832_v59 }
  0xb0   : > { %835 = vst [vmem:[%s10260_s30 + $0x9e0] sm:$0xff] %v834_v60  ;;  %837 = vst [vmem:[%s10260_s30 + $0x9e8] sm:$0xff] %v836_v61  ;;  %v838_v62 = vld [vmem:[%s10252_s29 + $0x13e0] sm:$0xff]  ;;  %v840_v63 = vld [vmem:[%s10252_s29 + $0x13e8] sm:$0xff] }
  0xb1   : > { %v842_v0 = vld [vmem:[%s10252_s29 + $0x1400] sm:$0xff]  ;;  %839 = vst [vmem:[%s10260_s30 + $0x9f0] sm:$0xff] %v838_v62  ;;  %841 = vst [vmem:[%s10260_s30 + $0x9f8] sm:$0xff] %v840_v63  ;;  %v844_v1 = vld [vmem:[%s10252_s29 + $0x1408] sm:$0xff] }
  0xb2   : > { %843 = vst [vmem:[%s10260_s30 + $0xa00] sm:$0xff] %v842_v0  ;;  %v846_v2 = vld [vmem:[%s10252_s29 + $0x1420] sm:$0xff]  ;;  %v848_v3 = vld [vmem:[%s10252_s29 + $0x1428] sm:$0xff]  ;;  %845 = vst [vmem:[%s10260_s30 + $0xa08] sm:$0xff] %v844_v1 }
  0xb3   : > { %847 = vst [vmem:[%s10260_s30 + $0xa10] sm:$0xff] %v846_v2  ;;  %849 = vst [vmem:[%s10260_s30 + $0xa18] sm:$0xff] %v848_v3  ;;  %v850_v4 = vld [vmem:[%s10252_s29 + $0x1440] sm:$0xff]  ;;  %v852_v5 = vld [vmem:[%s10252_s29 + $0x1448] sm:$0xff] }
  0xb4   : > { %v854_v6 = vld [vmem:[%s10252_s29 + $0x1460] sm:$0xff]  ;;  %851 = vst [vmem:[%s10260_s30 + $0xa20] sm:$0xff] %v850_v4  ;;  %853 = vst [vmem:[%s10260_s30 + $0xa28] sm:$0xff] %v852_v5  ;;  %v856_v7 = vld [vmem:[%s10252_s29 + $0x1468] sm:$0xff] }
  0xb5   : > { %855 = vst [vmem:[%s10260_s30 + $0xa30] sm:$0xff] %v854_v6  ;;  %v858_v8 = vld [vmem:[%s10252_s29 + $0x1480] sm:$0xff]  ;;  %v860_v9 = vld [vmem:[%s10252_s29 + $0x1488] sm:$0xff]  ;;  %857 = vst [vmem:[%s10260_s30 + $0xa38] sm:$0xff] %v856_v7 }
  0xb6   : > { %859 = vst [vmem:[%s10260_s30 + $0xa40] sm:$0xff] %v858_v8  ;;  %861 = vst [vmem:[%s10260_s30 + $0xa48] sm:$0xff] %v860_v9  ;;  %v862_v10 = vld [vmem:[%s10252_s29 + $0x14a0] sm:$0xff]  ;;  %v864_v11 = vld [vmem:[%s10252_s29 + $0x14a8] sm:$0xff] }
  0xb7   : > { %v866_v12 = vld [vmem:[%s10252_s29 + $0x14c0] sm:$0xff]  ;;  %863 = vst [vmem:[%s10260_s30 + $0xa50] sm:$0xff] %v862_v10  ;;  %865 = vst [vmem:[%s10260_s30 + $0xa58] sm:$0xff] %v864_v11  ;;  %v868_v13 = vld [vmem:[%s10252_s29 + $0x14c8] sm:$0xff] }
  0xb8   : > { %867 = vst [vmem:[%s10260_s30 + $0xa60] sm:$0xff] %v866_v12  ;;  %v870_v14 = vld [vmem:[%s10252_s29 + $0x14e0] sm:$0xff]  ;;  %v872_v15 = vld [vmem:[%s10252_s29 + $0x14e8] sm:$0xff]  ;;  %869 = vst [vmem:[%s10260_s30 + $0xa68] sm:$0xff] %v868_v13 }
  0xb9   : > { %871 = vst [vmem:[%s10260_s30 + $0xa70] sm:$0xff] %v870_v14  ;;  %873 = vst [vmem:[%s10260_s30 + $0xa78] sm:$0xff] %v872_v15  ;;  %v874_v16 = vld [vmem:[%s10252_s29 + $0x1500] sm:$0xff]  ;;  %v876_v17 = vld [vmem:[%s10252_s29 + $0x1508] sm:$0xff] }
  0xba   : > { %v878_v18 = vld [vmem:[%s10252_s29 + $0x1520] sm:$0xff]  ;;  %875 = vst [vmem:[%s10260_s30 + $0xa80] sm:$0xff] %v874_v16  ;;  %877 = vst [vmem:[%s10260_s30 + $0xa88] sm:$0xff] %v876_v17  ;;  %v880_v19 = vld [vmem:[%s10252_s29 + $0x1528] sm:$0xff] }
  0xbb   : > { %879 = vst [vmem:[%s10260_s30 + $0xa90] sm:$0xff] %v878_v18  ;;  %v882_v20 = vld [vmem:[%s10252_s29 + $0x1540] sm:$0xff]  ;;  %v884_v21 = vld [vmem:[%s10252_s29 + $0x1548] sm:$0xff]  ;;  %881 = vst [vmem:[%s10260_s30 + $0xa98] sm:$0xff] %v880_v19 }
  0xbc   : > { %883 = vst [vmem:[%s10260_s30 + $0xaa0] sm:$0xff] %v882_v20  ;;  %885 = vst [vmem:[%s10260_s30 + $0xaa8] sm:$0xff] %v884_v21  ;;  %v886_v22 = vld [vmem:[%s10252_s29 + $0x1560] sm:$0xff]  ;;  %v888_v23 = vld [vmem:[%s10252_s29 + $0x1568] sm:$0xff] }
  0xbd   : > { %v890_v24 = vld [vmem:[%s10252_s29 + $0x1580] sm:$0xff]  ;;  %887 = vst [vmem:[%s10260_s30 + $0xab0] sm:$0xff] %v886_v22  ;;  %889 = vst [vmem:[%s10260_s30 + $0xab8] sm:$0xff] %v888_v23  ;;  %v892_v25 = vld [vmem:[%s10252_s29 + $0x1588] sm:$0xff] }
  0xbe   : > { %891 = vst [vmem:[%s10260_s30 + $0xac0] sm:$0xff] %v890_v24  ;;  %v894_v26 = vld [vmem:[%s10252_s29 + $0x15a0] sm:$0xff]  ;;  %v896_v27 = vld [vmem:[%s10252_s29 + $0x15a8] sm:$0xff]  ;;  %893 = vst [vmem:[%s10260_s30 + $0xac8] sm:$0xff] %v892_v25 }
  0xbf   : > { %895 = vst [vmem:[%s10260_s30 + $0xad0] sm:$0xff] %v894_v26  ;;  %897 = vst [vmem:[%s10260_s30 + $0xad8] sm:$0xff] %v896_v27  ;;  %v898_v28 = vld [vmem:[%s10252_s29 + $0x15c0] sm:$0xff]  ;;  %v900_v29 = vld [vmem:[%s10252_s29 + $0x15c8] sm:$0xff] }
  0xc0   : > { %v902_v30 = vld [vmem:[%s10252_s29 + $0x15e0] sm:$0xff]  ;;  %899 = vst [vmem:[%s10260_s30 + $0xae0] sm:$0xff] %v898_v28  ;;  %901 = vst [vmem:[%s10260_s30 + $0xae8] sm:$0xff] %v900_v29  ;;  %v904_v31 = vld [vmem:[%s10252_s29 + $0x15e8] sm:$0xff] }
  0xc1   : > { %903 = vst [vmem:[%s10260_s30 + $0xaf0] sm:$0xff] %v902_v30  ;;  %v906_v32 = vld [vmem:[%s10252_s29 + $0x1600] sm:$0xff]  ;;  %v908_v33 = vld [vmem:[%s10252_s29 + $0x1608] sm:$0xff]  ;;  %905 = vst [vmem:[%s10260_s30 + $0xaf8] sm:$0xff] %v904_v31 }
  0xc2   : > { %907 = vst [vmem:[%s10260_s30 + $0xb00] sm:$0xff] %v906_v32  ;;  %909 = vst [vmem:[%s10260_s30 + $0xb08] sm:$0xff] %v908_v33  ;;  %v910_v34 = vld [vmem:[%s10252_s29 + $0x1620] sm:$0xff]  ;;  %v912_v35 = vld [vmem:[%s10252_s29 + $0x1628] sm:$0xff] }
  0xc3   : > { %v914_v36 = vld [vmem:[%s10252_s29 + $0x1640] sm:$0xff]  ;;  %911 = vst [vmem:[%s10260_s30 + $0xb10] sm:$0xff] %v910_v34  ;;  %913 = vst [vmem:[%s10260_s30 + $0xb18] sm:$0xff] %v912_v35  ;;  %v916_v37 = vld [vmem:[%s10252_s29 + $0x1648] sm:$0xff] }
  0xc4   : > { %915 = vst [vmem:[%s10260_s30 + $0xb20] sm:$0xff] %v914_v36  ;;  %v918_v38 = vld [vmem:[%s10252_s29 + $0x1660] sm:$0xff]  ;;  %v920_v39 = vld [vmem:[%s10252_s29 + $0x1668] sm:$0xff]  ;;  %917 = vst [vmem:[%s10260_s30 + $0xb28] sm:$0xff] %v916_v37 }
  0xc5   : > { %919 = vst [vmem:[%s10260_s30 + $0xb30] sm:$0xff] %v918_v38  ;;  %921 = vst [vmem:[%s10260_s30 + $0xb38] sm:$0xff] %v920_v39  ;;  %v922_v40 = vld [vmem:[%s10252_s29 + $0x1680] sm:$0xff]  ;;  %v924_v41 = vld [vmem:[%s10252_s29 + $0x1688] sm:$0xff] }
  0xc6   : > { %v926_v42 = vld [vmem:[%s10252_s29 + $0x16a0] sm:$0xff]  ;;  %923 = vst [vmem:[%s10260_s30 + $0xb40] sm:$0xff] %v922_v40  ;;  %925 = vst [vmem:[%s10260_s30 + $0xb48] sm:$0xff] %v924_v41  ;;  %v928_v43 = vld [vmem:[%s10252_s29 + $0x16a8] sm:$0xff] }
  0xc7   : > { %927 = vst [vmem:[%s10260_s30 + $0xb50] sm:$0xff] %v926_v42  ;;  %v930_v44 = vld [vmem:[%s10252_s29 + $0x16c0] sm:$0xff]  ;;  %v932_v45 = vld [vmem:[%s10252_s29 + $0x16c8] sm:$0xff]  ;;  %929 = vst [vmem:[%s10260_s30 + $0xb58] sm:$0xff] %v928_v43 }
  0xc8   : > { %931 = vst [vmem:[%s10260_s30 + $0xb60] sm:$0xff] %v930_v44  ;;  %933 = vst [vmem:[%s10260_s30 + $0xb68] sm:$0xff] %v932_v45  ;;  %v934_v46 = vld [vmem:[%s10252_s29 + $0x16e0] sm:$0xff]  ;;  %v936_v47 = vld [vmem:[%s10252_s29 + $0x16e8] sm:$0xff] }
  0xc9   : > { %v938_v48 = vld [vmem:[%s10252_s29 + $0x1700] sm:$0xff]  ;;  %935 = vst [vmem:[%s10260_s30 + $0xb70] sm:$0xff] %v934_v46  ;;  %937 = vst [vmem:[%s10260_s30 + $0xb78] sm:$0xff] %v936_v47  ;;  %v940_v49 = vld [vmem:[%s10252_s29 + $0x1708] sm:$0xff] }
  0xca   : > { %939 = vst [vmem:[%s10260_s30 + $0xb80] sm:$0xff] %v938_v48  ;;  %v942_v50 = vld [vmem:[%s10252_s29 + $0x1720] sm:$0xff]  ;;  %v944_v51 = vld [vmem:[%s10252_s29 + $0x1728] sm:$0xff]  ;;  %941 = vst [vmem:[%s10260_s30 + $0xb88] sm:$0xff] %v940_v49 }
  0xcb   : > { %943 = vst [vmem:[%s10260_s30 + $0xb90] sm:$0xff] %v942_v50  ;;  %945 = vst [vmem:[%s10260_s30 + $0xb98] sm:$0xff] %v944_v51  ;;  %v946_v52 = vld [vmem:[%s10252_s29 + $0x1740] sm:$0xff]  ;;  %v948_v53 = vld [vmem:[%s10252_s29 + $0x1748] sm:$0xff] }
  0xcc   : > { %v950_v54 = vld [vmem:[%s10252_s29 + $0x1760] sm:$0xff]  ;;  %947 = vst [vmem:[%s10260_s30 + $0xba0] sm:$0xff] %v946_v52  ;;  %949 = vst [vmem:[%s10260_s30 + $0xba8] sm:$0xff] %v948_v53  ;;  %v952_v55 = vld [vmem:[%s10252_s29 + $0x1768] sm:$0xff] }
  0xcd   : > { %951 = vst [vmem:[%s10260_s30 + $0xbb0] sm:$0xff] %v950_v54  ;;  %v954_v56 = vld [vmem:[%s10252_s29 + $0x1780] sm:$0xff]  ;;  %v956_v57 = vld [vmem:[%s10252_s29 + $0x1788] sm:$0xff]  ;;  %953 = vst [vmem:[%s10260_s30 + $0xbb8] sm:$0xff] %v952_v55 }
  0xce   : > { %955 = vst [vmem:[%s10260_s30 + $0xbc0] sm:$0xff] %v954_v56  ;;  %957 = vst [vmem:[%s10260_s30 + $0xbc8] sm:$0xff] %v956_v57  ;;  %v958_v58 = vld [vmem:[%s10252_s29 + $0x17a0] sm:$0xff]  ;;  %v960_v59 = vld [vmem:[%s10252_s29 + $0x17a8] sm:$0xff] }
  0xcf   : > { %v962_v60 = vld [vmem:[%s10252_s29 + $0x17c0] sm:$0xff]  ;;  %959 = vst [vmem:[%s10260_s30 + $0xbd0] sm:$0xff] %v958_v58  ;;  %961 = vst [vmem:[%s10260_s30 + $0xbd8] sm:$0xff] %v960_v59  ;;  %v964_v61 = vld [vmem:[%s10252_s29 + $0x17c8] sm:$0xff] }
  0xd0   : > { %963 = vst [vmem:[%s10260_s30 + $0xbe0] sm:$0xff] %v962_v60  ;;  %v966_v62 = vld [vmem:[%s10252_s29 + $0x17e0] sm:$0xff]  ;;  %v968_v63 = vld [vmem:[%s10252_s29 + $0x17e8] sm:$0xff]  ;;  %965 = vst [vmem:[%s10260_s30 + $0xbe8] sm:$0xff] %v964_v61 }
  0xd1   : > { %967 = vst [vmem:[%s10260_s30 + $0xbf0] sm:$0xff] %v966_v62  ;;  %969 = vst [vmem:[%s10260_s30 + $0xbf8] sm:$0xff] %v968_v63  ;;  %v970_v0 = vld [vmem:[%s10252_s29 + $0x1800] sm:$0xff]  ;;  %v972_v1 = vld [vmem:[%s10252_s29 + $0x1808] sm:$0xff] }
  0xd2   : > { %v974_v2 = vld [vmem:[%s10252_s29 + $0x1820] sm:$0xff]  ;;  %971 = vst [vmem:[%s10260_s30 + $0xc00] sm:$0xff] %v970_v0  ;;  %973 = vst [vmem:[%s10260_s30 + $0xc08] sm:$0xff] %v972_v1  ;;  %v976_v3 = vld [vmem:[%s10252_s29 + $0x1828] sm:$0xff] }
  0xd3   : > { %975 = vst [vmem:[%s10260_s30 + $0xc10] sm:$0xff] %v974_v2  ;;  %v978_v4 = vld [vmem:[%s10252_s29 + $0x1840] sm:$0xff]  ;;  %v980_v5 = vld [vmem:[%s10252_s29 + $0x1848] sm:$0xff]  ;;  %977 = vst [vmem:[%s10260_s30 + $0xc18] sm:$0xff] %v976_v3 }
  0xd4   : > { %979 = vst [vmem:[%s10260_s30 + $0xc20] sm:$0xff] %v978_v4  ;;  %981 = vst [vmem:[%s10260_s30 + $0xc28] sm:$0xff] %v980_v5  ;;  %v982_v6 = vld [vmem:[%s10252_s29 + $0x1860] sm:$0xff]  ;;  %v984_v7 = vld [vmem:[%s10252_s29 + $0x1868] sm:$0xff] }
  0xd5   : > { %v986_v8 = vld [vmem:[%s10252_s29 + $0x1880] sm:$0xff]  ;;  %983 = vst [vmem:[%s10260_s30 + $0xc30] sm:$0xff] %v982_v6  ;;  %985 = vst [vmem:[%s10260_s30 + $0xc38] sm:$0xff] %v984_v7  ;;  %v988_v9 = vld [vmem:[%s10252_s29 + $0x1888] sm:$0xff] }
  0xd6   : > { %987 = vst [vmem:[%s10260_s30 + $0xc40] sm:$0xff] %v986_v8  ;;  %v990_v10 = vld [vmem:[%s10252_s29 + $0x18a0] sm:$0xff]  ;;  %v992_v11 = vld [vmem:[%s10252_s29 + $0x18a8] sm:$0xff]  ;;  %989 = vst [vmem:[%s10260_s30 + $0xc48] sm:$0xff] %v988_v9 }
  0xd7   : > { %991 = vst [vmem:[%s10260_s30 + $0xc50] sm:$0xff] %v990_v10  ;;  %993 = vst [vmem:[%s10260_s30 + $0xc58] sm:$0xff] %v992_v11  ;;  %v994_v12 = vld [vmem:[%s10252_s29 + $0x18c0] sm:$0xff]  ;;  %v996_v13 = vld [vmem:[%s10252_s29 + $0x18c8] sm:$0xff] }
  0xd8   : > { %v998_v14 = vld [vmem:[%s10252_s29 + $0x18e0] sm:$0xff]  ;;  %995 = vst [vmem:[%s10260_s30 + $0xc60] sm:$0xff] %v994_v12  ;;  %997 = vst [vmem:[%s10260_s30 + $0xc68] sm:$0xff] %v996_v13  ;;  %v1000_v15 = vld [vmem:[%s10252_s29 + $0x18e8] sm:$0xff] }
  0xd9   : > { %999 = vst [vmem:[%s10260_s30 + $0xc70] sm:$0xff] %v998_v14  ;;  %v1002_v16 = vld [vmem:[%s10252_s29 + $0x1900] sm:$0xff]  ;;  %v1004_v17 = vld [vmem:[%s10252_s29 + $0x1908] sm:$0xff]  ;;  %1001 = vst [vmem:[%s10260_s30 + $0xc78] sm:$0xff] %v1000_v15 }
  0xda   : > { %1003 = vst [vmem:[%s10260_s30 + $0xc80] sm:$0xff] %v1002_v16  ;;  %1005 = vst [vmem:[%s10260_s30 + $0xc88] sm:$0xff] %v1004_v17  ;;  %v1006_v18 = vld [vmem:[%s10252_s29 + $0x1920] sm:$0xff]  ;;  %v1008_v19 = vld [vmem:[%s10252_s29 + $0x1928] sm:$0xff] }
  0xdb   : > { %v1010_v20 = vld [vmem:[%s10252_s29 + $0x1940] sm:$0xff]  ;;  %1007 = vst [vmem:[%s10260_s30 + $0xc90] sm:$0xff] %v1006_v18  ;;  %1009 = vst [vmem:[%s10260_s30 + $0xc98] sm:$0xff] %v1008_v19  ;;  %v1012_v21 = vld [vmem:[%s10252_s29 + $0x1948] sm:$0xff] }
  0xdc   : > { %1011 = vst [vmem:[%s10260_s30 + $0xca0] sm:$0xff] %v1010_v20  ;;  %v1014_v22 = vld [vmem:[%s10252_s29 + $0x1960] sm:$0xff]  ;;  %v1016_v23 = vld [vmem:[%s10252_s29 + $0x1968] sm:$0xff]  ;;  %1013 = vst [vmem:[%s10260_s30 + $0xca8] sm:$0xff] %v1012_v21 }
  0xdd   : > { %1015 = vst [vmem:[%s10260_s30 + $0xcb0] sm:$0xff] %v1014_v22  ;;  %1017 = vst [vmem:[%s10260_s30 + $0xcb8] sm:$0xff] %v1016_v23  ;;  %v1018_v24 = vld [vmem:[%s10252_s29 + $0x1980] sm:$0xff]  ;;  %v1020_v25 = vld [vmem:[%s10252_s29 + $0x1988] sm:$0xff] }
  0xde   : > { %v1022_v26 = vld [vmem:[%s10252_s29 + $0x19a0] sm:$0xff]  ;;  %1019 = vst [vmem:[%s10260_s30 + $0xcc0] sm:$0xff] %v1018_v24  ;;  %1021 = vst [vmem:[%s10260_s30 + $0xcc8] sm:$0xff] %v1020_v25  ;;  %v1024_v27 = vld [vmem:[%s10252_s29 + $0x19a8] sm:$0xff] }
  0xdf   : > { %1023 = vst [vmem:[%s10260_s30 + $0xcd0] sm:$0xff] %v1022_v26  ;;  %v1026_v28 = vld [vmem:[%s10252_s29 + $0x19c0] sm:$0xff]  ;;  %v1028_v29 = vld [vmem:[%s10252_s29 + $0x19c8] sm:$0xff]  ;;  %1025 = vst [vmem:[%s10260_s30 + $0xcd8] sm:$0xff] %v1024_v27 }
  0xe0   : > { %1027 = vst [vmem:[%s10260_s30 + $0xce0] sm:$0xff] %v1026_v28  ;;  %1029 = vst [vmem:[%s10260_s30 + $0xce8] sm:$0xff] %v1028_v29  ;;  %v1030_v30 = vld [vmem:[%s10252_s29 + $0x19e0] sm:$0xff]  ;;  %v1032_v31 = vld [vmem:[%s10252_s29 + $0x19e8] sm:$0xff] }
  0xe1   : > { %v1034_v32 = vld [vmem:[%s10252_s29 + $0x1a00] sm:$0xff]  ;;  %1031 = vst [vmem:[%s10260_s30 + $0xcf0] sm:$0xff] %v1030_v30  ;;  %1033 = vst [vmem:[%s10260_s30 + $0xcf8] sm:$0xff] %v1032_v31  ;;  %v1036_v33 = vld [vmem:[%s10252_s29 + $0x1a08] sm:$0xff] }
  0xe2   : > { %1035 = vst [vmem:[%s10260_s30 + $0xd00] sm:$0xff] %v1034_v32  ;;  %v1038_v34 = vld [vmem:[%s10252_s29 + $0x1a20] sm:$0xff]  ;;  %v1040_v35 = vld [vmem:[%s10252_s29 + $0x1a28] sm:$0xff]  ;;  %1037 = vst [vmem:[%s10260_s30 + $0xd08] sm:$0xff] %v1036_v33 }
  0xe3   : > { %1039 = vst [vmem:[%s10260_s30 + $0xd10] sm:$0xff] %v1038_v34  ;;  %1041 = vst [vmem:[%s10260_s30 + $0xd18] sm:$0xff] %v1040_v35  ;;  %v1042_v36 = vld [vmem:[%s10252_s29 + $0x1a40] sm:$0xff]  ;;  %v1044_v37 = vld [vmem:[%s10252_s29 + $0x1a48] sm:$0xff] }
  0xe4   : > { %v1046_v38 = vld [vmem:[%s10252_s29 + $0x1a60] sm:$0xff]  ;;  %1043 = vst [vmem:[%s10260_s30 + $0xd20] sm:$0xff] %v1042_v36  ;;  %1045 = vst [vmem:[%s10260_s30 + $0xd28] sm:$0xff] %v1044_v37  ;;  %v1048_v39 = vld [vmem:[%s10252_s29 + $0x1a68] sm:$0xff] }
  0xe5   : > { %1047 = vst [vmem:[%s10260_s30 + $0xd30] sm:$0xff] %v1046_v38  ;;  %v1050_v40 = vld [vmem:[%s10252_s29 + $0x1a80] sm:$0xff]  ;;  %v1052_v41 = vld [vmem:[%s10252_s29 + $0x1a88] sm:$0xff]  ;;  %1049 = vst [vmem:[%s10260_s30 + $0xd38] sm:$0xff] %v1048_v39 }
  0xe6   : > { %1051 = vst [vmem:[%s10260_s30 + $0xd40] sm:$0xff] %v1050_v40  ;;  %1053 = vst [vmem:[%s10260_s30 + $0xd48] sm:$0xff] %v1052_v41  ;;  %v1054_v42 = vld [vmem:[%s10252_s29 + $0x1aa0] sm:$0xff]  ;;  %v1056_v43 = vld [vmem:[%s10252_s29 + $0x1aa8] sm:$0xff] }
  0xe7   : > { %v1058_v44 = vld [vmem:[%s10252_s29 + $0x1ac0] sm:$0xff]  ;;  %1055 = vst [vmem:[%s10260_s30 + $0xd50] sm:$0xff] %v1054_v42  ;;  %1057 = vst [vmem:[%s10260_s30 + $0xd58] sm:$0xff] %v1056_v43  ;;  %v1060_v45 = vld [vmem:[%s10252_s29 + $0x1ac8] sm:$0xff] }
  0xe8   : > { %1059 = vst [vmem:[%s10260_s30 + $0xd60] sm:$0xff] %v1058_v44  ;;  %v1062_v46 = vld [vmem:[%s10252_s29 + $0x1ae0] sm:$0xff]  ;;  %v1064_v47 = vld [vmem:[%s10252_s29 + $0x1ae8] sm:$0xff]  ;;  %1061 = vst [vmem:[%s10260_s30 + $0xd68] sm:$0xff] %v1060_v45 }
  0xe9   : > { %1063 = vst [vmem:[%s10260_s30 + $0xd70] sm:$0xff] %v1062_v46  ;;  %1065 = vst [vmem:[%s10260_s30 + $0xd78] sm:$0xff] %v1064_v47  ;;  %v1066_v48 = vld [vmem:[%s10252_s29 + $0x1b00] sm:$0xff]  ;;  %v1068_v49 = vld [vmem:[%s10252_s29 + $0x1b08] sm:$0xff] }
  0xea   : > { %v1070_v50 = vld [vmem:[%s10252_s29 + $0x1b20] sm:$0xff]  ;;  %1067 = vst [vmem:[%s10260_s30 + $0xd80] sm:$0xff] %v1066_v48  ;;  %1069 = vst [vmem:[%s10260_s30 + $0xd88] sm:$0xff] %v1068_v49  ;;  %v1072_v51 = vld [vmem:[%s10252_s29 + $0x1b28] sm:$0xff] }
  0xeb   : > { %1071 = vst [vmem:[%s10260_s30 + $0xd90] sm:$0xff] %v1070_v50  ;;  %v1074_v52 = vld [vmem:[%s10252_s29 + $0x1b40] sm:$0xff]  ;;  %v1076_v53 = vld [vmem:[%s10252_s29 + $0x1b48] sm:$0xff]  ;;  %1073 = vst [vmem:[%s10260_s30 + $0xd98] sm:$0xff] %v1072_v51 }
  0xec   : > { %1075 = vst [vmem:[%s10260_s30 + $0xda0] sm:$0xff] %v1074_v52  ;;  %1077 = vst [vmem:[%s10260_s30 + $0xda8] sm:$0xff] %v1076_v53  ;;  %v1078_v54 = vld [vmem:[%s10252_s29 + $0x1b60] sm:$0xff]  ;;  %v1080_v55 = vld [vmem:[%s10252_s29 + $0x1b68] sm:$0xff] }
  0xed   : > { %v1082_v56 = vld [vmem:[%s10252_s29 + $0x1b80] sm:$0xff]  ;;  %1079 = vst [vmem:[%s10260_s30 + $0xdb0] sm:$0xff] %v1078_v54  ;;  %1081 = vst [vmem:[%s10260_s30 + $0xdb8] sm:$0xff] %v1080_v55  ;;  %v1084_v57 = vld [vmem:[%s10252_s29 + $0x1b88] sm:$0xff] }
  0xee   : > { %1083 = vst [vmem:[%s10260_s30 + $0xdc0] sm:$0xff] %v1082_v56  ;;  %v1086_v58 = vld [vmem:[%s10252_s29 + $0x1ba0] sm:$0xff]  ;;  %v1088_v59 = vld [vmem:[%s10252_s29 + $0x1ba8] sm:$0xff]  ;;  %1085 = vst [vmem:[%s10260_s30 + $0xdc8] sm:$0xff] %v1084_v57 }
  0xef   : > { %1087 = vst [vmem:[%s10260_s30 + $0xdd0] sm:$0xff] %v1086_v58  ;;  %1089 = vst [vmem:[%s10260_s30 + $0xdd8] sm:$0xff] %v1088_v59  ;;  %v1090_v60 = vld [vmem:[%s10252_s29 + $0x1bc0] sm:$0xff]  ;;  %v1092_v61 = vld [vmem:[%s10252_s29 + $0x1bc8] sm:$0xff] }
  0xf0   : > { %v1094_v62 = vld [vmem:[%s10252_s29 + $0x1be0] sm:$0xff]  ;;  %1091 = vst [vmem:[%s10260_s30 + $0xde0] sm:$0xff] %v1090_v60  ;;  %1093 = vst [vmem:[%s10260_s30 + $0xde8] sm:$0xff] %v1092_v61  ;;  %v1096_v63 = vld [vmem:[%s10252_s29 + $0x1be8] sm:$0xff] }
  0xf1   : > { %1095 = vst [vmem:[%s10260_s30 + $0xdf0] sm:$0xff] %v1094_v62  ;;  %v1098_v0 = vld [vmem:[%s10252_s29 + $0x1c00] sm:$0xff]  ;;  %v1100_v1 = vld [vmem:[%s10252_s29 + $0x1c08] sm:$0xff]  ;;  %1097 = vst [vmem:[%s10260_s30 + $0xdf8] sm:$0xff] %v1096_v63 }
  0xf2   : > { %1099 = vst [vmem:[%s10260_s30 + $0xe00] sm:$0xff] %v1098_v0  ;;  %1101 = vst [vmem:[%s10260_s30 + $0xe08] sm:$0xff] %v1100_v1  ;;  %v1102_v2 = vld [vmem:[%s10252_s29 + $0x1c20] sm:$0xff]  ;;  %v1104_v3 = vld [vmem:[%s10252_s29 + $0x1c28] sm:$0xff] }
  0xf3   : > { %v1106_v4 = vld [vmem:[%s10252_s29 + $0x1c40] sm:$0xff]  ;;  %1103 = vst [vmem:[%s10260_s30 + $0xe10] sm:$0xff] %v1102_v2  ;;  %1105 = vst [vmem:[%s10260_s30 + $0xe18] sm:$0xff] %v1104_v3  ;;  %v1108_v5 = vld [vmem:[%s10252_s29 + $0x1c48] sm:$0xff] }
  0xf4   : > { %1107 = vst [vmem:[%s10260_s30 + $0xe20] sm:$0xff] %v1106_v4  ;;  %v1110_v6 = vld [vmem:[%s10252_s29 + $0x1c60] sm:$0xff]  ;;  %v1112_v7 = vld [vmem:[%s10252_s29 + $0x1c68] sm:$0xff]  ;;  %1109 = vst [vmem:[%s10260_s30 + $0xe28] sm:$0xff] %v1108_v5 }
  0xf5   : > { %1111 = vst [vmem:[%s10260_s30 + $0xe30] sm:$0xff] %v1110_v6  ;;  %1113 = vst [vmem:[%s10260_s30 + $0xe38] sm:$0xff] %v1112_v7  ;;  %v1114_v8 = vld [vmem:[%s10252_s29 + $0x1c80] sm:$0xff]  ;;  %v1116_v9 = vld [vmem:[%s10252_s29 + $0x1c88] sm:$0xff] }
  0xf6   : > { %v1118_v10 = vld [vmem:[%s10252_s29 + $0x1ca0] sm:$0xff]  ;;  %1115 = vst [vmem:[%s10260_s30 + $0xe40] sm:$0xff] %v1114_v8  ;;  %1117 = vst [vmem:[%s10260_s30 + $0xe48] sm:$0xff] %v1116_v9  ;;  %v1120_v11 = vld [vmem:[%s10252_s29 + $0x1ca8] sm:$0xff] }
  0xf7   : > { %1119 = vst [vmem:[%s10260_s30 + $0xe50] sm:$0xff] %v1118_v10  ;;  %v1122_v12 = vld [vmem:[%s10252_s29 + $0x1cc0] sm:$0xff]  ;;  %v1124_v13 = vld [vmem:[%s10252_s29 + $0x1cc8] sm:$0xff]  ;;  %1121 = vst [vmem:[%s10260_s30 + $0xe58] sm:$0xff] %v1120_v11 }
  0xf8   : > { %1123 = vst [vmem:[%s10260_s30 + $0xe60] sm:$0xff] %v1122_v12  ;;  %1125 = vst [vmem:[%s10260_s30 + $0xe68] sm:$0xff] %v1124_v13  ;;  %v1126_v14 = vld [vmem:[%s10252_s29 + $0x1ce0] sm:$0xff]  ;;  %v1128_v15 = vld [vmem:[%s10252_s29 + $0x1ce8] sm:$0xff] }
  0xf9   : > { %v1130_v16 = vld [vmem:[%s10252_s29 + $0x1d00] sm:$0xff]  ;;  %1127 = vst [vmem:[%s10260_s30 + $0xe70] sm:$0xff] %v1126_v14  ;;  %1129 = vst [vmem:[%s10260_s30 + $0xe78] sm:$0xff] %v1128_v15  ;;  %v1132_v17 = vld [vmem:[%s10252_s29 + $0x1d08] sm:$0xff] }
  0xfa   : > { %1131 = vst [vmem:[%s10260_s30 + $0xe80] sm:$0xff] %v1130_v16  ;;  %v1134_v18 = vld [vmem:[%s10252_s29 + $0x1d20] sm:$0xff]  ;;  %v1136_v19 = vld [vmem:[%s10252_s29 + $0x1d28] sm:$0xff]  ;;  %1133 = vst [vmem:[%s10260_s30 + $0xe88] sm:$0xff] %v1132_v17 }
  0xfb   : > { %1135 = vst [vmem:[%s10260_s30 + $0xe90] sm:$0xff] %v1134_v18  ;;  %1137 = vst [vmem:[%s10260_s30 + $0xe98] sm:$0xff] %v1136_v19  ;;  %v1138_v20 = vld [vmem:[%s10252_s29 + $0x1d40] sm:$0xff]  ;;  %v1140_v21 = vld [vmem:[%s10252_s29 + $0x1d48] sm:$0xff] }
  0xfc   : > { %v1142_v22 = vld [vmem:[%s10252_s29 + $0x1d60] sm:$0xff]  ;;  %1139 = vst [vmem:[%s10260_s30 + $0xea0] sm:$0xff] %v1138_v20  ;;  %1141 = vst [vmem:[%s10260_s30 + $0xea8] sm:$0xff] %v1140_v21  ;;  %v1144_v23 = vld [vmem:[%s10252_s29 + $0x1d68] sm:$0xff] }
  0xfd   : > { %1143 = vst [vmem:[%s10260_s30 + $0xeb0] sm:$0xff] %v1142_v22  ;;  %v1146_v24 = vld [vmem:[%s10252_s29 + $0x1d80] sm:$0xff]  ;;  %v1148_v25 = vld [vmem:[%s10252_s29 + $0x1d88] sm:$0xff]  ;;  %1145 = vst [vmem:[%s10260_s30 + $0xeb8] sm:$0xff] %v1144_v23 }
  0xfe   : > { %1147 = vst [vmem:[%s10260_s30 + $0xec0] sm:$0xff] %v1146_v24  ;;  %1149 = vst [vmem:[%s10260_s30 + $0xec8] sm:$0xff] %v1148_v25  ;;  %v1150_v26 = vld [vmem:[%s10252_s29 + $0x1da0] sm:$0xff]  ;;  %v1152_v27 = vld [vmem:[%s10252_s29 + $0x1da8] sm:$0xff] }
  0xff   : > { %v1154_v28 = vld [vmem:[%s10252_s29 + $0x1dc0] sm:$0xff]  ;;  %1151 = vst [vmem:[%s10260_s30 + $0xed0] sm:$0xff] %v1150_v26  ;;  %1153 = vst [vmem:[%s10260_s30 + $0xed8] sm:$0xff] %v1152_v27  ;;  %v1156_v29 = vld [vmem:[%s10252_s29 + $0x1dc8] sm:$0xff] }
 0x100   : > { %1155 = vst [vmem:[%s10260_s30 + $0xee0] sm:$0xff] %v1154_v28  ;;  %v1158_v30 = vld [vmem:[%s10252_s29 + $0x1de0] sm:$0xff]  ;;  %v1160_v31 = vld [vmem:[%s10252_s29 + $0x1de8] sm:$0xff]  ;;  %1157 = vst [vmem:[%s10260_s30 + $0xee8] sm:$0xff] %v1156_v29 }
 0x101   : > { %1159 = vst [vmem:[%s10260_s30 + $0xef0] sm:$0xff] %v1158_v30  ;;  %1161 = vst [vmem:[%s10260_s30 + $0xef8] sm:$0xff] %v1160_v31  ;;  %v1162_v32 = vld [vmem:[%s10252_s29 + $0x1e00] sm:$0xff]  ;;  %v1164_v33 = vld [vmem:[%s10252_s29 + $0x1e08] sm:$0xff] }
 0x102   : > { %v1166_v34 = vld [vmem:[%s10252_s29 + $0x1e20] sm:$0xff]  ;;  %1163 = vst [vmem:[%s10260_s30 + $0xf00] sm:$0xff] %v1162_v32  ;;  %1165 = vst [vmem:[%s10260_s30 + $0xf08] sm:$0xff] %v1164_v33  ;;  %v1168_v35 = vld [vmem:[%s10252_s29 + $0x1e28] sm:$0xff] }
 0x103   : > { %1167 = vst [vmem:[%s10260_s30 + $0xf10] sm:$0xff] %v1166_v34  ;;  %v1170_v36 = vld [vmem:[%s10252_s29 + $0x1e40] sm:$0xff]  ;;  %v1172_v37 = vld [vmem:[%s10252_s29 + $0x1e48] sm:$0xff]  ;;  %1169 = vst [vmem:[%s10260_s30 + $0xf18] sm:$0xff] %v1168_v35 }
 0x104   : > { %1171 = vst [vmem:[%s10260_s30 + $0xf20] sm:$0xff] %v1170_v36  ;;  %1173 = vst [vmem:[%s10260_s30 + $0xf28] sm:$0xff] %v1172_v37  ;;  %v1174_v38 = vld [vmem:[%s10252_s29 + $0x1e60] sm:$0xff]  ;;  %v1176_v39 = vld [vmem:[%s10252_s29 + $0x1e68] sm:$0xff] }
 0x105   : > { %v1178_v40 = vld [vmem:[%s10252_s29 + $0x1e80] sm:$0xff]  ;;  %1175 = vst [vmem:[%s10260_s30 + $0xf30] sm:$0xff] %v1174_v38  ;;  %1177 = vst [vmem:[%s10260_s30 + $0xf38] sm:$0xff] %v1176_v39  ;;  %v1180_v41 = vld [vmem:[%s10252_s29 + $0x1e88] sm:$0xff] }
 0x106   : > { %1179 = vst [vmem:[%s10260_s30 + $0xf40] sm:$0xff] %v1178_v40  ;;  %v1182_v42 = vld [vmem:[%s10252_s29 + $0x1ea0] sm:$0xff]  ;;  %v1184_v43 = vld [vmem:[%s10252_s29 + $0x1ea8] sm:$0xff]  ;;  %1181 = vst [vmem:[%s10260_s30 + $0xf48] sm:$0xff] %v1180_v41 }
 0x107   : > { %1183 = vst [vmem:[%s10260_s30 + $0xf50] sm:$0xff] %v1182_v42  ;;  %1185 = vst [vmem:[%s10260_s30 + $0xf58] sm:$0xff] %v1184_v43  ;;  %v1186_v44 = vld [vmem:[%s10252_s29 + $0x1ec0] sm:$0xff]  ;;  %v1188_v45 = vld [vmem:[%s10252_s29 + $0x1ec8] sm:$0xff] }
 0x108   : > { %v1190_v46 = vld [vmem:[%s10252_s29 + $0x1ee0] sm:$0xff]  ;;  %1187 = vst [vmem:[%s10260_s30 + $0xf60] sm:$0xff] %v1186_v44  ;;  %1189 = vst [vmem:[%s10260_s30 + $0xf68] sm:$0xff] %v1188_v45  ;;  %v1192_v47 = vld [vmem:[%s10252_s29 + $0x1ee8] sm:$0xff] }
 0x109   : > { %1191 = vst [vmem:[%s10260_s30 + $0xf70] sm:$0xff] %v1190_v46  ;;  %v1194_v48 = vld [vmem:[%s10252_s29 + $0x1f00] sm:$0xff]  ;;  %v1196_v49 = vld [vmem:[%s10252_s29 + $0x1f08] sm:$0xff]  ;;  %1193 = vst [vmem:[%s10260_s30 + $0xf78] sm:$0xff] %v1192_v47 }
 0x10a   : > { %1195 = vst [vmem:[%s10260_s30 + $0xf80] sm:$0xff] %v1194_v48  ;;  %1197 = vst [vmem:[%s10260_s30 + $0xf88] sm:$0xff] %v1196_v49  ;;  %v1198_v50 = vld [vmem:[%s10252_s29 + $0x1f20] sm:$0xff]  ;;  %v1200_v51 = vld [vmem:[%s10252_s29 + $0x1f28] sm:$0xff] }
 0x10b   : > { %v1202_v52 = vld [vmem:[%s10252_s29 + $0x1f40] sm:$0xff]  ;;  %1199 = vst [vmem:[%s10260_s30 + $0xf90] sm:$0xff] %v1198_v50  ;;  %1201 = vst [vmem:[%s10260_s30 + $0xf98] sm:$0xff] %v1200_v51  ;;  %v1204_v53 = vld [vmem:[%s10252_s29 + $0x1f48] sm:$0xff] }
 0x10c   : > { %1203 = vst [vmem:[%s10260_s30 + $0xfa0] sm:$0xff] %v1202_v52  ;;  %v1206_v54 = vld [vmem:[%s10252_s29 + $0x1f60] sm:$0xff]  ;;  %v1208_v55 = vld [vmem:[%s10252_s29 + $0x1f68] sm:$0xff]  ;;  %1205 = vst [vmem:[%s10260_s30 + $0xfa8] sm:$0xff] %v1204_v53 }
 0x10d   : > { %1207 = vst [vmem:[%s10260_s30 + $0xfb0] sm:$0xff] %v1206_v54  ;;  %1209 = vst [vmem:[%s10260_s30 + $0xfb8] sm:$0xff] %v1208_v55  ;;  %v1210_v56 = vld [vmem:[%s10252_s29 + $0x1f80] sm:$0xff]  ;;  %v1212_v57 = vld [vmem:[%s10252_s29 + $0x1f88] sm:$0xff] }
 0x10e   : > { %v1214_v58 = vld [vmem:[%s10252_s29 + $0x1fa0] sm:$0xff]  ;;  %1211 = vst [vmem:[%s10260_s30 + $0xfc0] sm:$0xff] %v1210_v56  ;;  %1213 = vst [vmem:[%s10260_s30 + $0xfc8] sm:$0xff] %v1212_v57  ;;  %v1216_v59 = vld [vmem:[%s10252_s29 + $0x1fa8] sm:$0xff] }
 0x10f   : > { %1215 = vst [vmem:[%s10260_s30 + $0xfd0] sm:$0xff] %v1214_v58  ;;  %v1218_v60 = vld [vmem:[%s10252_s29 + $0x1fc0] sm:$0xff]  ;;  %v1220_v61 = vld [vmem:[%s10252_s29 + $0x1fc8] sm:$0xff]  ;;  %1217 = vst [vmem:[%s10260_s30 + $0xfd8] sm:$0xff] %v1216_v59 }
 0x110   : > { %1219 = vst [vmem:[%s10260_s30 + $0xfe0] sm:$0xff] %v1218_v60  ;;  %1221 = vst [vmem:[%s10260_s30 + $0xfe8] sm:$0xff] %v1220_v61  ;;  %v1222_v62 = vld [vmem:[%s10252_s29 + $0x1fe0] sm:$0xff]  ;;  %v1224_v63 = vld [vmem:[%s10252_s29 + $0x1fe8] sm:$0xff] }
 0x111   : > { %v1226_v0 = vld [vmem:[%s10252_s29 + $0x2000] sm:$0xff]  ;;  %1223 = vst [vmem:[%s10260_s30 + $0xff0] sm:$0xff] %v1222_v62  ;;  %1225 = vst [vmem:[%s10260_s30 + $0xff8] sm:$0xff] %v1224_v63  ;;  %v1228_v1 = vld [vmem:[%s10252_s29 + $0x2008] sm:$0xff] }
 0x112   : > { %1227 = vst [vmem:[%s10260_s30 + $0x1000] sm:$0xff] %v1226_v0  ;;  %v1230_v2 = vld [vmem:[%s10252_s29 + $0x2020] sm:$0xff]  ;;  %v1232_v3 = vld [vmem:[%s10252_s29 + $0x2028] sm:$0xff]  ;;  %1229 = vst [vmem:[%s10260_s30 + $0x1008] sm:$0xff] %v1228_v1 }
 0x113   : > { %1231 = vst [vmem:[%s10260_s30 + $0x1010] sm:$0xff] %v1230_v2  ;;  %1233 = vst [vmem:[%s10260_s30 + $0x1018] sm:$0xff] %v1232_v3  ;;  %v1234_v4 = vld [vmem:[%s10252_s29 + $0x2040] sm:$0xff]  ;;  %v1236_v5 = vld [vmem:[%s10252_s29 + $0x2048] sm:$0xff] }
 0x114   : > { %v1238_v6 = vld [vmem:[%s10252_s29 + $0x2060] sm:$0xff]  ;;  %1235 = vst [vmem:[%s10260_s30 + $0x1020] sm:$0xff] %v1234_v4  ;;  %1237 = vst [vmem:[%s10260_s30 + $0x1028] sm:$0xff] %v1236_v5  ;;  %v1240_v7 = vld [vmem:[%s10252_s29 + $0x2068] sm:$0xff] }
 0x115   : > { %1239 = vst [vmem:[%s10260_s30 + $0x1030] sm:$0xff] %v1238_v6  ;;  %v1242_v8 = vld [vmem:[%s10252_s29 + $0x2080] sm:$0xff]  ;;  %v1244_v9 = vld [vmem:[%s10252_s29 + $0x2088] sm:$0xff]  ;;  %1241 = vst [vmem:[%s10260_s30 + $0x1038] sm:$0xff] %v1240_v7 }
 0x116   : > { %1243 = vst [vmem:[%s10260_s30 + $0x1040] sm:$0xff] %v1242_v8  ;;  %1245 = vst [vmem:[%s10260_s30 + $0x1048] sm:$0xff] %v1244_v9  ;;  %v1246_v10 = vld [vmem:[%s10252_s29 + $0x20a0] sm:$0xff]  ;;  %v1248_v11 = vld [vmem:[%s10252_s29 + $0x20a8] sm:$0xff] }
 0x117   : > { %v1250_v12 = vld [vmem:[%s10252_s29 + $0x20c0] sm:$0xff]  ;;  %1247 = vst [vmem:[%s10260_s30 + $0x1050] sm:$0xff] %v1246_v10  ;;  %1249 = vst [vmem:[%s10260_s30 + $0x1058] sm:$0xff] %v1248_v11  ;;  %v1252_v13 = vld [vmem:[%s10252_s29 + $0x20c8] sm:$0xff] }
 0x118   : > { %1251 = vst [vmem:[%s10260_s30 + $0x1060] sm:$0xff] %v1250_v12  ;;  %v1254_v14 = vld [vmem:[%s10252_s29 + $0x20e0] sm:$0xff]  ;;  %v1256_v15 = vld [vmem:[%s10252_s29 + $0x20e8] sm:$0xff]  ;;  %1253 = vst [vmem:[%s10260_s30 + $0x1068] sm:$0xff] %v1252_v13 }
 0x119   : > { %1255 = vst [vmem:[%s10260_s30 + $0x1070] sm:$0xff] %v1254_v14  ;;  %1257 = vst [vmem:[%s10260_s30 + $0x1078] sm:$0xff] %v1256_v15  ;;  %v1258_v16 = vld [vmem:[%s10252_s29 + $0x2100] sm:$0xff]  ;;  %v1260_v17 = vld [vmem:[%s10252_s29 + $0x2108] sm:$0xff] }
 0x11a   : > { %v1262_v18 = vld [vmem:[%s10252_s29 + $0x2120] sm:$0xff]  ;;  %1259 = vst [vmem:[%s10260_s30 + $0x1080] sm:$0xff] %v1258_v16  ;;  %1261 = vst [vmem:[%s10260_s30 + $0x1088] sm:$0xff] %v1260_v17  ;;  %v1264_v19 = vld [vmem:[%s10252_s29 + $0x2128] sm:$0xff] }
 0x11b   : > { %1263 = vst [vmem:[%s10260_s30 + $0x1090] sm:$0xff] %v1262_v18  ;;  %v1266_v20 = vld [vmem:[%s10252_s29 + $0x2140] sm:$0xff]  ;;  %v1268_v21 = vld [vmem:[%s10252_s29 + $0x2148] sm:$0xff]  ;;  %1265 = vst [vmem:[%s10260_s30 + $0x1098] sm:$0xff] %v1264_v19 }
 0x11c   : > { %1267 = vst [vmem:[%s10260_s30 + $0x10a0] sm:$0xff] %v1266_v20  ;;  %1269 = vst [vmem:[%s10260_s30 + $0x10a8] sm:$0xff] %v1268_v21  ;;  %v1270_v22 = vld [vmem:[%s10252_s29 + $0x2160] sm:$0xff]  ;;  %v1272_v23 = vld [vmem:[%s10252_s29 + $0x2168] sm:$0xff] }
 0x11d   : > { %v1274_v24 = vld [vmem:[%s10252_s29 + $0x2180] sm:$0xff]  ;;  %1271 = vst [vmem:[%s10260_s30 + $0x10b0] sm:$0xff] %v1270_v22  ;;  %1273 = vst [vmem:[%s10260_s30 + $0x10b8] sm:$0xff] %v1272_v23  ;;  %v1276_v25 = vld [vmem:[%s10252_s29 + $0x2188] sm:$0xff] }
 0x11e   : > { %1275 = vst [vmem:[%s10260_s30 + $0x10c0] sm:$0xff] %v1274_v24  ;;  %v1278_v26 = vld [vmem:[%s10252_s29 + $0x21a0] sm:$0xff]  ;;  %v1280_v27 = vld [vmem:[%s10252_s29 + $0x21a8] sm:$0xff]  ;;  %1277 = vst [vmem:[%s10260_s30 + $0x10c8] sm:$0xff] %v1276_v25 }
 0x11f   : > { %1279 = vst [vmem:[%s10260_s30 + $0x10d0] sm:$0xff] %v1278_v26  ;;  %1281 = vst [vmem:[%s10260_s30 + $0x10d8] sm:$0xff] %v1280_v27  ;;  %v1282_v28 = vld [vmem:[%s10252_s29 + $0x21c0] sm:$0xff]  ;;  %v1284_v29 = vld [vmem:[%s10252_s29 + $0x21c8] sm:$0xff] }
 0x120   : > { %v1286_v30 = vld [vmem:[%s10252_s29 + $0x21e0] sm:$0xff]  ;;  %1283 = vst [vmem:[%s10260_s30 + $0x10e0] sm:$0xff] %v1282_v28  ;;  %1285 = vst [vmem:[%s10260_s30 + $0x10e8] sm:$0xff] %v1284_v29  ;;  %v1288_v31 = vld [vmem:[%s10252_s29 + $0x21e8] sm:$0xff] }
 0x121   : > { %1287 = vst [vmem:[%s10260_s30 + $0x10f0] sm:$0xff] %v1286_v30  ;;  %v1290_v32 = vld [vmem:[%s10252_s29 + $0x2200] sm:$0xff]  ;;  %v1292_v33 = vld [vmem:[%s10252_s29 + $0x2208] sm:$0xff]  ;;  %1289 = vst [vmem:[%s10260_s30 + $0x10f8] sm:$0xff] %v1288_v31 }
 0x122   : > { %1291 = vst [vmem:[%s10260_s30 + $0x1100] sm:$0xff] %v1290_v32  ;;  %1293 = vst [vmem:[%s10260_s30 + $0x1108] sm:$0xff] %v1292_v33  ;;  %v1294_v34 = vld [vmem:[%s10252_s29 + $0x2220] sm:$0xff]  ;;  %v1296_v35 = vld [vmem:[%s10252_s29 + $0x2228] sm:$0xff] }
 0x123   : > { %v1298_v36 = vld [vmem:[%s10252_s29 + $0x2240] sm:$0xff]  ;;  %1295 = vst [vmem:[%s10260_s30 + $0x1110] sm:$0xff] %v1294_v34  ;;  %1297 = vst [vmem:[%s10260_s30 + $0x1118] sm:$0xff] %v1296_v35  ;;  %v1300_v37 = vld [vmem:[%s10252_s29 + $0x2248] sm:$0xff] }
 0x124   : > { %1299 = vst [vmem:[%s10260_s30 + $0x1120] sm:$0xff] %v1298_v36  ;;  %v1302_v38 = vld [vmem:[%s10252_s29 + $0x2260] sm:$0xff]  ;;  %v1304_v39 = vld [vmem:[%s10252_s29 + $0x2268] sm:$0xff]  ;;  %1301 = vst [vmem:[%s10260_s30 + $0x1128] sm:$0xff] %v1300_v37 }
 0x125   : > { %1303 = vst [vmem:[%s10260_s30 + $0x1130] sm:$0xff] %v1302_v38  ;;  %1305 = vst [vmem:[%s10260_s30 + $0x1138] sm:$0xff] %v1304_v39  ;;  %v1306_v40 = vld [vmem:[%s10252_s29 + $0x2280] sm:$0xff]  ;;  %v1308_v41 = vld [vmem:[%s10252_s29 + $0x2288] sm:$0xff] }
 0x126   : > { %v1310_v42 = vld [vmem:[%s10252_s29 + $0x22a0] sm:$0xff]  ;;  %1307 = vst [vmem:[%s10260_s30 + $0x1140] sm:$0xff] %v1306_v40  ;;  %1309 = vst [vmem:[%s10260_s30 + $0x1148] sm:$0xff] %v1308_v41  ;;  %v1312_v43 = vld [vmem:[%s10252_s29 + $0x22a8] sm:$0xff] }
 0x127   : > { %1311 = vst [vmem:[%s10260_s30 + $0x1150] sm:$0xff] %v1310_v42  ;;  %v1314_v44 = vld [vmem:[%s10252_s29 + $0x22c0] sm:$0xff]  ;;  %v1316_v45 = vld [vmem:[%s10252_s29 + $0x22c8] sm:$0xff]  ;;  %1313 = vst [vmem:[%s10260_s30 + $0x1158] sm:$0xff] %v1312_v43 }
 0x128   : > { %1315 = vst [vmem:[%s10260_s30 + $0x1160] sm:$0xff] %v1314_v44  ;;  %1317 = vst [vmem:[%s10260_s30 + $0x1168] sm:$0xff] %v1316_v45  ;;  %v1318_v46 = vld [vmem:[%s10252_s29 + $0x22e0] sm:$0xff]  ;;  %v1320_v47 = vld [vmem:[%s10252_s29 + $0x22e8] sm:$0xff] }
 0x129   : > { %v1322_v48 = vld [vmem:[%s10252_s29 + $0x2300] sm:$0xff]  ;;  %1319 = vst [vmem:[%s10260_s30 + $0x1170] sm:$0xff] %v1318_v46  ;;  %1321 = vst [vmem:[%s10260_s30 + $0x1178] sm:$0xff] %v1320_v47  ;;  %v1324_v49 = vld [vmem:[%s10252_s29 + $0x2308] sm:$0xff] }
 0x12a   : > { %1323 = vst [vmem:[%s10260_s30 + $0x1180] sm:$0xff] %v1322_v48  ;;  %v1326_v50 = vld [vmem:[%s10252_s29 + $0x2320] sm:$0xff]  ;;  %v1328_v51 = vld [vmem:[%s10252_s29 + $0x2328] sm:$0xff]  ;;  %1325 = vst [vmem:[%s10260_s30 + $0x1188] sm:$0xff] %v1324_v49 }
 0x12b   : > { %1327 = vst [vmem:[%s10260_s30 + $0x1190] sm:$0xff] %v1326_v50  ;;  %1329 = vst [vmem:[%s10260_s30 + $0x1198] sm:$0xff] %v1328_v51  ;;  %v1330_v52 = vld [vmem:[%s10252_s29 + $0x2340] sm:$0xff]  ;;  %v1332_v53 = vld [vmem:[%s10252_s29 + $0x2348] sm:$0xff] }
 0x12c   : > { %v1334_v54 = vld [vmem:[%s10252_s29 + $0x2360] sm:$0xff]  ;;  %1331 = vst [vmem:[%s10260_s30 + $0x11a0] sm:$0xff] %v1330_v52  ;;  %1333 = vst [vmem:[%s10260_s30 + $0x11a8] sm:$0xff] %v1332_v53  ;;  %v1336_v55 = vld [vmem:[%s10252_s29 + $0x2368] sm:$0xff] }
 0x12d   : > { %1335 = vst [vmem:[%s10260_s30 + $0x11b0] sm:$0xff] %v1334_v54  ;;  %v1338_v56 = vld [vmem:[%s10252_s29 + $0x2380] sm:$0xff]  ;;  %v1340_v57 = vld [vmem:[%s10252_s29 + $0x2388] sm:$0xff]  ;;  %1337 = vst [vmem:[%s10260_s30 + $0x11b8] sm:$0xff] %v1336_v55 }
 0x12e   : > { %1339 = vst [vmem:[%s10260_s30 + $0x11c0] sm:$0xff] %v1338_v56  ;;  %1341 = vst [vmem:[%s10260_s30 + $0x11c8] sm:$0xff] %v1340_v57  ;;  %v1342_v58 = vld [vmem:[%s10252_s29 + $0x23a0] sm:$0xff]  ;;  %v1344_v59 = vld [vmem:[%s10252_s29 + $0x23a8] sm:$0xff] }
 0x12f   : > { %v1346_v60 = vld [vmem:[%s10252_s29 + $0x23c0] sm:$0xff]  ;;  %1343 = vst [vmem:[%s10260_s30 + $0x11d0] sm:$0xff] %v1342_v58  ;;  %1345 = vst [vmem:[%s10260_s30 + $0x11d8] sm:$0xff] %v1344_v59  ;;  %v1348_v61 = vld [vmem:[%s10252_s29 + $0x23c8] sm:$0xff] }
 0x130   : > { %1347 = vst [vmem:[%s10260_s30 + $0x11e0] sm:$0xff] %v1346_v60  ;;  %v1350_v62 = vld [vmem:[%s10252_s29 + $0x23e0] sm:$0xff]  ;;  %v1352_v63 = vld [vmem:[%s10252_s29 + $0x23e8] sm:$0xff]  ;;  %1349 = vst [vmem:[%s10260_s30 + $0x11e8] sm:$0xff] %v1348_v61 }
 0x131   : > { %1351 = vst [vmem:[%s10260_s30 + $0x11f0] sm:$0xff] %v1350_v62  ;;  %1353 = vst [vmem:[%s10260_s30 + $0x11f8] sm:$0xff] %v1352_v63  ;;  %v1354_v0 = vld [vmem:[%s10252_s29 + $0x2400] sm:$0xff]  ;;  %v1356_v1 = vld [vmem:[%s10252_s29 + $0x2408] sm:$0xff] }
 0x132   : > { %v1358_v2 = vld [vmem:[%s10252_s29 + $0x2420] sm:$0xff]  ;;  %1355 = vst [vmem:[%s10260_s30 + $0x1200] sm:$0xff] %v1354_v0  ;;  %1357 = vst [vmem:[%s10260_s30 + $0x1208] sm:$0xff] %v1356_v1  ;;  %v1360_v3 = vld [vmem:[%s10252_s29 + $0x2428] sm:$0xff] }
 0x133   : > { %1359 = vst [vmem:[%s10260_s30 + $0x1210] sm:$0xff] %v1358_v2  ;;  %v1362_v4 = vld [vmem:[%s10252_s29 + $0x2440] sm:$0xff]  ;;  %v1364_v5 = vld [vmem:[%s10252_s29 + $0x2448] sm:$0xff]  ;;  %1361 = vst [vmem:[%s10260_s30 + $0x1218] sm:$0xff] %v1360_v3 }
 0x134   : > { %1363 = vst [vmem:[%s10260_s30 + $0x1220] sm:$0xff] %v1362_v4  ;;  %1365 = vst [vmem:[%s10260_s30 + $0x1228] sm:$0xff] %v1364_v5  ;;  %v1366_v6 = vld [vmem:[%s10252_s29 + $0x2460] sm:$0xff]  ;;  %v1368_v7 = vld [vmem:[%s10252_s29 + $0x2468] sm:$0xff] }
 0x135   : > { %v1370_v8 = vld [vmem:[%s10252_s29 + $0x2480] sm:$0xff]  ;;  %1367 = vst [vmem:[%s10260_s30 + $0x1230] sm:$0xff] %v1366_v6  ;;  %1369 = vst [vmem:[%s10260_s30 + $0x1238] sm:$0xff] %v1368_v7  ;;  %v1372_v9 = vld [vmem:[%s10252_s29 + $0x2488] sm:$0xff] }
 0x136   : > { %1371 = vst [vmem:[%s10260_s30 + $0x1240] sm:$0xff] %v1370_v8  ;;  %v1374_v10 = vld [vmem:[%s10252_s29 + $0x24a0] sm:$0xff]  ;;  %v1376_v11 = vld [vmem:[%s10252_s29 + $0x24a8] sm:$0xff]  ;;  %1373 = vst [vmem:[%s10260_s30 + $0x1248] sm:$0xff] %v1372_v9 }
 0x137   : > { %1375 = vst [vmem:[%s10260_s30 + $0x1250] sm:$0xff] %v1374_v10  ;;  %1377 = vst [vmem:[%s10260_s30 + $0x1258] sm:$0xff] %v1376_v11  ;;  %v1378_v12 = vld [vmem:[%s10252_s29 + $0x24c0] sm:$0xff]  ;;  %v1380_v13 = vld [vmem:[%s10252_s29 + $0x24c8] sm:$0xff] }
 0x138   : > { %v1382_v14 = vld [vmem:[%s10252_s29 + $0x24e0] sm:$0xff]  ;;  %1379 = vst [vmem:[%s10260_s30 + $0x1260] sm:$0xff] %v1378_v12  ;;  %1381 = vst [vmem:[%s10260_s30 + $0x1268] sm:$0xff] %v1380_v13  ;;  %v1384_v15 = vld [vmem:[%s10252_s29 + $0x24e8] sm:$0xff] }
 0x139   : > { %1383 = vst [vmem:[%s10260_s30 + $0x1270] sm:$0xff] %v1382_v14  ;;  %v1386_v16 = vld [vmem:[%s10252_s29 + $0x2500] sm:$0xff]  ;;  %v1388_v17 = vld [vmem:[%s10252_s29 + $0x2508] sm:$0xff]  ;;  %1385 = vst [vmem:[%s10260_s30 + $0x1278] sm:$0xff] %v1384_v15 }
 0x13a   : > { %1387 = vst [vmem:[%s10260_s30 + $0x1280] sm:$0xff] %v1386_v16  ;;  %1389 = vst [vmem:[%s10260_s30 + $0x1288] sm:$0xff] %v1388_v17  ;;  %v1390_v18 = vld [vmem:[%s10252_s29 + $0x2520] sm:$0xff]  ;;  %v1392_v19 = vld [vmem:[%s10252_s29 + $0x2528] sm:$0xff] }
 0x13b   : > { %v1394_v20 = vld [vmem:[%s10252_s29 + $0x2540] sm:$0xff]  ;;  %1391 = vst [vmem:[%s10260_s30 + $0x1290] sm:$0xff] %v1390_v18  ;;  %1393 = vst [vmem:[%s10260_s30 + $0x1298] sm:$0xff] %v1392_v19  ;;  %v1396_v21 = vld [vmem:[%s10252_s29 + $0x2548] sm:$0xff] }
 0x13c   : > { %1395 = vst [vmem:[%s10260_s30 + $0x12a0] sm:$0xff] %v1394_v20  ;;  %v1398_v22 = vld [vmem:[%s10252_s29 + $0x2560] sm:$0xff]  ;;  %v1400_v23 = vld [vmem:[%s10252_s29 + $0x2568] sm:$0xff]  ;;  %1397 = vst [vmem:[%s10260_s30 + $0x12a8] sm:$0xff] %v1396_v21 }
 0x13d   : > { %1399 = vst [vmem:[%s10260_s30 + $0x12b0] sm:$0xff] %v1398_v22  ;;  %1401 = vst [vmem:[%s10260_s30 + $0x12b8] sm:$0xff] %v1400_v23  ;;  %v1402_v24 = vld [vmem:[%s10252_s29 + $0x2580] sm:$0xff]  ;;  %v1404_v25 = vld [vmem:[%s10252_s29 + $0x2588] sm:$0xff] }
 0x13e   : > { %v1406_v26 = vld [vmem:[%s10252_s29 + $0x25a0] sm:$0xff]  ;;  %1403 = vst [vmem:[%s10260_s30 + $0x12c0] sm:$0xff] %v1402_v24  ;;  %1405 = vst [vmem:[%s10260_s30 + $0x12c8] sm:$0xff] %v1404_v25  ;;  %v1408_v27 = vld [vmem:[%s10252_s29 + $0x25a8] sm:$0xff] }
 0x13f   : > { %1407 = vst [vmem:[%s10260_s30 + $0x12d0] sm:$0xff] %v1406_v26  ;;  %v1410_v28 = vld [vmem:[%s10252_s29 + $0x25c0] sm:$0xff]  ;;  %v1412_v29 = vld [vmem:[%s10252_s29 + $0x25c8] sm:$0xff]  ;;  %1409 = vst [vmem:[%s10260_s30 + $0x12d8] sm:$0xff] %v1408_v27 }
 0x140   : > { %1411 = vst [vmem:[%s10260_s30 + $0x12e0] sm:$0xff] %v1410_v28  ;;  %1413 = vst [vmem:[%s10260_s30 + $0x12e8] sm:$0xff] %v1412_v29  ;;  %v1414_v30 = vld [vmem:[%s10252_s29 + $0x25e0] sm:$0xff]  ;;  %v1416_v31 = vld [vmem:[%s10252_s29 + $0x25e8] sm:$0xff] }
 0x141   : > { %v1418_v32 = vld [vmem:[%s10252_s29 + $0x2600] sm:$0xff]  ;;  %1415 = vst [vmem:[%s10260_s30 + $0x12f0] sm:$0xff] %v1414_v30  ;;  %1417 = vst [vmem:[%s10260_s30 + $0x12f8] sm:$0xff] %v1416_v31  ;;  %v1420_v33 = vld [vmem:[%s10252_s29 + $0x2608] sm:$0xff] }
 0x142   : > { %1419 = vst [vmem:[%s10260_s30 + $0x1300] sm:$0xff] %v1418_v32  ;;  %v1422_v34 = vld [vmem:[%s10252_s29 + $0x2620] sm:$0xff]  ;;  %v1424_v35 = vld [vmem:[%s10252_s29 + $0x2628] sm:$0xff]  ;;  %1421 = vst [vmem:[%s10260_s30 + $0x1308] sm:$0xff] %v1420_v33 }
 0x143   : > { %1423 = vst [vmem:[%s10260_s30 + $0x1310] sm:$0xff] %v1422_v34  ;;  %1425 = vst [vmem:[%s10260_s30 + $0x1318] sm:$0xff] %v1424_v35  ;;  %v1426_v36 = vld [vmem:[%s10252_s29 + $0x2640] sm:$0xff]  ;;  %v1428_v37 = vld [vmem:[%s10252_s29 + $0x2648] sm:$0xff] }
 0x144   : > { %v1430_v38 = vld [vmem:[%s10252_s29 + $0x2660] sm:$0xff]  ;;  %1427 = vst [vmem:[%s10260_s30 + $0x1320] sm:$0xff] %v1426_v36  ;;  %1429 = vst [vmem:[%s10260_s30 + $0x1328] sm:$0xff] %v1428_v37  ;;  %v1432_v39 = vld [vmem:[%s10252_s29 + $0x2668] sm:$0xff] }
 0x145   : > { %1431 = vst [vmem:[%s10260_s30 + $0x1330] sm:$0xff] %v1430_v38  ;;  %v1434_v40 = vld [vmem:[%s10252_s29 + $0x2680] sm:$0xff]  ;;  %v1436_v41 = vld [vmem:[%s10252_s29 + $0x2688] sm:$0xff]  ;;  %1433 = vst [vmem:[%s10260_s30 + $0x1338] sm:$0xff] %v1432_v39 }
 0x146   : > { %1435 = vst [vmem:[%s10260_s30 + $0x1340] sm:$0xff] %v1434_v40  ;;  %1437 = vst [vmem:[%s10260_s30 + $0x1348] sm:$0xff] %v1436_v41  ;;  %v1438_v42 = vld [vmem:[%s10252_s29 + $0x26a0] sm:$0xff]  ;;  %v1440_v43 = vld [vmem:[%s10252_s29 + $0x26a8] sm:$0xff] }
 0x147   : > { %v1442_v44 = vld [vmem:[%s10252_s29 + $0x26c0] sm:$0xff]  ;;  %1439 = vst [vmem:[%s10260_s30 + $0x1350] sm:$0xff] %v1438_v42  ;;  %1441 = vst [vmem:[%s10260_s30 + $0x1358] sm:$0xff] %v1440_v43  ;;  %v1444_v45 = vld [vmem:[%s10252_s29 + $0x26c8] sm:$0xff] }
 0x148   : > { %1443 = vst [vmem:[%s10260_s30 + $0x1360] sm:$0xff] %v1442_v44  ;;  %v1446_v46 = vld [vmem:[%s10252_s29 + $0x26e0] sm:$0xff]  ;;  %v1448_v47 = vld [vmem:[%s10252_s29 + $0x26e8] sm:$0xff]  ;;  %1445 = vst [vmem:[%s10260_s30 + $0x1368] sm:$0xff] %v1444_v45 }
 0x149   : > { %1447 = vst [vmem:[%s10260_s30 + $0x1370] sm:$0xff] %v1446_v46  ;;  %1449 = vst [vmem:[%s10260_s30 + $0x1378] sm:$0xff] %v1448_v47  ;;  %v1450_v48 = vld [vmem:[%s10252_s29 + $0x2700] sm:$0xff]  ;;  %v1452_v49 = vld [vmem:[%s10252_s29 + $0x2708] sm:$0xff] }
 0x14a   : > { %v1454_v50 = vld [vmem:[%s10252_s29 + $0x2720] sm:$0xff]  ;;  %1451 = vst [vmem:[%s10260_s30 + $0x1380] sm:$0xff] %v1450_v48  ;;  %1453 = vst [vmem:[%s10260_s30 + $0x1388] sm:$0xff] %v1452_v49  ;;  %v1456_v51 = vld [vmem:[%s10252_s29 + $0x2728] sm:$0xff] }
 0x14b   : > { %1455 = vst [vmem:[%s10260_s30 + $0x1390] sm:$0xff] %v1454_v50  ;;  %v1458_v52 = vld [vmem:[%s10252_s29 + $0x2740] sm:$0xff]  ;;  %v1460_v53 = vld [vmem:[%s10252_s29 + $0x2748] sm:$0xff]  ;;  %1457 = vst [vmem:[%s10260_s30 + $0x1398] sm:$0xff] %v1456_v51 }
 0x14c   : > { %1459 = vst [vmem:[%s10260_s30 + $0x13a0] sm:$0xff] %v1458_v52  ;;  %1461 = vst [vmem:[%s10260_s30 + $0x13a8] sm:$0xff] %v1460_v53  ;;  %v1462_v54 = vld [vmem:[%s10252_s29 + $0x2760] sm:$0xff]  ;;  %v1464_v55 = vld [vmem:[%s10252_s29 + $0x2768] sm:$0xff] }
 0x14d   : > { %v1466_v56 = vld [vmem:[%s10252_s29 + $0x2780] sm:$0xff]  ;;  %1463 = vst [vmem:[%s10260_s30 + $0x13b0] sm:$0xff] %v1462_v54  ;;  %1465 = vst [vmem:[%s10260_s30 + $0x13b8] sm:$0xff] %v1464_v55  ;;  %v1468_v57 = vld [vmem:[%s10252_s29 + $0x2788] sm:$0xff] }
 0x14e   : > { %1467 = vst [vmem:[%s10260_s30 + $0x13c0] sm:$0xff] %v1466_v56  ;;  %v1470_v58 = vld [vmem:[%s10252_s29 + $0x27a0] sm:$0xff]  ;;  %v1472_v59 = vld [vmem:[%s10252_s29 + $0x27a8] sm:$0xff]  ;;  %1469 = vst [vmem:[%s10260_s30 + $0x13c8] sm:$0xff] %v1468_v57 }
 0x14f   : > { %1471 = vst [vmem:[%s10260_s30 + $0x13d0] sm:$0xff] %v1470_v58  ;;  %1473 = vst [vmem:[%s10260_s30 + $0x13d8] sm:$0xff] %v1472_v59  ;;  %v1474_v60 = vld [vmem:[%s10252_s29 + $0x27c0] sm:$0xff]  ;;  %v1476_v61 = vld [vmem:[%s10252_s29 + $0x27c8] sm:$0xff] }
 0x150   : > { %v1478_v62 = vld [vmem:[%s10252_s29 + $0x27e0] sm:$0xff]  ;;  %1475 = vst [vmem:[%s10260_s30 + $0x13e0] sm:$0xff] %v1474_v60  ;;  %1477 = vst [vmem:[%s10260_s30 + $0x13e8] sm:$0xff] %v1476_v61  ;;  %v1480_v63 = vld [vmem:[%s10252_s29 + $0x27e8] sm:$0xff] }
 0x151   : > { %1479 = vst [vmem:[%s10260_s30 + $0x13f0] sm:$0xff] %v1478_v62  ;;  %v1482_v0 = vld [vmem:[%s10252_s29 + $0x2800] sm:$0xff]  ;;  %v1484_v1 = vld [vmem:[%s10252_s29 + $0x2808] sm:$0xff]  ;;  %1481 = vst [vmem:[%s10260_s30 + $0x13f8] sm:$0xff] %v1480_v63 }
 0x152   : > { %1483 = vst [vmem:[%s10260_s30 + $0x1400] sm:$0xff] %v1482_v0  ;;  %1485 = vst [vmem:[%s10260_s30 + $0x1408] sm:$0xff] %v1484_v1  ;;  %v1486_v2 = vld [vmem:[%s10252_s29 + $0x2820] sm:$0xff]  ;;  %v1488_v3 = vld [vmem:[%s10252_s29 + $0x2828] sm:$0xff] }
 0x153   : > { %v1490_v4 = vld [vmem:[%s10252_s29 + $0x2840] sm:$0xff]  ;;  %1487 = vst [vmem:[%s10260_s30 + $0x1410] sm:$0xff] %v1486_v2  ;;  %1489 = vst [vmem:[%s10260_s30 + $0x1418] sm:$0xff] %v1488_v3  ;;  %v1492_v5 = vld [vmem:[%s10252_s29 + $0x2848] sm:$0xff] }
 0x154   : > { %1491 = vst [vmem:[%s10260_s30 + $0x1420] sm:$0xff] %v1490_v4  ;;  %v1494_v6 = vld [vmem:[%s10252_s29 + $0x2860] sm:$0xff]  ;;  %v1496_v7 = vld [vmem:[%s10252_s29 + $0x2868] sm:$0xff]  ;;  %1493 = vst [vmem:[%s10260_s30 + $0x1428] sm:$0xff] %v1492_v5 }
 0x155   : > { %1495 = vst [vmem:[%s10260_s30 + $0x1430] sm:$0xff] %v1494_v6  ;;  %1497 = vst [vmem:[%s10260_s30 + $0x1438] sm:$0xff] %v1496_v7  ;;  %v1498_v8 = vld [vmem:[%s10252_s29 + $0x2880] sm:$0xff]  ;;  %v1500_v9 = vld [vmem:[%s10252_s29 + $0x2888] sm:$0xff] }
 0x156   : > { %v1502_v10 = vld [vmem:[%s10252_s29 + $0x28a0] sm:$0xff]  ;;  %1499 = vst [vmem:[%s10260_s30 + $0x1440] sm:$0xff] %v1498_v8  ;;  %1501 = vst [vmem:[%s10260_s30 + $0x1448] sm:$0xff] %v1500_v9  ;;  %v1504_v11 = vld [vmem:[%s10252_s29 + $0x28a8] sm:$0xff] }
 0x157   : > { %1503 = vst [vmem:[%s10260_s30 + $0x1450] sm:$0xff] %v1502_v10  ;;  %v1506_v12 = vld [vmem:[%s10252_s29 + $0x28c0] sm:$0xff]  ;;  %v1508_v13 = vld [vmem:[%s10252_s29 + $0x28c8] sm:$0xff]  ;;  %1505 = vst [vmem:[%s10260_s30 + $0x1458] sm:$0xff] %v1504_v11 }
 0x158   : > { %1507 = vst [vmem:[%s10260_s30 + $0x1460] sm:$0xff] %v1506_v12  ;;  %1509 = vst [vmem:[%s10260_s30 + $0x1468] sm:$0xff] %v1508_v13  ;;  %v1510_v14 = vld [vmem:[%s10252_s29 + $0x28e0] sm:$0xff]  ;;  %v1512_v15 = vld [vmem:[%s10252_s29 + $0x28e8] sm:$0xff] }
 0x159   : > { %v1514_v16 = vld [vmem:[%s10252_s29 + $0x2900] sm:$0xff]  ;;  %1511 = vst [vmem:[%s10260_s30 + $0x1470] sm:$0xff] %v1510_v14  ;;  %1513 = vst [vmem:[%s10260_s30 + $0x1478] sm:$0xff] %v1512_v15  ;;  %v1516_v17 = vld [vmem:[%s10252_s29 + $0x2908] sm:$0xff] }
 0x15a   : > { %1515 = vst [vmem:[%s10260_s30 + $0x1480] sm:$0xff] %v1514_v16  ;;  %v1518_v18 = vld [vmem:[%s10252_s29 + $0x2920] sm:$0xff]  ;;  %v1520_v19 = vld [vmem:[%s10252_s29 + $0x2928] sm:$0xff]  ;;  %1517 = vst [vmem:[%s10260_s30 + $0x1488] sm:$0xff] %v1516_v17 }
 0x15b   : > { %1519 = vst [vmem:[%s10260_s30 + $0x1490] sm:$0xff] %v1518_v18  ;;  %1521 = vst [vmem:[%s10260_s30 + $0x1498] sm:$0xff] %v1520_v19  ;;  %v1522_v20 = vld [vmem:[%s10252_s29 + $0x2940] sm:$0xff]  ;;  %v1524_v21 = vld [vmem:[%s10252_s29 + $0x2948] sm:$0xff] }
 0x15c   : > { %v1526_v22 = vld [vmem:[%s10252_s29 + $0x2960] sm:$0xff]  ;;  %1523 = vst [vmem:[%s10260_s30 + $0x14a0] sm:$0xff] %v1522_v20  ;;  %1525 = vst [vmem:[%s10260_s30 + $0x14a8] sm:$0xff] %v1524_v21  ;;  %v1528_v23 = vld [vmem:[%s10252_s29 + $0x2968] sm:$0xff] }
 0x15d   : > { %1527 = vst [vmem:[%s10260_s30 + $0x14b0] sm:$0xff] %v1526_v22  ;;  %v1530_v24 = vld [vmem:[%s10252_s29 + $0x2980] sm:$0xff]  ;;  %v1532_v25 = vld [vmem:[%s10252_s29 + $0x2988] sm:$0xff]  ;;  %1529 = vst [vmem:[%s10260_s30 + $0x14b8] sm:$0xff] %v1528_v23 }
 0x15e   : > { %1531 = vst [vmem:[%s10260_s30 + $0x14c0] sm:$0xff] %v1530_v24  ;;  %1533 = vst [vmem:[%s10260_s30 + $0x14c8] sm:$0xff] %v1532_v25  ;;  %v1534_v26 = vld [vmem:[%s10252_s29 + $0x29a0] sm:$0xff]  ;;  %v1536_v27 = vld [vmem:[%s10252_s29 + $0x29a8] sm:$0xff] }
 0x15f   : > { %v1538_v28 = vld [vmem:[%s10252_s29 + $0x29c0] sm:$0xff]  ;;  %1535 = vst [vmem:[%s10260_s30 + $0x14d0] sm:$0xff] %v1534_v26  ;;  %1537 = vst [vmem:[%s10260_s30 + $0x14d8] sm:$0xff] %v1536_v27  ;;  %v1540_v29 = vld [vmem:[%s10252_s29 + $0x29c8] sm:$0xff] }
 0x160   : > { %1539 = vst [vmem:[%s10260_s30 + $0x14e0] sm:$0xff] %v1538_v28  ;;  %v1542_v30 = vld [vmem:[%s10252_s29 + $0x29e0] sm:$0xff]  ;;  %v1544_v31 = vld [vmem:[%s10252_s29 + $0x29e8] sm:$0xff]  ;;  %1541 = vst [vmem:[%s10260_s30 + $0x14e8] sm:$0xff] %v1540_v29 }
 0x161   : > { %1543 = vst [vmem:[%s10260_s30 + $0x14f0] sm:$0xff] %v1542_v30  ;;  %1545 = vst [vmem:[%s10260_s30 + $0x14f8] sm:$0xff] %v1544_v31  ;;  %v1546_v32 = vld [vmem:[%s10252_s29 + $0x2a00] sm:$0xff]  ;;  %v1548_v33 = vld [vmem:[%s10252_s29 + $0x2a08] sm:$0xff] }
 0x162   : > { %v1550_v34 = vld [vmem:[%s10252_s29 + $0x2a20] sm:$0xff]  ;;  %1547 = vst [vmem:[%s10260_s30 + $0x1500] sm:$0xff] %v1546_v32  ;;  %1549 = vst [vmem:[%s10260_s30 + $0x1508] sm:$0xff] %v1548_v33  ;;  %v1552_v35 = vld [vmem:[%s10252_s29 + $0x2a28] sm:$0xff] }
 0x163   : > { %1551 = vst [vmem:[%s10260_s30 + $0x1510] sm:$0xff] %v1550_v34  ;;  %v1554_v36 = vld [vmem:[%s10252_s29 + $0x2a40] sm:$0xff]  ;;  %v1556_v37 = vld [vmem:[%s10252_s29 + $0x2a48] sm:$0xff]  ;;  %1553 = vst [vmem:[%s10260_s30 + $0x1518] sm:$0xff] %v1552_v35 }
 0x164   : > { %1555 = vst [vmem:[%s10260_s30 + $0x1520] sm:$0xff] %v1554_v36  ;;  %1557 = vst [vmem:[%s10260_s30 + $0x1528] sm:$0xff] %v1556_v37  ;;  %v1558_v38 = vld [vmem:[%s10252_s29 + $0x2a60] sm:$0xff]  ;;  %v1560_v39 = vld [vmem:[%s10252_s29 + $0x2a68] sm:$0xff] }
 0x165   : > { %v1562_v40 = vld [vmem:[%s10252_s29 + $0x2a80] sm:$0xff]  ;;  %1559 = vst [vmem:[%s10260_s30 + $0x1530] sm:$0xff] %v1558_v38  ;;  %1561 = vst [vmem:[%s10260_s30 + $0x1538] sm:$0xff] %v1560_v39  ;;  %v1564_v41 = vld [vmem:[%s10252_s29 + $0x2a88] sm:$0xff] }
 0x166   : > { %1563 = vst [vmem:[%s10260_s30 + $0x1540] sm:$0xff] %v1562_v40  ;;  %v1566_v42 = vld [vmem:[%s10252_s29 + $0x2aa0] sm:$0xff]  ;;  %v1568_v43 = vld [vmem:[%s10252_s29 + $0x2aa8] sm:$0xff]  ;;  %1565 = vst [vmem:[%s10260_s30 + $0x1548] sm:$0xff] %v1564_v41 }
 0x167   : > { %1567 = vst [vmem:[%s10260_s30 + $0x1550] sm:$0xff] %v1566_v42  ;;  %1569 = vst [vmem:[%s10260_s30 + $0x1558] sm:$0xff] %v1568_v43  ;;  %v1570_v44 = vld [vmem:[%s10252_s29 + $0x2ac0] sm:$0xff]  ;;  %v1572_v45 = vld [vmem:[%s10252_s29 + $0x2ac8] sm:$0xff] }
 0x168   : > { %v1574_v46 = vld [vmem:[%s10252_s29 + $0x2ae0] sm:$0xff]  ;;  %1571 = vst [vmem:[%s10260_s30 + $0x1560] sm:$0xff] %v1570_v44  ;;  %1573 = vst [vmem:[%s10260_s30 + $0x1568] sm:$0xff] %v1572_v45  ;;  %v1576_v47 = vld [vmem:[%s10252_s29 + $0x2ae8] sm:$0xff] }
 0x169   : > { %1575 = vst [vmem:[%s10260_s30 + $0x1570] sm:$0xff] %v1574_v46  ;;  %v1578_v48 = vld [vmem:[%s10252_s29 + $0x2b00] sm:$0xff]  ;;  %v1580_v49 = vld [vmem:[%s10252_s29 + $0x2b08] sm:$0xff]  ;;  %1577 = vst [vmem:[%s10260_s30 + $0x1578] sm:$0xff] %v1576_v47 }
 0x16a   : > { %1579 = vst [vmem:[%s10260_s30 + $0x1580] sm:$0xff] %v1578_v48  ;;  %1581 = vst [vmem:[%s10260_s30 + $0x1588] sm:$0xff] %v1580_v49  ;;  %v1582_v50 = vld [vmem:[%s10252_s29 + $0x2b20] sm:$0xff]  ;;  %v1584_v51 = vld [vmem:[%s10252_s29 + $0x2b28] sm:$0xff] }
 0x16b   : > { %v1586_v52 = vld [vmem:[%s10252_s29 + $0x2b40] sm:$0xff]  ;;  %1583 = vst [vmem:[%s10260_s30 + $0x1590] sm:$0xff] %v1582_v50  ;;  %1585 = vst [vmem:[%s10260_s30 + $0x1598] sm:$0xff] %v1584_v51  ;;  %v1588_v53 = vld [vmem:[%s10252_s29 + $0x2b48] sm:$0xff] }
 0x16c   : > { %1587 = vst [vmem:[%s10260_s30 + $0x15a0] sm:$0xff] %v1586_v52  ;;  %v1590_v54 = vld [vmem:[%s10252_s29 + $0x2b60] sm:$0xff]  ;;  %v1592_v55 = vld [vmem:[%s10252_s29 + $0x2b68] sm:$0xff]  ;;  %1589 = vst [vmem:[%s10260_s30 + $0x15a8] sm:$0xff] %v1588_v53 }
 0x16d   : > { %1591 = vst [vmem:[%s10260_s30 + $0x15b0] sm:$0xff] %v1590_v54  ;;  %1593 = vst [vmem:[%s10260_s30 + $0x15b8] sm:$0xff] %v1592_v55  ;;  %v1594_v56 = vld [vmem:[%s10252_s29 + $0x2b80] sm:$0xff]  ;;  %v1596_v57 = vld [vmem:[%s10252_s29 + $0x2b88] sm:$0xff] }
 0x16e   : > { %v1598_v58 = vld [vmem:[%s10252_s29 + $0x2ba0] sm:$0xff]  ;;  %1595 = vst [vmem:[%s10260_s30 + $0x15c0] sm:$0xff] %v1594_v56  ;;  %1597 = vst [vmem:[%s10260_s30 + $0x15c8] sm:$0xff] %v1596_v57  ;;  %v1600_v59 = vld [vmem:[%s10252_s29 + $0x2ba8] sm:$0xff] }
 0x16f   : > { %1599 = vst [vmem:[%s10260_s30 + $0x15d0] sm:$0xff] %v1598_v58  ;;  %v1602_v60 = vld [vmem:[%s10252_s29 + $0x2bc0] sm:$0xff]  ;;  %v1604_v61 = vld [vmem:[%s10252_s29 + $0x2bc8] sm:$0xff]  ;;  %1601 = vst [vmem:[%s10260_s30 + $0x15d8] sm:$0xff] %v1600_v59 }
 0x170   : > { %1603 = vst [vmem:[%s10260_s30 + $0x15e0] sm:$0xff] %v1602_v60  ;;  %1605 = vst [vmem:[%s10260_s30 + $0x15e8] sm:$0xff] %v1604_v61  ;;  %v1606_v62 = vld [vmem:[%s10252_s29 + $0x2be0] sm:$0xff]  ;;  %v1608_v63 = vld [vmem:[%s10252_s29 + $0x2be8] sm:$0xff] }
 0x171   : > { %v1610_v0 = vld [vmem:[%s10252_s29 + $0x2c00] sm:$0xff]  ;;  %1607 = vst [vmem:[%s10260_s30 + $0x15f0] sm:$0xff] %v1606_v62  ;;  %1609 = vst [vmem:[%s10260_s30 + $0x15f8] sm:$0xff] %v1608_v63  ;;  %v1612_v1 = vld [vmem:[%s10252_s29 + $0x2c08] sm:$0xff] }
 0x172   : > { %1611 = vst [vmem:[%s10260_s30 + $0x1600] sm:$0xff] %v1610_v0  ;;  %v1614_v2 = vld [vmem:[%s10252_s29 + $0x2c20] sm:$0xff]  ;;  %v1616_v3 = vld [vmem:[%s10252_s29 + $0x2c28] sm:$0xff]  ;;  %1613 = vst [vmem:[%s10260_s30 + $0x1608] sm:$0xff] %v1612_v1 }
 0x173   : > { %1615 = vst [vmem:[%s10260_s30 + $0x1610] sm:$0xff] %v1614_v2  ;;  %1617 = vst [vmem:[%s10260_s30 + $0x1618] sm:$0xff] %v1616_v3  ;;  %v1618_v4 = vld [vmem:[%s10252_s29 + $0x2c40] sm:$0xff]  ;;  %v1620_v5 = vld [vmem:[%s10252_s29 + $0x2c48] sm:$0xff] }
 0x174   : > { %v1622_v6 = vld [vmem:[%s10252_s29 + $0x2c60] sm:$0xff]  ;;  %1619 = vst [vmem:[%s10260_s30 + $0x1620] sm:$0xff] %v1618_v4  ;;  %1621 = vst [vmem:[%s10260_s30 + $0x1628] sm:$0xff] %v1620_v5  ;;  %v1624_v7 = vld [vmem:[%s10252_s29 + $0x2c68] sm:$0xff] }
 0x175   : > { %1623 = vst [vmem:[%s10260_s30 + $0x1630] sm:$0xff] %v1622_v6  ;;  %v1626_v8 = vld [vmem:[%s10252_s29 + $0x2c80] sm:$0xff]  ;;  %v1628_v9 = vld [vmem:[%s10252_s29 + $0x2c88] sm:$0xff]  ;;  %1625 = vst [vmem:[%s10260_s30 + $0x1638] sm:$0xff] %v1624_v7 }
 0x176   : > { %1627 = vst [vmem:[%s10260_s30 + $0x1640] sm:$0xff] %v1626_v8  ;;  %1629 = vst [vmem:[%s10260_s30 + $0x1648] sm:$0xff] %v1628_v9  ;;  %v1630_v10 = vld [vmem:[%s10252_s29 + $0x2ca0] sm:$0xff]  ;;  %v1632_v11 = vld [vmem:[%s10252_s29 + $0x2ca8] sm:$0xff] }
 0x177   : > { %v1634_v12 = vld [vmem:[%s10252_s29 + $0x2cc0] sm:$0xff]  ;;  %1631 = vst [vmem:[%s10260_s30 + $0x1650] sm:$0xff] %v1630_v10  ;;  %1633 = vst [vmem:[%s10260_s30 + $0x1658] sm:$0xff] %v1632_v11  ;;  %v1636_v13 = vld [vmem:[%s10252_s29 + $0x2cc8] sm:$0xff] }
 0x178   : > { %1635 = vst [vmem:[%s10260_s30 + $0x1660] sm:$0xff] %v1634_v12  ;;  %v1638_v14 = vld [vmem:[%s10252_s29 + $0x2ce0] sm:$0xff]  ;;  %v1640_v15 = vld [vmem:[%s10252_s29 + $0x2ce8] sm:$0xff]  ;;  %1637 = vst [vmem:[%s10260_s30 + $0x1668] sm:$0xff] %v1636_v13 }
 0x179   : > { %1639 = vst [vmem:[%s10260_s30 + $0x1670] sm:$0xff] %v1638_v14  ;;  %1641 = vst [vmem:[%s10260_s30 + $0x1678] sm:$0xff] %v1640_v15  ;;  %v1642_v16 = vld [vmem:[%s10252_s29 + $0x2d00] sm:$0xff]  ;;  %v1644_v17 = vld [vmem:[%s10252_s29 + $0x2d08] sm:$0xff] }
 0x17a   : > { %v1646_v18 = vld [vmem:[%s10252_s29 + $0x2d20] sm:$0xff]  ;;  %1643 = vst [vmem:[%s10260_s30 + $0x1680] sm:$0xff] %v1642_v16  ;;  %1645 = vst [vmem:[%s10260_s30 + $0x1688] sm:$0xff] %v1644_v17  ;;  %v1648_v19 = vld [vmem:[%s10252_s29 + $0x2d28] sm:$0xff] }
 0x17b   : > { %1647 = vst [vmem:[%s10260_s30 + $0x1690] sm:$0xff] %v1646_v18  ;;  %v1650_v20 = vld [vmem:[%s10252_s29 + $0x2d40] sm:$0xff]  ;;  %v1652_v21 = vld [vmem:[%s10252_s29 + $0x2d48] sm:$0xff]  ;;  %1649 = vst [vmem:[%s10260_s30 + $0x1698] sm:$0xff] %v1648_v19 }
 0x17c   : > { %1651 = vst [vmem:[%s10260_s30 + $0x16a0] sm:$0xff] %v1650_v20  ;;  %1653 = vst [vmem:[%s10260_s30 + $0x16a8] sm:$0xff] %v1652_v21  ;;  %v1654_v22 = vld [vmem:[%s10252_s29 + $0x2d60] sm:$0xff]  ;;  %v1656_v23 = vld [vmem:[%s10252_s29 + $0x2d68] sm:$0xff] }
 0x17d   : > { %v1658_v24 = vld [vmem:[%s10252_s29 + $0x2d80] sm:$0xff]  ;;  %1655 = vst [vmem:[%s10260_s30 + $0x16b0] sm:$0xff] %v1654_v22  ;;  %1657 = vst [vmem:[%s10260_s30 + $0x16b8] sm:$0xff] %v1656_v23  ;;  %v1660_v25 = vld [vmem:[%s10252_s29 + $0x2d88] sm:$0xff] }
 0x17e   : > { %1659 = vst [vmem:[%s10260_s30 + $0x16c0] sm:$0xff] %v1658_v24  ;;  %v1662_v26 = vld [vmem:[%s10252_s29 + $0x2da0] sm:$0xff]  ;;  %v1664_v27 = vld [vmem:[%s10252_s29 + $0x2da8] sm:$0xff]  ;;  %1661 = vst [vmem:[%s10260_s30 + $0x16c8] sm:$0xff] %v1660_v25 }
 0x17f   : > { %1663 = vst [vmem:[%s10260_s30 + $0x16d0] sm:$0xff] %v1662_v26  ;;  %1665 = vst [vmem:[%s10260_s30 + $0x16d8] sm:$0xff] %v1664_v27  ;;  %v1666_v28 = vld [vmem:[%s10252_s29 + $0x2dc0] sm:$0xff]  ;;  %v1668_v29 = vld [vmem:[%s10252_s29 + $0x2dc8] sm:$0xff] }
 0x180   : > { %v1670_v30 = vld [vmem:[%s10252_s29 + $0x2de0] sm:$0xff]  ;;  %1667 = vst [vmem:[%s10260_s30 + $0x16e0] sm:$0xff] %v1666_v28  ;;  %1669 = vst [vmem:[%s10260_s30 + $0x16e8] sm:$0xff] %v1668_v29  ;;  %v1672_v31 = vld [vmem:[%s10252_s29 + $0x2de8] sm:$0xff] }
 0x181   : > { %1671 = vst [vmem:[%s10260_s30 + $0x16f0] sm:$0xff] %v1670_v30  ;;  %v1674_v32 = vld [vmem:[%s10252_s29 + $0x2e00] sm:$0xff]  ;;  %v1676_v33 = vld [vmem:[%s10252_s29 + $0x2e08] sm:$0xff]  ;;  %1673 = vst [vmem:[%s10260_s30 + $0x16f8] sm:$0xff] %v1672_v31 }
 0x182   : > { %1675 = vst [vmem:[%s10260_s30 + $0x1700] sm:$0xff] %v1674_v32  ;;  %1677 = vst [vmem:[%s10260_s30 + $0x1708] sm:$0xff] %v1676_v33  ;;  %v1678_v34 = vld [vmem:[%s10252_s29 + $0x2e20] sm:$0xff]  ;;  %v1680_v35 = vld [vmem:[%s10252_s29 + $0x2e28] sm:$0xff] }
 0x183   : > { %v1682_v36 = vld [vmem:[%s10252_s29 + $0x2e40] sm:$0xff]  ;;  %1679 = vst [vmem:[%s10260_s30 + $0x1710] sm:$0xff] %v1678_v34  ;;  %1681 = vst [vmem:[%s10260_s30 + $0x1718] sm:$0xff] %v1680_v35  ;;  %v1684_v37 = vld [vmem:[%s10252_s29 + $0x2e48] sm:$0xff] }
 0x184   : > { %1683 = vst [vmem:[%s10260_s30 + $0x1720] sm:$0xff] %v1682_v36  ;;  %v1686_v38 = vld [vmem:[%s10252_s29 + $0x2e60] sm:$0xff]  ;;  %v1688_v39 = vld [vmem:[%s10252_s29 + $0x2e68] sm:$0xff]  ;;  %1685 = vst [vmem:[%s10260_s30 + $0x1728] sm:$0xff] %v1684_v37 }
 0x185   : > { %1687 = vst [vmem:[%s10260_s30 + $0x1730] sm:$0xff] %v1686_v38  ;;  %1689 = vst [vmem:[%s10260_s30 + $0x1738] sm:$0xff] %v1688_v39  ;;  %v1690_v40 = vld [vmem:[%s10252_s29 + $0x2e80] sm:$0xff]  ;;  %v1692_v41 = vld [vmem:[%s10252_s29 + $0x2e88] sm:$0xff] }
 0x186   : > { %v1694_v42 = vld [vmem:[%s10252_s29 + $0x2ea0] sm:$0xff]  ;;  %1691 = vst [vmem:[%s10260_s30 + $0x1740] sm:$0xff] %v1690_v40  ;;  %1693 = vst [vmem:[%s10260_s30 + $0x1748] sm:$0xff] %v1692_v41  ;;  %v1696_v43 = vld [vmem:[%s10252_s29 + $0x2ea8] sm:$0xff] }
 0x187   : > { %1695 = vst [vmem:[%s10260_s30 + $0x1750] sm:$0xff] %v1694_v42  ;;  %v1698_v44 = vld [vmem:[%s10252_s29 + $0x2ec0] sm:$0xff]  ;;  %v1700_v45 = vld [vmem:[%s10252_s29 + $0x2ec8] sm:$0xff]  ;;  %1697 = vst [vmem:[%s10260_s30 + $0x1758] sm:$0xff] %v1696_v43 }
 0x188   : > { %1699 = vst [vmem:[%s10260_s30 + $0x1760] sm:$0xff] %v1698_v44  ;;  %1701 = vst [vmem:[%s10260_s30 + $0x1768] sm:$0xff] %v1700_v45  ;;  %v1702_v46 = vld [vmem:[%s10252_s29 + $0x2ee0] sm:$0xff]  ;;  %v1704_v47 = vld [vmem:[%s10252_s29 + $0x2ee8] sm:$0xff] }
 0x189   : > { %v1706_v48 = vld [vmem:[%s10252_s29 + $0x2f00] sm:$0xff]  ;;  %1703 = vst [vmem:[%s10260_s30 + $0x1770] sm:$0xff] %v1702_v46  ;;  %1705 = vst [vmem:[%s10260_s30 + $0x1778] sm:$0xff] %v1704_v47  ;;  %v1708_v49 = vld [vmem:[%s10252_s29 + $0x2f08] sm:$0xff] }
 0x18a   : > { %1707 = vst [vmem:[%s10260_s30 + $0x1780] sm:$0xff] %v1706_v48  ;;  %v1710_v50 = vld [vmem:[%s10252_s29 + $0x2f20] sm:$0xff]  ;;  %v1712_v51 = vld [vmem:[%s10252_s29 + $0x2f28] sm:$0xff]  ;;  %1709 = vst [vmem:[%s10260_s30 + $0x1788] sm:$0xff] %v1708_v49 }
 0x18b   : > { %1711 = vst [vmem:[%s10260_s30 + $0x1790] sm:$0xff] %v1710_v50  ;;  %1713 = vst [vmem:[%s10260_s30 + $0x1798] sm:$0xff] %v1712_v51  ;;  %v1714_v52 = vld [vmem:[%s10252_s29 + $0x2f40] sm:$0xff]  ;;  %v1716_v53 = vld [vmem:[%s10252_s29 + $0x2f48] sm:$0xff] }
 0x18c   : > { %v1718_v54 = vld [vmem:[%s10252_s29 + $0x2f60] sm:$0xff]  ;;  %1715 = vst [vmem:[%s10260_s30 + $0x17a0] sm:$0xff] %v1714_v52  ;;  %1717 = vst [vmem:[%s10260_s30 + $0x17a8] sm:$0xff] %v1716_v53  ;;  %v1720_v55 = vld [vmem:[%s10252_s29 + $0x2f68] sm:$0xff] }
 0x18d   : > { %1719 = vst [vmem:[%s10260_s30 + $0x17b0] sm:$0xff] %v1718_v54  ;;  %v1722_v56 = vld [vmem:[%s10252_s29 + $0x2f80] sm:$0xff]  ;;  %v1724_v57 = vld [vmem:[%s10252_s29 + $0x2f88] sm:$0xff]  ;;  %1721 = vst [vmem:[%s10260_s30 + $0x17b8] sm:$0xff] %v1720_v55 }
 0x18e   : > { %1723 = vst [vmem:[%s10260_s30 + $0x17c0] sm:$0xff] %v1722_v56  ;;  %1725 = vst [vmem:[%s10260_s30 + $0x17c8] sm:$0xff] %v1724_v57  ;;  %v1726_v58 = vld [vmem:[%s10252_s29 + $0x2fa0] sm:$0xff]  ;;  %v1728_v59 = vld [vmem:[%s10252_s29 + $0x2fa8] sm:$0xff] }
 0x18f   : > { %v1730_v60 = vld [vmem:[%s10252_s29 + $0x2fc0] sm:$0xff]  ;;  %1727 = vst [vmem:[%s10260_s30 + $0x17d0] sm:$0xff] %v1726_v58  ;;  %1729 = vst [vmem:[%s10260_s30 + $0x17d8] sm:$0xff] %v1728_v59  ;;  %v1732_v61 = vld [vmem:[%s10252_s29 + $0x2fc8] sm:$0xff] }
 0x190   : > { %1731 = vst [vmem:[%s10260_s30 + $0x17e0] sm:$0xff] %v1730_v60  ;;  %v1734_v62 = vld [vmem:[%s10252_s29 + $0x2fe0] sm:$0xff]  ;;  %v1736_v63 = vld [vmem:[%s10252_s29 + $0x2fe8] sm:$0xff]  ;;  %1733 = vst [vmem:[%s10260_s30 + $0x17e8] sm:$0xff] %v1732_v61 }
 0x191   : > { %1735 = vst [vmem:[%s10260_s30 + $0x17f0] sm:$0xff] %v1734_v62  ;;  %1737 = vst [vmem:[%s10260_s30 + $0x17f8] sm:$0xff] %v1736_v63  ;;  %v1738_v0 = vld [vmem:[%s10252_s29 + $0x3000] sm:$0xff]  ;;  %v1740_v1 = vld [vmem:[%s10252_s29 + $0x3008] sm:$0xff] }
 0x192   : > { %v1742_v2 = vld [vmem:[%s10252_s29 + $0x3020] sm:$0xff]  ;;  %1739 = vst [vmem:[%s10260_s30 + $0x1800] sm:$0xff] %v1738_v0  ;;  %1741 = vst [vmem:[%s10260_s30 + $0x1808] sm:$0xff] %v1740_v1  ;;  %v1744_v3 = vld [vmem:[%s10252_s29 + $0x3028] sm:$0xff] }
 0x193   : > { %1743 = vst [vmem:[%s10260_s30 + $0x1810] sm:$0xff] %v1742_v2  ;;  %v1746_v4 = vld [vmem:[%s10252_s29 + $0x3040] sm:$0xff]  ;;  %v1748_v5 = vld [vmem:[%s10252_s29 + $0x3048] sm:$0xff]  ;;  %1745 = vst [vmem:[%s10260_s30 + $0x1818] sm:$0xff] %v1744_v3 }
 0x194   : > { %1747 = vst [vmem:[%s10260_s30 + $0x1820] sm:$0xff] %v1746_v4  ;;  %1749 = vst [vmem:[%s10260_s30 + $0x1828] sm:$0xff] %v1748_v5  ;;  %v1750_v6 = vld [vmem:[%s10252_s29 + $0x3060] sm:$0xff]  ;;  %v1752_v7 = vld [vmem:[%s10252_s29 + $0x3068] sm:$0xff] }
 0x195   : > { %v1754_v8 = vld [vmem:[%s10252_s29 + $0x3080] sm:$0xff]  ;;  %1751 = vst [vmem:[%s10260_s30 + $0x1830] sm:$0xff] %v1750_v6  ;;  %1753 = vst [vmem:[%s10260_s30 + $0x1838] sm:$0xff] %v1752_v7  ;;  %v1756_v9 = vld [vmem:[%s10252_s29 + $0x3088] sm:$0xff] }
 0x196   : > { %1755 = vst [vmem:[%s10260_s30 + $0x1840] sm:$0xff] %v1754_v8  ;;  %v1758_v10 = vld [vmem:[%s10252_s29 + $0x30a0] sm:$0xff]  ;;  %v1760_v11 = vld [vmem:[%s10252_s29 + $0x30a8] sm:$0xff]  ;;  %1757 = vst [vmem:[%s10260_s30 + $0x1848] sm:$0xff] %v1756_v9 }
 0x197   : > { %1759 = vst [vmem:[%s10260_s30 + $0x1850] sm:$0xff] %v1758_v10  ;;  %1761 = vst [vmem:[%s10260_s30 + $0x1858] sm:$0xff] %v1760_v11  ;;  %v1762_v12 = vld [vmem:[%s10252_s29 + $0x30c0] sm:$0xff]  ;;  %v1764_v13 = vld [vmem:[%s10252_s29 + $0x30c8] sm:$0xff] }
 0x198   : > { %v1766_v14 = vld [vmem:[%s10252_s29 + $0x30e0] sm:$0xff]  ;;  %1763 = vst [vmem:[%s10260_s30 + $0x1860] sm:$0xff] %v1762_v12  ;;  %1765 = vst [vmem:[%s10260_s30 + $0x1868] sm:$0xff] %v1764_v13  ;;  %v1768_v15 = vld [vmem:[%s10252_s29 + $0x30e8] sm:$0xff] }
 0x199   : > { %1767 = vst [vmem:[%s10260_s30 + $0x1870] sm:$0xff] %v1766_v14  ;;  %1769 = vst [vmem:[%s10260_s30 + $0x1878] sm:$0xff] %v1768_v15 }
 0x19a PF: > { %p8023_p6 = scmp.ge.s32.totalorder %s10180_s19, 1  ;;  %p1790_p7 = scmp.lt.s32.totalorder %s10180_s19, 3 }
 0x19c   : > { %p1791_p8 = pnand %p8023_p6, %p1790_p7 }
 0x19d   : > { %s1797_s5 = sand.u32 (!%p1791_p8), 1, %s10164_s15   ;;  %v2651_v16 = vlaneseq (!%p1791_p8)  ;;  %v10182_v17 = vmov (!%p1791_p8), 1966171168   ;;  %v11832_v20 = vld [vmem:[%s12794_s0] sm:$0xff] (!%p1791_p8)  ;;  %vm6780_vm0 = vcmask (!%p1791_p8), 523264   ;;  %s8024_s24 = sshll.u32 (!%p1791_p8), %s10172_s17, 2 }
 0x19e   : > { %1794 = sbr.rel (%p1791_p8) target bundleno = 1573 (0x625), region = 55  ;;  %v2677_v18 = vunpack.c.l.s4 (!%p1791_p8), %v10182_v17  ;;  %p1843_p9 = scmp.lt.s32.totalorder (!%p1791_p8), %s8024_s24, 7  ;;  %vm7888_vm5 = vcmask (!%p1791_p8), 1041408  }
 0x19f   : > { %s8918_s6 = smul.u32 (!%p1791_p8), 6272, %s1797_s5  ;;  %v11827_v19 = vshrl.u32 (!%p1791_p8), %v2651_v16, 7  ;;  %p1854_p10 = scmp.lt.s32.totalorder (!%p1791_p8), %s10172_s17, 1 }
 0x1a0   : > { %v2678_v21 = vunpack.c.0.s8 (!%p1791_p8), %v2677_v18 }
 0x1a1   : > { %s11834_s9 = scalar_lea.vmem (!%p1791_p8), [#allocation2], %s8918_s6 }
 0x1a2   : > { %v8961_v22 = vld [vmem:[%s11834_s9 + $0x4] ss:$16 sps:$4 sm:$0xff] (!%p1791_p8)   ;;  %v8963_v23 = vld [vmem:[%s11834_s9 + $0xc] ss:$16 sps:$4 sm:$0xff] (!%p1791_p8)   ;;  %v11839_v24 = vsub.s32 (!%p1791_p8), %v2678_v21, %v11827_v19  ;;  %v8965_v25 = vld [vmem:[%s11834_s9] ss:$16 sps:$4 sm:$0xff] (!%p1791_p8)  }
 0x1a3   : > { %6784 = vmatprep.subr.bf16.mxu0 (!%p1791_p8), %v8961_v22  ;;  %v8966_v26 = vld [vmem:[%s11834_s9 + $0x8] ss:$16 sps:$4 sm:$0xff] (!%p1791_p8)   ;;  %7317 = vmatprep.subr.bf16.mxu1 (!%p1791_p8), %v8963_v23  ;;  %v8967_v27 = vld [vmem:[%s11834_s9 + $0x24] ss:$16 sps:$4 sm:$0xff] (!%p1791_p8)   ;;  %v8969_v29 = vld [vmem:[%s11834_s9 + $0x2c] ss:$16 sps:$4 sm:$0xff] (!%p1791_p8)  }
 0x1a4   : > { %v11846_v28 = vrot.slane (!%p1791_p8), %v11832_v20, %v11839_v24  ;;  %6785 = vmatpush1.bf16.msra.mxu0 (!%p1791_p8), %v8965_v25  ;;  %7318 = vmatpush1.bf16.msra.mxu1 (!%p1791_p8), %v8966_v26  ;;  %v8971_v30 = vld [vmem:[%s11834_s9 + $0x20] ss:$16 sps:$4 sm:$0xff] (!%p1791_p8)   ;;  %v8972_v31 = vld [vmem:[%s11834_s9 + $0x28] ss:$16 sps:$4 sm:$0xff] (!%p1791_p8)   ;;  %v8973_v33 = vld [vmem:[%s11834_s9 + $0x44] ss:$16 sps:$4 sm:$0xff] (!%p1791_p8)  }
 0x1a5   : > { %6786 = vmatprep.subr.bf16.mxu0 %v8967_v27  ;;  %7319 = vmatprep.subr.bf16.mxu1 %v8969_v29  ;;  %v8975_v34 = vld [vmem:[%s11834_s9 + $0x4c] ss:$16 sps:$4 sm:$0xff]   ;;  %v8977_v35 = vld [vmem:[%s11834_s9 + $0x40] ss:$16 sps:$4 sm:$0xff]   ;;  %v8978_v36 = vld [vmem:[%s11834_s9 + $0x48] ss:$16 sps:$4 sm:$0xff]  }
 0x1a6   : > { %v2690_v32 = vcombine.high %v11846_v28, %v11846_v28  ;;  %v8979_v38 = vld [vmem:[%s11834_s9 + $0x64] ss:$16 sps:$4 sm:$0xff]   ;;  %v8981_v39 = vld [vmem:[%s11834_s9 + $0x6c] ss:$16 sps:$4 sm:$0xff]   ;;  %v8983_v40 = vld [vmem:[%s11834_s9 + $0x60] ss:$16 sps:$4 sm:$0xff]  }
 0x1a7   : > { %v8984_v41 = vld [vmem:[%s11834_s9 + $0x68] ss:$16 sps:$4 sm:$0xff]   ;;  %v8985_v42 = vld [vmem:[%s11834_s9 + $0x84] ss:$16 sps:$4 sm:$0xff]   ;;  %v8987_v43 = vld [vmem:[%s11834_s9 + $0x8c] ss:$16 sps:$4 sm:$0xff]  }
 0x1a8   : > { %v11858_v37 = vrot.slane %v2690_v32, %v11839_v24  ;;  %6787 = vmatpush1.bf16.msra.mxu0 %v8971_v30  ;;  %7320 = vmatpush1.bf16.msra.mxu1 %v8972_v31  ;;  %v8989_v44 = vld [vmem:[%s11834_s9 + $0x80] ss:$16 sps:$4 sm:$0xff]   ;;  %v8990_v45 = vld [vmem:[%s11834_s9 + $0x88] ss:$16 sps:$4 sm:$0xff]   ;;  %v8991_v46 = vld [vmem:[%s11834_s9 + $0xa4] ss:$16 sps:$4 sm:$0xff]  }
 0x1a9   : > { %6788 = vmatprep.subr.bf16.mxu0 %v8973_v33  ;;  %7321 = vmatprep.subr.bf16.mxu1 %v8975_v34  ;;  %v8993_v47 = vld [vmem:[%s11834_s9 + $0xac] ss:$16 sps:$4 sm:$0xff]   ;;  %v8995_v48 = vld [vmem:[%s11834_s9 + $0xa0] ss:$16 sps:$4 sm:$0xff]   ;;  %v8996_v49 = vld [vmem:[%s11834_s9 + $0xa8] ss:$16 sps:$4 sm:$0xff]   ;;  %v11920_v34 = vrot.slane %v11846_v28, %v11839_v24 }
 0x1aa   : > { %6816 = vmatprep.mubr.bf16.mxu0 %v11858_v37  ;;  %7349 = vmatprep.mubr.bf16.mxu1 %v11858_v37  ;;  %v8997_v50 = vld [vmem:[%s11834_s9 + $0xc4] ss:$16 sps:$4 sm:$0xff]   ;;  %v8999_v51 = vld [vmem:[%s11834_s9 + $0xcc] ss:$16 sps:$4 sm:$0xff]   ;;  %v9001_v52 = vld [vmem:[%s11834_s9 + $0xc0] ss:$16 sps:$4 sm:$0xff]  }
 0x1ab   : > { %v9002_v53 = vld [vmem:[%s11834_s9 + $0xc8] ss:$16 sps:$4 sm:$0xff]   ;;  %v9003_v54 = vld [vmem:[%s11834_s9 + $0xe4] ss:$16 sps:$4 sm:$0xff]   ;;  %v9005_v55 = vld [vmem:[%s11834_s9 + $0xec] ss:$16 sps:$4 sm:$0xff]  }
 0x1ac   : > { %6789 = vmatpush1.bf16.msra.mxu0 %v8977_v35  ;;  %7322 = vmatpush1.bf16.msra.mxu1 %v8978_v36  ;;  %v9007_v56 = vld [vmem:[%s11834_s9 + $0xe0] ss:$16 sps:$4 sm:$0xff]   ;;  %v9008_v57 = vld [vmem:[%s11834_s9 + $0xe8] ss:$16 sps:$4 sm:$0xff]   ;;  %v9009_v58 = vld [vmem:[%s11834_s9 + $0x104] ss:$16 sps:$4 sm:$0xff]  }
 0x1ad   : > { %6790 = vmatprep.subr.bf16.mxu0 %v8979_v38  ;;  %7323 = vmatprep.subr.bf16.mxu1 %v8981_v39  ;;  %v9011_v59 = vld [vmem:[%s11834_s9 + $0x10c] ss:$16 sps:$4 sm:$0xff]   ;;  %v9013_v60 = vld [vmem:[%s11834_s9 + $0x100] ss:$16 sps:$4 sm:$0xff]   ;;  %v9014_v61 = vld [vmem:[%s11834_s9 + $0x108] ss:$16 sps:$4 sm:$0xff]   ;;  %v2722_v38 = vcombine.high %v11858_v37, %v11858_v37 }
 0x1ae   : > { %v9015_v62 = vld [vmem:[%s11834_s9 + $0x124] ss:$16 sps:$4 sm:$0xff]   ;;  %v9017_v63 = vld [vmem:[%s11834_s9 + $0x12c] ss:$16 sps:$4 sm:$0xff]   ;;  %v9019_v0 = vld [vmem:[%s11834_s9 + $0x120] ss:$16 sps:$4 sm:$0xff]  }
 0x1af   : > { %v9020_v1 = vld [vmem:[%s11834_s9 + $0x128] ss:$16 sps:$4 sm:$0xff]   ;;  %v9021_v2 = vld [vmem:[%s11834_s9 + $0x144] ss:$16 sps:$4 sm:$0xff]   ;;  %v9023_v3 = vld [vmem:[%s11834_s9 + $0x14c] ss:$16 sps:$4 sm:$0xff]  }
 0x1b0   : > { %6791 = vmatpush1.bf16.msra.mxu0 %v8983_v40  ;;  %7324 = vmatpush1.bf16.msra.mxu1 %v8984_v41  ;;  %v9025_v4 = vld [vmem:[%s11834_s9 + $0x140] ss:$16 sps:$4 sm:$0xff]   ;;  %v9026_v5 = vld [vmem:[%s11834_s9 + $0x148] ss:$16 sps:$4 sm:$0xff]   ;;  %v9027_v6 = vld [vmem:[%s11834_s9 + $0x164] ss:$16 sps:$4 sm:$0xff]  }
 0x1b1   : > { %6792 = vmatprep.subr.bf16.mxu0 %v8985_v42  ;;  %7325 = vmatprep.subr.bf16.mxu1 %v8987_v43  ;;  %v9029_v7 = vld [vmem:[%s11834_s9 + $0x16c] ss:$16 sps:$4 sm:$0xff]   ;;  %v9031_v8 = vld [vmem:[%s11834_s9 + $0x160] ss:$16 sps:$4 sm:$0xff]   ;;  %v9032_v9 = vld [vmem:[%s11834_s9 + $0x168] ss:$16 sps:$4 sm:$0xff]  }
 0x1b2   : > { %v9033_v10 = vld [vmem:[%s11834_s9 + $0x184] ss:$16 sps:$4 sm:$0xff]   ;;  %v9035_v11 = vld [vmem:[%s11834_s9 + $0x18c] ss:$16 sps:$4 sm:$0xff]   ;;  %v9037_v12 = vld [vmem:[%s11834_s9 + $0x180] ss:$16 sps:$4 sm:$0xff]  }
 0x1b3   : > { %v9038_v13 = vld [vmem:[%s11834_s9 + $0x188] ss:$16 sps:$4 sm:$0xff]   ;;  %v9039_v14 = vld [vmem:[%s11834_s9 + $0x1a4] ss:$16 sps:$4 sm:$0xff]   ;;  %v9041_v15 = vld [vmem:[%s11834_s9 + $0x1ac] ss:$16 sps:$4 sm:$0xff]  }
 0x1b4   : > { %6793 = vmatpush1.bf16.msra.mxu0 %v8989_v44  ;;  %7326 = vmatpush1.bf16.msra.mxu1 %v8990_v45  ;;  %v9043_v16 = vld [vmem:[%s11834_s9 + $0x1a0] ss:$16 sps:$4 sm:$0xff]   ;;  %v9044_v17 = vld [vmem:[%s11834_s9 + $0x1a8] ss:$16 sps:$4 sm:$0xff]   ;;  %v9045_v18 = vld [vmem:[%s11834_s9 + $0x1c4] ss:$16 sps:$4 sm:$0xff]  }
 0x1b5   : > { %6794 = vmatprep.subr.bf16.mxu0 %v8991_v46  ;;  %7327 = vmatprep.subr.bf16.mxu1 %v8993_v47  ;;  %v9047_v21 = vld [vmem:[%s11834_s9 + $0x1cc] ss:$16 sps:$4 sm:$0xff]   ;;  %v9049_v22 = vld [vmem:[%s11834_s9 + $0x1c0] ss:$16 sps:$4 sm:$0xff]   ;;  %v9050_v23 = vld [vmem:[%s11834_s9 + $0x1c8] ss:$16 sps:$4 sm:$0xff]  }
 0x1b6   : > { %v9051_v25 = vld [vmem:[%s11834_s9 + $0x1e4] ss:$16 sps:$4 sm:$0xff]   ;;  %v9053_v26 = vld [vmem:[%s11834_s9 + $0x1ec] ss:$16 sps:$4 sm:$0xff]   ;;  %v9055_v27 = vld [vmem:[%s11834_s9 + $0x1e0] ss:$16 sps:$4 sm:$0xff]  }
 0x1b7   : > { %v9056_v29 = vld [vmem:[%s11834_s9 + $0x1e8] ss:$16 sps:$4 sm:$0xff]   ;;  %v9059_v30 = vld [vmem:[%s11834_s9 + $0x204] ss:$16 sps:$4 sm:$0xff]   ;;  %v9062_v31 = vld [vmem:[%s11834_s9 + $0x20c] ss:$16 sps:$4 sm:$0xff]  }
 0x1b8   : > { %6795 = vmatpush1.bf16.msra.mxu0 %v8995_v48  ;;  %7328 = vmatpush1.bf16.msra.mxu1 %v8996_v49  ;;  %v9057_v32 = vld [vmem:[%s11834_s9 + $0x200] ss:$16 sps:$4 sm:$0xff]   ;;  %v9060_v33 = vld [vmem:[%s11834_s9 + $0x208] ss:$16 sps:$4 sm:$0xff]   ;;  %v9065_v35 = vld [vmem:[%s11834_s9 + $0x224] ss:$16 sps:$4 sm:$0xff]  }
 0x1b9   : > { %6796 = vmatprep.subr.bf16.mxu0 %v8997_v50  ;;  %7329 = vmatprep.subr.bf16.mxu1 %v8999_v51  ;;  %v9068_v36 = vld [vmem:[%s11834_s9 + $0x22c] ss:$16 sps:$4 sm:$0xff]   ;;  %v9063_v39 = vld [vmem:[%s11834_s9 + $0x220] ss:$16 sps:$4 sm:$0xff]   ;;  %v9066_v28 = vld [vmem:[%s11834_s9 + $0x228] ss:$16 sps:$4 sm:$0xff]  }
 0x1ba   : > { %v9071_v40 = vld [vmem:[%s11834_s9 + $0x244] ss:$16 sps:$4 sm:$0xff]   ;;  %v9074_v41 = vld [vmem:[%s11834_s9 + $0x24c] ss:$16 sps:$4 sm:$0xff]   ;;  %v9069_v37 = vld [vmem:[%s11834_s9 + $0x240] ss:$16 sps:$4 sm:$0xff]  }
 0x1bb   : > { %v9072_v42 = vld [vmem:[%s11834_s9 + $0x248] ss:$16 sps:$4 sm:$0xff]   ;;  %v9077_v43 = vld [vmem:[%s11834_s9 + $0x264] ss:$16 sps:$4 sm:$0xff]   ;;  %v9080_v44 = vld [vmem:[%s11834_s9 + $0x26c] ss:$16 sps:$4 sm:$0xff]  }
 0x1bc   : > { %6797 = vmatpush1.bf16.msra.mxu0 %v9001_v52  ;;  %7330 = vmatpush1.bf16.msra.mxu1 %v9002_v53  ;;  %v9075_v45 = vld [vmem:[%s11834_s9 + $0x260] ss:$16 sps:$4 sm:$0xff]   ;;  %v9078_v46 = vld [vmem:[%s11834_s9 + $0x268] ss:$16 sps:$4 sm:$0xff]   ;;  %v9083_v47 = vld [vmem:[%s11834_s9 + $0x284] ss:$16 sps:$4 sm:$0xff]  }
 0x1bd   : > { %6798 = vmatprep.subr.bf16.mxu0 %v9003_v54  ;;  %7331 = vmatprep.subr.bf16.mxu1 %v9005_v55  ;;  %v9086_v48 = vld [vmem:[%s11834_s9 + $0x28c] ss:$16 sps:$4 sm:$0xff]   ;;  %v9081_v49 = vld [vmem:[%s11834_s9 + $0x280] ss:$16 sps:$4 sm:$0xff]   ;;  %v9084_v50 = vld [vmem:[%s11834_s9 + $0x288] ss:$16 sps:$4 sm:$0xff]  }
 0x1be   : > { %v9089_v51 = vld [vmem:[%s11834_s9 + $0x2a4] ss:$16 sps:$4 sm:$0xff]   ;;  %v9092_v52 = vld [vmem:[%s11834_s9 + $0x2ac] ss:$16 sps:$4 sm:$0xff]   ;;  %v9087_v53 = vld [vmem:[%s11834_s9 + $0x2a0] ss:$16 sps:$4 sm:$0xff]  }
 0x1bf   : > { %v9090_v54 = vld [vmem:[%s11834_s9 + $0x2a8] ss:$16 sps:$4 sm:$0xff]   ;;  %v9095_v55 = vld [vmem:[%s11834_s9 + $0x2c4] ss:$16 sps:$4 sm:$0xff]   ;;  %s12806_s24 = smov (!%p1843_p9, %s8024_s24), 7  ;;  %s12808_s17 = smov (!%p1854_p10, %s10172_s17), 1 }
 0x1c0   : > { %6799 = vmatpush1.bf16.msra.mxu0 %v9007_v56  ;;  %7332 = vmatpush1.bf16.msra.mxu1 %v9008_v57  ;;  %v9098_v56 = vld [vmem:[%s11834_s9 + $0x2cc] ss:$16 sps:$4 sm:$0xff]   ;;  %v9093_v57 = vld [vmem:[%s11834_s9 + $0x2c0] ss:$16 sps:$4 sm:$0xff]   ;;  %s1845_s27 = scalar_lea.vmem %s12796_s2, %s12806_s24  ;;  %s1850_s30 = scalar_lea.vmem %s12797_s3, %s12806_s24 }
 0x1c1   : > { %6800 = vmatprep.subr.bf16.mxu0 %v9009_v58  ;;  %7333 = vmatprep.subr.bf16.mxu1 %v9011_v59  ;;  %v9096_v58 = vld [vmem:[%s11834_s9 + $0x2c8] ss:$16 sps:$4 sm:$0xff]   ;;  %v9101_v59 = vld [vmem:[%s11834_s9 + $0x2e4] ss:$16 sps:$4 sm:$0xff]   ;;  %s8026_s5 = sshll.u32 %s12808_s17, 1 }
 0x1c2   : > { %s1859_s8 = scalar_lea.vmem %s12798_s4, %s8026_s5 }
 0x1c4   : > { %6801 = vmatpush1.bf16.msra.mxu0 %v9013_v60  ;;  %7334 = vmatpush1.bf16.msra.mxu1 %v9014_v61  ;;  %v9104_v60 = vld [vmem:[%s11834_s9 + $0x2ec] ss:$16 sps:$4 sm:$0xff]   ;;  %v9099_v61 = vld [vmem:[%s11834_s9 + $0x2e0] ss:$16 sps:$4 sm:$0xff]  }
 0x1c5   : > { %6802 = vmatprep.subr.bf16.mxu0 %v9015_v62  ;;  %7335 = vmatprep.subr.bf16.mxu1 %v9017_v63  ;;  %v9102_v62 = vld [vmem:[%s11834_s9 + $0x2e8] ss:$16 sps:$4 sm:$0xff]   ;;  %v9107_v63 = vld [vmem:[%s11834_s9 + $0x304] ss:$16 sps:$4 sm:$0xff]  }
 0x1c8   : > { %6803 = vmatpush1.bf16.msra.mxu0 %v9019_v0  ;;  %7336 = vmatpush1.bf16.msra.mxu1 %v9020_v1  ;;  %v9110_v0 = vld [vmem:[%s11834_s9 + $0x30c] ss:$16 sps:$4 sm:$0xff]   ;;  %v9105_v1 = vld [vmem:[%s11834_s9 + $0x300] ss:$16 sps:$4 sm:$0xff]  }
 0x1c9   : > { %6804 = vmatprep.subr.bf16.mxu0 %v9021_v2  ;;  %7337 = vmatprep.subr.bf16.mxu1 %v9023_v3  ;;  %v9108_v2 = vld [vmem:[%s11834_s9 + $0x308] ss:$16 sps:$4 sm:$0xff]   ;;  %v9113_v3 = vld [vmem:[%s11834_s9 + $0x324] ss:$16 sps:$4 sm:$0xff]  }
 0x1cc   : > { %6805 = vmatpush1.bf16.msra.mxu0 %v9025_v4  ;;  %7338 = vmatpush1.bf16.msra.mxu1 %v9026_v5  ;;  %v9116_v4 = vld [vmem:[%s11834_s9 + $0x32c] ss:$16 sps:$4 sm:$0xff]   ;;  %v9111_v5 = vld [vmem:[%s11834_s9 + $0x320] ss:$16 sps:$4 sm:$0xff]  }
 0x1cd   : > { %6806 = vmatprep.subr.bf16.mxu0 %v9027_v6  ;;  %7339 = vmatprep.subr.bf16.mxu1 %v9029_v7  ;;  %v9114_v6 = vld [vmem:[%s11834_s9 + $0x328] ss:$16 sps:$4 sm:$0xff]   ;;  %v9119_v7 = vld [vmem:[%s11834_s9 + $0x344] ss:$16 sps:$4 sm:$0xff]  }
 0x1d0   : > { %6807 = vmatpush1.bf16.msra.mxu0 %v9031_v8  ;;  %7340 = vmatpush1.bf16.msra.mxu1 %v9032_v9  ;;  %v9122_v8 = vld [vmem:[%s11834_s9 + $0x34c] ss:$16 sps:$4 sm:$0xff]   ;;  %v9117_v9 = vld [vmem:[%s11834_s9 + $0x340] ss:$16 sps:$4 sm:$0xff]  }
 0x1d1   : > { %6808 = vmatprep.subr.bf16.mxu0 %v9033_v10  ;;  %7341 = vmatprep.subr.bf16.mxu1 %v9035_v11  ;;  %v9120_v10 = vld [vmem:[%s11834_s9 + $0x348] ss:$16 sps:$4 sm:$0xff]   ;;  %v9125_v11 = vld [vmem:[%s11834_s9 + $0x364] ss:$16 sps:$4 sm:$0xff]  }
 0x1d4   : > { %6809 = vmatpush1.bf16.msra.mxu0 %v9037_v12  ;;  %7342 = vmatpush1.bf16.msra.mxu1 %v9038_v13  ;;  %v9128_v12 = vld [vmem:[%s11834_s9 + $0x36c] ss:$16 sps:$4 sm:$0xff]   ;;  %v9123_v13 = vld [vmem:[%s11834_s9 + $0x360] ss:$16 sps:$4 sm:$0xff]  }
 0x1d5   : > { %6810 = vmatprep.subr.bf16.mxu0 %v9039_v14  ;;  %7343 = vmatprep.subr.bf16.mxu1 %v9041_v15  ;;  %v9126_v14 = vld [vmem:[%s11834_s9 + $0x368] ss:$16 sps:$4 sm:$0xff]   ;;  %v9131_v15 = vld [vmem:[%s11834_s9 + $0x384] ss:$16 sps:$4 sm:$0xff]  }
 0x1d8   : > { %6811 = vmatpush1.bf16.msra.mxu0 %v9043_v16  ;;  %7344 = vmatpush1.bf16.msra.mxu1 %v9044_v17  ;;  %v9134_v16 = vld [vmem:[%s11834_s9 + $0x38c] ss:$16 sps:$4 sm:$0xff]   ;;  %v9129_v17 = vld [vmem:[%s11834_s9 + $0x380] ss:$16 sps:$4 sm:$0xff]  }
 0x1d9   : > { %6812 = vmatprep.subr.bf16.mxu0 %v9045_v18  ;;  %7345 = vmatprep.subr.bf16.mxu1 %v9047_v21  ;;  %v9132_v18 = vld [vmem:[%s11834_s9 + $0x388] ss:$16 sps:$4 sm:$0xff]   ;;  %v9137_v21 = vld [vmem:[%s11834_s9 + $0x3a4] ss:$16 sps:$4 sm:$0xff]  }
 0x1dc   : > { %6813 = vmatpush1.bf16.msra.mxu0 %v9049_v22  ;;  %7346 = vmatpush1.bf16.msra.mxu1 %v9050_v23  ;;  %v9140_v22 = vld [vmem:[%s11834_s9 + $0x3ac] ss:$16 sps:$4 sm:$0xff]   ;;  %v9135_v23 = vld [vmem:[%s11834_s9 + $0x3a0] ss:$16 sps:$4 sm:$0xff]  }
 0x1dd   : > { %6814 = vmatprep.subr.bf16.mxu0 %v9051_v25  ;;  %7347 = vmatprep.subr.bf16.mxu1 %v9053_v26  ;;  %v9138_v25 = vld [vmem:[%s11834_s9 + $0x3a8] ss:$16 sps:$4 sm:$0xff]   ;;  %v9143_v26 = vld [vmem:[%s11834_s9 + $0x3c4] ss:$16 sps:$4 sm:$0xff]  }
 0x1e0   : > { %6815 = vmatpush1.bf16.msra.mxu0 %v9055_v27  ;;  %7348 = vmatpush1.bf16.msra.mxu1 %v9056_v29  ;;  %v9146_v27 = vld [vmem:[%s11834_s9 + $0x3cc] ss:$16 sps:$4 sm:$0xff]   ;;  %v2675_v29 = vcombine.high %v11832_v20, %v11832_v20  ;;  %v9155_v20 = vld [vmem:[%s11834_s9 + $0x404] ss:$16 sps:$4 sm:$0xff]  }
 0x1e1   : > { %6825 = vmatprep.subr.bf16.mxu0 %v9059_v30  ;;  %7358 = vmatprep.subr.bf16.mxu1 %v9062_v31  ;;  %v9141_v30 = vld [vmem:[%s11834_s9 + $0x3c0] ss:$16 sps:$4 sm:$0xff]   ;;  %v9144_v31 = vld [vmem:[%s11834_s9 + $0x3c8] ss:$16 sps:$4 sm:$0xff]  }
 0x1e3   : > { %6817 = vmatmul.mubr.bf16.vlgmr.msra.gmra.mrb[0].mxu0 %v11920_v34  ;;  %7350 = vmatmul.mubr.bf16.vlgmr.msra.gmra.mrb[0].mxu1 %v11920_v34 }
 0x1e4   : > { %6826 = vmatpush1.bf16.msra.mxu0 %v9057_v32  ;;  %7359 = vmatpush1.bf16.msra.mxu1 %v9060_v33  ;;  %v9149_v32 = vld [vmem:[%s11834_s9 + $0x3e4] ss:$16 sps:$4 sm:$0xff]   ;;  %v9152_v33 = vld [vmem:[%s11834_s9 + $0x3ec] ss:$16 sps:$4 sm:$0xff]  }
 0x1e5   : > { %6827 = vmatprep.subr.bf16.mxu0 %v9065_v35  ;;  %7360 = vmatprep.subr.bf16.mxu1 %v9068_v36  ;;  %v11987_v35 = vrot.slane %v2675_v29, %v11839_v24  ;;  %v9147_v36 = vld [vmem:[%s11834_s9 + $0x3e0] ss:$16 sps:$4 sm:$0xff]   ;;  %v9228_v29 = vld [vmem:[%s11834_s9 + $0x588] ss:$16 sps:$4 sm:$0xff]  }
 0x1e6   : > { %6857 = vmatprep.mubr.bf16.mxu0 %v2722_v38  ;;  %7390 = vmatprep.mubr.bf16.mxu1 %v2722_v38  ;;  %v9150_v38 = vld [vmem:[%s11834_s9 + $0x3e8] ss:$16 sps:$4 sm:$0xff]  }
 0x1e8   : > { %6828 = vmatpush1.bf16.msra.mxu0 %v9063_v39  ;;  %7361 = vmatpush1.bf16.msra.mxu1 %v9066_v28  ;;  %v9158_v39 = vld [vmem:[%s11834_s9 + $0x40c] ss:$16 sps:$4 sm:$0xff]   ;;  %v2691_v28 = vcombine.high %v11987_v35, %v11987_v35 }
 0x1e9   : > { %6829 = vmatprep.subr.bf16.mxu0 %v9071_v40  ;;  %7362 = vmatprep.subr.bf16.mxu1 %v9074_v41  ;;  %v9153_v40 = vld [vmem:[%s11834_s9 + $0x400] ss:$16 sps:$4 sm:$0xff]   ;;  %v9156_v41 = vld [vmem:[%s11834_s9 + $0x408] ss:$16 sps:$4 sm:$0xff]  }
 0x1ec   : > { %6830 = vmatpush1.bf16.msra.mxu0 %v9069_v37  ;;  %7363 = vmatpush1.bf16.msra.mxu1 %v9072_v42  ;;  %v2720_v37 = vcombine.high %v11920_v34, %v11920_v34  ;;  %v9161_v42 = vld [vmem:[%s11834_s9 + $0x424] ss:$16 sps:$4 sm:$0xff]  }
 0x1ed   : > { %6831 = vmatprep.subr.bf16.mxu0 %v9077_v43  ;;  %7364 = vmatprep.subr.bf16.mxu1 %v9080_v44  ;;  %v9164_v43 = vld [vmem:[%s11834_s9 + $0x42c] ss:$16 sps:$4 sm:$0xff]   ;;  %v12002_v44 = vrot.slane %v2691_v28, %v11839_v24  ;;  %v9167_v34 = vld [vmem:[%s11834_s9 + $0x444] ss:$16 sps:$4 sm:$0xff]  }
 0x1ee   : > { %v9245_v28 = vld [vmem:[%s11834_s9 + $0x5e4] ss:$16 sps:$4 sm:$0xff]  }
 0x1f0   : > { %6832 = vmatpush1.bf16.msra.mxu0 %v9075_v45  ;;  %7365 = vmatpush1.bf16.msra.mxu1 %v9078_v46  ;;  %v9159_v45 = vld [vmem:[%s11834_s9 + $0x420] ss:$16 sps:$4 sm:$0xff]   ;;  %v9162_v46 = vld [vmem:[%s11834_s9 + $0x428] ss:$16 sps:$4 sm:$0xff]  }
 0x1f1   : > { %6833 = vmatprep.subr.bf16.mxu0 %v9083_v47  ;;  %7366 = vmatprep.subr.bf16.mxu1 %v9086_v48  ;;  %v9170_v47 = vld [vmem:[%s11834_s9 + $0x44c] ss:$16 sps:$4 sm:$0xff]   ;;  %v9165_v48 = vld [vmem:[%s11834_s9 + $0x440] ss:$16 sps:$4 sm:$0xff]  }
 0x1f4   : > { %6834 = vmatpush1.bf16.msra.mxu0 %v9081_v49  ;;  %7367 = vmatpush1.bf16.msra.mxu1 %v9084_v50  ;;  %v9168_v49 = vld [vmem:[%s11834_s9 + $0x448] ss:$16 sps:$4 sm:$0xff]   ;;  %v9173_v50 = vld [vmem:[%s11834_s9 + $0x464] ss:$16 sps:$4 sm:$0xff]  }
 0x1f5   : > { %6835 = vmatprep.subr.bf16.mxu0 %v9089_v51  ;;  %7368 = vmatprep.subr.bf16.mxu1 %v9092_v52  ;;  %v9176_v51 = vld [vmem:[%s11834_s9 + $0x46c] ss:$16 sps:$4 sm:$0xff]   ;;  %v9171_v52 = vld [vmem:[%s11834_s9 + $0x460] ss:$16 sps:$4 sm:$0xff]  }
 0x1f8   : > { %6836 = vmatpush1.bf16.msra.mxu0 %v9087_v53  ;;  %7369 = vmatpush1.bf16.msra.mxu1 %v9090_v54  ;;  %v9174_v53 = vld [vmem:[%s11834_s9 + $0x468] ss:$16 sps:$4 sm:$0xff]   ;;  %v9179_v54 = vld [vmem:[%s11834_s9 + $0x484] ss:$16 sps:$4 sm:$0xff]  }
 0x1f9   : > { %6837 = vmatprep.subr.bf16.mxu0 %v9095_v55  ;;  %7370 = vmatprep.subr.bf16.mxu1 %v9098_v56  ;;  %v9182_v55 = vld [vmem:[%s11834_s9 + $0x48c] ss:$16 sps:$4 sm:$0xff]   ;;  %v9177_v56 = vld [vmem:[%s11834_s9 + $0x480] ss:$16 sps:$4 sm:$0xff]  }
 0x1fc   : > { %6838 = vmatpush1.bf16.msra.mxu0 %v9093_v57  ;;  %7371 = vmatpush1.bf16.msra.mxu1 %v9096_v58  ;;  %v9180_v57 = vld [vmem:[%s11834_s9 + $0x488] ss:$16 sps:$4 sm:$0xff]   ;;  %v9185_v58 = vld [vmem:[%s11834_s9 + $0x4a4] ss:$16 sps:$4 sm:$0xff]  }
 0x1fd   : > { %6839 = vmatprep.subr.bf16.mxu0 %v9101_v59  ;;  %7372 = vmatprep.subr.bf16.mxu1 %v9104_v60  ;;  %v9188_v59 = vld [vmem:[%s11834_s9 + $0x4ac] ss:$16 sps:$4 sm:$0xff]   ;;  %v9183_v60 = vld [vmem:[%s11834_s9 + $0x4a0] ss:$16 sps:$4 sm:$0xff]  }
 0x200   : > { %6840 = vmatpush1.bf16.msra.mxu0 %v9099_v61  ;;  %7373 = vmatpush1.bf16.msra.mxu1 %v9102_v62  ;;  %v9186_v61 = vld [vmem:[%s11834_s9 + $0x4a8] ss:$16 sps:$4 sm:$0xff]   ;;  %v9191_v62 = vld [vmem:[%s11834_s9 + $0x4c4] ss:$16 sps:$4 sm:$0xff]  }
 0x201   : > { %6841 = vmatprep.subr.bf16.mxu0 %v9107_v63  ;;  %7374 = vmatprep.subr.bf16.mxu1 %v9110_v0  ;;  %v9194_v63 = vld [vmem:[%s11834_s9 + $0x4cc] ss:$16 sps:$4 sm:$0xff]   ;;  %v9189_v0 = vld [vmem:[%s11834_s9 + $0x4c0] ss:$16 sps:$4 sm:$0xff]  }
 0x204   : > { %6842 = vmatpush1.bf16.msra.mxu0 %v9105_v1  ;;  %7375 = vmatpush1.bf16.msra.mxu1 %v9108_v2  ;;  %v9192_v1 = vld [vmem:[%s11834_s9 + $0x4c8] ss:$16 sps:$4 sm:$0xff]   ;;  %v9197_v2 = vld [vmem:[%s11834_s9 + $0x4e4] ss:$16 sps:$4 sm:$0xff]  }
 0x205   : > { %6843 = vmatprep.subr.bf16.mxu0 %v9113_v3  ;;  %7376 = vmatprep.subr.bf16.mxu1 %v9116_v4  ;;  %v9200_v3 = vld [vmem:[%s11834_s9 + $0x4ec] ss:$16 sps:$4 sm:$0xff]   ;;  %v9195_v4 = vld [vmem:[%s11834_s9 + $0x4e0] ss:$16 sps:$4 sm:$0xff]  }
 0x208   : > { %6844 = vmatpush1.bf16.msra.mxu0 %v9111_v5  ;;  %7377 = vmatpush1.bf16.msra.mxu1 %v9114_v6  ;;  %v9198_v5 = vld [vmem:[%s11834_s9 + $0x4e8] ss:$16 sps:$4 sm:$0xff]   ;;  %v9203_v6 = vld [vmem:[%s11834_s9 + $0x504] ss:$16 sps:$4 sm:$0xff]  }
 0x209   : > { %6845 = vmatprep.subr.bf16.mxu0 %v9119_v7  ;;  %7378 = vmatprep.subr.bf16.mxu1 %v9122_v8  ;;  %v9206_v7 = vld [vmem:[%s11834_s9 + $0x50c] ss:$16 sps:$4 sm:$0xff]   ;;  %v9201_v8 = vld [vmem:[%s11834_s9 + $0x500] ss:$16 sps:$4 sm:$0xff]  }
 0x20c   : > { %6846 = vmatpush1.bf16.msra.mxu0 %v9117_v9  ;;  %7379 = vmatpush1.bf16.msra.mxu1 %v9120_v10  ;;  %v9204_v9 = vld [vmem:[%s11834_s9 + $0x508] ss:$16 sps:$4 sm:$0xff]   ;;  %v9209_v10 = vld [vmem:[%s11834_s9 + $0x524] ss:$16 sps:$4 sm:$0xff]  }
 0x20d   : > { %6847 = vmatprep.subr.bf16.mxu0 %v9125_v11  ;;  %7380 = vmatprep.subr.bf16.mxu1 %v9128_v12  ;;  %v9212_v11 = vld [vmem:[%s11834_s9 + $0x52c] ss:$16 sps:$4 sm:$0xff]   ;;  %v9207_v12 = vld [vmem:[%s11834_s9 + $0x520] ss:$16 sps:$4 sm:$0xff]  }
 0x210   : > { %6848 = vmatpush1.bf16.msra.mxu0 %v9123_v13  ;;  %7381 = vmatpush1.bf16.msra.mxu1 %v9126_v14  ;;  %v9210_v13 = vld [vmem:[%s11834_s9 + $0x528] ss:$16 sps:$4 sm:$0xff]   ;;  %v9215_v14 = vld [vmem:[%s11834_s9 + $0x544] ss:$16 sps:$4 sm:$0xff]  }
 0x211   : > { %6849 = vmatprep.subr.bf16.mxu0 %v9131_v15  ;;  %7382 = vmatprep.subr.bf16.mxu1 %v9134_v16  ;;  %v9218_v15 = vld [vmem:[%s11834_s9 + $0x54c] ss:$16 sps:$4 sm:$0xff]   ;;  %v9213_v16 = vld [vmem:[%s11834_s9 + $0x540] ss:$16 sps:$4 sm:$0xff]  }
 0x214   : > { %6850 = vmatpush1.bf16.msra.mxu0 %v9129_v17  ;;  %7383 = vmatpush1.bf16.msra.mxu1 %v9132_v18  ;;  %v9216_v17 = vld [vmem:[%s11834_s9 + $0x548] ss:$16 sps:$4 sm:$0xff]   ;;  %v9221_v18 = vld [vmem:[%s11834_s9 + $0x564] ss:$16 sps:$4 sm:$0xff]  }
 0x215   : > { %6851 = vmatprep.subr.bf16.mxu0 %v9137_v21  ;;  %7384 = vmatprep.subr.bf16.mxu1 %v9140_v22  ;;  %v9224_v21 = vld [vmem:[%s11834_s9 + $0x56c] ss:$16 sps:$4 sm:$0xff]   ;;  %v9219_v22 = vld [vmem:[%s11834_s9 + $0x560] ss:$16 sps:$4 sm:$0xff]  }
 0x218   : > { %6852 = vmatpush1.bf16.msra.mxu0 %v9135_v23  ;;  %7385 = vmatpush1.bf16.msra.mxu1 %v9138_v25  ;;  %v9222_v23 = vld [vmem:[%s11834_s9 + $0x568] ss:$16 sps:$4 sm:$0xff]   ;;  %v9227_v25 = vld [vmem:[%s11834_s9 + $0x584] ss:$16 sps:$4 sm:$0xff]  }
 0x219   : > { %6853 = vmatprep.subr.bf16.mxu0 %v9143_v26  ;;  %7386 = vmatprep.subr.bf16.mxu1 %v9146_v27  ;;  %v9230_v26 = vld [vmem:[%s11834_s9 + $0x58c] ss:$16 sps:$4 sm:$0xff]   ;;  %v9225_v27 = vld [vmem:[%s11834_s9 + $0x580] ss:$16 sps:$4 sm:$0xff]  }
 0x21c   : > { %6854 = vmatpush1.bf16.msra.mxu0 %v9141_v30  ;;  %7387 = vmatpush1.bf16.msra.mxu1 %v9144_v31  ;;  %v9233_v30 = vld [vmem:[%s11834_s9 + $0x5a4] ss:$16 sps:$4 sm:$0xff]   ;;  %v9236_v31 = vld [vmem:[%s11834_s9 + $0x5ac] ss:$16 sps:$4 sm:$0xff]  }
 0x21d   : > { %6855 = vmatprep.subr.bf16.mxu0 %v9149_v32  ;;  %7388 = vmatprep.subr.bf16.mxu1 %v9152_v33  ;;  %v9231_v32 = vld [vmem:[%s11834_s9 + $0x5a0] ss:$16 sps:$4 sm:$0xff]   ;;  %v9234_v33 = vld [vmem:[%s11834_s9 + $0x5a8] ss:$16 sps:$4 sm:$0xff]  }
 0x220   : > { %6856 = vmatpush1.bf16.msra.mxu0 %v9147_v36  ;;  %7389 = vmatpush1.bf16.msra.mxu1 %v9150_v38  ;;  %v9239_v36 = vld [vmem:[%s11834_s9 + $0x5c4] ss:$16 sps:$4 sm:$0xff]   ;;  %v9242_v38 = vld [vmem:[%s11834_s9 + $0x5cc] ss:$16 sps:$4 sm:$0xff]  }
 0x221   : > { %6866 = vmatprep.subr.bf16.mxu0 %v9155_v20  ;;  %7399 = vmatprep.subr.bf16.mxu1 %v9158_v39  ;;  %v9237_v20 = vld [vmem:[%s11834_s9 + $0x5c0] ss:$16 sps:$4 sm:$0xff]   ;;  %v9240_v39 = vld [vmem:[%s11834_s9 + $0x5c8] ss:$16 sps:$4 sm:$0xff]  }
 0x223   : > { %6858 = vmatmul.mubr.bf16.vlgmr.msra.gmra.mrb[0].mxu0 %v2720_v37  ;;  %7391 = vmatmul.mubr.bf16.vlgmr.msra.gmra.mrb[0].mxu1 %v2720_v37  ;;  %v9246_v37 = vld [vmem:[%s11834_s9 + $0x5e8] ss:$16 sps:$4 sm:$0xff]  }
 0x224   : > { %6867 = vmatpush1.bf16.msra.mxu0 %v9153_v40  ;;  %7400 = vmatpush1.bf16.msra.mxu1 %v9156_v41  ;;  %v9248_v40 = vld [vmem:[%s11834_s9 + $0x5ec] ss:$16 sps:$4 sm:$0xff]   ;;  %v9243_v41 = vld [vmem:[%s11834_s9 + $0x5e0] ss:$16 sps:$4 sm:$0xff]  }
 0x225   : > { %6868 = vmatprep.subr.bf16.mxu0 %v9161_v42  ;;  %7401 = vmatprep.subr.bf16.mxu1 %v9164_v43  ;;  %v9252_v42 = vld [vmem:[%s11834_s9 + $0x604] ss:$16 sps:$4 sm:$0xff]   ;;  %v9255_v43 = vld [vmem:[%s11834_s9 + $0x60c] ss:$16 sps:$4 sm:$0xff]  }
 0x226   : > { %6898 = vmatprep.mubr.bf16.mxu0 %v12002_v44  ;;  %7431 = vmatprep.mubr.bf16.mxu1 %v12002_v44 }
 0x228   : > { %6869 = vmatpush1.bf16.msra.mxu0 %v9159_v45  ;;  %7402 = vmatpush1.bf16.msra.mxu1 %v9162_v46  ;;  %v9250_v45 = vld [vmem:[%s11834_s9 + $0x600] ss:$16 sps:$4 sm:$0xff]   ;;  %v9253_v46 = vld [vmem:[%s11834_s9 + $0x608] ss:$16 sps:$4 sm:$0xff]  }
 0x229   : > { %6870 = vmatprep.subr.bf16.mxu0 %v9167_v34  ;;  %7403 = vmatprep.subr.bf16.mxu1 %v9170_v47  ;;  %v12070_v34 = vrot.slane %v11987_v35, %v11839_v24  ;;  %v9258_v47 = vld [vmem:[%s11834_s9 + $0x624] ss:$16 sps:$4 sm:$0xff]   ;;  %v9259_v35 = vld [vmem:[%s11834_s9 + $0x628] ss:$16 sps:$4 sm:$0xff]  }
 0x22c   : > { %6871 = vmatpush1.bf16.msra.mxu0 %v9165_v48  ;;  %7404 = vmatpush1.bf16.msra.mxu1 %v9168_v49  ;;  %v9261_v48 = vld [vmem:[%s11834_s9 + $0x62c] ss:$16 sps:$4 sm:$0xff]   ;;  %v2723_v49 = vcombine.high %v12002_v44, %v12002_v44  ;;  %v9262_v44 = vld [vmem:[%s11834_s9 + $0x640] ss:$16 sps:$4 sm:$0xff]  }
 0x22d   : > { %6872 = vmatprep.subr.bf16.mxu0 %v9173_v50  ;;  %7405 = vmatprep.subr.bf16.mxu1 %v9176_v51  ;;  %v9256_v50 = vld [vmem:[%s11834_s9 + $0x620] ss:$16 sps:$4 sm:$0xff]   ;;  %v9264_v51 = vld [vmem:[%s11834_s9 + $0x644] ss:$16 sps:$4 sm:$0xff]  }
 0x230   : > { %6873 = vmatpush1.bf16.msra.mxu0 %v9171_v52  ;;  %7406 = vmatpush1.bf16.msra.mxu1 %v9174_v53  ;;  %v9267_v52 = vld [vmem:[%s11834_s9 + $0x64c] ss:$16 sps:$4 sm:$0xff]   ;;  %v9265_v53 = vld [vmem:[%s11834_s9 + $0x648] ss:$16 sps:$4 sm:$0xff]  }
 0x231   : > { %6874 = vmatprep.subr.bf16.mxu0 %v9179_v54  ;;  %7407 = vmatprep.subr.bf16.mxu1 %v9182_v55  ;;  %v9270_v54 = vld [vmem:[%s11834_s9 + $0x664] ss:$16 sps:$4 sm:$0xff]   ;;  %v9273_v55 = vld [vmem:[%s11834_s9 + $0x66c] ss:$16 sps:$4 sm:$0xff]  }
 0x234   : > { %6875 = vmatpush1.bf16.msra.mxu0 %v9177_v56  ;;  %7408 = vmatpush1.bf16.msra.mxu1 %v9180_v57  ;;  %v9268_v56 = vld [vmem:[%s11834_s9 + $0x660] ss:$16 sps:$4 sm:$0xff]   ;;  %v9271_v57 = vld [vmem:[%s11834_s9 + $0x668] ss:$16 sps:$4 sm:$0xff]  }
 0x235   : > { %6876 = vmatprep.subr.bf16.mxu0 %v9185_v58  ;;  %7409 = vmatprep.subr.bf16.mxu1 %v9188_v59  ;;  %v9276_v58 = vld [vmem:[%s11834_s9 + $0x684] ss:$16 sps:$4 sm:$0xff]   ;;  %v9279_v59 = vld [vmem:[%s11834_s9 + $0x68c] ss:$16 sps:$4 sm:$0xff]  }
 0x238   : > { %6877 = vmatpush1.bf16.msra.mxu0 %v9183_v60  ;;  %7410 = vmatpush1.bf16.msra.mxu1 %v9186_v61  ;;  %v9274_v60 = vld [vmem:[%s11834_s9 + $0x680] ss:$16 sps:$4 sm:$0xff]   ;;  %v9277_v61 = vld [vmem:[%s11834_s9 + $0x688] ss:$16 sps:$4 sm:$0xff]  }
 0x239   : > { %6878 = vmatprep.subr.bf16.mxu0 %v9191_v62  ;;  %7411 = vmatprep.subr.bf16.mxu1 %v9194_v63  ;;  %v9282_v62 = vld [vmem:[%s11834_s9 + $0x6a4] ss:$16 sps:$4 sm:$0xff]   ;;  %v9285_v63 = vld [vmem:[%s11834_s9 + $0x6ac] ss:$16 sps:$4 sm:$0xff]  }
 0x23c   : > { %6879 = vmatpush1.bf16.msra.mxu0 %v9189_v0  ;;  %7412 = vmatpush1.bf16.msra.mxu1 %v9192_v1  ;;  %v9280_v0 = vld [vmem:[%s11834_s9 + $0x6a0] ss:$16 sps:$4 sm:$0xff]   ;;  %v9283_v1 = vld [vmem:[%s11834_s9 + $0x6a8] ss:$16 sps:$4 sm:$0xff]  }
 0x23d   : > { %6880 = vmatprep.subr.bf16.mxu0 %v9197_v2  ;;  %7413 = vmatprep.subr.bf16.mxu1 %v9200_v3  ;;  %v9288_v2 = vld [vmem:[%s11834_s9 + $0x6c4] ss:$16 sps:$4 sm:$0xff]   ;;  %v9291_v3 = vld [vmem:[%s11834_s9 + $0x6cc] ss:$16 sps:$4 sm:$0xff]  }
 0x240   : > { %6881 = vmatpush1.bf16.msra.mxu0 %v9195_v4  ;;  %7414 = vmatpush1.bf16.msra.mxu1 %v9198_v5  ;;  %v9286_v4 = vld [vmem:[%s11834_s9 + $0x6c0] ss:$16 sps:$4 sm:$0xff]   ;;  %v9289_v5 = vld [vmem:[%s11834_s9 + $0x6c8] ss:$16 sps:$4 sm:$0xff]  }
 0x241   : > { %6882 = vmatprep.subr.bf16.mxu0 %v9203_v6  ;;  %7415 = vmatprep.subr.bf16.mxu1 %v9206_v7  ;;  %v9294_v6 = vld [vmem:[%s11834_s9 + $0x6e4] ss:$16 sps:$4 sm:$0xff]   ;;  %v9297_v7 = vld [vmem:[%s11834_s9 + $0x6ec] ss:$16 sps:$4 sm:$0xff]  }
 0x244   : > { %6883 = vmatpush1.bf16.msra.mxu0 %v9201_v8  ;;  %7416 = vmatpush1.bf16.msra.mxu1 %v9204_v9  ;;  %v9292_v8 = vld [vmem:[%s11834_s9 + $0x6e0] ss:$16 sps:$4 sm:$0xff]   ;;  %v9295_v9 = vld [vmem:[%s11834_s9 + $0x6e8] ss:$16 sps:$4 sm:$0xff]  }
 0x245   : > { %6884 = vmatprep.subr.bf16.mxu0 %v9209_v10  ;;  %7417 = vmatprep.subr.bf16.mxu1 %v9212_v11  ;;  %v9300_v10 = vld [vmem:[%s11834_s9 + $0x704] ss:$16 sps:$4 sm:$0xff]   ;;  %v9303_v11 = vld [vmem:[%s11834_s9 + $0x70c] ss:$16 sps:$4 sm:$0xff]  }
 0x248   : > { %6885 = vmatpush1.bf16.msra.mxu0 %v9207_v12  ;;  %7418 = vmatpush1.bf16.msra.mxu1 %v9210_v13  ;;  %v9298_v12 = vld [vmem:[%s11834_s9 + $0x700] ss:$16 sps:$4 sm:$0xff]   ;;  %v9301_v13 = vld [vmem:[%s11834_s9 + $0x708] ss:$16 sps:$4 sm:$0xff]  }
 0x249   : > { %6886 = vmatprep.subr.bf16.mxu0 %v9215_v14  ;;  %7419 = vmatprep.subr.bf16.mxu1 %v9218_v15  ;;  %v9306_v14 = vld [vmem:[%s11834_s9 + $0x724] ss:$16 sps:$4 sm:$0xff]   ;;  %v9309_v15 = vld [vmem:[%s11834_s9 + $0x72c] ss:$16 sps:$4 sm:$0xff]  }
 0x24c   : > { %6887 = vmatpush1.bf16.msra.mxu0 %v9213_v16  ;;  %7420 = vmatpush1.bf16.msra.mxu1 %v9216_v17  ;;  %v9304_v16 = vld [vmem:[%s11834_s9 + $0x720] ss:$16 sps:$4 sm:$0xff]   ;;  %v9307_v17 = vld [vmem:[%s11834_s9 + $0x728] ss:$16 sps:$4 sm:$0xff]  }
 0x24d   : > { %6888 = vmatprep.subr.bf16.mxu0 %v9221_v18  ;;  %7421 = vmatprep.subr.bf16.mxu1 %v9224_v21  ;;  %v9312_v18 = vld [vmem:[%s11834_s9 + $0x744] ss:$16 sps:$4 sm:$0xff]   ;;  %v9315_v21 = vld [vmem:[%s11834_s9 + $0x74c] ss:$16 sps:$4 sm:$0xff]  }
 0x250   : > { %6889 = vmatpush1.bf16.msra.mxu0 %v9219_v22  ;;  %7422 = vmatpush1.bf16.msra.mxu1 %v9222_v23  ;;  %v9310_v22 = vld [vmem:[%s11834_s9 + $0x740] ss:$16 sps:$4 sm:$0xff]   ;;  %v9313_v23 = vld [vmem:[%s11834_s9 + $0x748] ss:$16 sps:$4 sm:$0xff]  }
 0x251   : > { %6890 = vmatprep.subr.bf16.mxu0 %v9227_v25  ;;  %7423 = vmatprep.subr.bf16.mxu1 %v9230_v26  ;;  %v9318_v25 = vld [vmem:[%s11834_s9 + $0x764] ss:$16 sps:$4 sm:$0xff]   ;;  %v9321_v26 = vld [vmem:[%s11834_s9 + $0x76c] ss:$16 sps:$4 sm:$0xff]  }
 0x254   : > { %6891 = vmatpush1.bf16.msra.mxu0 %v9225_v27  ;;  %7424 = vmatpush1.bf16.msra.mxu1 %v9228_v29  ;;  %v9316_v27 = vld [vmem:[%s11834_s9 + $0x760] ss:$16 sps:$4 sm:$0xff]   ;;  %v9319_v29 = vld [vmem:[%s11834_s9 + $0x768] ss:$16 sps:$4 sm:$0xff]  }
 0x255   : > { %6892 = vmatprep.subr.bf16.mxu0 %v9233_v30  ;;  %7425 = vmatprep.subr.bf16.mxu1 %v9236_v31  ;;  %v9324_v30 = vld [vmem:[%s11834_s9 + $0x784] ss:$16 sps:$4 sm:$0xff]   ;;  %v9327_v31 = vld [vmem:[%s11834_s9 + $0x78c] ss:$16 sps:$4 sm:$0xff]  }
 0x258   : > { %6893 = vmatpush1.bf16.msra.mxu0 %v9231_v32  ;;  %7426 = vmatpush1.bf16.msra.mxu1 %v9234_v33  ;;  %v9322_v32 = vld [vmem:[%s11834_s9 + $0x780] ss:$16 sps:$4 sm:$0xff]   ;;  %v9325_v33 = vld [vmem:[%s11834_s9 + $0x788] ss:$16 sps:$4 sm:$0xff]  }
 0x259   : > { %6894 = vmatprep.subr.bf16.mxu0 %v9239_v36  ;;  %7427 = vmatprep.subr.bf16.mxu1 %v9242_v38  ;;  %v9330_v36 = vld [vmem:[%s11834_s9 + $0x7a4] ss:$16 sps:$4 sm:$0xff]   ;;  %v9333_v38 = vld [vmem:[%s11834_s9 + $0x7ac] ss:$16 sps:$4 sm:$0xff]  }
 0x25c   : > { %6895 = vmatpush1.bf16.msra.mxu0 %v9237_v20  ;;  %7428 = vmatpush1.bf16.msra.mxu1 %v9240_v39  ;;  %v9328_v20 = vld [vmem:[%s11834_s9 + $0x7a0] ss:$16 sps:$4 sm:$0xff]   ;;  %v9331_v39 = vld [vmem:[%s11834_s9 + $0x7a8] ss:$16 sps:$4 sm:$0xff]  }
 0x25d   : > { %6896 = vmatprep.subr.bf16.mxu0 %v9245_v28  ;;  %7429 = vmatprep.subr.bf16.mxu1 %v9248_v40  ;;  %v9336_v28 = vld [vmem:[%s11834_s9 + $0x7c4] ss:$16 sps:$4 sm:$0xff]   ;;  %v9339_v40 = vld [vmem:[%s11834_s9 + $0x7cc] ss:$16 sps:$4 sm:$0xff]  }
 0x260   : > { %6897 = vmatpush1.bf16.msra.mxu0 %v9243_v41  ;;  %7430 = vmatpush1.bf16.msra.mxu1 %v9246_v37  ;;  %v9334_v41 = vld [vmem:[%s11834_s9 + $0x7c0] ss:$16 sps:$4 sm:$0xff]   ;;  %v12134_v37 = vld.sshfl [vmem:[%s12794_s0 + $0x8] sm:$0xff pattern:$0x75316420] }
 0x261   : > { %6907 = vmatprep.subr.bf16.mxu0 %v9252_v42  ;;  %7440 = vmatprep.subr.bf16.mxu1 %v9255_v43  ;;  %v9337_v42 = vld [vmem:[%s11834_s9 + $0x7c8] ss:$16 sps:$4 sm:$0xff]   ;;  %v9342_v43 = vld [vmem:[%s11834_s9 + $0x7e4] ss:$16 sps:$4 sm:$0xff]  }
 0x263   : > { %6899 = vmatmul.mubr.bf16.vlgmr.msra.gmra.mrb[0].mxu0 %v12070_v34  ;;  %7432 = vmatmul.mubr.bf16.vlgmr.msra.gmra.mrb[0].mxu1 %v12070_v34 }
 0x264   : > { %6908 = vmatpush1.bf16.msra.mxu0 %v9250_v45  ;;  %7441 = vmatpush1.bf16.msra.mxu1 %v9253_v46  ;;  %v9345_v45 = vld [vmem:[%s11834_s9 + $0x7ec] ss:$16 sps:$4 sm:$0xff]   ;;  %v9340_v46 = vld [vmem:[%s11834_s9 + $0x7e0] ss:$16 sps:$4 sm:$0xff]  }
 0x265   : > { %6909 = vmatprep.subr.bf16.mxu0 %v9258_v47  ;;  %7442 = vmatprep.subr.bf16.mxu1 %v9261_v48  ;;  %v9343_v47 = vld [vmem:[%s11834_s9 + $0x7e8] ss:$16 sps:$4 sm:$0xff]   ;;  %v9348_v48 = vld [vmem:[%s11834_s9 + $0x804] ss:$16 sps:$4 sm:$0xff]  }
 0x266   : > { %6939 = vmatprep.mubr.bf16.mxu0 %v2723_v49  ;;  %7472 = vmatprep.mubr.bf16.mxu1 %v2723_v49  ;;  %v9351_v49 = vld [vmem:[%s11834_s9 + $0x80c] ss:$16 sps:$4 sm:$0xff]  }
 0x268   : > { %6910 = vmatpush1.bf16.msra.mxu0 %v9256_v50  ;;  %7443 = vmatpush1.bf16.msra.mxu1 %v9259_v35  ;;  %v2739_v50 = vcombine.high %v12134_v37, %v12134_v37  ;;  %v9346_v35 = vld [vmem:[%s11834_s9 + $0x800] ss:$16 sps:$4 sm:$0xff]  }
 0x269   : > { %6911 = vmatprep.subr.bf16.mxu0 %v9264_v51  ;;  %7444 = vmatprep.subr.bf16.mxu1 %v9267_v52  ;;  %v2721_v51 = vcombine.high %v12070_v34, %v12070_v34  ;;  %v9349_v52 = vld [vmem:[%s11834_s9 + $0x808] ss:$16 sps:$4 sm:$0xff]   ;;  %v9352_v34 = vld [vmem:[%s11834_s9 + $0x820] ss:$16 sps:$4 sm:$0xff]  }
 0x26c   : > { %6912 = vmatpush1.bf16.msra.mxu0 %v9262_v44  ;;  %7445 = vmatpush1.bf16.msra.mxu1 %v9265_v53  ;;  %v9354_v44 = vld [vmem:[%s11834_s9 + $0x824] ss:$16 sps:$4 sm:$0xff]   ;;  %v9357_v53 = vld [vmem:[%s11834_s9 + $0x82c] ss:$16 sps:$4 sm:$0xff]  }
 0x26d   : > { %6913 = vmatprep.subr.bf16.mxu0 %v9270_v54  ;;  %7446 = vmatprep.subr.bf16.mxu1 %v9273_v55  ;;  %v12152_v54 = vrot.slane %v2739_v50, %v11839_v24  ;;  %v9355_v55 = vld [vmem:[%s11834_s9 + $0x828] ss:$16 sps:$4 sm:$0xff]   ;;  %v9438_v50 = vld [vmem:[%s11834_s9 + $0x9e4] ss:$16 sps:$4 sm:$0xff]  }
 0x270   : > { %6914 = vmatpush1.bf16.msra.mxu0 %v9268_v56  ;;  %7447 = vmatpush1.bf16.msra.mxu1 %v9271_v57  ;;  %v9360_v56 = vld [vmem:[%s11834_s9 + $0x844] ss:$16 sps:$4 sm:$0xff]   ;;  %v9363_v57 = vld [vmem:[%s11834_s9 + $0x84c] ss:$16 sps:$4 sm:$0xff]  }
 0x271   : > { %6915 = vmatprep.subr.bf16.mxu0 %v9276_v58  ;;  %7448 = vmatprep.subr.bf16.mxu1 %v9279_v59  ;;  %v9358_v58 = vld [vmem:[%s11834_s9 + $0x840] ss:$16 sps:$4 sm:$0xff]   ;;  %v9361_v59 = vld [vmem:[%s11834_s9 + $0x848] ss:$16 sps:$4 sm:$0xff]  }
 0x274   : > { %6916 = vmatpush1.bf16.msra.mxu0 %v9274_v60  ;;  %7449 = vmatpush1.bf16.msra.mxu1 %v9277_v61  ;;  %v9366_v60 = vld [vmem:[%s11834_s9 + $0x864] ss:$16 sps:$4 sm:$0xff]   ;;  %v9369_v61 = vld [vmem:[%s11834_s9 + $0x86c] ss:$16 sps:$4 sm:$0xff]  }
 0x275   : > { %6917 = vmatprep.subr.bf16.mxu0 %v9282_v62  ;;  %7450 = vmatprep.subr.bf16.mxu1 %v9285_v63  ;;  %v9364_v62 = vld [vmem:[%s11834_s9 + $0x860] ss:$16 sps:$4 sm:$0xff]   ;;  %v9367_v63 = vld [vmem:[%s11834_s9 + $0x868] ss:$16 sps:$4 sm:$0xff]  }
 0x278   : > { %6918 = vmatpush1.bf16.msra.mxu0 %v9280_v0  ;;  %7451 = vmatpush1.bf16.msra.mxu1 %v9283_v1  ;;  %v9372_v0 = vld [vmem:[%s11834_s9 + $0x884] ss:$16 sps:$4 sm:$0xff]   ;;  %v9375_v1 = vld [vmem:[%s11834_s9 + $0x88c] ss:$16 sps:$4 sm:$0xff]  }
 0x279   : > { %6919 = vmatprep.subr.bf16.mxu0 %v9288_v2  ;;  %7452 = vmatprep.subr.bf16.mxu1 %v9291_v3  ;;  %v9370_v2 = vld [vmem:[%s11834_s9 + $0x880] ss:$16 sps:$4 sm:$0xff]   ;;  %v9373_v3 = vld [vmem:[%s11834_s9 + $0x888] ss:$16 sps:$4 sm:$0xff]  }
 0x27c   : > { %6920 = vmatpush1.bf16.msra.mxu0 %v9286_v4  ;;  %7453 = vmatpush1.bf16.msra.mxu1 %v9289_v5  ;;  %v9378_v4 = vld [vmem:[%s11834_s9 + $0x8a4] ss:$16 sps:$4 sm:$0xff]   ;;  %v9381_v5 = vld [vmem:[%s11834_s9 + $0x8ac] ss:$16 sps:$4 sm:$0xff]  }
 0x27d   : > { %6921 = vmatprep.subr.bf16.mxu0 %v9294_v6  ;;  %7454 = vmatprep.subr.bf16.mxu1 %v9297_v7  ;;  %v9376_v6 = vld [vmem:[%s11834_s9 + $0x8a0] ss:$16 sps:$4 sm:$0xff]   ;;  %v9379_v7 = vld [vmem:[%s11834_s9 + $0x8a8] ss:$16 sps:$4 sm:$0xff]  }
 0x280   : > { %6922 = vmatpush1.bf16.msra.mxu0 %v9292_v8  ;;  %7455 = vmatpush1.bf16.msra.mxu1 %v9295_v9  ;;  %v9384_v8 = vld [vmem:[%s11834_s9 + $0x8c4] ss:$16 sps:$4 sm:$0xff]   ;;  %v9387_v9 = vld [vmem:[%s11834_s9 + $0x8cc] ss:$16 sps:$4 sm:$0xff]  }
 0x281   : > { %6923 = vmatprep.subr.bf16.mxu0 %v9300_v10  ;;  %7456 = vmatprep.subr.bf16.mxu1 %v9303_v11  ;;  %v9382_v10 = vld [vmem:[%s11834_s9 + $0x8c0] ss:$16 sps:$4 sm:$0xff]   ;;  %v9385_v11 = vld [vmem:[%s11834_s9 + $0x8c8] ss:$16 sps:$4 sm:$0xff]  }
 0x284   : > { %6924 = vmatpush1.bf16.msra.mxu0 %v9298_v12  ;;  %7457 = vmatpush1.bf16.msra.mxu1 %v9301_v13  ;;  %v9390_v12 = vld [vmem:[%s11834_s9 + $0x8e4] ss:$16 sps:$4 sm:$0xff]   ;;  %v9393_v13 = vld [vmem:[%s11834_s9 + $0x8ec] ss:$16 sps:$4 sm:$0xff]  }
 0x285   : > { %6925 = vmatprep.subr.bf16.mxu0 %v9306_v14  ;;  %7458 = vmatprep.subr.bf16.mxu1 %v9309_v15  ;;  %v9388_v14 = vld [vmem:[%s11834_s9 + $0x8e0] ss:$16 sps:$4 sm:$0xff]   ;;  %v9391_v15 = vld [vmem:[%s11834_s9 + $0x8e8] ss:$16 sps:$4 sm:$0xff]  }
 0x288   : > { %6926 = vmatpush1.bf16.msra.mxu0 %v9304_v16  ;;  %7459 = vmatpush1.bf16.msra.mxu1 %v9307_v17  ;;  %v9396_v16 = vld [vmem:[%s11834_s9 + $0x904] ss:$16 sps:$4 sm:$0xff]   ;;  %v9399_v17 = vld [vmem:[%s11834_s9 + $0x90c] ss:$16 sps:$4 sm:$0xff]  }
 0x289   : > { %6927 = vmatprep.subr.bf16.mxu0 %v9312_v18  ;;  %7460 = vmatprep.subr.bf16.mxu1 %v9315_v21  ;;  %v9394_v18 = vld [vmem:[%s11834_s9 + $0x900] ss:$16 sps:$4 sm:$0xff]   ;;  %v9397_v21 = vld [vmem:[%s11834_s9 + $0x908] ss:$16 sps:$4 sm:$0xff]  }
 0x28c   : > { %6928 = vmatpush1.bf16.msra.mxu0 %v9310_v22  ;;  %7461 = vmatpush1.bf16.msra.mxu1 %v9313_v23  ;;  %v9402_v22 = vld [vmem:[%s11834_s9 + $0x924] ss:$16 sps:$4 sm:$0xff]   ;;  %v9405_v23 = vld [vmem:[%s11834_s9 + $0x92c] ss:$16 sps:$4 sm:$0xff]  }
 0x28d   : > { %6929 = vmatprep.subr.bf16.mxu0 %v9318_v25  ;;  %7462 = vmatprep.subr.bf16.mxu1 %v9321_v26  ;;  %v9400_v25 = vld [vmem:[%s11834_s9 + $0x920] ss:$16 sps:$4 sm:$0xff]   ;;  %v9403_v26 = vld [vmem:[%s11834_s9 + $0x928] ss:$16 sps:$4 sm:$0xff]  }
 0x290   : > { %6930 = vmatpush1.bf16.msra.mxu0 %v9316_v27  ;;  %7463 = vmatpush1.bf16.msra.mxu1 %v9319_v29  ;;  %v9408_v27 = vld [vmem:[%s11834_s9 + $0x944] ss:$16 sps:$4 sm:$0xff]   ;;  %v9411_v29 = vld [vmem:[%s11834_s9 + $0x94c] ss:$16 sps:$4 sm:$0xff]  }
 0x291   : > { %6931 = vmatprep.subr.bf16.mxu0 %v9324_v30  ;;  %7464 = vmatprep.subr.bf16.mxu1 %v9327_v31  ;;  %v9406_v30 = vld [vmem:[%s11834_s9 + $0x940] ss:$16 sps:$4 sm:$0xff]   ;;  %v9409_v31 = vld [vmem:[%s11834_s9 + $0x948] ss:$16 sps:$4 sm:$0xff]  }
 0x294   : > { %6932 = vmatpush1.bf16.msra.mxu0 %v9322_v32  ;;  %7465 = vmatpush1.bf16.msra.mxu1 %v9325_v33  ;;  %v9414_v32 = vld [vmem:[%s11834_s9 + $0x964] ss:$16 sps:$4 sm:$0xff]   ;;  %v9417_v33 = vld [vmem:[%s11834_s9 + $0x96c] ss:$16 sps:$4 sm:$0xff]  }
 0x295   : > { %6933 = vmatprep.subr.bf16.mxu0 %v9330_v36  ;;  %7466 = vmatprep.subr.bf16.mxu1 %v9333_v38  ;;  %v9412_v36 = vld [vmem:[%s11834_s9 + $0x960] ss:$16 sps:$4 sm:$0xff]   ;;  %v9415_v38 = vld [vmem:[%s11834_s9 + $0x968] ss:$16 sps:$4 sm:$0xff]  }
 0x298   : > { %6934 = vmatpush1.bf16.msra.mxu0 %v9328_v20  ;;  %7467 = vmatpush1.bf16.msra.mxu1 %v9331_v39  ;;  %v9420_v20 = vld [vmem:[%s11834_s9 + $0x984] ss:$16 sps:$4 sm:$0xff]   ;;  %v9423_v39 = vld [vmem:[%s11834_s9 + $0x98c] ss:$16 sps:$4 sm:$0xff]  }
 0x299   : > { %6935 = vmatprep.subr.bf16.mxu0 %v9336_v28  ;;  %7468 = vmatprep.subr.bf16.mxu1 %v9339_v40  ;;  %v9418_v28 = vld [vmem:[%s11834_s9 + $0x980] ss:$16 sps:$4 sm:$0xff]   ;;  %v9421_v40 = vld [vmem:[%s11834_s9 + $0x988] ss:$16 sps:$4 sm:$0xff]  }
 0x29c   : > { %6936 = vmatpush1.bf16.msra.mxu0 %v9334_v41  ;;  %7469 = vmatpush1.bf16.msra.mxu1 %v9337_v42  ;;  %v9426_v41 = vld [vmem:[%s11834_s9 + $0x9a4] ss:$16 sps:$4 sm:$0xff]   ;;  %v9429_v42 = vld [vmem:[%s11834_s9 + $0x9ac] ss:$16 sps:$4 sm:$0xff]  }
 0x29d   : > { %6937 = vmatprep.subr.bf16.mxu0 %v9342_v43  ;;  %7470 = vmatprep.subr.bf16.mxu1 %v9345_v45  ;;  %v9424_v43 = vld [vmem:[%s11834_s9 + $0x9a0] ss:$16 sps:$4 sm:$0xff]   ;;  %v9427_v45 = vld [vmem:[%s11834_s9 + $0x9a8] ss:$16 sps:$4 sm:$0xff]  }
 0x2a0   : > { %6938 = vmatpush1.bf16.msra.mxu0 %v9340_v46  ;;  %7471 = vmatpush1.bf16.msra.mxu1 %v9343_v47  ;;  %v9432_v46 = vld [vmem:[%s11834_s9 + $0x9c4] ss:$16 sps:$4 sm:$0xff]   ;;  %v9435_v47 = vld [vmem:[%s11834_s9 + $0x9cc] ss:$16 sps:$4 sm:$0xff]  }
 0x2a1   : > { %6948 = vmatprep.subr.bf16.mxu0 %v9348_v48  ;;  %7481 = vmatprep.subr.bf16.mxu1 %v9351_v49  ;;  %v9430_v48 = vld [vmem:[%s11834_s9 + $0x9c0] ss:$16 sps:$4 sm:$0xff]   ;;  %v9433_v49 = vld [vmem:[%s11834_s9 + $0x9c8] ss:$16 sps:$4 sm:$0xff]  }
 0x2a3   : > { %6940 = vmatmul.mubr.bf16.vlgmr.msra.gmra.mrb[0].mxu0 %v2721_v51  ;;  %7473 = vmatmul.mubr.bf16.vlgmr.msra.gmra.mrb[0].mxu1 %v2721_v51  ;;  %v9436_v51 = vld [vmem:[%s11834_s9 + $0x9e0] ss:$16 sps:$4 sm:$0xff]  }
 0x2a4   : > { %6949 = vmatpush1.bf16.msra.mxu0 %v9346_v35  ;;  %7482 = vmatpush1.bf16.msra.mxu1 %v9349_v52  ;;  %v9441_v35 = vld [vmem:[%s11834_s9 + $0x9ec] ss:$16 sps:$4 sm:$0xff]   ;;  %v9439_v52 = vld [vmem:[%s11834_s9 + $0x9e8] ss:$16 sps:$4 sm:$0xff]  }
 0x2a5   : > { %6950 = vmatprep.subr.bf16.mxu0 %v9354_v44  ;;  %7483 = vmatprep.subr.bf16.mxu1 %v9357_v53  ;;  %v9444_v44 = vld [vmem:[%s11834_s9 + $0xa04] ss:$16 sps:$4 sm:$0xff]   ;;  %v9447_v53 = vld [vmem:[%s11834_s9 + $0xa0c] ss:$16 sps:$4 sm:$0xff]  }
 0x2a6   : > { %6980 = vmatprep.mubr.bf16.mxu0 %v12152_v54  ;;  %7513 = vmatprep.mubr.bf16.mxu1 %v12152_v54 }
 0x2a8   : > { %6951 = vmatpush1.bf16.msra.mxu0 %v9352_v34  ;;  %7484 = vmatpush1.bf16.msra.mxu1 %v9355_v55  ;;  %v12218_v34 = vrot.slane %v12134_v37, %v11839_v24  ;;  %v9442_v55 = vld [vmem:[%s11834_s9 + $0xa00] ss:$16 sps:$4 sm:$0xff]  }
 0x2a9   : > { %6952 = vmatprep.subr.bf16.mxu0 %v9360_v56  ;;  %7485 = vmatprep.subr.bf16.mxu1 %v9363_v57  ;;  %v9445_v56 = vld [vmem:[%s11834_s9 + $0xa08] ss:$16 sps:$4 sm:$0xff]   ;;  %v9450_v57 = vld [vmem:[%s11834_s9 + $0xa24] ss:$16 sps:$4 sm:$0xff]   ;;  %v9448_v37 = vld [vmem:[%s11834_s9 + $0xa20] ss:$16 sps:$4 sm:$0xff]  }
 0x2ac   : > { %6953 = vmatpush1.bf16.msra.mxu0 %v9358_v58  ;;  %7486 = vmatpush1.bf16.msra.mxu1 %v9361_v59  ;;  %v9453_v58 = vld [vmem:[%s11834_s9 + $0xa2c] ss:$16 sps:$4 sm:$0xff]   ;;  %v2771_v59 = vcombine.high %v12152_v54, %v12152_v54  ;;  %v9454_v54 = vld [vmem:[%s11834_s9 + $0xa40] ss:$16 sps:$4 sm:$0xff]  }
 0x2ad   : > { %6954 = vmatprep.subr.bf16.mxu0 %v9366_v60  ;;  %7487 = vmatprep.subr.bf16.mxu1 %v9369_v61  ;;  %v9451_v60 = vld [vmem:[%s11834_s9 + $0xa28] ss:$16 sps:$4 sm:$0xff]   ;;  %v9456_v61 = vld [vmem:[%s11834_s9 + $0xa44] ss:$16 sps:$4 sm:$0xff]  }
 0x2b0   : > { %6955 = vmatpush1.bf16.msra.mxu0 %v9364_v62  ;;  %7488 = vmatpush1.bf16.msra.mxu1 %v9367_v63  ;;  %v9459_v62 = vld [vmem:[%s11834_s9 + $0xa4c] ss:$16 sps:$4 sm:$0xff]   ;;  %v9457_v63 = vld [vmem:[%s11834_s9 + $0xa48] ss:$16 sps:$4 sm:$0xff]  }
 0x2b1   : > { %6956 = vmatprep.subr.bf16.mxu0 %v9372_v0  ;;  %7489 = vmatprep.subr.bf16.mxu1 %v9375_v1  ;;  %v9462_v0 = vld [vmem:[%s11834_s9 + $0xa64] ss:$16 sps:$4 sm:$0xff]   ;;  %v9465_v1 = vld [vmem:[%s11834_s9 + $0xa6c] ss:$16 sps:$4 sm:$0xff]  }
 0x2b4   : > { %6957 = vmatpush1.bf16.msra.mxu0 %v9370_v2  ;;  %7490 = vmatpush1.bf16.msra.mxu1 %v9373_v3  ;;  %v9460_v2 = vld [vmem:[%s11834_s9 + $0xa60] ss:$16 sps:$4 sm:$0xff]   ;;  %v9463_v3 = vld [vmem:[%s11834_s9 + $0xa68] ss:$16 sps:$4 sm:$0xff]  }
 0x2b5   : > { %6958 = vmatprep.subr.bf16.mxu0 %v9378_v4  ;;  %7491 = vmatprep.subr.bf16.mxu1 %v9381_v5  ;;  %v9468_v4 = vld [vmem:[%s11834_s9 + $0xa84] ss:$16 sps:$4 sm:$0xff]   ;;  %v9471_v5 = vld [vmem:[%s11834_s9 + $0xa8c] ss:$16 sps:$4 sm:$0xff]  }
 0x2b8   : > { %6959 = vmatpush1.bf16.msra.mxu0 %v9376_v6  ;;  %7492 = vmatpush1.bf16.msra.mxu1 %v9379_v7  ;;  %v9466_v6 = vld [vmem:[%s11834_s9 + $0xa80] ss:$16 sps:$4 sm:$0xff]   ;;  %v9469_v7 = vld [vmem:[%s11834_s9 + $0xa88] ss:$16 sps:$4 sm:$0xff]  }
 0x2b9   : > { %6960 = vmatprep.subr.bf16.mxu0 %v9384_v8  ;;  %7493 = vmatprep.subr.bf16.mxu1 %v9387_v9  ;;  %v9474_v8 = vld [vmem:[%s11834_s9 + $0xaa4] ss:$16 sps:$4 sm:$0xff]   ;;  %v9477_v9 = vld [vmem:[%s11834_s9 + $0xaac] ss:$16 sps:$4 sm:$0xff]  }
 0x2bc   : > { %6961 = vmatpush1.bf16.msra.mxu0 %v9382_v10  ;;  %7494 = vmatpush1.bf16.msra.mxu1 %v9385_v11  ;;  %v9472_v10 = vld [vmem:[%s11834_s9 + $0xaa0] ss:$16 sps:$4 sm:$0xff]   ;;  %v9475_v11 = vld [vmem:[%s11834_s9 + $0xaa8] ss:$16 sps:$4 sm:$0xff]  }
 0x2bd   : > { %6962 = vmatprep.subr.bf16.mxu0 %v9390_v12  ;;  %7495 = vmatprep.subr.bf16.mxu1 %v9393_v13  ;;  %v9480_v12 = vld [vmem:[%s11834_s9 + $0xac4] ss:$16 sps:$4 sm:$0xff]   ;;  %v9483_v13 = vld [vmem:[%s11834_s9 + $0xacc] ss:$16 sps:$4 sm:$0xff]  }
 0x2c0   : > { %6963 = vmatpush1.bf16.msra.mxu0 %v9388_v14  ;;  %7496 = vmatpush1.bf16.msra.mxu1 %v9391_v15  ;;  %v9478_v14 = vld [vmem:[%s11834_s9 + $0xac0] ss:$16 sps:$4 sm:$0xff]   ;;  %v9481_v15 = vld [vmem:[%s11834_s9 + $0xac8] ss:$16 sps:$4 sm:$0xff]  }
 0x2c1   : > { %6964 = vmatprep.subr.bf16.mxu0 %v9396_v16  ;;  %7497 = vmatprep.subr.bf16.mxu1 %v9399_v17  ;;  %v9486_v16 = vld [vmem:[%s11834_s9 + $0xae4] ss:$16 sps:$4 sm:$0xff]   ;;  %v9489_v17 = vld [vmem:[%s11834_s9 + $0xaec] ss:$16 sps:$4 sm:$0xff]  }
 0x2c4   : > { %6965 = vmatpush1.bf16.msra.mxu0 %v9394_v18  ;;  %7498 = vmatpush1.bf16.msra.mxu1 %v9397_v21  ;;  %v9484_v18 = vld [vmem:[%s11834_s9 + $0xae0] ss:$16 sps:$4 sm:$0xff]   ;;  %v9487_v21 = vld [vmem:[%s11834_s9 + $0xae8] ss:$16 sps:$4 sm:$0xff]  }
 0x2c5   : > { %6966 = vmatprep.subr.bf16.mxu0 %v9402_v22  ;;  %7499 = vmatprep.subr.bf16.mxu1 %v9405_v23  ;;  %v9492_v22 = vld [vmem:[%s11834_s9 + $0xb04] ss:$16 sps:$4 sm:$0xff]   ;;  %v9495_v23 = vld [vmem:[%s11834_s9 + $0xb0c] ss:$16 sps:$4 sm:$0xff]  }
 0x2c8   : > { %6967 = vmatpush1.bf16.msra.mxu0 %v9400_v25  ;;  %7500 = vmatpush1.bf16.msra.mxu1 %v9403_v26  ;;  %v9490_v25 = vld [vmem:[%s11834_s9 + $0xb00] ss:$16 sps:$4 sm:$0xff]   ;;  %v9493_v26 = vld [vmem:[%s11834_s9 + $0xb08] ss:$16 sps:$4 sm:$0xff]  }
 0x2c9   : > { %6968 = vmatprep.subr.bf16.mxu0 %v9408_v27  ;;  %7501 = vmatprep.subr.bf16.mxu1 %v9411_v29  ;;  %v9498_v27 = vld [vmem:[%s11834_s9 + $0xb24] ss:$16 sps:$4 sm:$0xff]   ;;  %v9501_v29 = vld [vmem:[%s11834_s9 + $0xb2c] ss:$16 sps:$4 sm:$0xff]  }
 0x2cc   : > { %6969 = vmatpush1.bf16.msra.mxu0 %v9406_v30  ;;  %7502 = vmatpush1.bf16.msra.mxu1 %v9409_v31  ;;  %v9496_v30 = vld [vmem:[%s11834_s9 + $0xb20] ss:$16 sps:$4 sm:$0xff]   ;;  %v9499_v31 = vld [vmem:[%s11834_s9 + $0xb28] ss:$16 sps:$4 sm:$0xff]  }
 0x2cd   : > { %6970 = vmatprep.subr.bf16.mxu0 %v9414_v32  ;;  %7503 = vmatprep.subr.bf16.mxu1 %v9417_v33  ;;  %v9504_v32 = vld [vmem:[%s11834_s9 + $0xb44] ss:$16 sps:$4 sm:$0xff]   ;;  %v9507_v33 = vld [vmem:[%s11834_s9 + $0xb4c] ss:$16 sps:$4 sm:$0xff]  }
 0x2d0   : > { %6971 = vmatpush1.bf16.msra.mxu0 %v9412_v36  ;;  %7504 = vmatpush1.bf16.msra.mxu1 %v9415_v38  ;;  %v9502_v36 = vld [vmem:[%s11834_s9 + $0xb40] ss:$16 sps:$4 sm:$0xff]   ;;  %v9505_v38 = vld [vmem:[%s11834_s9 + $0xb48] ss:$16 sps:$4 sm:$0xff]  }
 0x2d1   : > { %6972 = vmatprep.subr.bf16.mxu0 %v9420_v20  ;;  %7505 = vmatprep.subr.bf16.mxu1 %v9423_v39  ;;  %v9510_v20 = vld [vmem:[%s11834_s9 + $0xb64] ss:$16 sps:$4 sm:$0xff]   ;;  %v9513_v39 = vld [vmem:[%s11834_s9 + $0xb6c] ss:$16 sps:$4 sm:$0xff]  }
 0x2d4   : > { %6973 = vmatpush1.bf16.msra.mxu0 %v9418_v28  ;;  %7506 = vmatpush1.bf16.msra.mxu1 %v9421_v40  ;;  %v9508_v28 = vld [vmem:[%s11834_s9 + $0xb60] ss:$16 sps:$4 sm:$0xff]   ;;  %v9511_v40 = vld [vmem:[%s11834_s9 + $0xb68] ss:$16 sps:$4 sm:$0xff]  }
 0x2d5   : > { %6974 = vmatprep.subr.bf16.mxu0 %v9426_v41  ;;  %7507 = vmatprep.subr.bf16.mxu1 %v9429_v42  ;;  %v9516_v41 = vld [vmem:[%s11834_s9 + $0xb84] ss:$16 sps:$4 sm:$0xff]   ;;  %v9519_v42 = vld [vmem:[%s11834_s9 + $0xb8c] ss:$16 sps:$4 sm:$0xff]  }
 0x2d8   : > { %6975 = vmatpush1.bf16.msra.mxu0 %v9424_v43  ;;  %7508 = vmatpush1.bf16.msra.mxu1 %v9427_v45  ;;  %v9514_v43 = vld [vmem:[%s11834_s9 + $0xb80] ss:$16 sps:$4 sm:$0xff]   ;;  %v9517_v45 = vld [vmem:[%s11834_s9 + $0xb88] ss:$16 sps:$4 sm:$0xff]  }
 0x2d9   : > { %6976 = vmatprep.subr.bf16.mxu0 %v9432_v46  ;;  %7509 = vmatprep.subr.bf16.mxu1 %v9435_v47  ;;  %v9522_v46 = vld [vmem:[%s11834_s9 + $0xba4] ss:$16 sps:$4 sm:$0xff]   ;;  %v9525_v47 = vld [vmem:[%s11834_s9 + $0xbac] ss:$16 sps:$4 sm:$0xff]  }
 0x2dc   : > { %6977 = vmatpush1.bf16.msra.mxu0 %v9430_v48  ;;  %7510 = vmatpush1.bf16.msra.mxu1 %v9433_v49  ;;  %v9520_v48 = vld [vmem:[%s11834_s9 + $0xba0] ss:$16 sps:$4 sm:$0xff]   ;;  %v9523_v49 = vld [vmem:[%s11834_s9 + $0xba8] ss:$16 sps:$4 sm:$0xff]  }
 0x2dd   : > { %6978 = vmatprep.subr.bf16.mxu0 %v9438_v50  ;;  %7511 = vmatprep.subr.bf16.mxu1 %v9441_v35  ;;  %v9528_v50 = vld [vmem:[%s11834_s9 + $0xbc4] ss:$16 sps:$4 sm:$0xff]   ;;  %v9531_v35 = vld [vmem:[%s11834_s9 + $0xbcc] ss:$16 sps:$4 sm:$0xff]  }
 0x2e0   : > { %6979 = vmatpush1.bf16.msra.mxu0 %v9436_v51  ;;  %7512 = vmatpush1.bf16.msra.mxu1 %v9439_v52  ;;  %v10140_v51 = vld [vmem:[%s12794_s0 + $0x8] sm:$0xff] }
 0x2e1   : > { %6989 = vmatprep.subr.bf16.mxu0 %v9444_v44  ;;  %7522 = vmatprep.subr.bf16.mxu1 %v9447_v53  ;;  %v2724_v52 = vcombine.high %v10140_v51, %v10140_v51  ;;  %v9526_v44 = vld [vmem:[%s11834_s9 + $0xbc0] ss:$16 sps:$4 sm:$0xff]   ;;  %v9529_v53 = vld [vmem:[%s11834_s9 + $0xbc8] ss:$16 sps:$4 sm:$0xff]  }
 0x2e2   : > { %v9610_v51 = vld [vmem:[%s11834_s9 + $0xd80] ss:$16 sps:$4 sm:$0xff]  }
 0x2e3   : > { %6981 = vmatmul.mubr.bf16.vlgmr.msra.gmra.mrb[0].mxu0 %v12218_v34  ;;  %7514 = vmatmul.mubr.bf16.vlgmr.msra.gmra.mrb[0].mxu1 %v12218_v34 }
 0x2e4   : > { %6990 = vmatpush1.bf16.msra.mxu0 %v9442_v55  ;;  %7523 = vmatpush1.bf16.msra.mxu1 %v9445_v56  ;;  %v9534_v55 = vld [vmem:[%s11834_s9 + $0xbe4] ss:$16 sps:$4 sm:$0xff]   ;;  %v9537_v56 = vld [vmem:[%s11834_s9 + $0xbec] ss:$16 sps:$4 sm:$0xff]  }
 0x2e5   : > { %6991 = vmatprep.subr.bf16.mxu0 %v9450_v57  ;;  %7524 = vmatprep.subr.bf16.mxu1 %v9453_v58  ;;  %v12288_v57 = vrot.slane %v2724_v52, %v11839_v24  ;;  %v9532_v58 = vld [vmem:[%s11834_s9 + $0xbe0] ss:$16 sps:$4 sm:$0xff]   ;;  %v9613_v52 = vld [vmem:[%s11834_s9 + $0xd88] ss:$16 sps:$4 sm:$0xff]  }
 0x2e6   : > { %7021 = vmatprep.mubr.bf16.mxu0 %v2771_v59  ;;  %7554 = vmatprep.mubr.bf16.mxu1 %v2771_v59  ;;  %v9535_v59 = vld [vmem:[%s11834_s9 + $0xbe8] ss:$16 sps:$4 sm:$0xff]  }
 0x2e8   : > { %6992 = vmatpush1.bf16.msra.mxu0 %v9448_v37  ;;  %7525 = vmatpush1.bf16.msra.mxu1 %v9451_v60  ;;  %v9540_v37 = vld [vmem:[%s11834_s9 + $0xc04] ss:$16 sps:$4 sm:$0xff]   ;;  %v9543_v60 = vld [vmem:[%s11834_s9 + $0xc0c] ss:$16 sps:$4 sm:$0xff]  }
 0x2e9   : > { %6993 = vmatprep.subr.bf16.mxu0 %v9456_v61  ;;  %7526 = vmatprep.subr.bf16.mxu1 %v9459_v62  ;;  %v2740_v61 = vcombine.high %v12288_v57, %v12288_v57  ;;  %v2769_v62 = vcombine.high %v12218_v34, %v12218_v34  ;;  %v9544_v34 = vld [vmem:[%s11834_s9 + $0xc20] ss:$16 sps:$4 sm:$0xff]  }
 0x2ec   : > { %6994 = vmatpush1.bf16.msra.mxu0 %v9454_v54  ;;  %7527 = vmatpush1.bf16.msra.mxu1 %v9457_v63  ;;  %v9538_v54 = vld [vmem:[%s11834_s9 + $0xc00] ss:$16 sps:$4 sm:$0xff]   ;;  %v9541_v63 = vld [vmem:[%s11834_s9 + $0xc08] ss:$16 sps:$4 sm:$0xff]  }
 0x2ed   : > { %6995 = vmatprep.subr.bf16.mxu0 %v9462_v0  ;;  %7528 = vmatprep.subr.bf16.mxu1 %v9465_v1  ;;  %v9546_v0 = vld [vmem:[%s11834_s9 + $0xc24] ss:$16 sps:$4 sm:$0xff]   ;;  %v9549_v1 = vld [vmem:[%s11834_s9 + $0xc2c] ss:$16 sps:$4 sm:$0xff]  }
 0x2f0   : > { %6996 = vmatpush1.bf16.msra.mxu0 %v9460_v2  ;;  %7529 = vmatpush1.bf16.msra.mxu1 %v9463_v3  ;;  %v12303_v2 = vrot.slane %v2740_v61, %v11839_v24  ;;  %v9547_v3 = vld [vmem:[%s11834_s9 + $0xc28] ss:$16 sps:$4 sm:$0xff]   ;;  %v9630_v61 = vld [vmem:[%s11834_s9 + $0xde4] ss:$16 sps:$4 sm:$0xff]  }
 0x2f1   : > { %6997 = vmatprep.subr.bf16.mxu0 %v9468_v4  ;;  %7530 = vmatprep.subr.bf16.mxu1 %v9471_v5  ;;  %v9552_v4 = vld [vmem:[%s11834_s9 + $0xc44] ss:$16 sps:$4 sm:$0xff]   ;;  %v9555_v5 = vld [vmem:[%s11834_s9 + $0xc4c] ss:$16 sps:$4 sm:$0xff]  }
 0x2f4   : > { %6998 = vmatpush1.bf16.msra.mxu0 %v9466_v6  ;;  %7531 = vmatpush1.bf16.msra.mxu1 %v9469_v7  ;;  %v9550_v6 = vld [vmem:[%s11834_s9 + $0xc40] ss:$16 sps:$4 sm:$0xff]   ;;  %v9553_v7 = vld [vmem:[%s11834_s9 + $0xc48] ss:$16 sps:$4 sm:$0xff]  }
 0x2f5   : > { %6999 = vmatprep.subr.bf16.mxu0 %v9474_v8  ;;  %7532 = vmatprep.subr.bf16.mxu1 %v9477_v9  ;;  %v9558_v8 = vld [vmem:[%s11834_s9 + $0xc64] ss:$16 sps:$4 sm:$0xff]   ;;  %v9561_v9 = vld [vmem:[%s11834_s9 + $0xc6c] ss:$16 sps:$4 sm:$0xff]  }
 0x2f8   : > { %7000 = vmatpush1.bf16.msra.mxu0 %v9472_v10  ;;  %7533 = vmatpush1.bf16.msra.mxu1 %v9475_v11  ;;  %v9556_v10 = vld [vmem:[%s11834_s9 + $0xc60] ss:$16 sps:$4 sm:$0xff]   ;;  %v9559_v11 = vld [vmem:[%s11834_s9 + $0xc68] ss:$16 sps:$4 sm:$0xff]  }
 0x2f9   : > { %7001 = vmatprep.subr.bf16.mxu0 %v9480_v12  ;;  %7534 = vmatprep.subr.bf16.mxu1 %v9483_v13  ;;  %v9564_v12 = vld [vmem:[%s11834_s9 + $0xc84] ss:$16 sps:$4 sm:$0xff]   ;;  %v9567_v13 = vld [vmem:[%s11834_s9 + $0xc8c] ss:$16 sps:$4 sm:$0xff]  }
 0x2fc   : > { %7002 = vmatpush1.bf16.msra.mxu0 %v9478_v14  ;;  %7535 = vmatpush1.bf16.msra.mxu1 %v9481_v15  ;;  %v9562_v14 = vld [vmem:[%s11834_s9 + $0xc80] ss:$16 sps:$4 sm:$0xff]   ;;  %v9565_v15 = vld [vmem:[%s11834_s9 + $0xc88] ss:$16 sps:$4 sm:$0xff]  }
 0x2fd   : > { %7003 = vmatprep.subr.bf16.mxu0 %v9486_v16  ;;  %7536 = vmatprep.subr.bf16.mxu1 %v9489_v17  ;;  %v9570_v16 = vld [vmem:[%s11834_s9 + $0xca4] ss:$16 sps:$4 sm:$0xff]   ;;  %v9573_v17 = vld [vmem:[%s11834_s9 + $0xcac] ss:$16 sps:$4 sm:$0xff]  }
 0x300   : > { %7004 = vmatpush1.bf16.msra.mxu0 %v9484_v18  ;;  %7537 = vmatpush1.bf16.msra.mxu1 %v9487_v21  ;;  %v9568_v18 = vld [vmem:[%s11834_s9 + $0xca0] ss:$16 sps:$4 sm:$0xff]   ;;  %v9571_v21 = vld [vmem:[%s11834_s9 + $0xca8] ss:$16 sps:$4 sm:$0xff]  }
 0x301   : > { %7005 = vmatprep.subr.bf16.mxu0 %v9492_v22  ;;  %7538 = vmatprep.subr.bf16.mxu1 %v9495_v23  ;;  %v9576_v22 = vld [vmem:[%s11834_s9 + $0xcc4] ss:$16 sps:$4 sm:$0xff]   ;;  %v9579_v23 = vld [vmem:[%s11834_s9 + $0xccc] ss:$16 sps:$4 sm:$0xff]  }
 0x304   : > { %7006 = vmatpush1.bf16.msra.mxu0 %v9490_v25  ;;  %7539 = vmatpush1.bf16.msra.mxu1 %v9493_v26  ;;  %v9574_v25 = vld [vmem:[%s11834_s9 + $0xcc0] ss:$16 sps:$4 sm:$0xff]   ;;  %v9577_v26 = vld [vmem:[%s11834_s9 + $0xcc8] ss:$16 sps:$4 sm:$0xff]  }
 0x305   : > { %7007 = vmatprep.subr.bf16.mxu0 %v9498_v27  ;;  %7540 = vmatprep.subr.bf16.mxu1 %v9501_v29  ;;  %v9582_v27 = vld [vmem:[%s11834_s9 + $0xce4] ss:$16 sps:$4 sm:$0xff]   ;;  %v9585_v29 = vld [vmem:[%s11834_s9 + $0xcec] ss:$16 sps:$4 sm:$0xff]  }
 0x308   : > { %7008 = vmatpush1.bf16.msra.mxu0 %v9496_v30  ;;  %7541 = vmatpush1.bf16.msra.mxu1 %v9499_v31  ;;  %v9580_v30 = vld [vmem:[%s11834_s9 + $0xce0] ss:$16 sps:$4 sm:$0xff]   ;;  %v9583_v31 = vld [vmem:[%s11834_s9 + $0xce8] ss:$16 sps:$4 sm:$0xff]  }
 0x309   : > { %7009 = vmatprep.subr.bf16.mxu0 %v9504_v32  ;;  %7542 = vmatprep.subr.bf16.mxu1 %v9507_v33  ;;  %v9588_v32 = vld [vmem:[%s11834_s9 + $0xd04] ss:$16 sps:$4 sm:$0xff]   ;;  %v9591_v33 = vld [vmem:[%s11834_s9 + $0xd0c] ss:$16 sps:$4 sm:$0xff]  }
 0x30c   : > { %7010 = vmatpush1.bf16.msra.mxu0 %v9502_v36  ;;  %7543 = vmatpush1.bf16.msra.mxu1 %v9505_v38  ;;  %v9586_v36 = vld [vmem:[%s11834_s9 + $0xd00] ss:$16 sps:$4 sm:$0xff]   ;;  %v9589_v38 = vld [vmem:[%s11834_s9 + $0xd08] ss:$16 sps:$4 sm:$0xff]  }
 0x30d   : > { %7011 = vmatprep.subr.bf16.mxu0 %v9510_v20  ;;  %7544 = vmatprep.subr.bf16.mxu1 %v9513_v39  ;;  %v9594_v20 = vld [vmem:[%s11834_s9 + $0xd24] ss:$16 sps:$4 sm:$0xff]   ;;  %v9597_v39 = vld [vmem:[%s11834_s9 + $0xd2c] ss:$16 sps:$4 sm:$0xff]  }
 0x310   : > { %7012 = vmatpush1.bf16.msra.mxu0 %v9508_v28  ;;  %7545 = vmatpush1.bf16.msra.mxu1 %v9511_v40  ;;  %v9592_v28 = vld [vmem:[%s11834_s9 + $0xd20] ss:$16 sps:$4 sm:$0xff]   ;;  %v9595_v40 = vld [vmem:[%s11834_s9 + $0xd28] ss:$16 sps:$4 sm:$0xff]  }
 0x311   : > { %7013 = vmatprep.subr.bf16.mxu0 %v9516_v41  ;;  %7546 = vmatprep.subr.bf16.mxu1 %v9519_v42  ;;  %v9600_v41 = vld [vmem:[%s11834_s9 + $0xd44] ss:$16 sps:$4 sm:$0xff]   ;;  %v9603_v42 = vld [vmem:[%s11834_s9 + $0xd4c] ss:$16 sps:$4 sm:$0xff]  }
 0x314   : > { %7014 = vmatpush1.bf16.msra.mxu0 %v9514_v43  ;;  %7547 = vmatpush1.bf16.msra.mxu1 %v9517_v45  ;;  %v9598_v43 = vld [vmem:[%s11834_s9 + $0xd40] ss:$16 sps:$4 sm:$0xff]   ;;  %v9601_v45 = vld [vmem:[%s11834_s9 + $0xd48] ss:$16 sps:$4 sm:$0xff]  }
 0x315   : > { %7015 = vmatprep.subr.bf16.mxu0 %v9522_v46  ;;  %7548 = vmatprep.subr.bf16.mxu1 %v9525_v47  ;;  %v9606_v46 = vld [vmem:[%s11834_s9 + $0xd64] ss:$16 sps:$4 sm:$0xff]   ;;  %v9609_v47 = vld [vmem:[%s11834_s9 + $0xd6c] ss:$16 sps:$4 sm:$0xff]  }
 0x318   : > { %7016 = vmatpush1.bf16.msra.mxu0 %v9520_v48  ;;  %7549 = vmatpush1.bf16.msra.mxu1 %v9523_v49  ;;  %v9604_v48 = vld [vmem:[%s11834_s9 + $0xd60] ss:$16 sps:$4 sm:$0xff]   ;;  %v9607_v49 = vld [vmem:[%s11834_s9 + $0xd68] ss:$16 sps:$4 sm:$0xff]  }
 0x319   : > { %7017 = vmatprep.subr.bf16.mxu0 %v9528_v50  ;;  %7550 = vmatprep.subr.bf16.mxu1 %v9531_v35  ;;  %v9612_v50 = vld [vmem:[%s11834_s9 + $0xd84] ss:$16 sps:$4 sm:$0xff]   ;;  %v9615_v35 = vld [vmem:[%s11834_s9 + $0xd8c] ss:$16 sps:$4 sm:$0xff]  }
 0x31c   : > { %7018 = vmatpush1.bf16.msra.mxu0 %v9526_v44  ;;  %7551 = vmatpush1.bf16.msra.mxu1 %v9529_v53  ;;  %v9618_v44 = vld [vmem:[%s11834_s9 + $0xda4] ss:$16 sps:$4 sm:$0xff]   ;;  %v9621_v53 = vld [vmem:[%s11834_s9 + $0xdac] ss:$16 sps:$4 sm:$0xff]  }
 0x31d   : > { %7019 = vmatprep.subr.bf16.mxu0 %v9534_v55  ;;  %7552 = vmatprep.subr.bf16.mxu1 %v9537_v56  ;;  %v9616_v55 = vld [vmem:[%s11834_s9 + $0xda0] ss:$16 sps:$4 sm:$0xff]   ;;  %v9619_v56 = vld [vmem:[%s11834_s9 + $0xda8] ss:$16 sps:$4 sm:$0xff]  }
 0x320   : > { %7020 = vmatpush1.bf16.msra.mxu0 %v9532_v58  ;;  %7553 = vmatpush1.bf16.msra.mxu1 %v9535_v59  ;;  %v9624_v58 = vld [vmem:[%s11834_s9 + $0xdc4] ss:$16 sps:$4 sm:$0xff]   ;;  %v9627_v59 = vld [vmem:[%s11834_s9 + $0xdcc] ss:$16 sps:$4 sm:$0xff]  }
 0x321   : > { %7030 = vmatprep.subr.bf16.mxu0 %v9540_v37  ;;  %7563 = vmatprep.subr.bf16.mxu1 %v9543_v60  ;;  %v9622_v37 = vld [vmem:[%s11834_s9 + $0xdc0] ss:$16 sps:$4 sm:$0xff]   ;;  %v9625_v60 = vld [vmem:[%s11834_s9 + $0xdc8] ss:$16 sps:$4 sm:$0xff]  }
 0x323   : > { %7022 = vmatmul.mubr.bf16.vlgmr.msra.gmra.mrb[0].mxu0 %v2769_v62  ;;  %7555 = vmatmul.mubr.bf16.vlgmr.msra.gmra.mrb[0].mxu1 %v2769_v62  ;;  %v9633_v62 = vld [vmem:[%s11834_s9 + $0xdec] ss:$16 sps:$4 sm:$0xff]  }
 0x324   : > { %7031 = vmatpush1.bf16.msra.mxu0 %v9538_v54  ;;  %7564 = vmatpush1.bf16.msra.mxu1 %v9541_v63  ;;  %v9628_v54 = vld [vmem:[%s11834_s9 + $0xde0] ss:$16 sps:$4 sm:$0xff]   ;;  %v9631_v63 = vld [vmem:[%s11834_s9 + $0xde8] ss:$16 sps:$4 sm:$0xff]  }
 0x325   : > { %7032 = vmatprep.subr.bf16.mxu0 %v9546_v0  ;;  %7565 = vmatprep.subr.bf16.mxu1 %v9549_v1  ;;  %v9637_v0 = vld [vmem:[%s11834_s9 + $0xe04] ss:$16 sps:$4 sm:$0xff]   ;;  %v9640_v1 = vld [vmem:[%s11834_s9 + $0xe0c] ss:$16 sps:$4 sm:$0xff]  }
 0x326   : > { %7062 = vmatprep.mubr.bf16.mxu0 %v12303_v2  ;;  %7595 = vmatprep.mubr.bf16.mxu1 %v12303_v2 }
 0x328   : > { %7033 = vmatpush1.bf16.msra.mxu0 %v9544_v34  ;;  %7566 = vmatpush1.bf16.msra.mxu1 %v9547_v3  ;;  %v12369_v34 = vrot.slane %v12288_v57, %v11839_v24  ;;  %v9635_v3 = vld [vmem:[%s11834_s9 + $0xe00] ss:$16 sps:$4 sm:$0xff]  }
 0x329   : > { %7034 = vmatprep.subr.bf16.mxu0 %v9552_v4  ;;  %7567 = vmatprep.subr.bf16.mxu1 %v9555_v5  ;;  %v9638_v4 = vld [vmem:[%s11834_s9 + $0xe08] ss:$16 sps:$4 sm:$0xff]   ;;  %v9643_v5 = vld [vmem:[%s11834_s9 + $0xe24] ss:$16 sps:$4 sm:$0xff]   ;;  %v9641_v57 = vld [vmem:[%s11834_s9 + $0xe20] ss:$16 sps:$4 sm:$0xff]  }
 0x32c   : > { %7035 = vmatpush1.bf16.msra.mxu0 %v9550_v6  ;;  %7568 = vmatpush1.bf16.msra.mxu1 %v9553_v7  ;;  %v9646_v6 = vld [vmem:[%s11834_s9 + $0xe2c] ss:$16 sps:$4 sm:$0xff]   ;;  %v2772_v7 = vcombine.high %v12303_v2, %v12303_v2  ;;  %v9647_v2 = vld [vmem:[%s11834_s9 + $0xe40] ss:$16 sps:$4 sm:$0xff]  }
 0x32d   : > { %7036 = vmatprep.subr.bf16.mxu0 %v9558_v8  ;;  %7569 = vmatprep.subr.bf16.mxu1 %v9561_v9  ;;  %v9644_v8 = vld [vmem:[%s11834_s9 + $0xe28] ss:$16 sps:$4 sm:$0xff]   ;;  %v9649_v9 = vld [vmem:[%s11834_s9 + $0xe44] ss:$16 sps:$4 sm:$0xff]  }
 0x330   : > { %7037 = vmatpush1.bf16.msra.mxu0 %v9556_v10  ;;  %7570 = vmatpush1.bf16.msra.mxu1 %v9559_v11  ;;  %v9652_v10 = vld [vmem:[%s11834_s9 + $0xe4c] ss:$16 sps:$4 sm:$0xff]   ;;  %v9650_v11 = vld [vmem:[%s11834_s9 + $0xe48] ss:$16 sps:$4 sm:$0xff]  }
 0x331   : > { %7038 = vmatprep.subr.bf16.mxu0 %v9564_v12  ;;  %7571 = vmatprep.subr.bf16.mxu1 %v9567_v13  ;;  %v9655_v12 = vld [vmem:[%s11834_s9 + $0xe64] ss:$16 sps:$4 sm:$0xff]   ;;  %v9658_v13 = vld [vmem:[%s11834_s9 + $0xe6c] ss:$16 sps:$4 sm:$0xff]  }
 0x334   : > { %7039 = vmatpush1.bf16.msra.mxu0 %v9562_v14  ;;  %7572 = vmatpush1.bf16.msra.mxu1 %v9565_v15  ;;  %v9653_v14 = vld [vmem:[%s11834_s9 + $0xe60] ss:$16 sps:$4 sm:$0xff]   ;;  %v9656_v15 = vld [vmem:[%s11834_s9 + $0xe68] ss:$16 sps:$4 sm:$0xff]  }
 0x335   : > { %7040 = vmatprep.subr.bf16.mxu0 %v9570_v16  ;;  %7573 = vmatprep.subr.bf16.mxu1 %v9573_v17  ;;  %v9661_v16 = vld [vmem:[%s11834_s9 + $0xe84] ss:$16 sps:$4 sm:$0xff]   ;;  %v9664_v17 = vld [vmem:[%s11834_s9 + $0xe8c] ss:$16 sps:$4 sm:$0xff]  }
 0x338   : > { %7041 = vmatpush1.bf16.msra.mxu0 %v9568_v18  ;;  %7574 = vmatpush1.bf16.msra.mxu1 %v9571_v21  ;;  %v9659_v18 = vld [vmem:[%s11834_s9 + $0xe80] ss:$16 sps:$4 sm:$0xff]   ;;  %v9662_v21 = vld [vmem:[%s11834_s9 + $0xe88] ss:$16 sps:$4 sm:$0xff]  }
 0x339   : > { %7042 = vmatprep.subr.bf16.mxu0 %v9576_v22  ;;  %7575 = vmatprep.subr.bf16.mxu1 %v9579_v23  ;;  %v9667_v22 = vld [vmem:[%s11834_s9 + $0xea4] ss:$16 sps:$4 sm:$0xff]   ;;  %v9670_v23 = vld [vmem:[%s11834_s9 + $0xeac] ss:$16 sps:$4 sm:$0xff]  }
 0x33c   : > { %7043 = vmatpush1.bf16.msra.mxu0 %v9574_v25  ;;  %7576 = vmatpush1.bf16.msra.mxu1 %v9577_v26  ;;  %v9665_v25 = vld [vmem:[%s11834_s9 + $0xea0] ss:$16 sps:$4 sm:$0xff]   ;;  %v9668_v26 = vld [vmem:[%s11834_s9 + $0xea8] ss:$16 sps:$4 sm:$0xff]  }
 0x33d   : > { %7044 = vmatprep.subr.bf16.mxu0 %v9582_v27  ;;  %7577 = vmatprep.subr.bf16.mxu1 %v9585_v29  ;;  %v9673_v27 = vld [vmem:[%s11834_s9 + $0xec4] ss:$16 sps:$4 sm:$0xff]   ;;  %v9676_v29 = vld [vmem:[%s11834_s9 + $0xecc] ss:$16 sps:$4 sm:$0xff]  }
 0x340   : > { %7045 = vmatpush1.bf16.msra.mxu0 %v9580_v30  ;;  %7578 = vmatpush1.bf16.msra.mxu1 %v9583_v31  ;;  %v9671_v30 = vld [vmem:[%s11834_s9 + $0xec0] ss:$16 sps:$4 sm:$0xff]   ;;  %v9674_v31 = vld [vmem:[%s11834_s9 + $0xec8] ss:$16 sps:$4 sm:$0xff]  }
 0x341   : > { %7046 = vmatprep.subr.bf16.mxu0 %v9588_v32  ;;  %7579 = vmatprep.subr.bf16.mxu1 %v9591_v33  ;;  %v9679_v32 = vld [vmem:[%s11834_s9 + $0xee4] ss:$16 sps:$4 sm:$0xff]   ;;  %v9682_v33 = vld [vmem:[%s11834_s9 + $0xeec] ss:$16 sps:$4 sm:$0xff]  }
 0x344   : > { %7047 = vmatpush1.bf16.msra.mxu0 %v9586_v36  ;;  %7580 = vmatpush1.bf16.msra.mxu1 %v9589_v38  ;;  %v9677_v36 = vld [vmem:[%s11834_s9 + $0xee0] ss:$16 sps:$4 sm:$0xff]   ;;  %v9680_v38 = vld [vmem:[%s11834_s9 + $0xee8] ss:$16 sps:$4 sm:$0xff]  }
 0x345   : > { %7048 = vmatprep.subr.bf16.mxu0 %v9594_v20  ;;  %7581 = vmatprep.subr.bf16.mxu1 %v9597_v39  ;;  %v9685_v20 = vld [vmem:[%s11834_s9 + $0xf04] ss:$16 sps:$4 sm:$0xff]   ;;  %v9688_v39 = vld [vmem:[%s11834_s9 + $0xf0c] ss:$16 sps:$4 sm:$0xff]  }
 0x348   : > { %7049 = vmatpush1.bf16.msra.mxu0 %v9592_v28  ;;  %7582 = vmatpush1.bf16.msra.mxu1 %v9595_v40  ;;  %v9683_v28 = vld [vmem:[%s11834_s9 + $0xf00] ss:$16 sps:$4 sm:$0xff]   ;;  %v9686_v40 = vld [vmem:[%s11834_s9 + $0xf08] ss:$16 sps:$4 sm:$0xff]  }
 0x349   : > { %7050 = vmatprep.subr.bf16.mxu0 %v9600_v41  ;;  %7583 = vmatprep.subr.bf16.mxu1 %v9603_v42  ;;  %v9691_v41 = vld [vmem:[%s11834_s9 + $0xf24] ss:$16 sps:$4 sm:$0xff]   ;;  %v9694_v42 = vld [vmem:[%s11834_s9 + $0xf2c] ss:$16 sps:$4 sm:$0xff]  }
 0x34c   : > { %7051 = vmatpush1.bf16.msra.mxu0 %v9598_v43  ;;  %7584 = vmatpush1.bf16.msra.mxu1 %v9601_v45  ;;  %v9689_v43 = vld [vmem:[%s11834_s9 + $0xf20] ss:$16 sps:$4 sm:$0xff]   ;;  %v9692_v45 = vld [vmem:[%s11834_s9 + $0xf28] ss:$16 sps:$4 sm:$0xff]  }
 0x34d   : > { %7052 = vmatprep.subr.bf16.mxu0 %v9606_v46  ;;  %7585 = vmatprep.subr.bf16.mxu1 %v9609_v47  ;;  %v9697_v46 = vld [vmem:[%s11834_s9 + $0xf44] ss:$16 sps:$4 sm:$0xff]   ;;  %v9700_v47 = vld [vmem:[%s11834_s9 + $0xf4c] ss:$16 sps:$4 sm:$0xff]  }
 0x350   : > { %7053 = vmatpush1.bf16.msra.mxu0 %v9604_v48  ;;  %7586 = vmatpush1.bf16.msra.mxu1 %v9607_v49  ;;  %v9695_v48 = vld [vmem:[%s11834_s9 + $0xf40] ss:$16 sps:$4 sm:$0xff]   ;;  %v9698_v49 = vld [vmem:[%s11834_s9 + $0xf48] ss:$16 sps:$4 sm:$0xff]  }
 0x351   : > { %7054 = vmatprep.subr.bf16.mxu0 %v9612_v50  ;;  %7587 = vmatprep.subr.bf16.mxu1 %v9615_v35  ;;  %v9703_v50 = vld [vmem:[%s11834_s9 + $0xf64] ss:$16 sps:$4 sm:$0xff]   ;;  %v9706_v35 = vld [vmem:[%s11834_s9 + $0xf6c] ss:$16 sps:$4 sm:$0xff]  }
 0x354   : > { %7055 = vmatpush1.bf16.msra.mxu0 %v9610_v51  ;;  %7588 = vmatpush1.bf16.msra.mxu1 %v9613_v52  ;;  %v9701_v51 = vld [vmem:[%s11834_s9 + $0xf60] ss:$16 sps:$4 sm:$0xff]   ;;  %v9704_v52 = vld [vmem:[%s11834_s9 + $0xf68] ss:$16 sps:$4 sm:$0xff]  }
 0x355   : > { %7056 = vmatprep.subr.bf16.mxu0 %v9618_v44  ;;  %7589 = vmatprep.subr.bf16.mxu1 %v9621_v53  ;;  %v9709_v44 = vld [vmem:[%s11834_s9 + $0xf84] ss:$16 sps:$4 sm:$0xff]   ;;  %v9712_v53 = vld [vmem:[%s11834_s9 + $0xf8c] ss:$16 sps:$4 sm:$0xff]  }
 0x358   : > { %7057 = vmatpush1.bf16.msra.mxu0 %v9616_v55  ;;  %7590 = vmatpush1.bf16.msra.mxu1 %v9619_v56  ;;  %v9707_v55 = vld [vmem:[%s11834_s9 + $0xf80] ss:$16 sps:$4 sm:$0xff]   ;;  %v9710_v56 = vld [vmem:[%s11834_s9 + $0xf88] ss:$16 sps:$4 sm:$0xff]  }
 0x359   : > { %7058 = vmatprep.subr.bf16.mxu0 %v9624_v58  ;;  %7591 = vmatprep.subr.bf16.mxu1 %v9627_v59  ;;  %v9715_v58 = vld [vmem:[%s11834_s9 + $0xfa4] ss:$16 sps:$4 sm:$0xff]   ;;  %v9718_v59 = vld [vmem:[%s11834_s9 + $0xfac] ss:$16 sps:$4 sm:$0xff]  }
 0x35c   : > { %7059 = vmatpush1.bf16.msra.mxu0 %v9622_v37  ;;  %7592 = vmatpush1.bf16.msra.mxu1 %v9625_v60  ;;  %v9713_v37 = vld [vmem:[%s11834_s9 + $0xfa0] ss:$16 sps:$4 sm:$0xff]   ;;  %v9716_v60 = vld [vmem:[%s11834_s9 + $0xfa8] ss:$16 sps:$4 sm:$0xff]  }
 0x35d   : > { %7060 = vmatprep.subr.bf16.mxu0 %v9630_v61  ;;  %7593 = vmatprep.subr.bf16.mxu1 %v9633_v62  ;;  %v9721_v61 = vld [vmem:[%s11834_s9 + $0xfc4] ss:$16 sps:$4 sm:$0xff]   ;;  %v9724_v62 = vld [vmem:[%s11834_s9 + $0xfcc] ss:$16 sps:$4 sm:$0xff]  }
 0x360   : > { %7061 = vmatpush1.bf16.msra.mxu0 %v9628_v54  ;;  %7594 = vmatpush1.bf16.msra.mxu1 %v9631_v63  ;;  %v12434_v54 = vld [vmem:[%s12794_s0 + $0x10] sm:$0xff] }
 0x361   : > { %7071 = vmatprep.subr.bf16.mxu0 %v9637_v0  ;;  %7604 = vmatprep.subr.bf16.mxu1 %v9640_v1  ;;  %v9719_v63 = vld [vmem:[%s11834_s9 + $0xfc0] ss:$16 sps:$4 sm:$0xff]   ;;  %v9722_v0 = vld [vmem:[%s11834_s9 + $0xfc8] ss:$16 sps:$4 sm:$0xff]   ;;  %v9727_v1 = vld [vmem:[%s11834_s9 + $0xfe4] ss:$16 sps:$4 sm:$0xff]  }
 0x363   : > { %7063 = vmatmul.mubr.bf16.vlgmr.msra.gmra.mrb[0].mxu0 %v12369_v34  ;;  %7596 = vmatmul.mubr.bf16.vlgmr.msra.gmra.mrb[0].mxu1 %v12369_v34 }
 0x364   : > { %7072 = vmatpush1.bf16.msra.mxu0 %v9635_v3  ;;  %7605 = vmatpush1.bf16.msra.mxu1 %v9638_v4  ;;  %v9730_v3 = vld [vmem:[%s11834_s9 + $0xfec] ss:$16 sps:$4 sm:$0xff]   ;;  %v12442_v4 = vrot.slane %v12434_v54, %v11839_v24 }
 0x365   : > { %7073 = vmatprep.subr.bf16.mxu0 %v9643_v5  ;;  %7606 = vmatprep.subr.bf16.mxu1 %v9646_v6  ;;  %v9725_v5 = vld [vmem:[%s11834_s9 + $0xfe0] ss:$16 sps:$4 sm:$0xff]   ;;  %v9728_v6 = vld [vmem:[%s11834_s9 + $0xfe8] ss:$16 sps:$4 sm:$0xff]  }
 0x366   : > { %7103 = vmatprep.mubr.bf16.mxu0 %v2772_v7  ;;  %7636 = vmatprep.mubr.bf16.mxu1 %v2772_v7  ;;  %v9733_v7 = vld [vmem:[%s11834_s9 + $0x1004] ss:$16 sps:$4 sm:$0xff]  }
 0x368   : > { %7074 = vmatpush1.bf16.msra.mxu0 %v9641_v57  ;;  %7607 = vmatpush1.bf16.msra.mxu1 %v9644_v8  ;;  %v9736_v57 = vld [vmem:[%s11834_s9 + $0x100c] ss:$16 sps:$4 sm:$0xff]   ;;  %v2788_v8 = vcombine.high %v12442_v4, %v12442_v4 }
 0x369   : > { %7075 = vmatprep.subr.bf16.mxu0 %v9649_v9  ;;  %7608 = vmatprep.subr.bf16.mxu1 %v9652_v10  ;;  %v2770_v9 = vcombine.high %v12369_v34, %v12369_v34  ;;  %v9731_v10 = vld [vmem:[%s11834_s9 + $0x1000] ss:$16 sps:$4 sm:$0xff]  }
 0x36a   : > { %v9737_v34 = vld [vmem:[%s11834_s9 + $0x1020] ss:$16 sps:$4 sm:$0xff]  }
 0x36c   : > { %7076 = vmatpush1.bf16.msra.mxu0 %v9647_v2  ;;  %7609 = vmatpush1.bf16.msra.mxu1 %v9650_v11  ;;  %v9734_v2 = vld [vmem:[%s11834_s9 + $0x1008] ss:$16 sps:$4 sm:$0xff]   ;;  %v9739_v11 = vld [vmem:[%s11834_s9 + $0x1024] ss:$16 sps:$4 sm:$0xff]  }
 0x36d   : > { %7077 = vmatprep.subr.bf16.mxu0 %v9655_v12  ;;  %7610 = vmatprep.subr.bf16.mxu1 %v9658_v13  ;;  %v9742_v12 = vld [vmem:[%s11834_s9 + $0x102c] ss:$16 sps:$4 sm:$0xff]   ;;  %v12457_v13 = vrot.slane %v2788_v8, %v11839_v24  ;;  %v9818_v8 = vld [vmem:[%s11834_s9 + $0x11c8] ss:$16 sps:$4 sm:$0xff]  }
 0x370   : > { %7078 = vmatpush1.bf16.msra.mxu0 %v9653_v14  ;;  %7611 = vmatpush1.bf16.msra.mxu1 %v9656_v15  ;;  %v9740_v14 = vld [vmem:[%s11834_s9 + $0x1028] ss:$16 sps:$4 sm:$0xff]   ;;  %v9745_v15 = vld [vmem:[%s11834_s9 + $0x1044] ss:$16 sps:$4 sm:$0xff]  }
 0x371   : > { %7079 = vmatprep.subr.bf16.mxu0 %v9661_v16  ;;  %7612 = vmatprep.subr.bf16.mxu1 %v9664_v17  ;;  %v9748_v16 = vld [vmem:[%s11834_s9 + $0x104c] ss:$16 sps:$4 sm:$0xff]   ;;  %v9743_v17 = vld [vmem:[%s11834_s9 + $0x1040] ss:$16 sps:$4 sm:$0xff]  }
 0x374   : > { %7080 = vmatpush1.bf16.msra.mxu0 %v9659_v18  ;;  %7613 = vmatpush1.bf16.msra.mxu1 %v9662_v21  ;;  %v9746_v18 = vld [vmem:[%s11834_s9 + $0x1048] ss:$16 sps:$4 sm:$0xff]   ;;  %v9751_v21 = vld [vmem:[%s11834_s9 + $0x1064] ss:$16 sps:$4 sm:$0xff]  }
 0x375   : > { %7081 = vmatprep.subr.bf16.mxu0 %v9667_v22  ;;  %7614 = vmatprep.subr.bf16.mxu1 %v9670_v23  ;;  %v9754_v22 = vld [vmem:[%s11834_s9 + $0x106c] ss:$16 sps:$4 sm:$0xff]   ;;  %v9749_v23 = vld [vmem:[%s11834_s9 + $0x1060] ss:$16 sps:$4 sm:$0xff]  }
 0x378   : > { %7082 = vmatpush1.bf16.msra.mxu0 %v9665_v25  ;;  %7615 = vmatpush1.bf16.msra.mxu1 %v9668_v26  ;;  %v9752_v25 = vld [vmem:[%s11834_s9 + $0x1068] ss:$16 sps:$4 sm:$0xff]   ;;  %v9757_v26 = vld [vmem:[%s11834_s9 + $0x1084] ss:$16 sps:$4 sm:$0xff]  }
 0x379   : > { %7083 = vmatprep.subr.bf16.mxu0 %v9673_v27  ;;  %7616 = vmatprep.subr.bf16.mxu1 %v9676_v29  ;;  %v9760_v27 = vld [vmem:[%s11834_s9 + $0x108c] ss:$16 sps:$4 sm:$0xff]   ;;  %v9755_v29 = vld [vmem:[%s11834_s9 + $0x1080] ss:$16 sps:$4 sm:$0xff]  }
 0x37c   : > { %7084 = vmatpush1.bf16.msra.mxu0 %v9671_v30  ;;  %7617 = vmatpush1.bf16.msra.mxu1 %v9674_v31  ;;  %v9758_v30 = vld [vmem:[%s11834_s9 + $0x1088] ss:$16 sps:$4 sm:$0xff]   ;;  %v9763_v31 = vld [vmem:[%s11834_s9 + $0x10a4] ss:$16 sps:$4 sm:$0xff]  }
 0x37d   : > { %7085 = vmatprep.subr.bf16.mxu0 %v9679_v32  ;;  %7618 = vmatprep.subr.bf16.mxu1 %v9682_v33  ;;  %v9766_v32 = vld [vmem:[%s11834_s9 + $0x10ac] ss:$16 sps:$4 sm:$0xff]   ;;  %v9761_v33 = vld [vmem:[%s11834_s9 + $0x10a0] ss:$16 sps:$4 sm:$0xff]  }
 0x380   : > { %7086 = vmatpush1.bf16.msra.mxu0 %v9677_v36  ;;  %7619 = vmatpush1.bf16.msra.mxu1 %v9680_v38  ;;  %v9764_v36 = vld [vmem:[%s11834_s9 + $0x10a8] ss:$16 sps:$4 sm:$0xff]   ;;  %v9769_v38 = vld [vmem:[%s11834_s9 + $0x10c4] ss:$16 sps:$4 sm:$0xff]  }
 0x381   : > { %7087 = vmatprep.subr.bf16.mxu0 %v9685_v20  ;;  %7620 = vmatprep.subr.bf16.mxu1 %v9688_v39  ;;  %v9772_v20 = vld [vmem:[%s11834_s9 + $0x10cc] ss:$16 sps:$4 sm:$0xff]   ;;  %v9767_v39 = vld [vmem:[%s11834_s9 + $0x10c0] ss:$16 sps:$4 sm:$0xff]  }
 0x384   : > { %7088 = vmatpush1.bf16.msra.mxu0 %v9683_v28  ;;  %7621 = vmatpush1.bf16.msra.mxu1 %v9686_v40  ;;  %v9770_v28 = vld [vmem:[%s11834_s9 + $0x10c8] ss:$16 sps:$4 sm:$0xff]   ;;  %v9775_v40 = vld [vmem:[%s11834_s9 + $0x10e4] ss:$16 sps:$4 sm:$0xff]  }
 0x385   : > { %7089 = vmatprep.subr.bf16.mxu0 %v9691_v41  ;;  %7622 = vmatprep.subr.bf16.mxu1 %v9694_v42  ;;  %v9778_v41 = vld [vmem:[%s11834_s9 + $0x10ec] ss:$16 sps:$4 sm:$0xff]   ;;  %v9773_v42 = vld [vmem:[%s11834_s9 + $0x10e0] ss:$16 sps:$4 sm:$0xff]  }
 0x388   : > { %7090 = vmatpush1.bf16.msra.mxu0 %v9689_v43  ;;  %7623 = vmatpush1.bf16.msra.mxu1 %v9692_v45  ;;  %v9776_v43 = vld [vmem:[%s11834_s9 + $0x10e8] ss:$16 sps:$4 sm:$0xff]   ;;  %v9781_v45 = vld [vmem:[%s11834_s9 + $0x1104] ss:$16 sps:$4 sm:$0xff]  }
 0x389   : > { %7091 = vmatprep.subr.bf16.mxu0 %v9697_v46  ;;  %7624 = vmatprep.subr.bf16.mxu1 %v9700_v47  ;;  %v9784_v46 = vld [vmem:[%s11834_s9 + $0x110c] ss:$16 sps:$4 sm:$0xff]   ;;  %v9779_v47 = vld [vmem:[%s11834_s9 + $0x1100] ss:$16 sps:$4 sm:$0xff]  }
 0x38c   : > { %7092 = vmatpush1.bf16.msra.mxu0 %v9695_v48  ;;  %7625 = vmatpush1.bf16.msra.mxu1 %v9698_v49  ;;  %v9782_v48 = vld [vmem:[%s11834_s9 + $0x1108] ss:$16 sps:$4 sm:$0xff]   ;;  %v9787_v49 = vld [vmem:[%s11834_s9 + $0x1124] ss:$16 sps:$4 sm:$0xff]  }
 0x38d   : > { %7093 = vmatprep.subr.bf16.mxu0 %v9703_v50  ;;  %7626 = vmatprep.subr.bf16.mxu1 %v9706_v35  ;;  %v9790_v50 = vld [vmem:[%s11834_s9 + $0x112c] ss:$16 sps:$4 sm:$0xff]   ;;  %v9785_v35 = vld [vmem:[%s11834_s9 + $0x1120] ss:$16 sps:$4 sm:$0xff]  }
 0x390   : > { %7094 = vmatpush1.bf16.msra.mxu0 %v9701_v51  ;;  %7627 = vmatpush1.bf16.msra.mxu1 %v9704_v52  ;;  %v9788_v51 = vld [vmem:[%s11834_s9 + $0x1128] ss:$16 sps:$4 sm:$0xff]   ;;  %v9793_v52 = vld [vmem:[%s11834_s9 + $0x1144] ss:$16 sps:$4 sm:$0xff]  }
 0x391   : > { %7095 = vmatprep.subr.bf16.mxu0 %v9709_v44  ;;  %7628 = vmatprep.subr.bf16.mxu1 %v9712_v53  ;;  %v9796_v44 = vld [vmem:[%s11834_s9 + $0x114c] ss:$16 sps:$4 sm:$0xff]   ;;  %v9791_v53 = vld [vmem:[%s11834_s9 + $0x1140] ss:$16 sps:$4 sm:$0xff]  }
 0x394   : > { %7096 = vmatpush1.bf16.msra.mxu0 %v9707_v55  ;;  %7629 = vmatpush1.bf16.msra.mxu1 %v9710_v56  ;;  %v9794_v55 = vld [vmem:[%s11834_s9 + $0x1148] ss:$16 sps:$4 sm:$0xff]   ;;  %v9799_v56 = vld [vmem:[%s11834_s9 + $0x1164] ss:$16 sps:$4 sm:$0xff]  }
 0x395   : > { %7097 = vmatprep.subr.bf16.mxu0 %v9715_v58  ;;  %7630 = vmatprep.subr.bf16.mxu1 %v9718_v59  ;;  %v9802_v58 = vld [vmem:[%s11834_s9 + $0x116c] ss:$16 sps:$4 sm:$0xff]   ;;  %v9797_v59 = vld [vmem:[%s11834_s9 + $0x1160] ss:$16 sps:$4 sm:$0xff]  }
 0x398   : > { %7098 = vmatpush1.bf16.msra.mxu0 %v9713_v37  ;;  %7631 = vmatpush1.bf16.msra.mxu1 %v9716_v60  ;;  %v9800_v37 = vld [vmem:[%s11834_s9 + $0x1168] ss:$16 sps:$4 sm:$0xff]   ;;  %v9805_v60 = vld [vmem:[%s11834_s9 + $0x1184] ss:$16 sps:$4 sm:$0xff]  }
 0x399   : > { %7099 = vmatprep.subr.bf16.mxu0 %v9721_v61  ;;  %7632 = vmatprep.subr.bf16.mxu1 %v9724_v62  ;;  %v9808_v61 = vld [vmem:[%s11834_s9 + $0x118c] ss:$16 sps:$4 sm:$0xff]   ;;  %v9803_v62 = vld [vmem:[%s11834_s9 + $0x1180] ss:$16 sps:$4 sm:$0xff]  }
 0x39c   : > { %7100 = vmatpush1.bf16.msra.mxu0 %v9719_v63  ;;  %7633 = vmatpush1.bf16.msra.mxu1 %v9722_v0  ;;  %v9806_v63 = vld [vmem:[%s11834_s9 + $0x1188] ss:$16 sps:$4 sm:$0xff]   ;;  %v9811_v0 = vld [vmem:[%s11834_s9 + $0x11a4] ss:$16 sps:$4 sm:$0xff]  }
 0x39d   : > { %7101 = vmatprep.subr.bf16.mxu0 %v9727_v1  ;;  %7634 = vmatprep.subr.bf16.mxu1 %v9730_v3  ;;  %v9814_v1 = vld [vmem:[%s11834_s9 + $0x11ac] ss:$16 sps:$4 sm:$0xff]   ;;  %v9809_v3 = vld [vmem:[%s11834_s9 + $0x11a0] ss:$16 sps:$4 sm:$0xff]  }
 0x3a0   : > { %7102 = vmatpush1.bf16.msra.mxu0 %v9725_v5  ;;  %7635 = vmatpush1.bf16.msra.mxu1 %v9728_v6  ;;  %v9812_v5 = vld [vmem:[%s11834_s9 + $0x11a8] ss:$16 sps:$4 sm:$0xff]   ;;  %v9817_v6 = vld [vmem:[%s11834_s9 + $0x11c4] ss:$16 sps:$4 sm:$0xff]  }
 0x3a1   : > { %7112 = vmatprep.subr.bf16.mxu0 %v9733_v7  ;;  %7645 = vmatprep.subr.bf16.mxu1 %v9736_v57  ;;  %v9820_v7 = vld [vmem:[%s11834_s9 + $0x11cc] ss:$16 sps:$4 sm:$0xff]   ;;  %v9815_v57 = vld [vmem:[%s11834_s9 + $0x11c0] ss:$16 sps:$4 sm:$0xff]  }
 0x3a3   : > { %7104 = vmatmul.mubr.bf16.vlgmr.msra.gmra.mrb[0].mxu0 %v2770_v9  ;;  %7637 = vmatmul.mubr.bf16.vlgmr.msra.gmra.mrb[0].mxu1 %v2770_v9  ;;  %v9823_v9 = vld [vmem:[%s11834_s9 + $0x11e4] ss:$16 sps:$4 sm:$0xff]  }
 0x3a4   : > { %7113 = vmatpush1.bf16.msra.mxu0 %v9731_v10  ;;  %7646 = vmatpush1.bf16.msra.mxu1 %v9734_v2  ;;  %v9826_v10 = vld [vmem:[%s11834_s9 + $0x11ec] ss:$16 sps:$4 sm:$0xff]   ;;  %v9821_v2 = vld [vmem:[%s11834_s9 + $0x11e0] ss:$16 sps:$4 sm:$0xff]  }
 0x3a5   : > { %7114 = vmatprep.subr.bf16.mxu0 %v9739_v11  ;;  %7647 = vmatprep.subr.bf16.mxu1 %v9742_v12  ;;  %v9824_v11 = vld [vmem:[%s11834_s9 + $0x11e8] ss:$16 sps:$4 sm:$0xff]   ;;  %v9829_v12 = vld [vmem:[%s11834_s9 + $0x1204] ss:$16 sps:$4 sm:$0xff]  }
 0x3a6   : > { %7144 = vmatprep.mubr.bf16.mxu0 %v12457_v13  ;;  %7677 = vmatprep.mubr.bf16.mxu1 %v12457_v13 }
 0x3a8   : > { %7115 = vmatpush1.bf16.msra.mxu0 %v9737_v34  ;;  %7648 = vmatpush1.bf16.msra.mxu1 %v9740_v14  ;;  %v9832_v34 = vld [vmem:[%s11834_s9 + $0x120c] ss:$16 sps:$4 sm:$0xff]   ;;  %v12523_v14 = vrot.slane %v12442_v4, %v11839_v24  ;;  %v9833_v4 = vld [vmem:[%s11834_s9 + $0x1220] ss:$16 sps:$4 sm:$0xff]  }
 0x3a9   : > { %7116 = vmatprep.subr.bf16.mxu0 %v9745_v15  ;;  %7649 = vmatprep.subr.bf16.mxu1 %v9748_v16  ;;  %v9827_v15 = vld [vmem:[%s11834_s9 + $0x1200] ss:$16 sps:$4 sm:$0xff]   ;;  %v9830_v16 = vld [vmem:[%s11834_s9 + $0x1208] ss:$16 sps:$4 sm:$0xff]  }
 0x3ac   : > { %7117 = vmatpush1.bf16.msra.mxu0 %v9743_v17  ;;  %7650 = vmatpush1.bf16.msra.mxu1 %v9746_v18  ;;  %v9835_v17 = vld [vmem:[%s11834_s9 + $0x1224] ss:$16 sps:$4 sm:$0xff]   ;;  %v9838_v18 = vld [vmem:[%s11834_s9 + $0x122c] ss:$16 sps:$4 sm:$0xff]  }
 0x3ad   : > { %7118 = vmatprep.subr.bf16.mxu0 %v9751_v21  ;;  %7651 = vmatprep.subr.bf16.mxu1 %v9754_v22  ;;  %v2820_v21 = vcombine.high %v12457_v13, %v12457_v13  ;;  %v9836_v22 = vld [vmem:[%s11834_s9 + $0x1228] ss:$16 sps:$4 sm:$0xff]   ;;  %v9839_v13 = vld [vmem:[%s11834_s9 + $0x1240] ss:$16 sps:$4 sm:$0xff]  }
 0x3b0   : > { %7119 = vmatpush1.bf16.msra.mxu0 %v9749_v23  ;;  %7652 = vmatpush1.bf16.msra.mxu1 %v9752_v25  ;;  %v9841_v23 = vld [vmem:[%s11834_s9 + $0x1244] ss:$16 sps:$4 sm:$0xff]   ;;  %v9844_v25 = vld [vmem:[%s11834_s9 + $0x124c] ss:$16 sps:$4 sm:$0xff]  }
 0x3b1   : > { %7120 = vmatprep.subr.bf16.mxu0 %v9757_v26  ;;  %7653 = vmatprep.subr.bf16.mxu1 %v9760_v27  ;;  %v9842_v26 = vld [vmem:[%s11834_s9 + $0x1248] ss:$16 sps:$4 sm:$0xff]   ;;  %v9847_v27 = vld [vmem:[%s11834_s9 + $0x1264] ss:$16 sps:$4 sm:$0xff]  }
 0x3b4   : > { %7121 = vmatpush1.bf16.msra.mxu0 %v9755_v29  ;;  %7654 = vmatpush1.bf16.msra.mxu1 %v9758_v30  ;;  %v9850_v29 = vld [vmem:[%s11834_s9 + $0x126c] ss:$16 sps:$4 sm:$0xff]   ;;  %v9845_v30 = vld [vmem:[%s11834_s9 + $0x1260] ss:$16 sps:$4 sm:$0xff]  }
 0x3b5   : > { %7122 = vmatprep.subr.bf16.mxu0 %v9763_v31  ;;  %7655 = vmatprep.subr.bf16.mxu1 %v9766_v32  ;;  %v9848_v31 = vld [vmem:[%s11834_s9 + $0x1268] ss:$16 sps:$4 sm:$0xff]   ;;  %v9853_v32 = vld [vmem:[%s11834_s9 + $0x1284] ss:$16 sps:$4 sm:$0xff]  }
 0x3b8   : > { %7123 = vmatpush1.bf16.msra.mxu0 %v9761_v33  ;;  %7656 = vmatpush1.bf16.msra.mxu1 %v9764_v36  ;;  %v9856_v33 = vld [vmem:[%s11834_s9 + $0x128c] ss:$16 sps:$4 sm:$0xff]   ;;  %v9851_v36 = vld [vmem:[%s11834_s9 + $0x1280] ss:$16 sps:$4 sm:$0xff]  }
 0x3b9   : > { %7124 = vmatprep.subr.bf16.mxu0 %v9769_v38  ;;  %7657 = vmatprep.subr.bf16.mxu1 %v9772_v20  ;;  %v9854_v38 = vld [vmem:[%s11834_s9 + $0x1288] ss:$16 sps:$4 sm:$0xff]   ;;  %v9859_v20 = vld [vmem:[%s11834_s9 + $0x12a4] ss:$16 sps:$4 sm:$0xff]  }
 0x3bc   : > { %7125 = vmatpush1.bf16.msra.mxu0 %v9767_v39  ;;  %7658 = vmatpush1.bf16.msra.mxu1 %v9770_v28  ;;  %v9862_v39 = vld [vmem:[%s11834_s9 + $0x12ac] ss:$16 sps:$4 sm:$0xff]   ;;  %v9857_v28 = vld [vmem:[%s11834_s9 + $0x12a0] ss:$16 sps:$4 sm:$0xff]  }
 0x3bd   : > { %7126 = vmatprep.subr.bf16.mxu0 %v9775_v40  ;;  %7659 = vmatprep.subr.bf16.mxu1 %v9778_v41  ;;  %v9860_v40 = vld [vmem:[%s11834_s9 + $0x12a8] ss:$16 sps:$4 sm:$0xff]   ;;  %v9865_v41 = vld [vmem:[%s11834_s9 + $0x12c4] ss:$16 sps:$4 sm:$0xff]  }
 0x3c0   : > { %7127 = vmatpush1.bf16.msra.mxu0 %v9773_v42  ;;  %7660 = vmatpush1.bf16.msra.mxu1 %v9776_v43  ;;  %v9868_v42 = vld [vmem:[%s11834_s9 + $0x12cc] ss:$16 sps:$4 sm:$0xff]   ;;  %v9863_v43 = vld [vmem:[%s11834_s9 + $0x12c0] ss:$16 sps:$4 sm:$0xff]  }
 0x3c1   : > { %7128 = vmatprep.subr.bf16.mxu0 %v9781_v45  ;;  %7661 = vmatprep.subr.bf16.mxu1 %v9784_v46  ;;  %v9866_v45 = vld [vmem:[%s11834_s9 + $0x12c8] ss:$16 sps:$4 sm:$0xff]   ;;  %v9871_v46 = vld [vmem:[%s11834_s9 + $0x12e4] ss:$16 sps:$4 sm:$0xff]  }
 0x3c4   : > { %7129 = vmatpush1.bf16.msra.mxu0 %v9779_v47  ;;  %7662 = vmatpush1.bf16.msra.mxu1 %v9782_v48  ;;  %v9874_v47 = vld [vmem:[%s11834_s9 + $0x12ec] ss:$16 sps:$4 sm:$0xff]   ;;  %v9869_v48 = vld [vmem:[%s11834_s9 + $0x12e0] ss:$16 sps:$4 sm:$0xff]  }
 0x3c5   : > { %7130 = vmatprep.subr.bf16.mxu0 %v9787_v49  ;;  %7663 = vmatprep.subr.bf16.mxu1 %v9790_v50  ;;  %v9872_v49 = vld [vmem:[%s11834_s9 + $0x12e8] ss:$16 sps:$4 sm:$0xff]   ;;  %v9877_v50 = vld [vmem:[%s11834_s9 + $0x1304] ss:$16 sps:$4 sm:$0xff]  }
 0x3c8   : > { %7131 = vmatpush1.bf16.msra.mxu0 %v9785_v35  ;;  %7664 = vmatpush1.bf16.msra.mxu1 %v9788_v51  ;;  %v9880_v35 = vld [vmem:[%s11834_s9 + $0x130c] ss:$16 sps:$4 sm:$0xff]   ;;  %v9875_v51 = vld [vmem:[%s11834_s9 + $0x1300] ss:$16 sps:$4 sm:$0xff]  }
 0x3c9   : > { %7132 = vmatprep.subr.bf16.mxu0 %v9793_v52  ;;  %7665 = vmatprep.subr.bf16.mxu1 %v9796_v44  ;;  %v9878_v52 = vld [vmem:[%s11834_s9 + $0x1308] ss:$16 sps:$4 sm:$0xff]   ;;  %v9883_v44 = vld [vmem:[%s11834_s9 + $0x1324] ss:$16 sps:$4 sm:$0xff]  }
 0x3cc   : > { %7133 = vmatpush1.bf16.msra.mxu0 %v9791_v53  ;;  %7666 = vmatpush1.bf16.msra.mxu1 %v9794_v55  ;;  %v9886_v53 = vld [vmem:[%s11834_s9 + $0x132c] ss:$16 sps:$4 sm:$0xff]   ;;  %v9881_v55 = vld [vmem:[%s11834_s9 + $0x1320] ss:$16 sps:$4 sm:$0xff]  }
 0x3cd   : > { %7134 = vmatprep.subr.bf16.mxu0 %v9799_v56  ;;  %7667 = vmatprep.subr.bf16.mxu1 %v9802_v58  ;;  %v9884_v56 = vld [vmem:[%s11834_s9 + $0x1328] ss:$16 sps:$4 sm:$0xff]   ;;  %v9889_v58 = vld [vmem:[%s11834_s9 + $0x1344] ss:$16 sps:$4 sm:$0xff]  }
 0x3d0   : > { %7135 = vmatpush1.bf16.msra.mxu0 %v9797_v59  ;;  %7668 = vmatpush1.bf16.msra.mxu1 %v9800_v37  ;;  %v9892_v59 = vld [vmem:[%s11834_s9 + $0x134c] ss:$16 sps:$4 sm:$0xff]   ;;  %v9887_v37 = vld [vmem:[%s11834_s9 + $0x1340] ss:$16 sps:$4 sm:$0xff]  }
 0x3d1   : > { %7136 = vmatprep.subr.bf16.mxu0 %v9805_v60  ;;  %7669 = vmatprep.subr.bf16.mxu1 %v9808_v61  ;;  %v9890_v60 = vld [vmem:[%s11834_s9 + $0x1348] ss:$16 sps:$4 sm:$0xff]   ;;  %v9895_v61 = vld [vmem:[%s11834_s9 + $0x1364] ss:$16 sps:$4 sm:$0xff]  }
 0x3d4   : > { %7137 = vmatpush1.bf16.msra.mxu0 %v9803_v62  ;;  %7670 = vmatpush1.bf16.msra.mxu1 %v9806_v63  ;;  %v9898_v62 = vld [vmem:[%s11834_s9 + $0x136c] ss:$16 sps:$4 sm:$0xff]   ;;  %v9893_v63 = vld [vmem:[%s11834_s9 + $0x1360] ss:$16 sps:$4 sm:$0xff]  }
 0x3d5   : > { %7138 = vmatprep.subr.bf16.mxu0 %v9811_v0  ;;  %7671 = vmatprep.subr.bf16.mxu1 %v9814_v1  ;;  %v9896_v0 = vld [vmem:[%s11834_s9 + $0x1368] ss:$16 sps:$4 sm:$0xff]   ;;  %v9901_v1 = vld [vmem:[%s11834_s9 + $0x1384] ss:$16 sps:$4 sm:$0xff]  }
 0x3d8   : > { %7139 = vmatpush1.bf16.msra.mxu0 %v9809_v3  ;;  %7672 = vmatpush1.bf16.msra.mxu1 %v9812_v5  ;;  %v9904_v3 = vld [vmem:[%s11834_s9 + $0x138c] ss:$16 sps:$4 sm:$0xff]   ;;  %v9899_v5 = vld [vmem:[%s11834_s9 + $0x1380] ss:$16 sps:$4 sm:$0xff]  }
 0x3d9   : > { %7140 = vmatprep.subr.bf16.mxu0 %v9817_v6  ;;  %7673 = vmatprep.subr.bf16.mxu1 %v9820_v7  ;;  %v9902_v6 = vld [vmem:[%s11834_s9 + $0x1388] ss:$16 sps:$4 sm:$0xff]   ;;  %v9907_v7 = vld [vmem:[%s11834_s9 + $0x13a4] ss:$16 sps:$4 sm:$0xff]  }
 0x3dc   : > { %7141 = vmatpush1.bf16.msra.mxu0 %v9815_v57  ;;  %7674 = vmatpush1.bf16.msra.mxu1 %v9818_v8  ;;  %v9910_v57 = vld [vmem:[%s11834_s9 + $0x13ac] ss:$16 sps:$4 sm:$0xff]   ;;  %v9905_v8 = vld [vmem:[%s11834_s9 + $0x13a0] ss:$16 sps:$4 sm:$0xff]  }
 0x3dd   : > { %7142 = vmatprep.subr.bf16.mxu0 %v9823_v9  ;;  %7675 = vmatprep.subr.bf16.mxu1 %v9826_v10  ;;  %v9908_v9 = vld [vmem:[%s11834_s9 + $0x13a8] ss:$16 sps:$4 sm:$0xff]   ;;  %v9913_v10 = vld [vmem:[%s11834_s9 + $0x13c4] ss:$16 sps:$4 sm:$0xff]  }
 0x3e0   : > { %7143 = vmatpush1.bf16.msra.mxu0 %v9821_v2  ;;  %7676 = vmatpush1.bf16.msra.mxu1 %v9824_v11  ;;  %v9916_v2 = vld [vmem:[%s11834_s9 + $0x13cc] ss:$16 sps:$4 sm:$0xff]   ;;  %v2773_v11 = vcombine.high %v12434_v54, %v12434_v54  ;;  %v9917_v54 = vld [vmem:[%s11834_s9 + $0x13e0] ss:$16 sps:$4 sm:$0xff]  }
 0x3e1   : > { %7153 = vmatprep.subr.bf16.mxu0 %v9829_v12  ;;  %7686 = vmatprep.subr.bf16.mxu1 %v9832_v34  ;;  %v9911_v12 = vld [vmem:[%s11834_s9 + $0x13c0] ss:$16 sps:$4 sm:$0xff]   ;;  %v9914_v34 = vld [vmem:[%s11834_s9 + $0x13c8] ss:$16 sps:$4 sm:$0xff]  }
 0x3e3   : > { %7145 = vmatmul.mubr.bf16.vlgmr.msra.gmra.mrb[0].mxu0 %v12523_v14  ;;  %7678 = vmatmul.mubr.bf16.vlgmr.msra.gmra.mrb[0].mxu1 %v12523_v14 }
 0x3e4   : > { %7154 = vmatpush1.bf16.msra.mxu0 %v9827_v15  ;;  %7687 = vmatpush1.bf16.msra.mxu1 %v9830_v16  ;;  %v9919_v15 = vld [vmem:[%s11834_s9 + $0x13e4] ss:$16 sps:$4 sm:$0xff]   ;;  %v9922_v16 = vld [vmem:[%s11834_s9 + $0x13ec] ss:$16 sps:$4 sm:$0xff]  }
 0x3e5   : > { %7155 = vmatprep.subr.bf16.mxu0 %v9835_v17  ;;  %7688 = vmatprep.subr.bf16.mxu1 %v9838_v18  ;;  %v12592_v17 = vrot.slane %v2773_v11, %v11839_v24  ;;  %v9920_v18 = vld [vmem:[%s11834_s9 + $0x13e8] ss:$16 sps:$4 sm:$0xff]  }
 0x3e6   : > { %7185 = vmatprep.mubr.bf16.mxu0 %v2820_v21  ;;  %7718 = vmatprep.mubr.bf16.mxu1 %v2820_v21  ;;  %v9925_v21 = vld [vmem:[%s11834_s9 + $0x1404] ss:$16 sps:$4 sm:$0xff]   ;;  %v9998_v11 = vld [vmem:[%s11834_s9 + $0x1588] ss:$16 sps:$4 sm:$0xff]  }
 0x3e8   : > { %7156 = vmatpush1.bf16.msra.mxu0 %v9833_v4  ;;  %7689 = vmatpush1.bf16.msra.mxu1 %v9836_v22  ;;  %v9928_v4 = vld [vmem:[%s11834_s9 + $0x140c] ss:$16 sps:$4 sm:$0xff]   ;;  %v2789_v22 = vcombine.high %v12592_v17, %v12592_v17 }
 0x3e9   : > { %7157 = vmatprep.subr.bf16.mxu0 %v9841_v23  ;;  %7690 = vmatprep.subr.bf16.mxu1 %v9844_v25  ;;  %v2818_v23 = vcombine.high %v12523_v14, %v12523_v14  ;;  %v9923_v25 = vld [vmem:[%s11834_s9 + $0x1400] ss:$16 sps:$4 sm:$0xff]  }
 0x3ea   : > { %v9929_v14 = vld [vmem:[%s11834_s9 + $0x1420] ss:$16 sps:$4 sm:$0xff]  }
 0x3ec   : > { %7158 = vmatpush1.bf16.msra.mxu0 %v9839_v13  ;;  %7691 = vmatpush1.bf16.msra.mxu1 %v9842_v26  ;;  %v9926_v13 = vld [vmem:[%s11834_s9 + $0x1408] ss:$16 sps:$4 sm:$0xff]   ;;  %v9931_v26 = vld [vmem:[%s11834_s9 + $0x1424] ss:$16 sps:$4 sm:$0xff]  }
 0x3ed   : > { %7159 = vmatprep.subr.bf16.mxu0 %v9847_v27  ;;  %7692 = vmatprep.subr.bf16.mxu1 %v9850_v29  ;;  %v9934_v27 = vld [vmem:[%s11834_s9 + $0x142c] ss:$16 sps:$4 sm:$0xff]   ;;  %v12607_v29 = vrot.slane %v2789_v22, %v11839_v24  ;;  %v10015_v22 = vld [vmem:[%s11834_s9 + $0x15e4] ss:$16 sps:$4 sm:$0xff]  }
 0x3f0   : > { %7160 = vmatpush1.bf16.msra.mxu0 %v9845_v30  ;;  %7693 = vmatpush1.bf16.msra.mxu1 %v9848_v31  ;;  %v9932_v30 = vld [vmem:[%s11834_s9 + $0x1428] ss:$16 sps:$4 sm:$0xff]   ;;  %v9937_v31 = vld [vmem:[%s11834_s9 + $0x1444] ss:$16 sps:$4 sm:$0xff]  }
 0x3f1   : > { %7161 = vmatprep.subr.bf16.mxu0 %v9853_v32  ;;  %7694 = vmatprep.subr.bf16.mxu1 %v9856_v33  ;;  %v9940_v32 = vld [vmem:[%s11834_s9 + $0x144c] ss:$16 sps:$4 sm:$0xff]   ;;  %v9935_v33 = vld [vmem:[%s11834_s9 + $0x1440] ss:$16 sps:$4 sm:$0xff]  }
 0x3f4   : > { %7162 = vmatpush1.bf16.msra.mxu0 %v9851_v36  ;;  %7695 = vmatpush1.bf16.msra.mxu1 %v9854_v38  ;;  %v9938_v36 = vld [vmem:[%s11834_s9 + $0x1448] ss:$16 sps:$4 sm:$0xff]   ;;  %v9943_v38 = vld [vmem:[%s11834_s9 + $0x1464] ss:$16 sps:$4 sm:$0xff]  }
 0x3f5   : > { %7163 = vmatprep.subr.bf16.mxu0 %v9859_v20  ;;  %7696 = vmatprep.subr.bf16.mxu1 %v9862_v39  ;;  %v9946_v20 = vld [vmem:[%s11834_s9 + $0x146c] ss:$16 sps:$4 sm:$0xff]   ;;  %v9941_v39 = vld [vmem:[%s11834_s9 + $0x1460] ss:$16 sps:$4 sm:$0xff]  }
 0x3f8   : > { %7164 = vmatpush1.bf16.msra.mxu0 %v9857_v28  ;;  %7697 = vmatpush1.bf16.msra.mxu1 %v9860_v40  ;;  %v9944_v28 = vld [vmem:[%s11834_s9 + $0x1468] ss:$16 sps:$4 sm:$0xff]   ;;  %v9949_v40 = vld [vmem:[%s11834_s9 + $0x1484] ss:$16 sps:$4 sm:$0xff]  }
 0x3f9   : > { %7165 = vmatprep.subr.bf16.mxu0 %v9865_v41  ;;  %7698 = vmatprep.subr.bf16.mxu1 %v9868_v42  ;;  %v9952_v41 = vld [vmem:[%s11834_s9 + $0x148c] ss:$16 sps:$4 sm:$0xff]   ;;  %v9947_v42 = vld [vmem:[%s11834_s9 + $0x1480] ss:$16 sps:$4 sm:$0xff]  }
 0x3fc   : > { %7166 = vmatpush1.bf16.msra.mxu0 %v9863_v43  ;;  %7699 = vmatpush1.bf16.msra.mxu1 %v9866_v45  ;;  %v9950_v43 = vld [vmem:[%s11834_s9 + $0x1488] ss:$16 sps:$4 sm:$0xff]   ;;  %v9955_v45 = vld [vmem:[%s11834_s9 + $0x14a4] ss:$16 sps:$4 sm:$0xff]  }
 0x3fd   : > { %7167 = vmatprep.subr.bf16.mxu0 %v9871_v46  ;;  %7700 = vmatprep.subr.bf16.mxu1 %v9874_v47  ;;  %v9958_v46 = vld [vmem:[%s11834_s9 + $0x14ac] ss:$16 sps:$4 sm:$0xff]   ;;  %v9953_v47 = vld [vmem:[%s11834_s9 + $0x14a0] ss:$16 sps:$4 sm:$0xff]  }
 0x400   : > { %7168 = vmatpush1.bf16.msra.mxu0 %v9869_v48  ;;  %7701 = vmatpush1.bf16.msra.mxu1 %v9872_v49  ;;  %v9956_v48 = vld [vmem:[%s11834_s9 + $0x14a8] ss:$16 sps:$4 sm:$0xff]   ;;  %v9961_v49 = vld [vmem:[%s11834_s9 + $0x14c4] ss:$16 sps:$4 sm:$0xff]  }
 0x401   : > { %7169 = vmatprep.subr.bf16.mxu0 %v9877_v50  ;;  %7702 = vmatprep.subr.bf16.mxu1 %v9880_v35  ;;  %v9964_v50 = vld [vmem:[%s11834_s9 + $0x14cc] ss:$16 sps:$4 sm:$0xff]   ;;  %v9959_v35 = vld [vmem:[%s11834_s9 + $0x14c0] ss:$16 sps:$4 sm:$0xff]  }
 0x404   : > { %7170 = vmatpush1.bf16.msra.mxu0 %v9875_v51  ;;  %7703 = vmatpush1.bf16.msra.mxu1 %v9878_v52  ;;  %v9962_v51 = vld [vmem:[%s11834_s9 + $0x14c8] ss:$16 sps:$4 sm:$0xff]   ;;  %v9967_v52 = vld [vmem:[%s11834_s9 + $0x14e4] ss:$16 sps:$4 sm:$0xff]  }
 0x405   : > { %7171 = vmatprep.subr.bf16.mxu0 %v9883_v44  ;;  %7704 = vmatprep.subr.bf16.mxu1 %v9886_v53  ;;  %v9970_v44 = vld [vmem:[%s11834_s9 + $0x14ec] ss:$16 sps:$4 sm:$0xff]   ;;  %v9965_v53 = vld [vmem:[%s11834_s9 + $0x14e0] ss:$16 sps:$4 sm:$0xff]  }
 0x408   : > { %7172 = vmatpush1.bf16.msra.mxu0 %v9881_v55  ;;  %7705 = vmatpush1.bf16.msra.mxu1 %v9884_v56  ;;  %v9968_v55 = vld [vmem:[%s11834_s9 + $0x14e8] ss:$16 sps:$4 sm:$0xff]   ;;  %v9973_v56 = vld [vmem:[%s11834_s9 + $0x1504] ss:$16 sps:$4 sm:$0xff]  }
 0x409   : > { %7173 = vmatprep.subr.bf16.mxu0 %v9889_v58  ;;  %7706 = vmatprep.subr.bf16.mxu1 %v9892_v59  ;;  %v9976_v58 = vld [vmem:[%s11834_s9 + $0x150c] ss:$16 sps:$4 sm:$0xff]   ;;  %v9971_v59 = vld [vmem:[%s11834_s9 + $0x1500] ss:$16 sps:$4 sm:$0xff]  }
 0x40c   : > { %7174 = vmatpush1.bf16.msra.mxu0 %v9887_v37  ;;  %7707 = vmatpush1.bf16.msra.mxu1 %v9890_v60  ;;  %v9974_v37 = vld [vmem:[%s11834_s9 + $0x1508] ss:$16 sps:$4 sm:$0xff]   ;;  %v9979_v60 = vld [vmem:[%s11834_s9 + $0x1524] ss:$16 sps:$4 sm:$0xff]  }
 0x40d   : > { %7175 = vmatprep.subr.bf16.mxu0 %v9895_v61  ;;  %7708 = vmatprep.subr.bf16.mxu1 %v9898_v62  ;;  %v9982_v61 = vld [vmem:[%s11834_s9 + $0x152c] ss:$16 sps:$4 sm:$0xff]   ;;  %v9977_v62 = vld [vmem:[%s11834_s9 + $0x1520] ss:$16 sps:$4 sm:$0xff]  }
 0x410   : > { %7176 = vmatpush1.bf16.msra.mxu0 %v9893_v63  ;;  %7709 = vmatpush1.bf16.msra.mxu1 %v9896_v0  ;;  %v9980_v63 = vld [vmem:[%s11834_s9 + $0x1528] ss:$16 sps:$4 sm:$0xff]   ;;  %v9985_v0 = vld [vmem:[%s11834_s9 + $0x1544] ss:$16 sps:$4 sm:$0xff]  }
 0x411   : > { %7177 = vmatprep.subr.bf16.mxu0 %v9901_v1  ;;  %7710 = vmatprep.subr.bf16.mxu1 %v9904_v3  ;;  %v9988_v1 = vld [vmem:[%s11834_s9 + $0x154c] ss:$16 sps:$4 sm:$0xff]   ;;  %v9983_v3 = vld [vmem:[%s11834_s9 + $0x1540] ss:$16 sps:$4 sm:$0xff]  }
 0x414   : > { %7178 = vmatpush1.bf16.msra.mxu0 %v9899_v5  ;;  %7711 = vmatpush1.bf16.msra.mxu1 %v9902_v6  ;;  %v9986_v5 = vld [vmem:[%s11834_s9 + $0x1548] ss:$16 sps:$4 sm:$0xff]   ;;  %v9991_v6 = vld [vmem:[%s11834_s9 + $0x1564] ss:$16 sps:$4 sm:$0xff]  }
 0x415   : > { %7179 = vmatprep.subr.bf16.mxu0 %v9907_v7  ;;  %7712 = vmatprep.subr.bf16.mxu1 %v9910_v57  ;;  %v9994_v7 = vld [vmem:[%s11834_s9 + $0x156c] ss:$16 sps:$4 sm:$0xff]   ;;  %v9989_v57 = vld [vmem:[%s11834_s9 + $0x1560] ss:$16 sps:$4 sm:$0xff]  }
 0x418   : > { %7180 = vmatpush1.bf16.msra.mxu0 %v9905_v8  ;;  %7713 = vmatpush1.bf16.msra.mxu1 %v9908_v9  ;;  %v9992_v8 = vld [vmem:[%s11834_s9 + $0x1568] ss:$16 sps:$4 sm:$0xff]   ;;  %v9997_v9 = vld [vmem:[%s11834_s9 + $0x1584] ss:$16 sps:$4 sm:$0xff]  }
 0x419   : > { %7181 = vmatprep.subr.bf16.mxu0 %v9913_v10  ;;  %7714 = vmatprep.subr.bf16.mxu1 %v9916_v2  ;;  %v10000_v10 = vld [vmem:[%s11834_s9 + $0x158c] ss:$16 sps:$4 sm:$0xff]   ;;  %v9995_v2 = vld [vmem:[%s11834_s9 + $0x1580] ss:$16 sps:$4 sm:$0xff]  }
 0x41c   : > { %7182 = vmatpush1.bf16.msra.mxu0 %v9911_v12  ;;  %7715 = vmatpush1.bf16.msra.mxu1 %v9914_v34  ;;  %v10003_v12 = vld [vmem:[%s11834_s9 + $0x15a4] ss:$16 sps:$4 sm:$0xff]   ;;  %v10006_v34 = vld [vmem:[%s11834_s9 + $0x15ac] ss:$16 sps:$4 sm:$0xff]  }
 0x41d   : > { %7183 = vmatprep.subr.bf16.mxu0 %v9919_v15  ;;  %7716 = vmatprep.subr.bf16.mxu1 %v9922_v16  ;;  %v10001_v15 = vld [vmem:[%s11834_s9 + $0x15a0] ss:$16 sps:$4 sm:$0xff]   ;;  %v10004_v16 = vld [vmem:[%s11834_s9 + $0x15a8] ss:$16 sps:$4 sm:$0xff]  }
 0x420   : > { %7184 = vmatpush1.bf16.msra.mxu0 %v9917_v54  ;;  %7717 = vmatpush1.bf16.msra.mxu1 %v9920_v18  ;;  %v10009_v54 = vld [vmem:[%s11834_s9 + $0x15c4] ss:$16 sps:$4 sm:$0xff]   ;;  %v10012_v18 = vld [vmem:[%s11834_s9 + $0x15cc] ss:$16 sps:$4 sm:$0xff]  }
 0x421   : > { %7194 = vmatprep.subr.bf16.mxu0 %v9925_v21  ;;  %7727 = vmatprep.subr.bf16.mxu1 %v9928_v4  ;;  %v10007_v21 = vld [vmem:[%s11834_s9 + $0x15c0] ss:$16 sps:$4 sm:$0xff]   ;;  %v10010_v4 = vld [vmem:[%s11834_s9 + $0x15c8] ss:$16 sps:$4 sm:$0xff]  }
 0x423   : > { %7186 = vmatmul.mubr.bf16.vlgmr.msra.gmra.mrb[0].mxu0 %v2818_v23  ;;  %7719 = vmatmul.mubr.bf16.vlgmr.msra.gmra.mrb[0].mxu1 %v2818_v23  ;;  %v10018_v23 = vld [vmem:[%s11834_s9 + $0x15ec] ss:$16 sps:$4 sm:$0xff]  }
 0x424   : > { %7195 = vmatpush1.bf16.msra.mxu0 %v9923_v25  ;;  %7728 = vmatpush1.bf16.msra.mxu1 %v9926_v13  ;;  %v10013_v25 = vld [vmem:[%s11834_s9 + $0x15e0] ss:$16 sps:$4 sm:$0xff]   ;;  %v10016_v13 = vld [vmem:[%s11834_s9 + $0x15e8] ss:$16 sps:$4 sm:$0xff]  }
 0x425   : > { %7196 = vmatprep.subr.bf16.mxu0 %v9931_v26  ;;  %7729 = vmatprep.subr.bf16.mxu1 %v9934_v27  ;;  %v10022_v26 = vld [vmem:[%s11834_s9 + $0x1604] ss:$16 sps:$4 sm:$0xff]   ;;  %v10025_v27 = vld [vmem:[%s11834_s9 + $0x160c] ss:$16 sps:$4 sm:$0xff]  }
 0x426   : > { %7226 = vmatprep.mubr.bf16.mxu0 %v12607_v29  ;;  %7759 = vmatprep.mubr.bf16.mxu1 %v12607_v29 }
 0x428   : > { %7197 = vmatpush1.bf16.msra.mxu0 %v9929_v14  ;;  %7730 = vmatpush1.bf16.msra.mxu1 %v9932_v30  ;;  %v12673_v14 = vrot.slane %v12592_v17, %v11839_v24  ;;  %v10020_v30 = vld [vmem:[%s11834_s9 + $0x1600] ss:$16 sps:$4 sm:$0xff]  }
 0x429   : > { %7198 = vmatprep.subr.bf16.mxu0 %v9937_v31  ;;  %7731 = vmatprep.subr.bf16.mxu1 %v9940_v32  ;;  %v10023_v31 = vld [vmem:[%s11834_s9 + $0x1608] ss:$16 sps:$4 sm:$0xff]   ;;  %v10028_v32 = vld [vmem:[%s11834_s9 + $0x1624] ss:$16 sps:$4 sm:$0xff]   ;;  %v10026_v17 = vld [vmem:[%s11834_s9 + $0x1620] ss:$16 sps:$4 sm:$0xff]  }
 0x42c   : > { %7199 = vmatpush1.bf16.msra.mxu0 %v9935_v33  ;;  %7732 = vmatpush1.bf16.msra.mxu1 %v9938_v36  ;;  %v10031_v33 = vld [vmem:[%s11834_s9 + $0x162c] ss:$16 sps:$4 sm:$0xff]   ;;  %v2821_v36 = vcombine.high %v12607_v29, %v12607_v29  ;;  %v10032_v29 = vld [vmem:[%s11834_s9 + $0x1640] ss:$16 sps:$4 sm:$0xff]  }
 0x42d   : > { %7200 = vmatprep.subr.bf16.mxu0 %v9943_v38  ;;  %7733 = vmatprep.subr.bf16.mxu1 %v9946_v20  ;;  %v10029_v38 = vld [vmem:[%s11834_s9 + $0x1628] ss:$16 sps:$4 sm:$0xff]   ;;  %v10034_v20 = vld [vmem:[%s11834_s9 + $0x1644] ss:$16 sps:$4 sm:$0xff]  }
 0x430   : > { %7201 = vmatpush1.bf16.msra.mxu0 %v9941_v39  ;;  %7734 = vmatpush1.bf16.msra.mxu1 %v9944_v28  ;;  %v10037_v39 = vld [vmem:[%s11834_s9 + $0x164c] ss:$16 sps:$4 sm:$0xff]   ;;  %v10035_v28 = vld [vmem:[%s11834_s9 + $0x1648] ss:$16 sps:$4 sm:$0xff]  }
 0x431   : > { %7202 = vmatprep.subr.bf16.mxu0 %v9949_v40  ;;  %7735 = vmatprep.subr.bf16.mxu1 %v9952_v41  ;;  %v10040_v40 = vld [vmem:[%s11834_s9 + $0x1664] ss:$16 sps:$4 sm:$0xff]   ;;  %v10043_v41 = vld [vmem:[%s11834_s9 + $0x166c] ss:$16 sps:$4 sm:$0xff]  }
 0x434   : > { %7203 = vmatpush1.bf16.msra.mxu0 %v9947_v42  ;;  %7736 = vmatpush1.bf16.msra.mxu1 %v9950_v43  ;;  %v10038_v42 = vld [vmem:[%s11834_s9 + $0x1660] ss:$16 sps:$4 sm:$0xff]   ;;  %v10041_v43 = vld [vmem:[%s11834_s9 + $0x1668] ss:$16 sps:$4 sm:$0xff]  }
 0x435   : > { %7204 = vmatprep.subr.bf16.mxu0 %v9955_v45  ;;  %7737 = vmatprep.subr.bf16.mxu1 %v9958_v46  ;;  %v10046_v45 = vld [vmem:[%s11834_s9 + $0x1684] ss:$16 sps:$4 sm:$0xff]   ;;  %v10049_v46 = vld [vmem:[%s11834_s9 + $0x168c] ss:$16 sps:$4 sm:$0xff]  }
 0x438   : > { %7205 = vmatpush1.bf16.msra.mxu0 %v9953_v47  ;;  %7738 = vmatpush1.bf16.msra.mxu1 %v9956_v48  ;;  %v10044_v47 = vld [vmem:[%s11834_s9 + $0x1680] ss:$16 sps:$4 sm:$0xff]   ;;  %v10047_v48 = vld [vmem:[%s11834_s9 + $0x1688] ss:$16 sps:$4 sm:$0xff]  }
 0x439   : > { %7206 = vmatprep.subr.bf16.mxu0 %v9961_v49  ;;  %7739 = vmatprep.subr.bf16.mxu1 %v9964_v50  ;;  %v10052_v49 = vld [vmem:[%s11834_s9 + $0x16a4] ss:$16 sps:$4 sm:$0xff]   ;;  %v10055_v50 = vld [vmem:[%s11834_s9 + $0x16ac] ss:$16 sps:$4 sm:$0xff]  }
 0x43c   : > { %7207 = vmatpush1.bf16.msra.mxu0 %v9959_v35  ;;  %7740 = vmatpush1.bf16.msra.mxu1 %v9962_v51  ;;  %v10050_v35 = vld [vmem:[%s11834_s9 + $0x16a0] ss:$16 sps:$4 sm:$0xff]   ;;  %v10053_v51 = vld [vmem:[%s11834_s9 + $0x16a8] ss:$16 sps:$4 sm:$0xff]  }
 0x43d   : > { %7208 = vmatprep.subr.bf16.mxu0 %v9967_v52  ;;  %7741 = vmatprep.subr.bf16.mxu1 %v9970_v44  ;;  %v10058_v52 = vld [vmem:[%s11834_s9 + $0x16c4] ss:$16 sps:$4 sm:$0xff]   ;;  %v10061_v44 = vld [vmem:[%s11834_s9 + $0x16cc] ss:$16 sps:$4 sm:$0xff]  }
 0x440   : > { %7209 = vmatpush1.bf16.msra.mxu0 %v9965_v53  ;;  %7742 = vmatpush1.bf16.msra.mxu1 %v9968_v55  ;;  %v10056_v53 = vld [vmem:[%s11834_s9 + $0x16c0] ss:$16 sps:$4 sm:$0xff]   ;;  %v10059_v55 = vld [vmem:[%s11834_s9 + $0x16c8] ss:$16 sps:$4 sm:$0xff]  }
 0x441   : > { %7210 = vmatprep.subr.bf16.mxu0 %v9973_v56  ;;  %7743 = vmatprep.subr.bf16.mxu1 %v9976_v58  ;;  %v10064_v56 = vld [vmem:[%s11834_s9 + $0x16e4] ss:$16 sps:$4 sm:$0xff]   ;;  %v10067_v58 = vld [vmem:[%s11834_s9 + $0x16ec] ss:$16 sps:$4 sm:$0xff]  }
 0x444   : > { %7211 = vmatpush1.bf16.msra.mxu0 %v9971_v59  ;;  %7744 = vmatpush1.bf16.msra.mxu1 %v9974_v37  ;;  %v10062_v59 = vld [vmem:[%s11834_s9 + $0x16e0] ss:$16 sps:$4 sm:$0xff]   ;;  %v10065_v37 = vld [vmem:[%s11834_s9 + $0x16e8] ss:$16 sps:$4 sm:$0xff]  }
 0x445   : > { %7212 = vmatprep.subr.bf16.mxu0 %v9979_v60  ;;  %7745 = vmatprep.subr.bf16.mxu1 %v9982_v61  ;;  %v10070_v60 = vld [vmem:[%s11834_s9 + $0x1704] ss:$16 sps:$4 sm:$0xff]   ;;  %v10073_v61 = vld [vmem:[%s11834_s9 + $0x170c] ss:$16 sps:$4 sm:$0xff]  }
 0x448   : > { %7213 = vmatpush1.bf16.msra.mxu0 %v9977_v62  ;;  %7746 = vmatpush1.bf16.msra.mxu1 %v9980_v63  ;;  %v10068_v62 = vld [vmem:[%s11834_s9 + $0x1700] ss:$16 sps:$4 sm:$0xff]   ;;  %v10071_v63 = vld [vmem:[%s11834_s9 + $0x1708] ss:$16 sps:$4 sm:$0xff]  }
 0x449   : > { %7214 = vmatprep.subr.bf16.mxu0 %v9985_v0  ;;  %7747 = vmatprep.subr.bf16.mxu1 %v9988_v1  ;;  %v10076_v0 = vld [vmem:[%s11834_s9 + $0x1724] ss:$16 sps:$4 sm:$0xff]   ;;  %v10079_v1 = vld [vmem:[%s11834_s9 + $0x172c] ss:$16 sps:$4 sm:$0xff]  }
 0x44c   : > { %7215 = vmatpush1.bf16.msra.mxu0 %v9983_v3  ;;  %7748 = vmatpush1.bf16.msra.mxu1 %v9986_v5  ;;  %v10074_v3 = vld [vmem:[%s11834_s9 + $0x1720] ss:$16 sps:$4 sm:$0xff]   ;;  %v10077_v5 = vld [vmem:[%s11834_s9 + $0x1728] ss:$16 sps:$4 sm:$0xff]  }
 0x44d   : > { %7216 = vmatprep.subr.bf16.mxu0 %v9991_v6  ;;  %7749 = vmatprep.subr.bf16.mxu1 %v9994_v7  ;;  %v10082_v6 = vld [vmem:[%s11834_s9 + $0x1744] ss:$16 sps:$4 sm:$0xff]   ;;  %v10085_v7 = vld [vmem:[%s11834_s9 + $0x174c] ss:$16 sps:$4 sm:$0xff]  }
 0x450   : > { %7217 = vmatpush1.bf16.msra.mxu0 %v9989_v57  ;;  %7750 = vmatpush1.bf16.msra.mxu1 %v9992_v8  ;;  %v10080_v57 = vld [vmem:[%s11834_s9 + $0x1740] ss:$16 sps:$4 sm:$0xff]   ;;  %v10083_v8 = vld [vmem:[%s11834_s9 + $0x1748] ss:$16 sps:$4 sm:$0xff]  }
 0x451   : > { %7218 = vmatprep.subr.bf16.mxu0 %v9997_v9  ;;  %7751 = vmatprep.subr.bf16.mxu1 %v10000_v10  ;;  %v10088_v9 = vld [vmem:[%s11834_s9 + $0x1764] ss:$16 sps:$4 sm:$0xff]   ;;  %v10091_v10 = vld [vmem:[%s11834_s9 + $0x176c] ss:$16 sps:$4 sm:$0xff]  }
 0x454   : > { %7219 = vmatpush1.bf16.msra.mxu0 %v9995_v2  ;;  %7752 = vmatpush1.bf16.msra.mxu1 %v9998_v11  ;;  %v10086_v2 = vld [vmem:[%s11834_s9 + $0x1760] ss:$16 sps:$4 sm:$0xff]   ;;  %v10089_v11 = vld [vmem:[%s11834_s9 + $0x1768] ss:$16 sps:$4 sm:$0xff]  }
 0x455   : > { %7220 = vmatprep.subr.bf16.mxu0 %v10003_v12  ;;  %7753 = vmatprep.subr.bf16.mxu1 %v10006_v34  ;;  %v10094_v12 = vld [vmem:[%s11834_s9 + $0x1784] ss:$16 sps:$4 sm:$0xff]   ;;  %v10097_v34 = vld [vmem:[%s11834_s9 + $0x178c] ss:$16 sps:$4 sm:$0xff]  }
 0x458   : > { %7221 = vmatpush1.bf16.msra.mxu0 %v10001_v15  ;;  %7754 = vmatpush1.bf16.msra.mxu1 %v10004_v16  ;;  %v10092_v15 = vld [vmem:[%s11834_s9 + $0x1780] ss:$16 sps:$4 sm:$0xff]   ;;  %v10095_v16 = vld [vmem:[%s11834_s9 + $0x1788] ss:$16 sps:$4 sm:$0xff]  }
 0x459   : > { %7222 = vmatprep.subr.bf16.mxu0 %v10009_v54  ;;  %7755 = vmatprep.subr.bf16.mxu1 %v10012_v18  ;;  %v10100_v54 = vld [vmem:[%s11834_s9 + $0x17a4] ss:$16 sps:$4 sm:$0xff]   ;;  %v10103_v18 = vld [vmem:[%s11834_s9 + $0x17ac] ss:$16 sps:$4 sm:$0xff]  }
 0x45c   : > { %7223 = vmatpush1.bf16.msra.mxu0 %v10007_v21  ;;  %7756 = vmatpush1.bf16.msra.mxu1 %v10010_v4  ;;  %v10098_v21 = vld [vmem:[%s11834_s9 + $0x17a0] ss:$16 sps:$4 sm:$0xff]   ;;  %v10101_v4 = vld [vmem:[%s11834_s9 + $0x17a8] ss:$16 sps:$4 sm:$0xff]  }
 0x45d   : > { %7224 = vmatprep.subr.bf16.mxu0 %v10015_v22  ;;  %7757 = vmatprep.subr.bf16.mxu1 %v10018_v23  ;;  %v10106_v22 = vld [vmem:[%s11834_s9 + $0x17c4] ss:$16 sps:$4 sm:$0xff]   ;;  %v10109_v23 = vld [vmem:[%s11834_s9 + $0x17cc] ss:$16 sps:$4 sm:$0xff]  }
 0x460   : > { %7225 = vmatpush1.bf16.msra.mxu0 %v10013_v25  ;;  %7758 = vmatpush1.bf16.msra.mxu1 %v10016_v13  ;;  %v10104_v25 = vld [vmem:[%s11834_s9 + $0x17c0] ss:$16 sps:$4 sm:$0xff]   ;;  %v10107_v13 = vld [vmem:[%s11834_s9 + $0x17c8] ss:$16 sps:$4 sm:$0xff]  }
 0x461   : > { %7235 = vmatprep.subr.bf16.mxu0 %v10022_v26  ;;  %7768 = vmatprep.subr.bf16.mxu1 %v10025_v27  ;;  %v10112_v26 = vld [vmem:[%s11834_s9 + $0x17e4] ss:$16 sps:$4 sm:$0xff]   ;;  %v10115_v27 = vld [vmem:[%s11834_s9 + $0x17ec] ss:$16 sps:$4 sm:$0xff]  }
 0x463   : > { %7227 = vmatmul.mubr.bf16.vlgmr.msra.gmra.mrb[0].mxu0 %v12673_v14  ;;  %7760 = vmatmul.mubr.bf16.vlgmr.msra.gmra.mrb[0].mxu1 %v12673_v14 }
 0x464   : > { %7236 = vmatpush1.bf16.msra.mxu0 %v10020_v30  ;;  %7769 = vmatpush1.bf16.msra.mxu1 %v10023_v31  ;;  %v10110_v30 = vld [vmem:[%s11834_s9 + $0x17e0] ss:$16 sps:$4 sm:$0xff]   ;;  %v10113_v31 = vld [vmem:[%s11834_s9 + $0x17e8] ss:$16 sps:$4 sm:$0xff]  }
 0x465   : > { %7237 = vmatprep.subr.bf16.mxu0 %v10028_v32  ;;  %7770 = vmatprep.subr.bf16.mxu1 %v10031_v33  ;;  %v10118_v32 = vld [vmem:[%s11834_s9 + $0x1804] ss:$16 sps:$4 sm:$0xff]   ;;  %v10121_v33 = vld [vmem:[%s11834_s9 + $0x180c] ss:$16 sps:$4 sm:$0xff]  }
 0x466   : > { %7267 = vmatprep.mubr.bf16.mxu0 %v2821_v36  ;;  %7800 = vmatprep.mubr.bf16.mxu1 %v2821_v36  ;;  %v2819_v36 = vcombine.high %v12673_v14, %v12673_v14  ;;  %v10125_v14 = vld [vmem:[%s11834_s9 + $0x1828] ss:$16 sps:$4 sm:$0xff]  }
 0x468   : > { %7238 = vmatpush1.bf16.msra.mxu0 %v10026_v17  ;;  %7771 = vmatpush1.bf16.msra.mxu1 %v10029_v38  ;;  %v10116_v17 = vld [vmem:[%s11834_s9 + $0x1800] ss:$16 sps:$4 sm:$0xff]   ;;  %v10119_v38 = vld [vmem:[%s11834_s9 + $0x1808] ss:$16 sps:$4 sm:$0xff]  }
 0x469   : > { %7239 = vmatprep.subr.bf16.mxu0 %v10034_v20  ;;  %7772 = vmatprep.subr.bf16.mxu1 %v10037_v39  ;;  %v10124_v20 = vld [vmem:[%s11834_s9 + $0x1824] ss:$16 sps:$4 sm:$0xff]   ;;  %v10127_v39 = vld [vmem:[%s11834_s9 + $0x182c] ss:$16 sps:$4 sm:$0xff]  }
 0x46c   : > { %7240 = vmatpush1.bf16.msra.mxu0 %v10032_v29  ;;  %7773 = vmatpush1.bf16.msra.mxu1 %v10035_v28  ;;  %v10122_v29 = vld [vmem:[%s11834_s9 + $0x1820] ss:$16 sps:$4 sm:$0xff]   ;;  %v10130_v28 = vld [vmem:[%s11834_s9 + $0x1844] ss:$16 sps:$4 sm:$0xff]  }
 0x46d   : > { %7241 = vmatprep.subr.bf16.mxu0 %v10040_v40  ;;  %7774 = vmatprep.subr.bf16.mxu1 %v10043_v41  ;;  %v10133_v40 = vld [vmem:[%s11834_s9 + $0x184c] ss:$16 sps:$4 sm:$0xff]   ;;  %v10183_v41 = vmov 0  }
 0x470   : > { %7242 = vmatpush1.bf16.msra.mxu0 %v10038_v42  ;;  %7775 = vmatpush1.bf16.msra.mxu1 %v10041_v43  ;;  %v10128_v42 = vld [vmem:[%s11834_s9 + $0x1840] ss:$16 sps:$4 sm:$0xff]   ;;  %v10131_v43 = vld [vmem:[%s11834_s9 + $0x1848] ss:$16 sps:$4 sm:$0xff]  }
 0x471   : > { %7243 = vmatprep.subr.bf16.mxu0 %v10046_v45  ;;  %7776 = vmatprep.subr.bf16.mxu1 %v10049_v46  ;;  %v10136_v45 = vld [vmem:[%s11834_s9 + $0x1864] ss:$16 sps:$4 sm:$0xff]   ;;  %v10139_v46 = vld [vmem:[%s11834_s9 + $0x186c] ss:$16 sps:$4 sm:$0xff]  }
 0x474   : > { %7244 = vmatpush1.bf16.msra.mxu0 %v10044_v47  ;;  %7777 = vmatpush1.bf16.msra.mxu1 %v10047_v48  ;;  %v10134_v47 = vld [vmem:[%s11834_s9 + $0x1860] ss:$16 sps:$4 sm:$0xff]   ;;  %v10137_v48 = vld [vmem:[%s11834_s9 + $0x1868] ss:$16 sps:$4 sm:$0xff]  }
 0x475   : > { %7245 = vmatprep.subr.bf16.mxu0 %v10052_v49  ;;  %7778 = vmatprep.subr.bf16.mxu1 %v10055_v50  ;;  %v8027_v49 = vld.sshfl [vmem:[%s12794_s0 + $0x18] sm:$0x1 pattern:$0x75316420] }
 0x476   : > { %v2835_v50 = vrot.slane %v8027_v49, %v11839_v24  ;;  %v2665_v24 = vsub.s32 3, %v11827_v19 }
 0x478   : > { %7246 = vmatpush1.bf16.msra.mxu0 %v10050_v35  ;;  %7779 = vmatpush1.bf16.msra.mxu1 %v10053_v51  ;;  %v2653_v35 = vsub.s32 0, %v11827_v19  ;;  %v2661_v51 = vsub.s32 2, %v11827_v19 }
 0x479   : > { %7247 = vmatprep.subr.bf16.mxu0 %v10058_v52  ;;  %7780 = vmatprep.subr.bf16.mxu1 %v10061_v44  ;;  %v2649_v52 = vld [vmem:[%s1845_s27] sm:$0xf]  ;;  %v2657_v44 = vsub.s32 1, %v11827_v19 }
 0x47c   : > { %7248 = vmatpush1.bf16.msra.mxu0 %v10056_v53  ;;  %7781 = vmatpush1.bf16.msra.mxu1 %v10059_v55  ;;  %v2654_v53 = vrot.slane %v2649_v52, %v2653_v35  ;;  %v2662_v55 = vrot.slane %v2649_v52, %v2661_v51 }
 0x47d   : > { %7249 = vmatprep.subr.bf16.mxu0 %v10064_v56  ;;  %7782 = vmatprep.subr.bf16.mxu1 %v10067_v58  ;;  %v7862_v56 = vld [vmem:[%s1850_s30] sm:$0xf]  ;;  %v2658_v58 = vrot.slane %v2649_v52, %v2657_v44 }
 0x480   : > { %7250 = vmatpush1.bf16.msra.mxu0 %v10062_v59  ;;  %7783 = vmatpush1.bf16.msra.mxu1 %v10065_v37  ;;  %v2666_v59 = vrot.slane %v2649_v52, %v2665_v24 }
 0x481   : > { %7251 = vmatprep.subr.bf16.mxu0 %v10070_v60  ;;  %7784 = vmatprep.subr.bf16.mxu1 %v10073_v61 }
 0x484   : > { %7252 = vmatpush1.bf16.msra.mxu0 %v10068_v62  ;;  %7785 = vmatpush1.bf16.msra.mxu1 %v10071_v63  ;;  %v7867_v62 = vrot.slane %v7862_v56, %v2653_v35 }
 0x485   : > { %7253 = vmatprep.subr.bf16.mxu0 %v10076_v0  ;;  %7786 = vmatprep.subr.bf16.mxu1 %v10079_v1 }
 0x488   : > { %7254 = vmatpush1.bf16.msra.mxu0 %v10074_v3  ;;  %7787 = vmatpush1.bf16.msra.mxu1 %v10077_v5  ;;  %v7875_v3 = vrot.slane %v7862_v56, %v2661_v51 }
 0x489   : > { %7255 = vmatprep.subr.bf16.mxu0 %v10082_v6  ;;  %7788 = vmatprep.subr.bf16.mxu1 %v10085_v7  ;;  %v7871_v6 = vrot.slane %v7862_v56, %v2657_v44 }
 0x48c   : > { %7256 = vmatpush1.bf16.msra.mxu0 %v10080_v57  ;;  %7789 = vmatpush1.bf16.msra.mxu1 %v10083_v8 }
 0x48d   : > { %7257 = vmatprep.subr.bf16.mxu0 %v10088_v9  ;;  %7790 = vmatprep.subr.bf16.mxu1 %v10091_v10 }
 0x490   : > { %7258 = vmatpush1.bf16.msra.mxu0 %v10086_v2  ;;  %7791 = vmatpush1.bf16.msra.mxu1 %v10089_v11 }
 0x491   : > { %7259 = vmatprep.subr.bf16.mxu0 %v10094_v12  ;;  %7792 = vmatprep.subr.bf16.mxu1 %v10097_v34 }
 0x494   : > { %7260 = vmatpush1.bf16.msra.mxu0 %v10092_v15  ;;  %7793 = vmatpush1.bf16.msra.mxu1 %v10095_v16  ;;  %v7879_v16 = vrot.slane %v7862_v56, %v2665_v24 }
 0x495   : > { %7261 = vmatprep.subr.bf16.mxu0 %v10100_v54  ;;  %7794 = vmatprep.subr.bf16.mxu1 %v10103_v18 }
 0x498   : > { %7262 = vmatpush1.bf16.msra.mxu0 %v10098_v21  ;;  %7795 = vmatpush1.bf16.msra.mxu1 %v10101_v4 }
 0x499   : > { %7263 = vmatprep.subr.bf16.mxu0 %v10106_v22  ;;  %7796 = vmatprep.subr.bf16.mxu1 %v10109_v23 }
 0x49c   : > { %7264 = vmatpush1.bf16.msra.mxu0 %v10104_v25  ;;  %7797 = vmatpush1.bf16.msra.mxu1 %v10107_v13 }
 0x49d   : > { %7265 = vmatprep.subr.bf16.mxu0 %v10112_v26  ;;  %7798 = vmatprep.subr.bf16.mxu1 %v10115_v27 }
 0x4a0   : > { %7266 = vmatpush1.bf16.msra.mxu0 %v10110_v30  ;;  %7799 = vmatpush1.bf16.msra.mxu1 %v10113_v31 }
 0x4a1   : > { %7276 = vmatprep.subr.bf16.mxu0 %v10118_v32  ;;  %7809 = vmatprep.subr.bf16.mxu1 %v10121_v33 }
 0x4a3   : > { %7268 = vmatmul.mubr.bf16.vlgmr.msra.gmra.mrb[0].mxu0 %v2819_v36  ;;  %7801 = vmatmul.mubr.bf16.vlgmr.msra.gmra.mrb[0].mxu1 %v2819_v36 }
 0x4a4   : > { %7277 = vmatpush1.bf16.msra.mxu0 %v10116_v17  ;;  %7810 = vmatpush1.bf16.msra.mxu1 %v10119_v38 }
 0x4a5   : > { %7278 = vmatprep.subr.bf16.mxu0 %v10124_v20  ;;  %7811 = vmatprep.subr.bf16.mxu1 %v10127_v39 }
 0x4a6   : > { %7308 = vmatprep.mubr.bf16.mxu0 %v10183_v41  ;;  %7841 = vmatprep.mubr.bf16.mxu1 %v10183_v41 }
 0x4a8   : > { %7279 = vmatpush1.bf16.msra.mxu0 %v10122_v29  ;;  %7812 = vmatpush1.bf16.msra.mxu1 %v10125_v14 }
 0x4a9   : > { %7280 = vmatprep.subr.bf16.mxu0 %v10130_v28  ;;  %7813 = vmatprep.subr.bf16.mxu1 %v10133_v40 }
 0x4ac   : > { %7281 = vmatpush1.bf16.msra.mxu0 %v10128_v42  ;;  %7814 = vmatpush1.bf16.msra.mxu1 %v10131_v43 }
 0x4ad   : > { %7282 = vmatprep.subr.bf16.mxu0 %v10136_v45  ;;  %7815 = vmatprep.subr.bf16.mxu1 %v10139_v46 }
 0x4b0   : > { %7283 = vmatpush1.bf16.msra.mxu0 %v10134_v47  ;;  %7816 = vmatpush1.bf16.msra.mxu1 %v10137_v48 }
 0x4b3   : > { %8812 = vmatmul.mubr.msk.bf16.vlgmr.msra.gmra.mrb[0].mxu0 %vm6780_vm0, %v2835_v50  ;;  %8813 = vmatmul.mubr.msk.bf16.vlgmr.msra.gmra.mrb[0].mxu1 %vm6780_vm0, %v2835_v50 }
 0x586   : > { %v7310_v37 = vpop.f32.mrb[0].mxu0  ;;  %v7843_v60 = vpop.f32.mrb[0].mxu1 }
 0x587   : > { %v8817_v61 = vadd.f32 %v7310_v37, %v2654_v53  ;;  %v8819_v63 = vadd.f32 %v7843_v60, %v2662_v55  ;;  %v7312_v0 = vpop.f32.mrb[1].mxu0  ;;  %v7845_v1 = vpop.f32.mrb[1].mxu1 }
 0x588   : > { %v8818_v5 = vadd.f32 %v7312_v0, %v2658_v58  ;;  %v8820_v19 = vadd.f32 %v7845_v1, %v2666_v59  ;;  %v7314_v7 = vpop.f32.mrb[2].mxu0  ;;  %v7847_v57 = vpop.f32.mrb[2].mxu1 }
 0x589   : > { %vm7850_vm1 = vcmp.gt.f32.partialorder %v8817_v61, 0.0  ;;  %v7854_v8 = vmul.f32 0.2, %v8817_v61  ;;  %vm7852_vm2 = vcmp.gt.f32.partialorder %v8819_v63, 0.0  ;;  %v7856_v9 = vmul.f32 0.2, %v8819_v63 }
 0x58a   : > { %vm7851_vm3 = vcmp.gt.f32.partialorder %v8818_v5, 0.0  ;;  %v7855_v10 = vmul.f32 0.2, %v8818_v5  ;;  %vm7853_vm4 = vcmp.gt.f32.partialorder %v8820_v19, 0.0  ;;  %v7857_v2 = vmul.f32 0.2, %v8820_v19 }
 0x58b   : > { %v7858_v11 = vsel %vm7850_vm1, %v8817_v61, %v7854_v8  ;;  %v7860_v12 = vsel %vm7852_vm2, %v8819_v63, %v7856_v9  ;;  %v7315_v34 = vpop.f32.mrb[3].mxu0  ;;  %v7848_v15 = vpop.f32.mrb[3].mxu1 }
 0x58c   : > { %v7884_v54 = vmul.f32 %v7867_v62, %v7858_v11  ;;  %v7859_v18 = vsel %vm7851_vm3, %v8818_v5, %v7855_v10  ;;  %v7861_v21 = vsel %vm7853_vm4, %v8820_v19, %v7857_v2  ;;  %v7886_v22 = vmul.f32 %v7875_v3, %v7860_v12 }
 0x58d   : > { %v7885_v4 = vmul.f32 %v7871_v6, %v7859_v18  ;;  %v7887_v25 = vmul.f32 %v7879_v16, %v7861_v21 }
 0x58e   : > { %v7889_v23 = vsel %vm7888_vm5, %v7884_v54, 0.0  ;;  %v7892_v27 = vsel %vm7888_vm5, %v7886_v22, 0.0 }
 0x58f   : > { %v7890_v13 = vsel %vm7888_vm5, %v7885_v4, 0.0  ;;  %v7894_v31 = vsel %vm7888_vm5, %v7887_v25, 0.0 }
 0x590   : > { %v7891_v26 = vadd.f32 %v7890_v13, %v7889_v23 }
 0x592   : > { %v7893_v30 = vadd.f32 %v7892_v27, %v7891_v26 }
 0x594   : > { %v7895_v32 = vadd.f32 %v7894_v31, %v7893_v30 }
 0x596   : > { %7896 = vadd.xlane.f32.xlu0 %v7895_v32 }
 0x623   : > { %v7897_v33 = vpop.xlane.xlu0 %7896 }
 0x624   : > { %7898 = vst [vmem:[%s1859_s8] sm:$0x3] %v7897_v33 }
 0x625 PF: > { %s14_s19 = sadd.s32 1, %s10180_s19   ;;  %s12799_s15 = smov %s10168_s16 }
 0x626   : > { %p11_p11 = scmp.ge.s32.totalorder %s14_s19, 4   ;;  %s12800_s16 = smov %s10244_s23 }
 0x627   : > { %s12801_s17 = smov %s10176_s18  ;;  %s12802_s18 = smov %s12804_s20 }
 0x628   :  { %13 = sbr.rel (!%p11_p11) target bundleno = 3 (0x3), region = 103 }

</bundles_post_ra>
